<compile_context>
chip_gen: v7x
topology: tpu7x:2x2x1
jax: 0.10.0
libtpu: 0.0.40
codegen_flags: <defaults>
</compile_context>

<pallas_src>
import functools

import jax
import jax.numpy as jnp
import numpy as np
from jax import lax
from jax.experimental import pallas as pl
from jax.experimental.pallas import tpu as pltpu

TP = 16
EPS = 1e-5
# Conservative scoped-VMEM budget: fits v7x's 64 MiB physical VMEM and is a
# no-op headroom bump on v5e/v6e (128 MiB physical).
VMEM_LIMIT_BYTES = 48 * 1024 * 1024


def _compiler_params(n_axes=1):
    return pltpu.CompilerParams(
        dimension_semantics=("parallel",) * n_axes,
        vmem_limit_bytes=VMEM_LIMIT_BYTES,
    )


def _pick_tile_m(M):
    # 256-row activation tiles, falling back to any divisor so block dims stay
    # legal ((8,128) rule: divisible-by-8 or full extent).
    for t in (256, 512, 128, 64, 32, 16, 8):
        if M % t == 0:
            return t
    return M  # tiny M: single full-array block


def _resident(shape):
    # weight / LN-param spec: same block for every grid step -> stays in VMEM
    return pl.BlockSpec(shape, lambda i: (0,) * len(shape))


# ----------------------------------------------------------------------------
# Kernel 1: fused LayerNorm + QKV projection (lnMatmulBlock) -> qkv (M, 3*split)
# ----------------------------------------------------------------------------
def _ln_qkv_kernel(x_ref, g_ref, be_ref, w_ref, b_ref, qkv_ref):
    x = x_ref[...].astype(jnp.float32)
    mean = jnp.mean(x, axis=-1, keepdims=True)
    var = jnp.mean(jnp.square(x - mean), axis=-1, keepdims=True)
    xn = (x - mean) * lax.rsqrt(var + EPS)
    xn = xn * g_ref[...] + be_ref[...]
    qkv = jnp.dot(xn.astype(jnp.bfloat16), w_ref[...],
                  preferred_element_type=jnp.float32) + b_ref[...]
    qkv_ref[...] = qkv.astype(qkv_ref.dtype)


def ln_qkv(x2d, gamma, beta, w, b):
    M, H = x2d.shape
    D = w.shape[1]                       # 3 * split
    tm = _pick_tile_m(M)
    row_h = pl.BlockSpec((tm, H), lambda i: (i, 0))
    row_d = pl.BlockSpec((tm, D), lambda i: (i, 0))
    # TODO(synk): for full GPT-3 hidden sizes the (H, 3H/TP) weight should be
    # K/N-tiled instead of kept fully resident in VMEM.
    return pl.pallas_call(
        _ln_qkv_kernel,
        out_shape=jax.ShapeDtypeStruct((M, D), x2d.dtype),
        grid=(M // tm,),
        in_specs=[row_h, _resident((1, H)), _resident((1, H)),
                  _resident((H, D)), _resident((1, D))],
        out_specs=row_d,
        compiler_params=_compiler_params(1),
    )(x2d, gamma.reshape(1, H), beta.reshape(1, H),
      w.astype(jnp.bfloat16), b.reshape(1, D))


# ----------------------------------------------------------------------------
# Kernel 2: fused multi-head causal attention + merge-heads + c_proj
#   grid over batch; qkv block (1, S, 3*split), output block (1, S, H)
# ----------------------------------------------------------------------------
def _attn_cproj_kernel(qkv_ref, wp_ref, bp_ref, o_ref,
                       *, num_heads, head_dim, split, scale):
    S = qkv_ref.shape[1]
    qkv = qkv_ref[0]                                   # (S, 3*split)
    wp = wp_ref[...]                                   # (split, H) bf16
    row = lax.broadcasted_iota(jnp.int32, (S, S), 0)
    col = lax.broadcasted_iota(jnp.int32, (S, S), 1)
    causal = col <= row

    # TODO(synk): for long sequences use an online-softmax (flash-style) loop
    # over key tiles instead of materializing the full (S, S) score matrix.
    acc = None
    for h in range(num_heads):
        lo = h * head_dim
        hi = lo + head_dim
        qh = qkv[:, lo:hi].astype(jnp.bfloat16)
        kh = qkv[:, split + lo:split + hi].astype(jnp.bfloat16)
        vh = qkv[:, 2 * split + lo:2 * split + hi].astype(jnp.bfloat16)
        # q @ k^T without materializing a transpose (contract last dims).
        s = lax.dot_general(qh, kh, (((1,), (1,)), ((), ())),
                            preferred_element_type=jnp.float32) * scale
        s = jnp.where(causal, s, jnp.float32(-10000.0))    # masked_bias
        m = jnp.max(s, axis=-1, keepdims=True)
        p = jnp.exp(s - m)
        denom = jnp.sum(p, axis=-1, keepdims=True)
        p = p * pl.reciprocal(denom, approx=True)
        a_h = jnp.dot(p.astype(jnp.bfloat16), vh,
                      preferred_element_type=jnp.float32)  # (S, hd)
        # merge-heads + c_proj fused: out = sum_h a_h @ Wp[h*hd:(h+1)*hd, :]
        contrib = jnp.dot(a_h.astype(jnp.bfloat16), wp[lo:hi, :],
                          preferred_element_type=jnp.float32)
        acc = contrib if acc is None else acc + contrib

    o_ref[0] = (acc + bp_ref[...]).astype(o_ref.dtype)


def attention_cproj(qkv, wp, bp, *, num_heads, head_dim, split):
    B, S, D3 = qkv.shape
    H = wp.shape[1]
    scale = 1.0 / float(head_dim) ** 0.5
    qkv_spec = pl.BlockSpec((1, S, D3), lambda b: (b, 0, 0))
    return pl.pallas_call(
        functools.partial(_attn_cproj_kernel, num_heads=num_heads,
                          head_dim=head_dim, split=split, scale=scale),
        out_shape=jax.ShapeDtypeStruct((B, S, H), qkv.dtype),
        grid=(B,),
        in_specs=[qkv_spec, _resident((split, H)), _resident((1, H))],
        out_specs=pl.BlockSpec((1, S, H), lambda b: (b, 0, 0)),
        compiler_params=_compiler_params(1),
    )(qkv, wp.astype(jnp.bfloat16), bp.reshape(1, H))


# ----------------------------------------------------------------------------
# Kernel 3: fused add + LayerNorm + MLP fc + GELU + MLP proj + residual add
#   (AddlnMatmulBlock + GPT2MLP + final residual, all per row tile)
# ----------------------------------------------------------------------------
def _add_ln_mlp_kernel(x1_ref, x2_ref, g_ref, be_ref, w2_ref, b2_ref,
                       w3_ref, b3_ref, o_ref):
    x = x1_ref[...].astype(jnp.float32) + x2_ref[...].astype(jnp.float32)
    mean = jnp.mean(x, axis=-1, keepdims=True)
    var = jnp.mean(jnp.square(x - mean), axis=-1, keepdims=True)
    xn = (x - mean) * lax.rsqrt(var + EPS)
    xn = xn * g_ref[...] + be_ref[...]
    h = jnp.dot(xn.astype(jnp.bfloat16), w2_ref[...],
                preferred_element_type=jnp.float32) + b2_ref[...]
    g = 0.5 * h * (1.0 + lax.erf(h * 0.7071067811865476))   # exact gelu (F.gelu)
    ff = jnp.dot(g.astype(jnp.bfloat16), w3_ref[...],
                 preferred_element_type=jnp.float32) + b3_ref[...]
    o_ref[...] = (x + ff).astype(o_ref.dtype)


def add_ln_mlp(x1, x2, gamma, beta, w2, b2, w3, b3):
    M, H = x1.shape
    D = w2.shape[1]                     # inner_dim // TP
    tm = _pick_tile_m(M)
    row_h = pl.BlockSpec((tm, H), lambda i: (i, 0))
    # TODO(synk): for full GPT-3 sizes, K/N-tile the (H, 4H/TP) and (4H/TP, H)
    # weights instead of keeping both fully resident in VMEM.
    return pl.pallas_call(
        _add_ln_mlp_kernel,
        out_shape=jax.ShapeDtypeStruct((M, H), x1.dtype),
        grid=(M // tm,),
        in_specs=[row_h, row_h, _resident((1, H)), _resident((1, H)),
                  _resident((H, D)), _resident((1, D)),
                  _resident((D, H)), _resident((1, H))],
        out_specs=row_h,
        compiler_params=_compiler_params(1),
    )(x1, x2, gamma.reshape(1, H), beta.reshape(1, H),
      w2.astype(jnp.bfloat16), b2.reshape(1, D),
      w3.astype(jnp.bfloat16), b3.reshape(1, H))


# ----------------------------------------------------------------------------
# GPT2Block forward (only trivial row-major reshapes between kernels)
# ----------------------------------------------------------------------------
def gpt2_block_forward(hidden_states, params, *, num_heads):
    B, S, H = hidden_states.shape
    split = H // TP
    hd = split // num_heads
    M = B * S
    x2d = hidden_states.reshape(M, H)

    # 1. ln_fc: LayerNorm + QKV projection (fused) -> (M, 3*split)
    qkv2d = ln_qkv(x2d, params["ln_fc_gamma"], params["ln_fc_beta"],
                   params["ln_fc_w"], params["ln_fc_b"])

    # 2. causal self-attention + merge heads + c_proj, fused (no transposes)
    attn_out = attention_cproj(qkv2d.reshape(B, S, 3 * split),
                               params["attn_proj_w"], params["attn_proj_b"],
                               num_heads=num_heads, head_dim=hd,
                               split=split)                     # (B, S, H)

    # 3. add + LayerNorm + MLP fc + GELU + MLP proj + residual, fully fused
    out = add_ln_mlp(attn_out.reshape(M, H), x2d,
                     params["add_ln_gamma"], params["add_ln_beta"],
                     params["add_ln_w"], params["add_ln_b"],
                     params["mlp_proj_w"], params["mlp_proj_b"])
    return out.reshape(B, S, H)


# ----------------------------------------------------------------------------
# Pure-JAX f32 reference for correctness check
# ----------------------------------------------------------------------------
def _layernorm(x, gamma, beta):
    mean = jnp.mean(x, axis=-1, keepdims=True)
    var = jnp.mean(jnp.square(x - mean), axis=-1, keepdims=True)
    return (x - mean) / jnp.sqrt(var + EPS) * gamma + beta


def reference_forward(hidden_states, params, *, num_heads):
    B, S, H = hidden_states.shape
    split = H // TP
    hd = split // num_heads
    qkv = _layernorm(hidden_states, params["ln_fc_gamma"], params["ln_fc_beta"])
    qkv = qkv @ params["ln_fc_w"] + params["ln_fc_b"]
    q, k, v = jnp.split(qkv, 3, axis=-1)

    def heads(t):
        return t.reshape(B, S, num_heads, hd).transpose(0, 2, 1, 3)

    q, k, v = heads(q), heads(k), heads(v)
    s = jnp.einsum("bhqd,bhkd->bhqk", q, k) / jnp.sqrt(float(hd))
    mask = jnp.tril(jnp.ones((S, S), dtype=bool))
    s = jnp.where(mask[None, None], s, jnp.float32(-10000.0))
    p = jax.nn.softmax(s, axis=-1)
    a = jnp.einsum("bhqk,bhkd->bhqd", p, v)
    a = a.transpose(0, 2, 1, 3).reshape(B, S, split)
    attn_out = a @ params["attn_proj_w"] + params["attn_proj_b"]

    out_add = attn_out + hidden_states
    h = _layernorm(out_add, params["add_ln_gamma"], params["add_ln_beta"])
    h = h @ params["add_ln_w"] + params["add_ln_b"]
    g = 0.5 * h * (1.0 + lax.erf(h * 0.7071067811865476))
    ff = g @ params["mlp_proj_w"] + params["mlp_proj_b"]
    return out_add + ff


# ----------------------------------------------------------------------------
if __name__ == "__main__":
    # small config consistent with the module (TP=16); 2 heads per shard so
    # the multi-head merge/c_proj fusion path is exercised.
    hidden_size = 256
    num_attention_heads = 32            # per-shard heads = 32 // TP = 2
    inner_dim = 4 * hidden_size
    num_heads = num_attention_heads // TP
    B, S = 2, 256                       # M = 512 -> two 256-row grid steps

    key = jax.random.PRNGKey(0)
    keys = jax.random.split(key, 13)
    f32 = jnp.float32

    params = {
        # lnMatmulBlock(embed_dim, 3*embed_dim//TP)
        "ln_fc_w": 0.02 * jax.random.normal(keys[0], (hidden_size, 3 * hidden_size // TP), f32),
        "ln_fc_b": 0.02 * jax.random.normal(keys[1], (3 * hidden_size // TP,), f32),
        "ln_fc_gamma": 1.0 + 0.02 * jax.random.normal(keys[2], (hidden_size,), f32),
        "ln_fc_beta": 0.02 * jax.random.normal(keys[3], (hidden_size,), f32),
        # attn.c_proj: Conv1D(embed_dim, embed_dim//TP)
        "attn_proj_w": 0.02 * jax.random.normal(keys[4], (hidden_size // TP, hidden_size), f32),
        "attn_proj_b": 0.02 * jax.random.normal(keys[5], (hidden_size,), f32),
        # AddlnMatmulBlock(hidden_size, inner_dim//TP)
        "add_ln_w": 0.02 * jax.random.normal(keys[6], (hidden_size, inner_dim // TP), f32),
        "add_ln_b": 0.02 * jax.random.normal(keys[7], (inner_dim // TP,), f32),
        "add_ln_gamma": 1.0 + 0.02 * jax.random.normal(keys[8], (hidden_size,), f32),
        "add_ln_beta": 0.02 * jax.random.normal(keys[9], (hidden_size,), f32),
        # mlp.c_proj: Conv1D(embed_dim, inner_dim//TP)
        "mlp_proj_w": 0.02 * jax.random.normal(keys[10], (inner_dim // TP, hidden_size), f32),
        "mlp_proj_b": 0.02 * jax.random.normal(keys[11], (hidden_size,), f32),
        # NOTE: attn.c_attn and mlp.c_fc exist in __init__ but are unused in
        # forward (their role is taken by the fused ln_fc / add_ln_fc blocks).
    }

    x = jax.random.normal(keys[12], (B, S, hidden_size), f32)

    fwd = jax.jit(functools.partial(gpt2_block_forward, num_heads=num_heads))
    out = jax.block_until_ready(fwd(x, params))

    ref = reference_forward(x, params, num_heads=num_heads)
    # bf16 MXU operands + approx reciprocal -> compare against f32 reference
    # with a tolerance that still catches structural bugs (biases are ~0.02).
    np.testing.assert_allclose(np.asarray(out), np.asarray(ref),
                               rtol=1e-2, atol=1e-2)

    print("KERNEL_OK")
</pallas_src>

<mosaic_0001>
module attributes {stable_mosaic.version = 11 : i64} {
  func.func @_ln_qkv_kernel(%arg0: i32, %arg1: memref<256x256xf32, #tpu.memory_space<vmem>>, %arg2: memref<1x256xf32, #tpu.memory_space<vmem>>, %arg3: memref<1x256xf32, #tpu.memory_space<vmem>>, %arg4: memref<256x48xbf16, #tpu.memory_space<vmem>>, %arg5: memref<1x48xf32, #tpu.memory_space<vmem>>, %arg6: memref<256x48xf32, #tpu.memory_space<vmem>>) attributes {dimension_semantics = [#tpu.dimension_semantics<parallel>], iteration_bounds = array<i64: 2>, scalar_prefetch = 0 : i64, scratch_operands = 0 : i64, tpu.core_type = #tpu.core_type<tc>, window_params = [{transform_indices = @transform_0, window_bounds = array<i64: 256, 256>}, {pipeline_mode = #tpu.pipeline_mode<synchronous>, transform_indices = @transform_1, window_bounds = array<i64: 1, 256>}, {pipeline_mode = #tpu.pipeline_mode<synchronous>, transform_indices = @transform_2, window_bounds = array<i64: 1, 256>}, {pipeline_mode = #tpu.pipeline_mode<synchronous>, transform_indices = @transform_3, window_bounds = array<i64: 256, 48>}, {pipeline_mode = #tpu.pipeline_mode<synchronous>, transform_indices = @transform_4, window_bounds = array<i64: 1, 48>}, {transform_indices = @transform_5, window_bounds = array<i64: 256, 48>}]} {
    %c0 = arith.constant 0 : index
    %c0_0 = arith.constant 0 : index
    %0 = vector.load %arg1[%c0, %c0_0] : memref<256x256xf32, #tpu.memory_space<vmem>>, vector<256x256xf32>
    %cst = arith.constant dense<0.000000e+00> : vector<256xf32>
    %1 = vector.multi_reduction <add>, %0, %cst [1] : vector<256x256xf32> to vector<256xf32>
    %2 = vector.shape_cast %1 : vector<256xf32> to vector<256x1xf32>
    %cst_1 = arith.constant 2.560000e+02 : f32
    %3 = vector.broadcast %cst_1 : f32 to vector<256x1xf32>
    %4 = arith.divf %2, %3 : vector<256x1xf32>
    %5 = vector.broadcast %4 : vector<256x1xf32> to vector<256x256xf32>
    %6 = arith.subf %0, %5 : vector<256x256xf32>
    %7 = arith.mulf %6, %6 : vector<256x256xf32>
    %cst_2 = arith.constant dense<0.000000e+00> : vector<256xf32>
    %8 = vector.multi_reduction <add>, %7, %cst_2 [1] : vector<256x256xf32> to vector<256xf32>
    %9 = vector.shape_cast %8 : vector<256xf32> to vector<256x1xf32>
    %cst_3 = arith.constant 2.560000e+02 : f32
    %10 = vector.broadcast %cst_3 : f32 to vector<256x1xf32>
    %11 = arith.divf %9, %10 : vector<256x1xf32>
    %12 = vector.broadcast %4 : vector<256x1xf32> to vector<256x256xf32>
    %13 = arith.subf %0, %12 : vector<256x256xf32>
    %cst_4 = arith.constant 9.99999974E-6 : f32
    %14 = vector.broadcast %cst_4 : f32 to vector<256x1xf32>
    %15 = arith.addf %11, %14 : vector<256x1xf32>
    %16 = math.rsqrt %15 : vector<256x1xf32>
    %17 = vector.broadcast %16 : vector<256x1xf32> to vector<256x256xf32>
    %18 = arith.mulf %13, %17 : vector<256x256xf32>
    %c0_5 = arith.constant 0 : index
    %c0_6 = arith.constant 0 : index
    %19 = vector.load %arg2[%c0_5, %c0_6] : memref<1x256xf32, #tpu.memory_space<vmem>>, vector<1x256xf32>
    %20 = vector.broadcast %19 : vector<1x256xf32> to vector<256x256xf32>
    %21 = arith.mulf %18, %20 : vector<256x256xf32>
    %c0_7 = arith.constant 0 : index
    %c0_8 = arith.constant 0 : index
    %22 = vector.load %arg3[%c0_7, %c0_8] : memref<1x256xf32, #tpu.memory_space<vmem>>, vector<1x256xf32>
    %23 = vector.broadcast %22 : vector<1x256xf32> to vector<256x256xf32>
    %24 = arith.addf %21, %23 : vector<256x256xf32>
    %25 = arith.truncf %24 : vector<256x256xf32> to vector<256x256xbf16>
    %c0_9 = arith.constant 0 : index
    %c0_10 = arith.constant 0 : index
    %26 = vector.load %arg4[%c0_9, %c0_10] : memref<256x48xbf16, #tpu.memory_space<vmem>>, vector<256x48xbf16>
    %cst_11 = arith.constant dense<0.000000e+00> : vector<256x48xf32>
    %27 = tpu.matmul %25, %26, %cst_11 {dimension_numbers = #tpu.dot_dimension_numbers<[1], [0], [0], [1], [0, 0, 1, 1], [], []>} : vector<256x256xbf16>, vector<256x48xbf16>, vector<256x48xf32> -> vector<256x48xf32>
    %c0_12 = arith.constant 0 : index
    %c0_13 = arith.constant 0 : index
    %28 = vector.load %arg5[%c0_12, %c0_13] : memref<1x48xf32, #tpu.memory_space<vmem>>, vector<1x48xf32>
    %29 = vector.broadcast %28 : vector<1x48xf32> to vector<256x48xf32>
    %30 = arith.addf %27, %29 : vector<256x48xf32>
    %c0_14 = arith.constant 0 : index
    %c0_15 = arith.constant 0 : index
    %31 = vector.load %arg6[%c0_14, %c0_15] : memref<256x48xf32, #tpu.memory_space<vmem>>, vector<256x48xf32>
    tpu.vector_store %arg6[%c0_14, %c0_15], %30 {strides = array<i32>} : memref<256x48xf32, #tpu.memory_space<vmem>>, vector<256x48xf32>,
    return
  }
  func.func @transform_0(%arg0: i32) -> (i32, i32) {
    %c0_i32 = arith.constant 0 : i32
    %c0_i32_0 = arith.constant 0 : i32
    return %arg0, %c0_i32 : i32, i32
  }
  func.func @transform_1(%arg0: i32) -> (i32, i32) {
    %c0_i32 = arith.constant 0 : i32
    %c0_i32_0 = arith.constant 0 : i32
    %c0_i32_1 = arith.constant 0 : i32
    return %c0_i32, %c0_i32_0 : i32, i32
  }
  func.func @transform_2(%arg0: i32) -> (i32, i32) {
    %c0_i32 = arith.constant 0 : i32
    %c0_i32_0 = arith.constant 0 : i32
    %c0_i32_1 = arith.constant 0 : i32
    return %c0_i32, %c0_i32_0 : i32, i32
  }
  func.func @transform_3(%arg0: i32) -> (i32, i32) {
    %c0_i32 = arith.constant 0 : i32
    %c0_i32_0 = arith.constant 0 : i32
    %c0_i32_1 = arith.constant 0 : i32
    return %c0_i32, %c0_i32_0 : i32, i32
  }
  func.func @transform_4(%arg0: i32) -> (i32, i32) {
    %c0_i32 = arith.constant 0 : i32
    %c0_i32_0 = arith.constant 0 : i32
    %c0_i32_1 = arith.constant 0 : i32
    return %c0_i32, %c0_i32_0 : i32, i32
  }
  func.func @transform_5(%arg0: i32) -> (i32, i32) {
    %c0_i32 = arith.constant 0 : i32
    %c0_i32_0 = arith.constant 0 : i32
    return %arg0, %c0_i32 : i32, i32
  }
}

module attributes {stable_mosaic.version = 11 : i64} {
  func.func @_attn_cproj_kernel(%arg0: i32, %arg1: memref<1x256x48xf32, #tpu.memory_space<vmem>>, %arg2: memref<16x256xbf16, #tpu.memory_space<vmem>>, %arg3: memref<1x256xf32, #tpu.memory_space<vmem>>, %arg4: memref<1x256x256xf32, #tpu.memory_space<vmem>>) attributes {dimension_semantics = [#tpu.dimension_semantics<parallel>], iteration_bounds = array<i64: 2>, scalar_prefetch = 0 : i64, scratch_operands = 0 : i64, tpu.core_type = #tpu.core_type<tc>, window_params = [{transform_indices = @transform_0, window_bounds = array<i64: 1, 256, 48>}, {pipeline_mode = #tpu.pipeline_mode<synchronous>, transform_indices = @transform_1, window_bounds = array<i64: 16, 256>}, {pipeline_mode = #tpu.pipeline_mode<synchronous>, transform_indices = @transform_2, window_bounds = array<i64: 1, 256>}, {transform_indices = @transform_3, window_bounds = array<i64: 1, 256, 256>}]} {
    %c0 = arith.constant 0 : index
    %c0_0 = arith.constant 0 : index
    %c0_1 = arith.constant 0 : index
    %0 = vector.load %arg1[%c0, %c0_0, %c0_1] : memref<1x256x48xf32, #tpu.memory_space<vmem>>, vector<1x256x48xf32>
    %1 = vector.shape_cast %0 : vector<1x256x48xf32> to vector<256x48xf32>
    %c0_2 = arith.constant 0 : index
    %c0_3 = arith.constant 0 : index
    %2 = vector.load %arg2[%c0_2, %c0_3] : memref<16x256xbf16, #tpu.memory_space<vmem>>, vector<16x256xbf16>
    %3 = tpu.iota {dimensions = array<i32: 0>} : vector<256x256xi32>
    %4 = tpu.iota {dimensions = array<i32: 1>} : vector<256x256xi32>
    %5 = arith.cmpi sle, %4, %3 : vector<256x256xi32>
    %6 = vector.extract_strided_slice %1 {offsets = [0, 0], sizes = [256, 8], strides = [1, 1]} : vector<256x48xf32> to vector<256x8xf32>
    %7 = arith.truncf %6 : vector<256x8xf32> to vector<256x8xbf16>
    %8 = vector.extract_strided_slice %1 {offsets = [0, 16], sizes = [256, 8], strides = [1, 1]} : vector<256x48xf32> to vector<256x8xf32>
    %9 = arith.truncf %8 : vector<256x8xf32> to vector<256x8xbf16>
    %10 = vector.extract_strided_slice %1 {offsets = [0, 32], sizes = [256, 8], strides = [1, 1]} : vector<256x48xf32> to vector<256x8xf32>
    %11 = arith.truncf %10 : vector<256x8xf32> to vector<256x8xbf16>
    %cst = arith.constant dense<0.000000e+00> : vector<256x256xf32>
    %12 = tpu.matmul %7, %9, %cst {dimension_numbers = #tpu.dot_dimension_numbers<[1], [1], [0], [0], [0, 0, 1, 0], [], []>} : vector<256x8xbf16>, vector<256x8xbf16>, vector<256x256xf32> -> vector<256x256xf32>
    %cst_4 = arith.constant 0.353553385 : f32
    %13 = vector.broadcast %cst_4 : f32 to vector<256x256xf32>
    %14 = arith.mulf %12, %13 : vector<256x256xf32>
    %cst_5 = arith.constant -1.000000e+04 : f32
    %15 = vector.broadcast %cst_5 : f32 to vector<256x256xf32>
    %16 = arith.select %5, %14, %15 : vector<256x256xi1>, vector<256x256xf32>
    %cst_6 = arith.constant dense<0xFF800000> : vector<256xf32>
    %17 = vector.multi_reduction <maximumf>, %16, %cst_6 [1] : vector<256x256xf32> to vector<256xf32>
    %18 = vector.shape_cast %17 : vector<256xf32> to vector<256x1xf32>
    %19 = vector.broadcast %18 : vector<256x1xf32> to vector<256x256xf32>
    %20 = arith.subf %16, %19 : vector<256x256xf32>
    %21 = math.exp %20 : vector<256x256xf32>
    %cst_7 = arith.constant dense<0.000000e+00> : vector<256xf32>
    %22 = vector.multi_reduction <add>, %21, %cst_7 [1] : vector<256x256xf32> to vector<256xf32>
    %23 = vector.shape_cast %22 : vector<256xf32> to vector<256x1xf32>
    %24 = tpu.reciprocal %23 {approx = true} : vector<256x1xf32> -> vector<256x1xf32>
    %25 = vector.broadcast %24 : vector<256x1xf32> to vector<256x256xf32>
    %26 = arith.mulf %21, %25 : vector<256x256xf32>
    %27 = arith.truncf %26 : vector<256x256xf32> to vector<256x256xbf16>
    %cst_8 = arith.constant dense<0.000000e+00> : vector<256x8xf32>
    %28 = tpu.matmul %27, %11, %cst_8 {dimension_numbers = #tpu.dot_dimension_numbers<[1], [0], [0], [1], [0, 0, 1, 1], [], []>} : vector<256x256xbf16>, vector<256x8xbf16>, vector<256x8xf32> -> vector<256x8xf32>
    %29 = arith.truncf %28 : vector<256x8xf32> to vector<256x8xbf16>
    %30 = vector.extract_strided_slice %2 {offsets = [0, 0], sizes = [8, 256], strides = [1, 1]} : vector<16x256xbf16> to vector<8x256xbf16>
    %cst_9 = arith.constant dense<0.000000e+00> : vector<256x256xf32>
    %31 = tpu.matmul %29, %30, %cst_9 {dimension_numbers = #tpu.dot_dimension_numbers<[1], [0], [0], [1], [0, 0, 1, 1], [], []>} : vector<256x8xbf16>, vector<8x256xbf16>, vector<256x256xf32> -> vector<256x256xf32>
    %32 = vector.extract_strided_slice %1 {offsets = [0, 8], sizes = [256, 8], strides = [1, 1]} : vector<256x48xf32> to vector<256x8xf32>
    %33 = arith.truncf %32 : vector<256x8xf32> to vector<256x8xbf16>
    %34 = vector.extract_strided_slice %1 {offsets = [0, 24], sizes = [256, 8], strides = [1, 1]} : vector<256x48xf32> to vector<256x8xf32>
    %35 = arith.truncf %34 : vector<256x8xf32> to vector<256x8xbf16>
    %36 = vector.extract_strided_slice %1 {offsets = [0, 40], sizes = [256, 8], strides = [1, 1]} : vector<256x48xf32> to vector<256x8xf32>
    %37 = arith.truncf %36 : vector<256x8xf32> to vector<256x8xbf16>
    %cst_10 = arith.constant dense<0.000000e+00> : vector<256x256xf32>
    %38 = tpu.matmul %33, %35, %cst_10 {dimension_numbers = #tpu.dot_dimension_numbers<[1], [1], [0], [0], [0, 0, 1, 0], [], []>} : vector<256x8xbf16>, vector<256x8xbf16>, vector<256x256xf32> -> vector<256x256xf32>
    %cst_11 = arith.constant 0.353553385 : f32
    %39 = vector.broadcast %cst_11 : f32 to vector<256x256xf32>
    %40 = arith.mulf %38, %39 : vector<256x256xf32>
    %cst_12 = arith.constant -1.000000e+04 : f32
    %41 = vector.broadcast %cst_12 : f32 to vector<256x256xf32>
    %42 = arith.select %5, %40, %41 : vector<256x256xi1>, vector<256x256xf32>
    %cst_13 = arith.constant dense<0xFF800000> : vector<256xf32>
    %43 = vector.multi_reduction <maximumf>, %42, %cst_13 [1] : vector<256x256xf32> to vector<256xf32>
    %44 = vector.shape_cast %43 : vector<256xf32> to vector<256x1xf32>
    %45 = vector.broadcast %44 : vector<256x1xf32> to vector<256x256xf32>
    %46 = arith.subf %42, %45 : vector<256x256xf32>
    %47 = math.exp %46 : vector<256x256xf32>
    %cst_14 = arith.constant dense<0.000000e+00> : vector<256xf32>
    %48 = vector.multi_reduction <add>, %47, %cst_14 [1] : vector<256x256xf32> to vector<256xf32>
    %49 = vector.shape_cast %48 : vector<256xf32> to vector<256x1xf32>
    %50 = tpu.reciprocal %49 {approx = true} : vector<256x1xf32> -> vector<256x1xf32>
    %51 = vector.broadcast %50 : vector<256x1xf32> to vector<256x256xf32>
    %52 = arith.mulf %47, %51 : vector<256x256xf32>
    %53 = arith.truncf %52 : vector<256x256xf32> to vector<256x256xbf16>
    %cst_15 = arith.constant dense<0.000000e+00> : vector<256x8xf32>
    %54 = tpu.matmul %53, %37, %cst_15 {dimension_numbers = #tpu.dot_dimension_numbers<[1], [0], [0], [1], [0, 0, 1, 1], [], []>} : vector<256x256xbf16>, vector<256x8xbf16>, vector<256x8xf32> -> vector<256x8xf32>
    %55 = arith.truncf %54 : vector<256x8xf32> to vector<256x8xbf16>
    %56 = vector.extract_strided_slice %2 {offsets = [8, 0], sizes = [8, 256], strides = [1, 1]} : vector<16x256xbf16> to vector<8x256xbf16>
    %cst_16 = arith.constant dense<0.000000e+00> : vector<256x256xf32>
    %57 = tpu.matmul %55, %56, %cst_16 {dimension_numbers = #tpu.dot_dimension_numbers<[1], [0], [0], [1], [0, 0, 1, 1], [], []>} : vector<256x8xbf16>, vector<8x256xbf16>, vector<256x256xf32> -> vector<256x256xf32>
    %58 = arith.addf %31, %57 : vector<256x256xf32>
    %c0_17 = arith.constant 0 : index
    %c0_18 = arith.constant 0 : index
    %59 = vector.load %arg3[%c0_17, %c0_18] : memref<1x256xf32, #tpu.memory_space<vmem>>, vector<1x256xf32>
    %60 = vector.broadcast %59 : vector<1x256xf32> to vector<256x256xf32>
    %61 = arith.addf %58, %60 : vector<256x256xf32>
    %c0_19 = arith.constant 0 : index
    %c0_20 = arith.constant 0 : index
    %c0_21 = arith.constant 0 : index
    %62 = vector.load %arg4[%c0_19, %c0_20, %c0_21] : memref<1x256x256xf32, #tpu.memory_space<vmem>>, vector<1x256x256xf32>
    %63 = vector.shape_cast %62 : vector<1x256x256xf32> to vector<256x256xf32>
    %64 = vector.shape_cast %61 : vector<256x256xf32> to vector<1x256x256xf32>
    tpu.vector_store %arg4[%c0_19, %c0_20, %c0_21], %64 {strides = array<i32>} : memref<1x256x256xf32, #tpu.memory_space<vmem>>, vector<1x256x256xf32>,
    return
  }
  func.func @transform_0(%arg0: i32) -> (i32, i32, i32) {
    %c0_i32 = arith.constant 0 : i32
    %c0_i32_0 = arith.constant 0 : i32
    %c0_i32_1 = arith.constant 0 : i32
    return %arg0, %c0_i32, %c0_i32_0 : i32, i32, i32
  }
  func.func @transform_1(%arg0: i32) -> (i32, i32) {
    %c0_i32 = arith.constant 0 : i32
    %c0_i32_0 = arith.constant 0 : i32
    %c0_i32_1 = arith.constant 0 : i32
    return %c0_i32, %c0_i32_0 : i32, i32
  }
  func.func @transform_2(%arg0: i32) -> (i32, i32) {
    %c0_i32 = arith.constant 0 : i32
    %c0_i32_0 = arith.constant 0 : i32
    %c0_i32_1 = arith.constant 0 : i32
    return %c0_i32, %c0_i32_0 : i32, i32
  }
  func.func @transform_3(%arg0: i32) -> (i32, i32, i32) {
    %c0_i32 = arith.constant 0 : i32
    %c0_i32_0 = arith.constant 0 : i32
    %c0_i32_1 = arith.constant 0 : i32
    return %arg0, %c0_i32, %c0_i32_0 : i32, i32, i32
  }
}

module attributes {stable_mosaic.version = 11 : i64} {
  func.func @_add_ln_mlp_kernel(%arg0: i32, %arg1: memref<256x256xf32, #tpu.memory_space<vmem>>, %arg2: memref<256x256xf32, #tpu.memory_space<vmem>>, %arg3: memref<1x256xf32, #tpu.memory_space<vmem>>, %arg4: memref<1x256xf32, #tpu.memory_space<vmem>>, %arg5: memref<256x64xbf16, #tpu.memory_space<vmem>>, %arg6: memref<1x64xf32, #tpu.memory_space<vmem>>, %arg7: memref<64x256xbf16, #tpu.memory_space<vmem>>, %arg8: memref<1x256xf32, #tpu.memory_space<vmem>>, %arg9: memref<256x256xf32, #tpu.memory_space<vmem>>) attributes {dimension_semantics = [#tpu.dimension_semantics<parallel>], iteration_bounds = array<i64: 2>, scalar_prefetch = 0 : i64, scratch_operands = 0 : i64, tpu.core_type = #tpu.core_type<tc>, window_params = [{transform_indices = @transform_0, window_bounds = array<i64: 256, 256>}, {transform_indices = @transform_1, window_bounds = array<i64: 256, 256>}, {pipeline_mode = #tpu.pipeline_mode<synchronous>, transform_indices = @transform_2, window_bounds = array<i64: 1, 256>}, {pipeline_mode = #tpu.pipeline_mode<synchronous>, transform_indices = @transform_3, window_bounds = array<i64: 1, 256>}, {pipeline_mode = #tpu.pipeline_mode<synchronous>, transform_indices = @transform_4, window_bounds = array<i64: 256, 64>}, {pipeline_mode = #tpu.pipeline_mode<synchronous>, transform_indices = @transform_5, window_bounds = array<i64: 1, 64>}, {pipeline_mode = #tpu.pipeline_mode<synchronous>, transform_indices = @transform_6, window_bounds = array<i64: 64, 256>}, {pipeline_mode = #tpu.pipeline_mode<synchronous>, transform_indices = @transform_7, window_bounds = array<i64: 1, 256>}, {transform_indices = @transform_8, window_bounds = array<i64: 256, 256>}]} {
    %c0 = arith.constant 0 : index
    %c0_0 = arith.constant 0 : index
    %0 = vector.load %arg1[%c0, %c0_0] : memref<256x256xf32, #tpu.memory_space<vmem>>, vector<256x256xf32>
    %c0_1 = arith.constant 0 : index
    %c0_2 = arith.constant 0 : index
    %1 = vector.load %arg2[%c0_1, %c0_2] : memref<256x256xf32, #tpu.memory_space<vmem>>, vector<256x256xf32>
    %2 = arith.addf %0, %1 : vector<256x256xf32>
    %cst = arith.constant dense<0.000000e+00> : vector<256xf32>
    %3 = vector.multi_reduction <add>, %2, %cst [1] : vector<256x256xf32> to vector<256xf32>
    %4 = vector.shape_cast %3 : vector<256xf32> to vector<256x1xf32>
    %cst_3 = arith.constant 2.560000e+02 : f32
    %5 = vector.broadcast %cst_3 : f32 to vector<256x1xf32>
    %6 = arith.divf %4, %5 : vector<256x1xf32>
    %7 = vector.broadcast %6 : vector<256x1xf32> to vector<256x256xf32>
    %8 = arith.subf %2, %7 : vector<256x256xf32>
    %9 = arith.mulf %8, %8 : vector<256x256xf32>
    %cst_4 = arith.constant dense<0.000000e+00> : vector<256xf32>
    %10 = vector.multi_reduction <add>, %9, %cst_4 [1] : vector<256x256xf32> to vector<256xf32>
    %11 = vector.shape_cast %10 : vector<256xf32> to vector<256x1xf32>
    %cst_5 = arith.constant 2.560000e+02 : f32
    %12 = vector.broadcast %cst_5 : f32 to vector<256x1xf32>
    %13 = arith.divf %11, %12 : vector<256x1xf32>
    %14 = vector.broadcast %6 : vector<256x1xf32> to vector<256x256xf32>
    %15 = arith.subf %2, %14 : vector<256x256xf32>
    %cst_6 = arith.constant 9.99999974E-6 : f32
    %16 = vector.broadcast %cst_6 : f32 to vector<256x1xf32>
    %17 = arith.addf %13, %16 : vector<256x1xf32>
    %18 = math.rsqrt %17 : vector<256x1xf32>
    %19 = vector.broadcast %18 : vector<256x1xf32> to vector<256x256xf32>
    %20 = arith.mulf %15, %19 : vector<256x256xf32>
    %c0_7 = arith.constant 0 : index
    %c0_8 = arith.constant 0 : index
    %21 = vector.load %arg3[%c0_7, %c0_8] : memref<1x256xf32, #tpu.memory_space<vmem>>, vector<1x256xf32>
    %22 = vector.broadcast %21 : vector<1x256xf32> to vector<256x256xf32>
    %23 = arith.mulf %20, %22 : vector<256x256xf32>
    %c0_9 = arith.constant 0 : index
    %c0_10 = arith.constant 0 : index
    %24 = vector.load %arg4[%c0_9, %c0_10] : memref<1x256xf32, #tpu.memory_space<vmem>>, vector<1x256xf32>
    %25 = vector.broadcast %24 : vector<1x256xf32> to vector<256x256xf32>
    %26 = arith.addf %23, %25 : vector<256x256xf32>
    %27 = arith.truncf %26 : vector<256x256xf32> to vector<256x256xbf16>
    %c0_11 = arith.constant 0 : index
    %c0_12 = arith.constant 0 : index
    %28 = vector.load %arg5[%c0_11, %c0_12] : memref<256x64xbf16, #tpu.memory_space<vmem>>, vector<256x64xbf16>
    %cst_13 = arith.constant dense<0.000000e+00> : vector<256x64xf32>
    %29 = tpu.matmul %27, %28, %cst_13 {dimension_numbers = #tpu.dot_dimension_numbers<[1], [0], [0], [1], [0, 0, 1, 1], [], []>} : vector<256x256xbf16>, vector<256x64xbf16>, vector<256x64xf32> -> vector<256x64xf32>
    %c0_14 = arith.constant 0 : index
    %c0_15 = arith.constant 0 : index
    %30 = vector.load %arg6[%c0_14, %c0_15] : memref<1x64xf32, #tpu.memory_space<vmem>>, vector<1x64xf32>
    %31 = vector.broadcast %30 : vector<1x64xf32> to vector<256x64xf32>
    %32 = arith.addf %29, %31 : vector<256x64xf32>
    %cst_16 = arith.constant 5.000000e-01 : f32
    %33 = vector.broadcast %cst_16 : f32 to vector<256x64xf32>
    %34 = arith.mulf %33, %32 : vector<256x64xf32>
    %cst_17 = arith.constant 0.707106769 : f32
    %35 = vector.broadcast %cst_17 : f32 to vector<256x64xf32>
    %36 = arith.mulf %32, %35 : vector<256x64xf32>
    %37 = math.erf %36 : vector<256x64xf32>
    %cst_18 = arith.constant 1.000000e+00 : f32
    %38 = vector.broadcast %cst_18 : f32 to vector<256x64xf32>
    %39 = arith.addf %38, %37 : vector<256x64xf32>
    %40 = arith.mulf %34, %39 : vector<256x64xf32>
    %41 = arith.truncf %40 : vector<256x64xf32> to vector<256x64xbf16>
    %c0_19 = arith.constant 0 : index
    %c0_20 = arith.constant 0 : index
    %42 = vector.load %arg7[%c0_19, %c0_20] : memref<64x256xbf16, #tpu.memory_space<vmem>>, vector<64x256xbf16>
    %cst_21 = arith.constant dense<0.000000e+00> : vector<256x256xf32>
    %43 = tpu.matmul %41, %42, %cst_21 {dimension_numbers = #tpu.dot_dimension_numbers<[1], [0], [0], [1], [0, 0, 1, 1], [], []>} : vector<256x64xbf16>, vector<64x256xbf16>, vector<256x256xf32> -> vector<256x256xf32>
    %c0_22 = arith.constant 0 : index
    %c0_23 = arith.constant 0 : index
    %44 = vector.load %arg8[%c0_22, %c0_23] : memref<1x256xf32, #tpu.memory_space<vmem>>, vector<1x256xf32>
    %45 = vector.broadcast %44 : vector<1x256xf32> to vector<256x256xf32>
    %46 = arith.addf %43, %45 : vector<256x256xf32>
    %47 = arith.addf %2, %46 : vector<256x256xf32>
    %c0_24 = arith.constant 0 : index
    %c0_25 = arith.constant 0 : index
    %48 = vector.load %arg9[%c0_24, %c0_25] : memref<256x256xf32, #tpu.memory_space<vmem>>, vector<256x256xf32>
    tpu.vector_store %arg9[%c0_24, %c0_25], %47 {strides = array<i32>} : memref<256x256xf32, #tpu.memory_space<vmem>>, vector<256x256xf32>,
    return
  }
  func.func @transform_0(%arg0: i32) -> (i32, i32) {
    %c0_i32 = arith.constant 0 : i32
    %c0_i32_0 = arith.constant 0 : i32
    return %arg0, %c0_i32 : i32, i32
  }
  func.func @transform_1(%arg0: i32) -> (i32, i32) {
    %c0_i32 = arith.constant 0 : i32
    %c0_i32_0 = arith.constant 0 : i32
    return %arg0, %c0_i32 : i32, i32
  }
  func.func @transform_2(%arg0: i32) -> (i32, i32) {
    %c0_i32 = arith.constant 0 : i32
    %c0_i32_0 = arith.constant 0 : i32
    %c0_i32_1 = arith.constant 0 : i32
    return %c0_i32, %c0_i32_0 : i32, i32
  }
  func.func @transform_3(%arg0: i32) -> (i32, i32) {
    %c0_i32 = arith.constant 0 : i32
    %c0_i32_0 = arith.constant 0 : i32
    %c0_i32_1 = arith.constant 0 : i32
    return %c0_i32, %c0_i32_0 : i32, i32
  }
  func.func @transform_4(%arg0: i32) -> (i32, i32) {
    %c0_i32 = arith.constant 0 : i32
    %c0_i32_0 = arith.constant 0 : i32
    %c0_i32_1 = arith.constant 0 : i32
    return %c0_i32, %c0_i32_0 : i32, i32
  }
  func.func @transform_5(%arg0: i32) -> (i32, i32) {
    %c0_i32 = arith.constant 0 : i32
    %c0_i32_0 = arith.constant 0 : i32
    %c0_i32_1 = arith.constant 0 : i32
    return %c0_i32, %c0_i32_0 : i32, i32
  }
  func.func @transform_6(%arg0: i32) -> (i32, i32) {
    %c0_i32 = arith.constant 0 : i32
    %c0_i32_0 = arith.constant 0 : i32
    %c0_i32_1 = arith.constant 0 : i32
    return %c0_i32, %c0_i32_0 : i32, i32
  }
  func.func @transform_7(%arg0: i32) -> (i32, i32) {
    %c0_i32 = arith.constant 0 : i32
    %c0_i32_0 = arith.constant 0 : i32
    %c0_i32_1 = arith.constant 0 : i32
    return %c0_i32, %c0_i32_0 : i32, i32
  }
  func.func @transform_8(%arg0: i32) -> (i32, i32) {
    %c0_i32 = arith.constant 0 : i32
    %c0_i32_0 = arith.constant 0 : i32
    return %arg0, %c0_i32 : i32, i32
  }
}

</mosaic_0001>

<bundles_post_ra>
// kernel: gpt2_block_forward.3
= control target key start
LH: loop header
LB: loop body
LE: loop exit
PB: predicated region body
PF: predicated region fallthrough
CT: control target
= control target key end

     0   :  { %10 = vsyncpa [#allocation3], 0  ;;  %s2893_s0 = inlined_call_operand.hbm [shape: f32[512,256], index: 0, kind: input, shape index: {}]   ;;  %s2894_s1 = inlined_call_operand.vmem [shape: f32[1,256], index: 1, kind: input, shape index: {}]   ;;  %s2895_s2 = inlined_call_operand.vmem [shape: f32[1,256], index: 2, kind: input, shape index: {}]   ;;  %s2896_s3 = inlined_call_operand.vmem [shape: bf16[256,48], index: 3, kind: input, shape index: {}]   ;;  %s2897_s4 = inlined_call_operand.vmem [shape: f32[1,48], index: 4, kind: input, shape index: {}]   ;;  %s2898_s5 = inlined_call_operand.vmem [shape: f32[512,48], index: 5, kind: output, shape index: {}]  }
   0x1   :  { %12 = vsyncpa [#allocation3 + $0x1], 0  ;;  %s1787_s18 = smov 0   ;;  %s1789_s19 = smov 0  }
   0x2   :  { %s1791_s20 = smov 0   ;;  %s1793_s21 = smov 0  }
   0x3 LB: > { %s1406_s22 = sadd.s32 4294967295, %s1752_s21   ;;  %s1807_s23 = sadd.s32 1, %s1752_s21   ;;  %s1752_s21 = sphi %s1793_s21, %s3022_s21   ;;  %s1748_s20 = sphi %s1791_s20, %s3021_s20   ;;  %s1744_s19 = sphi %s1789_s19, %s3020_s19   ;;  %s1740_s18 = sphi %s1787_s18, %s3019_s18  }
   0x4   : > { %s22_s24 = ssub.s32 %s1752_s21, %s1807_s23  ;;  %s25_s25 = sadd.s32 1, %s1748_s20 }
   0x5   : > { %p23_p0 = scmp.eq.s32.totalorder %s22_s24, 0  ;;  %p32_p1 = scmp.ne.s32.totalorder %s1748_s20, %s1744_s19 }
   0x6   : > { %p33_p2 = scmp.eq.s32.totalorder %s1752_s21, 0  ;;  %p38_p3 = scmp.ne.s32.totalorder %s1744_s19, %s1740_s18 }
   0x7   : > { %s1817_s26 = scalar_select %p23_p0, %s1748_s20, %s25_s25  }
   0x8   : > { %p34_p4 = por %p33_p2, %p32_p1  ;;  %p39_p5 = scmp.eq.s32.totalorder %s1406_s22, 0 }
   0x9   : > { %p1573_p6 = scmp.lt.s32.totalorder %s1752_s21, 2  ;;  %s184_s28 = sand.u32 1, %s1748_s20  }
   0xa   : > { %p1822_p7 = por %p39_p5, %p38_p3  ;;  %s1410_s29 = sshll.u32 %s184_s28, 9 }
   0xb   : > { %s1438_s30 = sshll.u32 %s1752_s21, 13  ;;  %s188_s9 = scalar_lea.vmem [#allocation2], %s1410_s29 }
   0xc   : > { %s1831_s8 = scalar_lea.hbm %s2893_s0, %s1438_s30  ;;  %s196_s10 = sshll.u32 %s188_s9, 4  ;;  %s1833_s10 = int_to_ptr.vmem [resolvable:$true] %s196_s10 }
   0xd   : > { %p1835_p8 = pnand %p1573_p6, %p34_p4  ;;  %s1840_s12 = scalar_lea.sflag [#allocation3], %s184_s28 }
   0xe   : > { %s1688_s13 = scalar_lea.hbm %s1831_s8, 8192  ;;  %s1693_s16 = scalar_lea.hbm %s2893_s0, 16384 }
   0xf   : > { %p1689_p10 = scmp.ne.s32.totalorder %s1831_s8, %s1688_s13  ;;  %p1690_p11 = pneg %p1835_p8 }
  0x10   : > { %p1694_p0 = scmp.lt.u32.totalorder %s1831_s8, %s2893_s0  ;;  %p1695_p1 = scmp.lt.u32.totalorder %s1693_s16, %s1688_s13 }
  0x11   : > { %p1691_p12 = pnand %p1690_p11, %p1689_p10  ;;  %p1697_p3 = scmp.lt.u32.totalorder %s1688_s13, %s1831_s8 }
  0x12   : > { %p1696_p2 = por %p1695_p1, %p1694_p0 }
  0x13   : > { %p1692_p13 = pneg %p1691_p12 }
  0x14   : > { %p1698_p4 = por %p1697_p3, %p1696_p2 }
  0x16   : > { %p1699_p5 = pnand %p1698_p4, %p1692_p13 }
  0x18   : > { %1702 = shalt.err (!%p1699_p5)
}
  0x19   : > { %s1703_s24 = scalar_lea.vmem %s1833_s10, 8192  ;;  %s1754_s25 = smov [#allocation2]  }
  0x1a   : > { %p1704_p6 = scmp.ne.s32.totalorder %s1833_s10, %s1703_s24  ;;  %s1708_s28 = sshll.u32 %s1754_s25, 4  ;;  %s1709_s28 = int_to_ptr.vmem [resolvable:$false] %s1708_s28 }
  0x1b   : > { %s1710_s29 = scalar_lea.vmem %s1709_s28, 16384  ;;  %p1711_p9 = scmp.lt.s32.totalorder %s1833_s10, %s1709_s28 }
  0x1c   : > { %p1706_p10 = pnand %p1704_p6, %p1690_p11  ;;  %p1712_p0 = scmp.lt.s32.totalorder %s1710_s29, %s1703_s24 }
  0x1e   : > { %p1707_p12 = pneg %p1706_p10  ;;  %p1713_p1 = por %p1712_p0, %p1711_p9 }
  0x20   : > { %p1714_p2 = pnand %p1713_p1, %p1707_p12 }
  0x22   : > { %1717 = shalt.err (!%p1714_p2)
}
  0x23   : > { %s1755_s30 = smov 256   ;;  %s1756_s6 = smov 16  }
  0x24   : > { %1572 = dma.hbm_to_vmem [thread:$0]  (!%p1835_p8), %s1831_s8, 8192, %s1833_s10, %s1840_s12, %s1755_s30, %s1755_s30, %s1756_s6  }
  0x25   : > { %p204_p11 = scmp.lt.s32.totalorder %s1752_s21, 3  ;;  %p2940_p13 = scmp.ge.s32.totalorder %s1752_s21, 1 }
  0x27   : > { %p205_p3 = pnand %p2940_p13, %p204_p11 }
  0x29   : > { %208 = sbr.rel (%p205_p3) target bundleno = 667 (0x29b), region = 40 }
  0x30   : > { %s210_s7 = sand.u32 1, %s1744_s19  }
  0x31   : > { %s1415_s9 = sshll.u32 %s210_s7, 9  ;;  %s211_s13 = scalar_lea.sflag [#allocation3], %s210_s7 }
  0x32   : > { %s1872_s14 = scalar_lea.vmem [#allocation2], %s1415_s9 }
  0x33   : > { %1735 = dma.done.wait (%p1822_p7), %s211_s13, 8192  }
  0x34   : > { %1737 = vsyncadd (%p1822_p7), %s211_s13, 4294959104  ;;  %v1879_v0 = vld [vmem:[%s1872_s14] sm:$0xff]  ;;  %v1882_v1 = vld [vmem:[%s1872_s14 + $0x8] sm:$0xff]  ;;  %s1416_s13 = sshll.u32 %s1406_s22, 5  ;;  %vm1306_vm0 = vcmask 392192  }
  0x35   : > { %v1885_v2 = vld [vmem:[%s1872_s14 + $0x100] sm:$0xff]  ;;  %v313_v3 = vadd.f32 %v1882_v1, %v1879_v0  ;;  %v1890_v4 = vld [vmem:[%s1872_s14 + $0x108] sm:$0xff]  ;;  %v1893_v5 = vld [vmem:[%s1872_s14 + $0x10] sm:$0xff]  ;;  %p243_p7 = scmp.lt.s32.totalorder %s1416_s13, 63 }
  0x36   : > { %v1896_v6 = vld [vmem:[%s1872_s14 + $0x18] sm:$0xff]  ;;  %v361_v7 = vadd.f32 %v1890_v4, %v1885_v2  ;;  %v1901_v8 = vld [vmem:[%s1872_s14 + $0x110] sm:$0xff]  ;;  %v1911_v12 = vld [vmem:[%s1872_s14 + $0x20] sm:$0xff] }
  0x37   : > { %v1904_v9 = vld [vmem:[%s1872_s14 + $0x118] sm:$0xff]  ;;  %314 = vadd.xlane.f32.xlu0 %v313_v3  ;;  %v316_v10 = vadd.f32 %v1896_v6, %v1893_v5  ;;  %v1914_v13 = vld [vmem:[%s1872_s14 + $0x28] sm:$0xff]  ;;  %v1917_v14 = vld [vmem:[%s1872_s14 + $0x30] sm:$0xff]  ;;  %s3024_s13 = smov (!%p243_p7, %s1416_s13), 63 }
  0x38   : > { %362 = vadd.xlane.f32.xlu1 %v361_v7  ;;  %v364_v11 = vadd.f32 %v1904_v9, %v1901_v8  ;;  %v1920_v15 = vld [vmem:[%s1872_s14 + $0x38] sm:$0xff]  ;;  %v319_v16 = vadd.f32 %v1914_v13, %v1911_v12  ;;  %v1927_v18 = vld [vmem:[%s1872_s14 + $0x120] sm:$0xff]  ;;  %v1930_v19 = vld [vmem:[%s1872_s14 + $0x128] sm:$0xff] }
  0x39   : > { %v322_v17 = vadd.f32 %v1920_v15, %v1917_v14  ;;  %v1933_v20 = vld [vmem:[%s1872_s14 + $0x130] sm:$0xff]  ;;  %v1936_v21 = vld [vmem:[%s1872_s14 + $0x138] sm:$0xff]  ;;  %v367_v22 = vadd.f32 %v1930_v19, %v1927_v18  ;;  %v1943_v24 = vld [vmem:[%s1872_s14 + $0x40] sm:$0xff] }
  0x3a   : > { %v370_v23 = vadd.f32 %v1936_v21, %v1933_v20  ;;  %v1946_v25 = vld [vmem:[%s1872_s14 + $0x48] sm:$0xff]  ;;  %v1949_v26 = vld [vmem:[%s1872_s14 + $0x50] sm:$0xff]  ;;  %v1952_v27 = vld [vmem:[%s1872_s14 + $0x58] sm:$0xff] }
  0x3b   : > { %317 = vadd.xlane.f32.xlu0 %v316_v10  ;;  %v325_v28 = vadd.f32 %v1946_v25, %v1943_v24  ;;  %v328_v29 = vadd.f32 %v1952_v27, %v1949_v26  ;;  %v1959_v30 = vld [vmem:[%s1872_s14 + $0x140] sm:$0xff]  ;;  %v1962_v31 = vld [vmem:[%s1872_s14 + $0x148] sm:$0xff]  ;;  %v1965_v32 = vld [vmem:[%s1872_s14 + $0x150] sm:$0xff] }
  0x3c   : > { %365 = vadd.xlane.f32.xlu1 %v364_v11  ;;  %v1968_v33 = vld [vmem:[%s1872_s14 + $0x158] sm:$0xff]  ;;  %v373_v34 = vadd.f32 %v1962_v31, %v1959_v30  ;;  %v1975_v36 = vld [vmem:[%s1872_s14 + $0x60] sm:$0xff]  ;;  %v1978_v37 = vld [vmem:[%s1872_s14 + $0x68] sm:$0xff] }
  0x3d   : > { %v376_v35 = vadd.f32 %v1968_v33, %v1965_v32  ;;  %v1981_v38 = vld [vmem:[%s1872_s14 + $0x70] sm:$0xff]  ;;  %v1984_v39 = vld [vmem:[%s1872_s14 + $0x78] sm:$0xff]  ;;  %v1987_v40 = vld [vmem:[%s1872_s14 + $0x160] sm:$0xff]  ;;  %v331_v42 = vadd.f32 %v1978_v37, %v1975_v36 }
  0x3e   : > { %v1990_v41 = vld [vmem:[%s1872_s14 + $0x168] sm:$0xff]  ;;  %v1995_v43 = vld [vmem:[%s1872_s14 + $0x170] sm:$0xff]  ;;  %v1998_v44 = vld [vmem:[%s1872_s14 + $0x178] sm:$0xff]  ;;  %v334_v45 = vadd.f32 %v1984_v39, %v1981_v38 }
  0x3f   : > { %320 = vadd.xlane.f32.xlu0 %v319_v16  ;;  %v2003_v46 = vld [vmem:[%s1872_s14 + $0x80] sm:$0xff]  ;;  %v2006_v47 = vld [vmem:[%s1872_s14 + $0x88] sm:$0xff]  ;;  %v379_v48 = vadd.f32 %v1990_v41, %v1987_v40  ;;  %v2011_v49 = vld [vmem:[%s1872_s14 + $0x90] sm:$0xff]  ;;  %v382_v51 = vadd.f32 %v1998_v44, %v1995_v43 }
  0x40   : > { %323 = vadd.xlane.f32.xlu1 %v322_v17  ;;  %v2014_v50 = vld [vmem:[%s1872_s14 + $0x98] sm:$0xff]  ;;  %v337_v52 = vadd.f32 %v2006_v47, %v2003_v46  ;;  %v2023_v54 = vld [vmem:[%s1872_s14 + $0x180] sm:$0xff]  ;;  %v2026_v55 = vld [vmem:[%s1872_s14 + $0x188] sm:$0xff] }
  0x41   : > { %v340_v53 = vadd.f32 %v2014_v50, %v2011_v49  ;;  %v2029_v56 = vld [vmem:[%s1872_s14 + $0x190] sm:$0xff]  ;;  %v2032_v57 = vld [vmem:[%s1872_s14 + $0x198] sm:$0xff]  ;;  %v385_v58 = vadd.f32 %v2026_v55, %v2023_v54  ;;  %v2039_v60 = vld [vmem:[%s1872_s14 + $0xa0] sm:$0xff] }
  0x42   : > { %v388_v59 = vadd.f32 %v2032_v57, %v2029_v56  ;;  %v2042_v61 = vld [vmem:[%s1872_s14 + $0xa8] sm:$0xff]  ;;  %v2045_v62 = vld [vmem:[%s1872_s14 + $0xb0] sm:$0xff]  ;;  %v2048_v63 = vld [vmem:[%s1872_s14 + $0xb8] sm:$0xff] }
  0x43   : > { %368 = vadd.xlane.f32.xlu0 %v367_v22  ;;  %v343_v3 = vadd.f32 %v2042_v61, %v2039_v60  ;;  %v346_v7 = vadd.f32 %v2048_v63, %v2045_v62  ;;  %v2055_v10 = vld [vmem:[%s1872_s14 + $0x1a0] sm:$0xff]  ;;  %v2058_v11 = vld [vmem:[%s1872_s14 + $0x1a8] sm:$0xff]  ;;  %v2061_v16 = vld [vmem:[%s1872_s14 + $0x1b0] sm:$0xff] }
  0x44   : > { %371 = vadd.xlane.f32.xlu1 %v370_v23  ;;  %v2064_v17 = vld [vmem:[%s1872_s14 + $0x1b8] sm:$0xff]  ;;  %v391_v22 = vadd.f32 %v2058_v11, %v2055_v10 }
  0x45   : > { %v394_v23 = vadd.f32 %v2064_v17, %v2061_v16 }
  0x47   : > { %326 = vadd.xlane.f32.xlu0 %v325_v28  ;;  %v2071_v28 = vld [vmem:[%s1872_s14 + $0xc0] sm:$0xff] }
  0x48   : > { %329 = vadd.xlane.f32.xlu1 %v328_v29  ;;  %v2074_v29 = vld [vmem:[%s1872_s14 + $0xc8] sm:$0xff] }
  0x4b   : > { %374 = vadd.xlane.f32.xlu0 %v373_v34  ;;  %v2077_v34 = vld [vmem:[%s1872_s14 + $0xd0] sm:$0xff] }
  0x4c   : > { %377 = vadd.xlane.f32.xlu1 %v376_v35  ;;  %v2080_v35 = vld [vmem:[%s1872_s14 + $0xd8] sm:$0xff] }
  0x4d   : > { %2941 = vst [vmem:[#allocation5_spill] sm:$0xff] %v2080_v35 }
  0x4f   : > { %332 = vadd.xlane.f32.xlu0 %v331_v42  ;;  %v349_v42 = vadd.f32 %v2074_v29, %v2071_v28 }
  0x50   : > { %335 = vadd.xlane.f32.xlu1 %v334_v45  ;;  %v352_v45 = vadd.f32 %v2080_v35, %v2077_v34 }
  0x53   : > { %380 = vadd.xlane.f32.xlu0 %v379_v48  ;;  %v2087_v48 = vld [vmem:[%s1872_s14 + $0x1c0] sm:$0xff] }
  0x54   : > { %383 = vadd.xlane.f32.xlu1 %v382_v51  ;;  %2942 = vst [vmem:[#allocation6_spill] sm:$0xff] %v2087_v48  ;;  %v2090_v51 = vld [vmem:[%s1872_s14 + $0x1c8] sm:$0xff] }
  0x55   : > { %2943 = vst [vmem:[#allocation7_spill] sm:$0xff] %v2090_v51 }
  0x57   : > { %338 = vadd.xlane.f32.xlu0 %v337_v52  ;;  %v2093_v52 = vld [vmem:[%s1872_s14 + $0x1d0] sm:$0xff] }
  0x58   : > { %341 = vadd.xlane.f32.xlu1 %v340_v53  ;;  %2944 = vst [vmem:[#allocation8_spill] sm:$0xff] %v2093_v52  ;;  %v2096_v53 = vld [vmem:[%s1872_s14 + $0x1d8] sm:$0xff] }
  0x59   : > { %2945 = vst [vmem:[#allocation9_spill] sm:$0xff] %v2096_v53 }
  0x5b   : > { %386 = vadd.xlane.f32.xlu0 %v385_v58  ;;  %v397_v58 = vadd.f32 %v2090_v51, %v2087_v48  ;;  %v2122_v51 = vld [vmem:[%s1872_s14 + $0x1e8] sm:$0xff] }
  0x5c   : > { %389 = vadd.xlane.f32.xlu1 %v388_v59  ;;  %v400_v59 = vadd.f32 %v2096_v53, %v2093_v52  ;;  %2950 = vst [vmem:[#allocation14_spill] sm:$0xff] %v2122_v51  ;;  %v2125_v53 = vld [vmem:[%s1872_s14 + $0x1f0] sm:$0xff]  ;;  %v2128_v52 = vld [vmem:[%s1872_s14 + $0x1f8] sm:$0xff] }
  0x5d   : > { %2951 = vst [vmem:[#allocation15_spill] sm:$0xff] %v2125_v53  ;;  %2952 = vst [vmem:[#allocation16_spill] sm:$0xff] %v2128_v52 }
  0x5f   : > { %344 = vadd.xlane.f32.xlu0 %v343_v3  ;;  %v2103_v3 = vld [vmem:[%s1872_s14 + $0xe0] sm:$0xff] }
  0x60   : > { %347 = vadd.xlane.f32.xlu1 %v346_v7  ;;  %v2106_v7 = vld [vmem:[%s1872_s14 + $0xe8] sm:$0xff] }
  0x61   : > { %2946 = vst [vmem:[#allocation10_spill] sm:$0xff] %v2106_v7  ;;  %v355_v35 = vadd.f32 %v2106_v7, %v2103_v3 }
  0x63   : > { %392 = vadd.xlane.f32.xlu0 %v391_v22  ;;  %v2109_v22 = vld [vmem:[%s1872_s14 + $0xf0] sm:$0xff] }
  0x64   : > { %395 = vadd.xlane.f32.xlu1 %v394_v23  ;;  %2947 = vst [vmem:[#allocation11_spill] sm:$0xff] %v2109_v22  ;;  %v2112_v23 = vld [vmem:[%s1872_s14 + $0xf8] sm:$0xff] }
  0x65   : > { %2948 = vst [vmem:[#allocation12_spill] sm:$0xff] %v2112_v23 }
  0x67   : > { %350 = vadd.xlane.f32.xlu0 %v349_v42  ;;  %v358_v42 = vadd.f32 %v2112_v23, %v2109_v22  ;;  %v1609_v23 = vld [vmem:[%s2896_s3] sm:$0xff]  }
  0x68   : > { %353 = vadd.xlane.f32.xlu1 %v352_v45  ;;  %v2119_v45 = vld [vmem:[%s1872_s14 + $0x1e0] sm:$0xff]  ;;  %s1417_s14 = sshll.u32 %s3024_s13, 3 }
  0x69   : > { %2949 = vst [vmem:[#allocation13_spill] sm:$0xff] %v2119_v45  ;;  %v403_v48 = vadd.f32 %v2122_v51, %v2119_v45  ;;  %s2782_s12 = scalar_lea.vmem %s2898_s5, %s1417_s14 }
  0x6b   : > { %398 = vadd.xlane.f32.xlu0 %v397_v58  ;;  %v406_v58 = vadd.f32 %v2128_v52, %v2125_v53 }
  0x6c   : > { %401 = vadd.xlane.f32.xlu1 %v400_v59  ;;  %v1608_v59 = vld [vmem:[%s2896_s3 + $0x40] sm:$0xff]  }
  0x6d   : > { %1439 = vmatprep.subr.bf16.mxu0 %v1608_v59  ;;  %1551 = vmatprep.subr.bf16.mxu1 %v1608_v59 }
  0x6e   : > { %1440 = vmatpush3.bf16.msra.mxu0 %v1609_v23  ;;  %1559 = vmatpush3.bf16.msra.mxu1 %v1609_v23 }
  0x6f   : > { %356 = vadd.xlane.f32.xlu0 %v355_v35 }
  0x70   : > { %359 = vadd.xlane.f32.xlu1 %v358_v42 }
  0x73   : > { %404 = vadd.xlane.f32.xlu0 %v403_v48 }
  0x74   : > { %407 = vadd.xlane.f32.xlu1 %v406_v58 }
  0xc4   : > { %v315_v35 = vpop.xlane.xlu0 %314 }
  0xc5   : > { %v410_v51 = vmul.f32 0.00390625, %v315_v35  ;;  %v363_v42 = vpop.xlane.xlu1 %362 }
  0xc6   : > { %v426_v45 = vmul.f32 0.00390625, %v363_v42 }
  0xc7   : > { %v2141_v52 = vsub.f32 %v1879_v0, %v410_v51  ;;  %v2144_v48 = vsub.f32 %v1882_v1, %v410_v51 }
  0xc8   : > { %v2147_v58 = vsub.f32 %v1885_v2, %v426_v45  ;;  %v2150_v53 = vsub.f32 %v1890_v4, %v426_v45  ;;  %v318_v22 = vpop.xlane.xlu0 %317 }
  0xc9   : > { %2953 = vst [vmem:[#allocation17_spill] sm:$0xff] %v2141_v52  ;;  %2954 = vst [vmem:[#allocation18_spill] sm:$0xff] %v2144_v48  ;;  %v411_v59 = vmul.f32 0.00390625, %v318_v22  ;;  %v366_v7 = vpop.xlane.xlu1 %365  ;;  %v506_v23 = vmul.f32 %v2141_v52, %v2141_v52  ;;  %v507_v35 = vmul.f32 %v2144_v48, %v2144_v48 }
  0xca   : > { %2955 = vst [vmem:[#allocation19_spill] sm:$0xff] %v2147_v58  ;;  %2956 = vst [vmem:[#allocation20_spill] sm:$0xff] %v2150_v53  ;;  %v427_v0 = vmul.f32 0.00390625, %v366_v7  ;;  %v538_v1 = vmul.f32 %v2147_v58, %v2147_v58  ;;  %v539_v2 = vmul.f32 %v2150_v53, %v2150_v53 }
  0xcb   : > { %v2161_v51 = vsub.f32 %v1893_v5, %v411_v59  ;;  %v2164_v4 = vsub.f32 %v1896_v6, %v411_v59  ;;  %v570_v22 = vadd.f32 %v507_v35, %v506_v23 }
  0xcc   : > { %v2167_v45 = vsub.f32 %v1901_v8, %v427_v0  ;;  %v2170_v42 = vsub.f32 %v1904_v9, %v427_v0  ;;  %v321_v7 = vpop.xlane.xlu0 %320  ;;  %v618_v48 = vadd.f32 %v539_v2, %v538_v1 }
  0xcd   : > { %v412_v52 = vmul.f32 0.00390625, %v321_v7  ;;  %571 = vadd.xlane.f32.xlu0 %v570_v22  ;;  %v324_v58 = vpop.xlane.xlu1 %323  ;;  %v508_v53 = vmul.f32 %v2161_v51, %v2161_v51  ;;  %v509_v5 = vmul.f32 %v2164_v4, %v2164_v4 }
  0xce   : > { %v413_v6 = vmul.f32 0.00390625, %v324_v58  ;;  %v540_v59 = vmul.f32 %v2167_v45, %v2167_v45  ;;  %v541_v8 = vmul.f32 %v2170_v42, %v2170_v42 }
  0xcf   : > { %v2181_v9 = vsub.f32 %v1911_v12, %v412_v52  ;;  %v2184_v23 = vsub.f32 %v1914_v13, %v412_v52  ;;  %v573_v35 = vadd.f32 %v509_v5, %v508_v53 }
  0xd0   : > { %v2187_v0 = vsub.f32 %v1917_v14, %v413_v6  ;;  %v2190_v1 = vsub.f32 %v1920_v15, %v413_v6  ;;  %v369_v58 = vpop.xlane.xlu0 %368  ;;  %v621_v7 = vadd.f32 %v541_v8, %v540_v59 }
  0xd1   : > { %v428_v2 = vmul.f32 0.00390625, %v369_v58  ;;  %619 = vadd.xlane.f32.xlu0 %v618_v48  ;;  %574 = vadd.xlane.f32.xlu1 %v573_v35  ;;  %v372_v22 = vpop.xlane.xlu1 %371  ;;  %v510_v12 = vmul.f32 %v2181_v9, %v2181_v9  ;;  %v511_v13 = vmul.f32 %v2184_v23, %v2184_v23 }
  0xd2   : > { %v429_v52 = vmul.f32 0.00390625, %v372_v22  ;;  %v512_v14 = vmul.f32 %v2187_v0, %v2187_v0  ;;  %v513_v15 = vmul.f32 %v2190_v1, %v2190_v1 }
  0xd3   : > { %v2201_v53 = vsub.f32 %v1927_v18, %v428_v2  ;;  %v2204_v48 = vsub.f32 %v1930_v19, %v428_v2  ;;  %v576_v5 = vadd.f32 %v511_v13, %v510_v12 }
  0xd4   : > { %v2207_v6 = vsub.f32 %v1933_v20, %v429_v52  ;;  %v2210_v59 = vsub.f32 %v1936_v21, %v429_v52  ;;  %v327_v8 = vpop.xlane.xlu0 %326  ;;  %v579_v22 = vadd.f32 %v513_v15, %v512_v14 }
  0xd5   : > { %v414_v35 = vmul.f32 0.00390625, %v327_v8  ;;  %622 = vadd.xlane.f32.xlu1 %v621_v7  ;;  %577 = vadd.xlane.f32.xlu0 %v576_v5  ;;  %v330_v58 = vpop.xlane.xlu1 %329  ;;  %v542_v18 = vmul.f32 %v2201_v53, %v2201_v53  ;;  %v543_v19 = vmul.f32 %v2204_v48, %v2204_v48 }
  0xd6   : > { %v415_v2 = vmul.f32 0.00390625, %v330_v58  ;;  %v544_v20 = vmul.f32 %v2207_v6, %v2207_v6  ;;  %v545_v21 = vmul.f32 %v2210_v59, %v2210_v59 }
  0xd7   : > { %v2221_v12 = vsub.f32 %v1943_v24, %v414_v35  ;;  %v2224_v7 = vsub.f32 %v1946_v25, %v414_v35  ;;  %v624_v13 = vadd.f32 %v543_v19, %v542_v18  ;;  %v1611_v18 = vld [vmem:[%s2896_s3 + $0x8] sm:$0xff]  }
  0xd8   : > { %v2227_v52 = vsub.f32 %v1949_v26, %v415_v2  ;;  %v2230_v14 = vsub.f32 %v1952_v27, %v415_v2  ;;  %v375_v15 = vpop.xlane.xlu0 %374  ;;  %v627_v58 = vadd.f32 %v545_v21, %v544_v20  ;;  %v1610_v26 = vld [vmem:[%s2896_s3 + $0x48] sm:$0xff]  }
  0xd9   : > { %v430_v5 = vmul.f32 0.00390625, %v375_v15  ;;  %580 = vadd.xlane.f32.xlu1 %v579_v22  ;;  %625 = vadd.xlane.f32.xlu0 %v624_v13  ;;  %v378_v8 = vpop.xlane.xlu1 %377  ;;  %v514_v24 = vmul.f32 %v2221_v12, %v2221_v12  ;;  %v515_v25 = vmul.f32 %v2224_v7, %v2224_v7 }
  0xda   : > { %2957 = vst [vmem:[#allocation21_spill] sm:$0xff] %v2227_v52  ;;  %v431_v35 = vmul.f32 0.00390625, %v378_v8  ;;  %v516_v27 = vmul.f32 %v2227_v52, %v2227_v52  ;;  %v517_v22 = vmul.f32 %v2230_v14, %v2230_v14  ;;  %1441 = vmatprep.subr.bf16.mxu0 %v1610_v26  ;;  %1552 = vmatprep.subr.bf16.mxu1 %v1610_v26 }
  0xdb   : > { %v2247_v19 = vsub.f32 %v1959_v30, %v430_v5  ;;  %v2250_v2 = vsub.f32 %v1962_v31, %v430_v5  ;;  %v582_v20 = vadd.f32 %v515_v25, %v514_v24  ;;  %1442 = vmatpush3.bf16.msra.mxu0 %v1611_v18  ;;  %1560 = vmatpush3.bf16.msra.mxu1 %v1611_v18 }
  0xdc   : > { %v2253_v21 = vsub.f32 %v1965_v32, %v431_v35  ;;  %v2256_v13 = vsub.f32 %v1968_v33, %v431_v35  ;;  %v333_v15 = vpop.xlane.xlu0 %332  ;;  %v585_v52 = vadd.f32 %v517_v22, %v516_v27  ;;  %v1613_v27 = vld [vmem:[%s2896_s3 + $0x10] sm:$0xff]  }
  0xdd   : > { %v416_v8 = vmul.f32 0.00390625, %v333_v15  ;;  %628 = vadd.xlane.f32.xlu1 %v627_v58  ;;  %583 = vadd.xlane.f32.xlu0 %v582_v20  ;;  %v336_v30 = vpop.xlane.xlu1 %335  ;;  %v546_v31 = vmul.f32 %v2247_v19, %v2247_v19  ;;  %v547_v5 = vmul.f32 %v2250_v2, %v2250_v2  ;;  %v1612_v58 = vld [vmem:[%s2896_s3 + $0x50] sm:$0xff]  }
  0xde   : > { %v417_v24 = vmul.f32 0.00390625, %v336_v30  ;;  %v548_v32 = vmul.f32 %v2253_v21, %v2253_v21  ;;  %v549_v33 = vmul.f32 %v2256_v13, %v2256_v13  ;;  %1443 = vmatprep.subr.bf16.mxu0 %v1612_v58  ;;  %1553 = vmatprep.subr.bf16.mxu1 %v1612_v58 }
  0xdf   : > { %v2270_v25 = vsub.f32 %v1975_v36, %v416_v8  ;;  %v2273_v26 = vsub.f32 %v1978_v37, %v416_v8  ;;  %v630_v35 = vadd.f32 %v547_v5, %v546_v31  ;;  %1444 = vmatpush3.bf16.msra.mxu0 %v1613_v27  ;;  %1561 = vmatpush3.bf16.msra.mxu1 %v1613_v27 }
  0xe0   : > { %v2279_v22 = vsub.f32 %v1981_v38, %v417_v24  ;;  %v2282_v18 = vsub.f32 %v1984_v39, %v417_v24  ;;  %v381_v20 = vpop.xlane.xlu0 %380  ;;  %v633_v37 = vadd.f32 %v549_v33, %v548_v32  ;;  %v1615_v33 = vld [vmem:[%s2896_s3 + $0x18] sm:$0xff]  }
  0xe1   : > { %v432_v15 = vmul.f32 0.00390625, %v381_v20  ;;  %586 = vadd.xlane.f32.xlu1 %v585_v52  ;;  %631 = vadd.xlane.f32.xlu0 %v630_v35  ;;  %v384_v36 = vpop.xlane.xlu1 %383  ;;  %v518_v8 = vmul.f32 %v2270_v25, %v2270_v25  ;;  %v519_v30 = vmul.f32 %v2273_v26, %v2273_v26  ;;  %v1614_v52 = vld [vmem:[%s2896_s3 + $0x58] sm:$0xff]  }
  0xe2   : > { %v433_v31 = vmul.f32 0.00390625, %v384_v36  ;;  %v520_v38 = vmul.f32 %v2279_v22, %v2279_v22  ;;  %v521_v39 = vmul.f32 %v2282_v18, %v2282_v18  ;;  %1445 = vmatprep.subr.bf16.mxu0 %v1614_v52  ;;  %1554 = vmatprep.subr.bf16.mxu1 %v1614_v52 }
  0xe3   : > { %v2296_v5 = vsub.f32 %v1987_v40, %v432_v15  ;;  %v2299_v24 = vsub.f32 %v1990_v41, %v432_v15  ;;  %v588_v32 = vadd.f32 %v519_v30, %v518_v8  ;;  %1446 = vmatpush3.bf16.msra.mxu0 %v1615_v33  ;;  %1562 = vmatpush3.bf16.msra.mxu1 %v1615_v33 }
  0xe4   : > { %v2305_v58 = vsub.f32 %v1995_v43, %v433_v31  ;;  %v2308_v35 = vsub.f32 %v1998_v44, %v433_v31  ;;  %v339_v20 = vpop.xlane.xlu0 %338  ;;  %v591_v41 = vadd.f32 %v521_v39, %v520_v38  ;;  %v1617_v39 = vld [vmem:[%s2896_s3 + $0x20] sm:$0xff]  }
  0xe5   : > { %v418_v27 = vmul.f32 0.00390625, %v339_v20  ;;  %634 = vadd.xlane.f32.xlu1 %v633_v37  ;;  %589 = vadd.xlane.f32.xlu0 %v588_v32  ;;  %v342_v40 = vpop.xlane.xlu1 %341  ;;  %v550_v15 = vmul.f32 %v2296_v5, %v2296_v5  ;;  %v551_v36 = vmul.f32 %v2299_v24, %v2299_v24  ;;  %v1616_v37 = vld [vmem:[%s2896_s3 + $0x60] sm:$0xff]  }
  0xe6   : > { %v419_v8 = vmul.f32 0.00390625, %v342_v40  ;;  %v552_v43 = vmul.f32 %v2305_v58, %v2305_v58  ;;  %v553_v44 = vmul.f32 %v2308_v35, %v2308_v35  ;;  %1447 = vmatprep.subr.bf16.mxu0 %v1616_v37  ;;  %1555 = vmatprep.subr.bf16.mxu1 %v1616_v37 }
  0xe7   : > { %v2322_v30 = vsub.f32 %v2003_v46, %v418_v27  ;;  %v2325_v31 = vsub.f32 %v2006_v47, %v418_v27  ;;  %v636_v38 = vadd.f32 %v551_v36, %v550_v15  ;;  %1448 = vmatpush3.bf16.msra.mxu0 %v1617_v39  ;;  %1563 = vmatpush3.bf16.msra.mxu1 %v1617_v39 }
  0xe8   : > { %v2331_v52 = vsub.f32 %v2011_v49, %v419_v8  ;;  %v2334_v32 = vsub.f32 %v2014_v50, %v419_v8  ;;  %v387_v20 = vpop.xlane.xlu0 %386  ;;  %v639_v47 = vadd.f32 %v553_v44, %v552_v43  ;;  %v1619_v44 = vld [vmem:[%s2896_s3 + $0x28] sm:$0xff]  }
  0xe9   : > { %v434_v33 = vmul.f32 0.00390625, %v387_v20  ;;  %592 = vadd.xlane.f32.xlu1 %v591_v41  ;;  %637 = vadd.xlane.f32.xlu0 %v636_v38  ;;  %v390_v46 = vpop.xlane.xlu1 %389  ;;  %v522_v27 = vmul.f32 %v2322_v30, %v2322_v30  ;;  %v523_v40 = vmul.f32 %v2325_v31, %v2325_v31  ;;  %v1618_v41 = vld [vmem:[%s2896_s3 + $0x68] sm:$0xff]  }
  0xea   : > { %v435_v15 = vmul.f32 0.00390625, %v390_v46  ;;  %v524_v49 = vmul.f32 %v2331_v52, %v2331_v52  ;;  %v525_v50 = vmul.f32 %v2334_v32, %v2334_v32  ;;  %1449 = vmatprep.subr.bf16.mxu0 %v1618_v41  ;;  %1556 = vmatprep.subr.bf16.mxu1 %v1618_v41 }
  0xeb   : > { %v2348_v36 = vsub.f32 %v2023_v54, %v434_v33  ;;  %v2351_v8 = vsub.f32 %v2026_v55, %v434_v33  ;;  %v594_v43 = vadd.f32 %v523_v40, %v522_v27  ;;  %1450 = vmatpush3.bf16.msra.mxu0 %v1619_v44  ;;  %1564 = vmatpush3.bf16.msra.mxu1 %v1619_v44 }
  0xec   : > { %v2357_v37 = vsub.f32 %v2029_v56, %v435_v15  ;;  %v2360_v38 = vsub.f32 %v2032_v57, %v435_v15  ;;  %v345_v20 = vpop.xlane.xlu0 %344  ;;  %v597_v55 = vadd.f32 %v525_v50, %v524_v49  ;;  %v1621_v50 = vld [vmem:[%s2896_s3 + $0x30] sm:$0xff]  }
  0xed   : > { %v420_v39 = vmul.f32 0.00390625, %v345_v20  ;;  %640 = vadd.xlane.f32.xlu1 %v639_v47  ;;  %595 = vadd.xlane.f32.xlu0 %v594_v43  ;;  %v348_v54 = vpop.xlane.xlu1 %347  ;;  %v554_v33 = vmul.f32 %v2348_v36, %v2348_v36  ;;  %v555_v46 = vmul.f32 %v2351_v8, %v2351_v8  ;;  %v1620_v47 = vld [vmem:[%s2896_s3 + $0x70] sm:$0xff]  }
  0xee   : > { %v421_v27 = vmul.f32 0.00390625, %v348_v54  ;;  %v556_v56 = vmul.f32 %v2357_v37, %v2357_v37  ;;  %v557_v57 = vmul.f32 %v2360_v38, %v2360_v38  ;;  %1451 = vmatprep.subr.bf16.mxu0 %v1620_v47  ;;  %1557 = vmatprep.subr.bf16.mxu1 %v1620_v47 }
  0xef   : > { %v2374_v40 = vsub.f32 %v2039_v60, %v420_v39  ;;  %v2377_v15 = vsub.f32 %v2042_v61, %v420_v39  ;;  %v642_v49 = vadd.f32 %v555_v46, %v554_v33  ;;  %1452 = vmatpush3.bf16.msra.mxu0 %v1621_v50  ;;  %1565 = vmatpush3.bf16.msra.mxu1 %v1621_v50 }
  0xf0   : > { %v2383_v41 = vsub.f32 %v2045_v62, %v421_v27  ;;  %v2386_v43 = vsub.f32 %v2048_v63, %v421_v27  ;;  %v393_v20 = vpop.xlane.xlu0 %392  ;;  %v645_v61 = vadd.f32 %v557_v57, %v556_v56  ;;  %v1623_v57 = vld [vmem:[%s2896_s3 + $0x38] sm:$0xff]  }
  0xf1   : > { %2958 = vst [vmem:[#allocation22_spill] sm:$0xff] %v2374_v40  ;;  %v436_v44 = vmul.f32 0.00390625, %v393_v20  ;;  %598 = vadd.xlane.f32.xlu1 %v597_v55  ;;  %643 = vadd.xlane.f32.xlu0 %v642_v49  ;;  %v396_v60 = vpop.xlane.xlu1 %395  ;;  %v526_v39 = vmul.f32 %v2374_v40, %v2374_v40  ;;  %v527_v54 = vmul.f32 %v2377_v15, %v2377_v15  ;;  %v1622_v55 = vld [vmem:[%s2896_s3 + $0x78] sm:$0xff]  }
  0xf2   : > { %2959 = vst [vmem:[#allocation23_spill] sm:$0xff] %v2383_v41  ;;  %v437_v33 = vmul.f32 0.00390625, %v396_v60  ;;  %v528_v62 = vmul.f32 %v2383_v41, %v2383_v41  ;;  %v529_v63 = vmul.f32 %v2386_v43, %v2386_v43  ;;  %1453 = vmatprep.subr.bf16.mxu0 %v1622_v55  ;;  %1558 = vmatprep.subr.bf16.mxu1 %v1622_v55 }
  0xf3   : > { %v2400_v46 = vsub.f32 %v2055_v10, %v436_v44  ;;  %v2403_v27 = vsub.f32 %v2058_v11, %v436_v44  ;;  %v600_v56 = vadd.f32 %v527_v54, %v526_v39  ;;  %1454 = vmatpush3.bf16.msra.mxu0 %v1623_v57  ;;  %1566 = vmatpush3.bf16.msra.mxu1 %v1623_v57 }
  0xf4   : > { %v2409_v47 = vsub.f32 %v2061_v16, %v437_v33  ;;  %v2412_v49 = vsub.f32 %v2064_v17, %v437_v33  ;;  %v351_v20 = vpop.xlane.xlu0 %350  ;;  %v603_v11 = vadd.f32 %v529_v63, %v528_v62  ;;  %v2967_v63 = vld [vmem:[#allocation5_spill] sm:$0xff] }
  0xf5   : > { %2960 = vst [vmem:[#allocation24_spill] sm:$0xff] %v2400_v46  ;;  %2961 = vst [vmem:[#allocation25_spill] sm:$0xff] %v2403_v27  ;;  %v422_v50 = vmul.f32 0.00390625, %v351_v20  ;;  %646 = vadd.xlane.f32.xlu1 %v645_v61  ;;  %601 = vadd.xlane.f32.xlu0 %v600_v56  ;;  %v354_v10 = vpop.xlane.xlu1 %353  ;;  %v558_v44 = vmul.f32 %v2400_v46, %v2400_v46  ;;  %v559_v60 = vmul.f32 %v2403_v27, %v2403_v27 }
  0xf6   : > { %2962 = vst [vmem:[#allocation26_spill] sm:$0xff] %v2409_v47  ;;  %2963 = vst [vmem:[#allocation27_spill] sm:$0xff] %v2412_v49  ;;  %v423_v39 = vmul.f32 0.00390625, %v354_v10  ;;  %v560_v16 = vmul.f32 %v2409_v47, %v2409_v47  ;;  %v561_v17 = vmul.f32 %v2412_v49, %v2412_v49 }
  0xf7   : > { %v2423_v61 = vsub.f32 %v2071_v28, %v422_v50  ;;  %v2426_v54 = vsub.f32 %v2074_v29, %v422_v50  ;;  %v648_v33 = vadd.f32 %v559_v60, %v558_v44  ;;  %v2969_v44 = vld [vmem:[#allocation6_spill] sm:$0xff] }
  0xf8   : > { %v2429_v62 = vsub.f32 %v2077_v34, %v423_v39  ;;  %v2432_v55 = vsub.f32 %v2967_v63, %v423_v39  ;;  %v399_v56 = vpop.xlane.xlu0 %398  ;;  %v651_v47 = vadd.f32 %v561_v17, %v560_v16  ;;  %v2973_v17 = vld [vmem:[#allocation8_spill] sm:$0xff]  ;;  %v2975_v63 = vld [vmem:[#allocation9_spill] sm:$0xff] }
  0xf9   : > { %2964 = vst [vmem:[#allocation28_spill] sm:$0xff] %v2423_v61  ;;  %2965 = vst [vmem:[#allocation29_spill] sm:$0xff] %v2426_v54  ;;  %v438_v20 = vmul.f32 0.00390625, %v399_v56  ;;  %604 = vadd.xlane.f32.xlu1 %v603_v11  ;;  %649 = vadd.xlane.f32.xlu0 %v648_v33  ;;  %v402_v10 = vpop.xlane.xlu1 %401  ;;  %v530_v28 = vmul.f32 %v2423_v61, %v2423_v61  ;;  %v531_v29 = vmul.f32 %v2426_v54, %v2426_v54  ;;  %v2971_v11 = vld [vmem:[#allocation7_spill] sm:$0xff] }
  0xfa   : > { %2966 = vst [vmem:[#allocation30_spill] sm:$0xff] %v2429_v62  ;;  %2968 = vst [vmem:[#allocation5_spill] sm:$0xff] %v2432_v55  ;;  %v439_v57 = vmul.f32 0.00390625, %v402_v10  ;;  %v532_v34 = vmul.f32 %v2429_v62, %v2429_v62  ;;  %v533_v50 = vmul.f32 %v2432_v55, %v2432_v55 }
  0xfb   : > { %v2443_v60 = vsub.f32 %v2969_v44, %v438_v20  ;;  %v2446_v39 = vsub.f32 %v2971_v11, %v438_v20  ;;  %v606_v16 = vadd.f32 %v531_v29, %v530_v28 }
  0xfc   : > { %v2449_v33 = vsub.f32 %v2973_v17, %v439_v57  ;;  %v2452_v56 = vsub.f32 %v2975_v63, %v439_v57  ;;  %v357_v10 = vpop.xlane.xlu0 %356  ;;  %v609_v54 = vadd.f32 %v533_v50, %v532_v34  ;;  %v2980_v50 = vld [vmem:[#allocation11_spill] sm:$0xff]  ;;  %v2982_v63 = vld [vmem:[#allocation12_spill] sm:$0xff] }
  0xfd   : > { %2970 = vst [vmem:[#allocation6_spill] sm:$0xff] %v2443_v60  ;;  %2972 = vst [vmem:[#allocation7_spill] sm:$0xff] %v2446_v39  ;;  %v424_v61 = vmul.f32 0.00390625, %v357_v10  ;;  %652 = vadd.xlane.f32.xlu1 %v651_v47  ;;  %607 = vadd.xlane.f32.xlu0 %v606_v16  ;;  %v360_v62 = vpop.xlane.xlu1 %359  ;;  %v562_v44 = vmul.f32 %v2443_v60, %v2443_v60  ;;  %v563_v20 = vmul.f32 %v2446_v39, %v2446_v39  ;;  %v2978_v47 = vld [vmem:[#allocation10_spill] sm:$0xff] }
  0xfe   : > { %2974 = vst [vmem:[#allocation8_spill] sm:$0xff] %v2449_v33  ;;  %2976 = vst [vmem:[#allocation9_spill] sm:$0xff] %v2452_v56  ;;  %v425_v11 = vmul.f32 0.00390625, %v360_v62  ;;  %v564_v28 = vmul.f32 %v2449_v33, %v2449_v33  ;;  %v565_v29 = vmul.f32 %v2452_v56, %v2452_v56 }
  0xff   : > { %v2463_v57 = vsub.f32 %v2103_v3, %v424_v61  ;;  %v2466_v16 = vsub.f32 %v2978_v47, %v424_v61  ;;  %v654_v34 = vadd.f32 %v563_v20, %v562_v44 }
 0x100   : > { %v2469_v17 = vsub.f32 %v2980_v50, %v425_v11  ;;  %v2472_v10 = vsub.f32 %v2982_v63, %v425_v11  ;;  %v405_v62 = vpop.xlane.xlu0 %404  ;;  %v657_v39 = vadd.f32 %v565_v29, %v564_v28  ;;  %v2984_v11 = vld [vmem:[#allocation13_spill] sm:$0xff]  ;;  %v2988_v29 = vld [vmem:[#allocation15_spill] sm:$0xff] }
 0x101   : > { %2977 = vst [vmem:[#allocation31_spill] sm:$0xff] %v2463_v57  ;;  %2979 = vst [vmem:[#allocation10_spill] sm:$0xff] %v2466_v16  ;;  %v440_v60 = vmul.f32 0.00390625, %v405_v62  ;;  %610 = vadd.xlane.f32.xlu1 %v609_v54  ;;  %655 = vadd.xlane.f32.xlu0 %v654_v34  ;;  %v408_v33 = vpop.xlane.xlu1 %407  ;;  %v534_v3 = vmul.f32 %v2463_v57, %v2463_v57  ;;  %v535_v61 = vmul.f32 %v2466_v16, %v2466_v16  ;;  %v2986_v54 = vld [vmem:[#allocation14_spill] sm:$0xff]  ;;  %v2990_v62 = vld [vmem:[#allocation16_spill] sm:$0xff] }
 0x102   : > { %2981 = vst [vmem:[#allocation11_spill] sm:$0xff] %v2469_v17  ;;  %2983 = vst [vmem:[#allocation12_spill] sm:$0xff] %v2472_v10  ;;  %v441_v47 = vmul.f32 0.00390625, %v408_v33  ;;  %v536_v44 = vmul.f32 %v2469_v17, %v2469_v17  ;;  %v537_v20 = vmul.f32 %v2472_v10, %v2472_v10 }
 0x103   : > { %v2483_v50 = vsub.f32 %v2984_v11, %v440_v60  ;;  %v2486_v34 = vsub.f32 %v2986_v54, %v440_v60  ;;  %v612_v28 = vadd.f32 %v535_v61, %v534_v3 }
 0x104   : > { %v2489_v63 = vsub.f32 %v2988_v29, %v441_v47  ;;  %v2492_v57 = vsub.f32 %v2990_v62, %v441_v47  ;;  %v615_v33 = vadd.f32 %v537_v20, %v536_v44  ;;  %v828_v44 = vlaneseq }
 0x105   : > { %2985 = vst [vmem:[#allocation13_spill] sm:$0xff] %v2483_v50  ;;  %2987 = vst [vmem:[#allocation14_spill] sm:$0xff] %v2486_v34  ;;  %658 = vadd.xlane.f32.xlu1 %v657_v39  ;;  %613 = vadd.xlane.f32.xlu0 %v612_v28  ;;  %v566_v17 = vmul.f32 %v2483_v50, %v2483_v50  ;;  %v567_v11 = vmul.f32 %v2486_v34, %v2486_v34 }
 0x106   : > { %2989 = vst [vmem:[#allocation15_spill] sm:$0xff] %v2489_v63  ;;  %2991 = vst [vmem:[#allocation16_spill] sm:$0xff] %v2492_v57  ;;  %v568_v60 = vmul.f32 %v2489_v63, %v2489_v63  ;;  %v569_v3 = vmul.f32 %v2492_v57, %v2492_v57  ;;  %v829_v34 = vshrl.u32 %v828_v44, 7 }
 0x107   : > { %v660_v61 = vadd.f32 %v567_v11, %v566_v17 }
 0x108   : > { %v663_v47 = vadd.f32 %v569_v3, %v568_v60  ;;  %v830_v11 = vsub.s32 0, %v829_v34  ;;  %v834_v60 = vsub.s32 1, %v829_v34 }
 0x109   : > { %616 = vadd.xlane.f32.xlu1 %v615_v33  ;;  %661 = vadd.xlane.f32.xlu0 %v660_v61 }
 0x10d   : > { %664 = vadd.xlane.f32.xlu1 %v663_v47  ;;  %v826_v47 = vld [vmem:[%s2894_s1] sm:$0x3] }
 0x15a   : > { %v572_v39 = vpop.xlane.xlu0 %571 }
 0x15b   : > { %v666_v54 = vmul.f32 0.00390625, %v572_v39 }
 0x15d   : > { %v698_v20 = vadd.f32 1e-05, %v666_v54 }
 0x15e   : > { %v575_v28 = vpop.xlane.xlu1 %574  ;;  %v620_v29 = vpop.xlane.xlu0 %619 }
 0x15f   : > { %1624 = vrsqrt.f32 %v698_v20  ;;  %v667_v62 = vmul.f32 0.00390625, %v575_v28  ;;  %v682_v50 = vmul.f32 0.00390625, %v620_v29 }
 0x161   : > { %v699_v10 = vadd.f32 1e-05, %v667_v62  ;;  %v714_v63 = vadd.f32 1e-05, %v682_v50  ;;  %v2992_v62 = vld [vmem:[#allocation18_spill] sm:$0xff] }
 0x162   : > { %v623_v16 = vpop.xlane.xlu1 %622  ;;  %v578_v56 = vpop.xlane.xlu0 %577 }
 0x163   : > { %1626 = vrsqrt.f32 %v699_v10  ;;  %v683_v17 = vmul.f32 0.00390625, %v623_v16  ;;  %v668_v33 = vmul.f32 0.00390625, %v578_v56  ;;  %v902_v10 = vld [vmem:[%s2895_s2] sm:$0x3]  ;;  %v2508_v16 = vrot.slane %v826_v47, %v830_v11 }
 0x164   : > { %1628 = vrsqrt.f32 %v714_v63  ;;  %v2510_v56 = vrot.slane %v826_v47, %v834_v60  ;;  %v2517_v46 = vrot.slane %v902_v10, %v830_v11  ;;  %v2994_v11 = vld [vmem:[#allocation20_spill] sm:$0xff] }
 0x165   : > { %v715_v3 = vadd.f32 1e-05, %v683_v17  ;;  %v700_v61 = vadd.f32 1e-05, %v668_v33  ;;  %v2513_v33 = vrot.slane %v902_v10, %v834_v60 }
 0x166   : > { %v581_v39 = vpop.xlane.xlu1 %580  ;;  %v626_v54 = vpop.xlane.xlu0 %625 }
 0x167   : > { %1630 = vrsqrt.f32 %v715_v3  ;;  %v669_v44 = vmul.f32 0.00390625, %v581_v39  ;;  %v684_v20 = vmul.f32 0.00390625, %v626_v54  ;;  %v2993_v3 = vld [vmem:[#allocation17_spill] sm:$0xff] }
 0x168   : > { %1632 = vrsqrt.f32 %v700_v61 }
 0x169   : > { %v1625_v50 = vpop.eup %1624  ;;  %v701_v34 = vadd.f32 1e-05, %v669_v44  ;;  %v716_v63 = vadd.f32 1e-05, %v684_v20 }
 0x16a   : > { %v629_v28 = vpop.xlane.xlu1 %628  ;;  %v584_v29 = vpop.xlane.xlu0 %583  ;;  %v763_v17 = vmul.f32 %v1625_v50, %v2992_v62  ;;  %v762_v39 = vmul.f32 %v1625_v50, %v2993_v3 }
 0x16b   : > { %1634 = vrsqrt.f32 %v701_v34  ;;  %v685_v54 = vmul.f32 0.00390625, %v629_v28  ;;  %v670_v57 = vmul.f32 0.00390625, %v584_v29 }
 0x16c   : > { %v839_v55 = vmul.f32 %v2510_v56, %v763_v17  ;;  %v838_v47 = vmul.f32 %v2508_v16, %v762_v39  ;;  %1636 = vrsqrt.f32 %v716_v63 }
 0x16d   : > { %v1627_v61 = vpop.eup %1626  ;;  %v717_v44 = vadd.f32 1e-05, %v685_v54  ;;  %v702_v20 = vadd.f32 1e-05, %v670_v57 }
 0x16e   : > { %v1629_v49 = vpop.eup %1628  ;;  %v587_v27 = vpop.xlane.xlu1 %586  ;;  %v765_v60 = vmul.f32 %v1627_v61, %v2164_v4  ;;  %v915_v50 = vadd.f32 %v2513_v33, %v839_v55  ;;  %v764_v34 = vmul.f32 %v1627_v61, %v2161_v51  ;;  %v914_v57 = vadd.f32 %v2517_v46, %v838_v47  ;;  %v2995_v55 = vld [vmem:[#allocation19_spill] sm:$0xff] }
 0x16f   : > { %v632_v62 = vpop.xlane.xlu0 %631  ;;  %1638 = vrsqrt.f32 %v717_v44  ;;  %v671_v28 = vmul.f32 0.00390625, %v587_v27  ;;  %v795_v10 = vmul.f32 %v1629_v49, %v2994_v11  ;;  %v794_v41 = vmul.f32 %v1629_v49, %v2995_v55 }
 0x170   : > { %v686_v29 = vmul.f32 0.00390625, %v632_v62  ;;  %1640 = vrsqrt.f32 %v702_v20  ;;  %v841_v17 = vmul.f32 %v2510_v56, %v765_v60  ;;  %v840_v63 = vmul.f32 %v2508_v16, %v764_v34 }
 0x171   : > { %v1631_v3 = vpop.eup %1630  ;;  %v703_v39 = vadd.f32 1e-05, %v671_v28  ;;  %v871_v4 = vmul.f32 %v2510_v56, %v795_v10 }
 0x172   : > { %v718_v54 = vadd.f32 1e-05, %v686_v29  ;;  %v635_v51 = vpop.xlane.xlu1 %634  ;;  %v917_v27 = vadd.f32 %v2513_v33, %v841_v17  ;;  %v916_v44 = vadd.f32 %v2517_v46, %v840_v63  ;;  %v797_v20 = vmul.f32 %v1631_v3, %v2170_v42  ;;  %v1633_v60 = vpop.eup %1632 }
 0x173   : > { %v590_v61 = vpop.xlane.xlu0 %589  ;;  %v796_v62 = vmul.f32 %v1631_v3, %v2167_v45  ;;  %1642 = vrsqrt.f32 %v703_v39  ;;  %v687_v47 = vmul.f32 0.00390625, %v635_v51  ;;  %v947_v28 = vadd.f32 %v2513_v33, %v871_v4 }
 0x174   : > { %v672_v34 = vmul.f32 0.00390625, %v590_v61  ;;  %1644 = vrsqrt.f32 %v718_v54  ;;  %v979_v29 = vpack.c.bf16 %v917_v27, %v915_v50  ;;  %v978_v11 = vpack.c.bf16 %v916_v44, %v914_v57 }
 0x175   : > { %v873_v49 = vmul.f32 %v2510_v56, %v797_v20  ;;  %v1635_v10 = vpop.eup %1634  ;;  %v719_v55 = vadd.f32 1e-05, %v687_v47  ;;  %v870_v63 = vmul.f32 %v2508_v16, %v794_v41  ;;  %v872_v42 = vmul.f32 %v2508_v16, %v796_v62 }
 0x176   : > { %v704_v17 = vadd.f32 1e-05, %v672_v34  ;;  %v593_v40 = vpop.xlane.xlu1 %592  ;;  %1177 = vmatprep.mubr.bf16.mxu0 %v979_v29  ;;  %v767_v39 = vmul.f32 %v1633_v60, %v2184_v23  ;;  %v769_v54 = vmul.f32 %v1635_v10, %v2190_v1  ;;  %v766_v50 = vmul.f32 %v1633_v60, %v2181_v9  ;;  %v1637_v57 = vpop.eup %1636 }
 0x177   : > { %v638_v45 = vpop.xlane.xlu0 %637  ;;  %v949_v3 = vadd.f32 %v2513_v33, %v873_v49  ;;  %1646 = vrsqrt.f32 %v719_v55  ;;  %v673_v4 = vmul.f32 0.00390625, %v593_v40  ;;  %1178 = vmatmul.mubr.bf16.vlgmr.msra.gmra.mrb[0].mxu0 %v978_v11  ;;  %v946_v41 = vadd.f32 %v2517_v46, %v870_v63 }
 0x178   : > { %v688_v51 = vmul.f32 0.00390625, %v638_v45  ;;  %1648 = vrsqrt.f32 %v704_v17  ;;  %v948_v27 = vadd.f32 %v2517_v46, %v872_v42  ;;  %v843_v44 = vmul.f32 %v2510_v56, %v767_v39 }
 0x179   : > { %v995_v61 = vpack.c.bf16 %v949_v3, %v947_v28  ;;  %v1639_v20 = vpop.eup %1638  ;;  %v705_v62 = vadd.f32 1e-05, %v673_v4  ;;  %v845_v1 = vmul.f32 %v2510_v56, %v769_v54  ;;  %v768_v9 = vmul.f32 %v1635_v10, %v2187_v0 }
 0x17a   : > { %v720_v23 = vadd.f32 1e-05, %v688_v51  ;;  %v1641_v60 = vpop.eup %1640  ;;  %v641_v47 = vpop.xlane.xlu1 %640  ;;  %v994_v34 = vpack.c.bf16 %v948_v27, %v946_v41  ;;  %v919_v29 = vadd.f32 %v2513_v33, %v843_v44  ;;  %v842_v28 = vmul.f32 %v2508_v16, %v766_v50 }
 0x17b   : > { %1241 = vmatprep.mubr.bf16.mxu1 %v995_v61  ;;  %v596_v40 = vpop.xlane.xlu0 %595  ;;  %v799_v11 = vmul.f32 %v1637_v57, %v2204_v48  ;;  %1650 = vrsqrt.f32 %v705_v62  ;;  %v689_v49 = vmul.f32 0.00390625, %v641_v47  ;;  %v921_v17 = vadd.f32 %v2513_v33, %v845_v1 }
 0x17c   : > { %v674_v55 = vmul.f32 0.00390625, %v596_v40  ;;  %1652 = vrsqrt.f32 %v720_v23  ;;  %1242 = vmatmul.mubr.bf16.vlgmr.msra.gmra.mrb[0].mxu1 %v994_v34  ;;  %v844_v0 = vmul.f32 %v2508_v16, %v768_v9  ;;  %v918_v10 = vadd.f32 %v2517_v46, %v842_v28 }
 0x17d   : > { %v801_v63 = vmul.f32 %v1639_v20, %v2210_v59  ;;  %v1643_v42 = vpop.eup %1642  ;;  %v721_v45 = vadd.f32 1e-05, %v689_v49  ;;  %v981_v39 = vpack.c.bf16 %v921_v17, %v919_v29  ;;  %v875_v54 = vmul.f32 %v2510_v56, %v799_v11 }
 0x17e   : > { %v706_v3 = vadd.f32 1e-05, %v674_v55  ;;  %v2554_v48 = vpop.eup %1644  ;;  %v599_v50 = vpop.xlane.xlu1 %598  ;;  %v920_v51 = vadd.f32 %v2517_v46, %v844_v0  ;;  %v798_v61 = vmul.f32 %v1637_v57, %v2201_v53  ;;  %v800_v27 = vmul.f32 %v1639_v20, %v2207_v6 }
 0x17f   : > { %v644_v4 = vpop.xlane.xlu0 %643  ;;  %v877_v41 = vmul.f32 %v2510_v56, %v801_v63  ;;  %1654 = vrsqrt.f32 %v721_v45  ;;  %v675_v59 = vmul.f32 0.00390625, %v599_v50  ;;  %1185 = vmatprep.mubr.bf16.mxu0 %v981_v39  ;;  %v951_v62 = vadd.f32 %v2513_v33, %v875_v54  ;;  %v2996_v45 = vld [vmem:[#allocation21_spill] sm:$0xff] }
 0x180   : > { %v690_v44 = vmul.f32 0.00390625, %v644_v4  ;;  %1656 = vrsqrt.f32 %v706_v3  ;;  %v980_v23 = vpack.c.bf16 %v920_v51, %v918_v10  ;;  %v874_v9 = vmul.f32 %v2508_v16, %v798_v61 }
 0x181   : > { %v953_v1 = vadd.f32 %v2513_v33, %v877_v41  ;;  %v1647_v47 = vpop.eup %1646  ;;  %v707_v40 = vadd.f32 1e-05, %v675_v59  ;;  %v876_v29 = vmul.f32 %v2508_v16, %v800_v27  ;;  %v771_v53 = vmul.f32 %v1641_v60, %v2224_v7 }
 0x182   : > { %v722_v34 = vadd.f32 1e-05, %v690_v44  ;;  %v2565_v6 = vpop.eup %1648  ;;  %1186 = vmatmul.mubr.bf16.gmra.mrb[4].mxu0 %v980_v23  ;;  %v647_v57 = vpop.xlane.xlu1 %646  ;;  %v950_v11 = vadd.f32 %v2517_v46, %v874_v9  ;;  %v773_v49 = vmul.f32 %v1643_v42, %v2230_v14  ;;  %v770_v55 = vmul.f32 %v1641_v60, %v2221_v12 }
 0x183   : > { %v997_v20 = vpack.c.bf16 %v953_v1, %v951_v62  ;;  %v602_v28 = vpop.xlane.xlu0 %601  ;;  %1658 = vrsqrt.f32 %v707_v40  ;;  %v691_v17 = vmul.f32 0.00390625, %v647_v57  ;;  %v952_v10 = vadd.f32 %v2517_v46, %v876_v29 }
 0x184   : > { %v676_v0 = vmul.f32 0.00390625, %v602_v28  ;;  %1660 = vrsqrt.f32 %v722_v34  ;;  %v847_v7 = vmul.f32 %v2510_v56, %v771_v53  ;;  %v849_v63 = vmul.f32 %v2510_v56, %v773_v49 }
 0x185   : > { %1249 = vmatprep.mubr.bf16.mxu1 %v997_v20  ;;  %v772_v3 = vmul.f32 %v1643_v42, %v2996_v45  ;;  %v2574_v39 = vpop.eup %1650  ;;  %v723_v54 = vadd.f32 1e-05, %v691_v17  ;;  %v996_v14 = vpack.c.bf16 %v952_v10, %v950_v11  ;;  %v846_v12 = vmul.f32 %v2508_v16, %v770_v55 }
 0x186   : > { %v708_v50 = vadd.f32 1e-05, %v676_v0  ;;  %v2577_v60 = vpop.eup %1652  ;;  %v605_v4 = vpop.xlane.xlu1 %604  ;;  %v923_v51 = vadd.f32 %v2513_v33, %v847_v7  ;;  %v925_v41 = vadd.f32 %v2513_v33, %v849_v63  ;;  %v803_v42 = vmul.f32 %v2554_v48, %v2250_v2 }
 0x187   : > { %v650_v61 = vpop.xlane.xlu0 %649  ;;  %v848_v27 = vmul.f32 %v2508_v16, %v772_v3  ;;  %1662 = vrsqrt.f32 %v723_v54  ;;  %1250 = vmatmul.mubr.bf16.gmra.mrb[4].mxu1 %v996_v14  ;;  %v677_v59 = vmul.f32 0.00390625, %v605_v4  ;;  %v922_v62 = vadd.f32 %v2517_v46, %v846_v12 }
 0x188   : > { %v692_v44 = vmul.f32 0.00390625, %v650_v61  ;;  %1664 = vrsqrt.f32 %v708_v50  ;;  %v983_v23 = vpack.c.bf16 %v925_v41, %v923_v51  ;;  %v805_v9 = vmul.f32 %v1647_v47, %v2256_v13 }
 0x189   : > { %v924_v1 = vadd.f32 %v2517_v46, %v848_v27  ;;  %v2587_v40 = vpop.eup %1654  ;;  %v709_v34 = vadd.f32 1e-05, %v677_v59  ;;  %v879_v53 = vmul.f32 %v2510_v56, %v803_v42  ;;  %v802_v2 = vmul.f32 %v2554_v48, %v2247_v19 }
 0x18a   : > { %v724_v29 = vadd.f32 1e-05, %v692_v44  ;;  %v2592_v57 = vpop.eup %1656  ;;  %1193 = vmatprep.mubr.bf16.mxu0 %v983_v23  ;;  %v653_v28 = vpop.xlane.xlu1 %652  ;;  %v881_v11 = vmul.f32 %v2510_v56, %v805_v9  ;;  %v804_v55 = vmul.f32 %v1647_v47, %v2253_v21  ;;  %v775_v13 = vmul.f32 %v2565_v6, %v2273_v26 }
 0x18b   : > { %v982_v20 = vpack.c.bf16 %v924_v1, %v922_v62  ;;  %v608_v49 = vpop.xlane.xlu0 %607  ;;  %1666 = vrsqrt.f32 %v709_v34  ;;  %v693_v17 = vmul.f32 0.00390625, %v653_v28  ;;  %v955_v0 = vadd.f32 %v2513_v33, %v879_v53 }
 0x18c   : > { %v678_v10 = vmul.f32 0.00390625, %v608_v49  ;;  %1668 = vrsqrt.f32 %v724_v29  ;;  %v957_v19 = vadd.f32 %v2513_v33, %v881_v11  ;;  %v878_v48 = vmul.f32 %v2508_v16, %v802_v2 }
 0x18d   : > { %1194 = vmatmul.mubr.bf16.gmra.mrb[8].mxu0 %v982_v20  ;;  %v880_v7 = vmul.f32 %v2508_v16, %v804_v55  ;;  %v2602_v63 = vpop.eup %1658  ;;  %v725_v45 = vadd.f32 1e-05, %v693_v17  ;;  %v777_v26 = vmul.f32 %v2574_v39, %v2282_v18  ;;  %v851_v47 = vmul.f32 %v2510_v56, %v775_v13 }
 0x18e   : > { %v710_v21 = vadd.f32 1e-05, %v678_v10  ;;  %v2607_v3 = vpop.eup %1660  ;;  %v999_v54 = vpack.c.bf16 %v957_v19, %v955_v0  ;;  %v954_v50 = vadd.f32 %v2517_v46, %v878_v48  ;;  %v611_v12 = vpop.xlane.xlu1 %610  ;;  %v774_v51 = vmul.f32 %v2565_v6, %v2270_v25 }
 0x18f   : > { %v956_v14 = vadd.f32 %v2517_v46, %v880_v7  ;;  %v656_v4 = vpop.xlane.xlu0 %655  ;;  %1670 = vrsqrt.f32 %v725_v45  ;;  %v679_v41 = vmul.f32 0.00390625, %v611_v12  ;;  %v853_v61 = vmul.f32 %v2510_v56, %v777_v26 }
 0x190   : > { %v927_v18 = vadd.f32 %v2513_v33, %v851_v47  ;;  %1257 = vmatprep.mubr.bf16.mxu1 %v999_v54  ;;  %1672 = vrsqrt.f32 %v710_v21  ;;  %v694_v42 = vmul.f32 0.00390625, %v656_v4  ;;  %v776_v59 = vmul.f32 %v2574_v39, %v2279_v22 }
 0x191   : > { %v998_v27 = vpack.c.bf16 %v956_v14, %v954_v50  ;;  %v2617_v44 = vpop.eup %1662  ;;  %v711_v62 = vadd.f32 1e-05, %v679_v41  ;;  %v929_v23 = vadd.f32 %v2513_v33, %v853_v61  ;;  %v850_v25 = vmul.f32 %v2508_v16, %v774_v51 }
 0x192   : > { %v807_v6 = vmul.f32 %v2577_v60, %v2299_v24  ;;  %v2623_v1 = vpop.eup %1664  ;;  %v726_v9 = vadd.f32 1e-05, %v694_v42  ;;  %v852_v34 = vmul.f32 %v2508_v16, %v776_v59  ;;  %v659_v29 = vpop.xlane.xlu1 %658  ;;  %v809_v22 = vmul.f32 %v2587_v40, %v2308_v35 }
 0x193   : > { %1258 = vmatmul.mubr.bf16.gmra.mrb[8].mxu1 %v998_v27  ;;  %v614_v39 = vpop.xlane.xlu0 %613  ;;  %v806_v53 = vmul.f32 %v2577_v60, %v2296_v5  ;;  %1674 = vrsqrt.f32 %v711_v62  ;;  %v985_v2 = vpack.c.bf16 %v929_v23, %v927_v18  ;;  %v926_v20 = vadd.f32 %v2517_v46, %v850_v25 }
 0x194   : > { %v695_v28 = vmul.f32 0.00390625, %v659_v29  ;;  %1676 = vrsqrt.f32 %v726_v9  ;;  %v928_v24 = vadd.f32 %v2517_v46, %v852_v34  ;;  %v883_v11 = vmul.f32 %v2510_v56, %v807_v6 }
 0x195   : > { %v885_v49 = vmul.f32 %v2510_v56, %v809_v22  ;;  %v2634_v55 = vpop.eup %1666  ;;  %1201 = vmatprep.mubr.bf16.mxu0 %v985_v2  ;;  %v680_v13 = vmul.f32 0.00390625, %v614_v39  ;;  %v808_v5 = vmul.f32 %v2587_v40, %v2305_v58  ;;  %v882_v60 = vmul.f32 %v2508_v16, %v806_v53 }
 0x196   : > { %v727_v35 = vadd.f32 1e-05, %v695_v28  ;;  %v2639_v17 = vpop.eup %1668  ;;  %v984_v0 = vpack.c.bf16 %v928_v24, %v926_v20  ;;  %v959_v10 = vadd.f32 %v2513_v33, %v883_v11  ;;  %v617_v48 = vpop.xlane.xlu1 %616  ;;  %v779_v7 = vmul.f32 %v2592_v57, %v2325_v31 }
 0x197   : > { %v961_v19 = vadd.f32 %v2513_v33, %v885_v49  ;;  %v662_v45 = vpop.xlane.xlu0 %661  ;;  %v712_v21 = vadd.f32 1e-05, %v680_v13  ;;  %v884_v26 = vmul.f32 %v2508_v16, %v808_v5  ;;  %v958_v58 = vadd.f32 %v2517_v46, %v882_v60  ;;  %v2998_v5 = vld [vmem:[#allocation23_spill] sm:$0xff] }
 0x198   : > { %1678 = vrsqrt.f32 %v727_v35  ;;  %1202 = vmatmul.mubr.bf16.gmra.mrb[12].mxu0 %v984_v0  ;;  %v681_v47 = vmul.f32 0.00390625, %v617_v48  ;;  %v781_v54 = vmul.f32 %v2602_v63, %v2334_v32  ;;  %v855_v50 = vmul.f32 %v2510_v56, %v779_v7  ;;  %v2999_v0 = vld [vmem:[#allocation25_spill] sm:$0xff] }
 0x199   : > { %v1001_v40 = vpack.c.bf16 %v961_v19, %v959_v10  ;;  %v2650_v14 = vpop.eup %1670  ;;  %1680 = vrsqrt.f32 %v712_v21  ;;  %v960_v31 = vadd.f32 %v2517_v46, %v884_v26  ;;  %v696_v12 = vmul.f32 0.00390625, %v662_v45  ;;  %v3000_v26 = vld [vmem:[#allocation27_spill] sm:$0xff] }
 0x19a   : > { %v778_v4 = vmul.f32 %v2592_v57, %v2322_v30  ;;  %v2655_v51 = vpop.eup %1672  ;;  %v713_v41 = vadd.f32 1e-05, %v681_v47  ;;  %v857_v61 = vmul.f32 %v2510_v56, %v781_v54  ;;  %v931_v18 = vadd.f32 %v2513_v33, %v855_v50  ;;  %v665_v27 = vpop.xlane.xlu1 %664  ;;  %v3001_v54 = vld [vmem:[#allocation24_spill] sm:$0xff] }
 0x19b   : > { %1265 = vmatprep.mubr.bf16.mxu1 %v1001_v40  ;;  %v780_v32 = vmul.f32 %v2602_v63, %v2331_v52  ;;  %v1000_v42 = vpack.c.bf16 %v960_v31, %v958_v58  ;;  %v728_v59 = vadd.f32 1e-05, %v696_v12  ;;  %v697_v23 = vmul.f32 0.00390625, %v665_v27  ;;  %v3002_v31 = vld [vmem:[#allocation26_spill] sm:$0xff] }
 0x19c   : > { %v854_v62 = vmul.f32 %v2508_v16, %v778_v4  ;;  %1682 = vrsqrt.f32 %v713_v41  ;;  %v933_v30 = vadd.f32 %v2513_v33, %v857_v61  ;;  %v811_v25 = vmul.f32 %v2607_v3, %v2351_v8 }
 0x19d   : > { %v856_v57 = vmul.f32 %v2508_v16, %v780_v32  ;;  %v1675_v6 = vpop.eup %1674  ;;  %1266 = vmatmul.mubr.bf16.gmra.mrb[12].mxu1 %v1000_v42  ;;  %1684 = vrsqrt.f32 %v728_v59  ;;  %v729_v52 = vadd.f32 1e-05, %v697_v23  ;;  %v813_v63 = vmul.f32 %v2617_v44, %v2360_v38  ;;  %v3004_v23 = vld [vmem:[#allocation5_spill] sm:$0xff] }
 0x19e   : > { %v930_v9 = vadd.f32 %v2517_v46, %v854_v62  ;;  %v2669_v34 = vpop.eup %1676  ;;  %v987_v29 = vpack.c.bf16 %v933_v30, %v931_v18  ;;  %v887_v39 = vmul.f32 %v2510_v56, %v811_v25  ;;  %v810_v53 = vmul.f32 %v2607_v3, %v2348_v36  ;;  %v3003_v62 = vld [vmem:[#allocation29_spill] sm:$0xff]  ;;  %v3005_v25 = vld [vmem:[#allocation28_spill] sm:$0xff] }
 0x19f   : > { %v932_v22 = vadd.f32 %v2517_v46, %v856_v57  ;;  %1686 = vrsqrt.f32 %v729_v52  ;;  %v889_v8 = vmul.f32 %v2510_v56, %v813_v63  ;;  %v812_v2 = vmul.f32 %v2617_v44, %v2357_v37  ;;  %v2997_v37 = vld [vmem:[#allocation22_spill] sm:$0xff] }
 0x1a0   : > { %v783_v20 = vmul.f32 %v2623_v1, %v2377_v15  ;;  %1209 = vmatprep.mubr.bf16.mxu0 %v987_v29  ;;  %v963_v28 = vadd.f32 %v2513_v33, %v887_v39  ;;  %v886_v24 = vmul.f32 %v2508_v16, %v810_v53  ;;  %v785_v11 = vmul.f32 %v2634_v55, %v2386_v43  ;;  %v3006_v52 = vld [vmem:[#allocation30_spill] sm:$0xff] }
 0x1a1   : > { %v986_v38 = vpack.c.bf16 %v932_v22, %v930_v9  ;;  %v965_v36 = vadd.f32 %v2513_v33, %v889_v8  ;;  %v888_v3 = vmul.f32 %v2508_v16, %v812_v2  ;;  %v782_v44 = vmul.f32 %v2623_v1, %v2997_v37 }
 0x1a2   : > { %v1679_v49 = vpop.eup %1678  ;;  %v859_v35 = vmul.f32 %v2510_v56, %v783_v20  ;;  %v962_v15 = vadd.f32 %v2517_v46, %v886_v24  ;;  %v861_v13 = vmul.f32 %v2510_v56, %v785_v11  ;;  %v784_v60 = vmul.f32 %v2634_v55, %v2998_v5 }
 0x1a3   : > { %1210 = vmatmul.mubr.bf16.gmra.mrb[16].mxu0 %v986_v38  ;;  %v815_v43 = vmul.f32 %v2639_v17, %v2999_v0  ;;  %v2695_v10 = vpop.eup %1680  ;;  %v1003_v19 = vpack.c.bf16 %v965_v36, %v963_v28  ;;  %v964_v48 = vadd.f32 %v2517_v46, %v888_v3  ;;  %v858_v1 = vmul.f32 %v2508_v16, %v782_v44  ;;  %v3007_v28 = vld [vmem:[#allocation7_spill] sm:$0xff]  ;;  %v3008_v36 = vld [vmem:[#allocation9_spill] sm:$0xff]  ;;  %v3010_v0 = vld [vmem:[#allocation8_spill] sm:$0xff] }
 0x1a4   : > { %v935_v7 = vadd.f32 %v2513_v33, %v859_v35  ;;  %v937_v45 = vadd.f32 %v2513_v33, %v861_v13  ;;  %v860_v21 = vmul.f32 %v2508_v16, %v784_v60  ;;  %v817_v58 = vmul.f32 %v2650_v14, %v3000_v26 }
 0x1a5   : > { %v891_v55 = vmul.f32 %v2510_v56, %v815_v43  ;;  %1273 = vmatprep.mubr.bf16.mxu1 %v1003_v19  ;;  %v1002_v40 = vpack.c.bf16 %v964_v48, %v962_v15  ;;  %v934_v47 = vadd.f32 %v2517_v46, %v858_v1  ;;  %v814_v50 = vmul.f32 %v2639_v17, %v3001_v54  ;;  %v3009_v15 = vld [vmem:[#allocation6_spill] sm:$0xff] }
 0x1a6   : > { %v816_v12 = vmul.f32 %v2650_v14, %v3002_v31  ;;  %v1683_v4 = vpop.eup %1682  ;;  %v989_v41 = vpack.c.bf16 %v937_v45, %v935_v7  ;;  %v936_v61 = vadd.f32 %v2517_v46, %v860_v21  ;;  %v893_v18 = vmul.f32 %v2510_v56, %v817_v58  ;;  %v3011_v19 = vld [vmem:[#allocation10_spill] sm:$0xff]  ;;  %v3012_v21 = vld [vmem:[#allocation12_spill] sm:$0xff] }
 0x1a7   : > { %v967_v32 = vadd.f32 %v2513_v33, %v891_v55  ;;  %v1685_v27 = vpop.eup %1684  ;;  %1274 = vmatmul.mubr.bf16.gmra.mrb[16].mxu1 %v1002_v40  ;;  %v890_v42 = vmul.f32 %v2508_v16, %v814_v50  ;;  %v787_v17 = vmul.f32 %v2655_v51, %v3003_v62  ;;  %v789_v30 = vmul.f32 %v1675_v6, %v3004_v23  ;;  %v3014_v50 = vld [vmem:[#allocation11_spill] sm:$0xff] }
 0x1a8   : > { %v892_v59 = vmul.f32 %v2508_v16, %v816_v12  ;;  %1217 = vmatprep.mubr.bf16.mxu0 %v989_v41  ;;  %v988_v14 = vpack.c.bf16 %v936_v61, %v934_v47  ;;  %v969_v57 = vadd.f32 %v2513_v33, %v893_v18  ;;  %v786_v9 = vmul.f32 %v2655_v51, %v3005_v25  ;;  %v3013_v47 = vld [vmem:[#allocation31_spill] sm:$0xff]  ;;  %v3015_v18 = vld [vmem:[#allocation14_spill] sm:$0xff] }
 0x1a9   : > { %v788_v63 = vmul.f32 %v1675_v6, %v3006_v52  ;;  %v1687_v29 = vpop.eup %1686  ;;  %v966_v22 = vadd.f32 %v2517_v46, %v890_v42  ;;  %v863_v53 = vmul.f32 %v2510_v56, %v787_v17  ;;  %v865_v8 = vmul.f32 %v2510_v56, %v789_v30  ;;  %v3016_v17 = vld [vmem:[#allocation16_spill] sm:$0xff]  ;;  %v3017_v30 = vld [vmem:[#allocation13_spill] sm:$0xff] }
 0x1aa   : > { %v968_v39 = vadd.f32 %v2517_v46, %v892_v59  ;;  %v1005_v2 = vpack.c.bf16 %v969_v57, %v967_v32  ;;  %v862_v20 = vmul.f32 %v2508_v16, %v786_v9  ;;  %v819_v51 = vmul.f32 %v2669_v34, %v3007_v28  ;;  %v3018_v57 = vld [vmem:[#allocation15_spill] sm:$0xff] }
 0x1ab   : > { %1218 = vmatmul.mubr.bf16.gmra.mrb[20].mxu0 %v988_v14  ;;  %v864_v38 = vmul.f32 %v2508_v16, %v788_v63  ;;  %v939_v6 = vadd.f32 %v2513_v33, %v863_v53  ;;  %v941_v11 = vadd.f32 %v2513_v33, %v865_v8  ;;  %v821_v3 = vmul.f32 %v1679_v49, %v3008_v36 }
 0x1ac   : > { %v1004_v24 = vpack.c.bf16 %v968_v39, %v966_v22  ;;  %1281 = vmatprep.mubr.bf16.mxu1 %v1005_v2  ;;  %v938_v35 = vadd.f32 %v2517_v46, %v862_v20  ;;  %v895_v44 = vmul.f32 %v2510_v56, %v819_v51  ;;  %v818_v13 = vmul.f32 %v2669_v34, %v3009_v15 }
 0x1ad   : > { %v940_v37 = vadd.f32 %v2517_v46, %v864_v38  ;;  %v991_v5 = vpack.c.bf16 %v941_v11, %v939_v6  ;;  %v897_v60 = vmul.f32 %v2510_v56, %v821_v3  ;;  %v820_v43 = vmul.f32 %v1679_v49, %v3010_v0 }
 0x1ae   : > { %v791_v48 = vmul.f32 %v2695_v10, %v3011_v19  ;;  %v971_v1 = vadd.f32 %v2513_v33, %v895_v44  ;;  %v894_v45 = vmul.f32 %v2508_v16, %v818_v13  ;;  %v793_v26 = vmul.f32 %v1683_v4, %v3012_v21 }
 0x1af   : > { %v990_v7 = vpack.c.bf16 %v940_v37, %v938_v35  ;;  %1282 = vmatmul.mubr.bf16.gmra.mrb[20].mxu1 %v1004_v24  ;;  %1225 = vmatprep.mubr.bf16.mxu0 %v991_v5  ;;  %v973_v58 = vadd.f32 %v2513_v33, %v897_v60  ;;  %v896_v34 = vmul.f32 %v2508_v16, %v820_v43 }
 0x1b0   : > { %v867_v55 = vmul.f32 %v2510_v56, %v791_v48  ;;  %v970_v49 = vadd.f32 %v2517_v46, %v894_v45  ;;  %v869_v40 = vmul.f32 %v2510_v56, %v793_v26  ;;  %v790_v54 = vmul.f32 %v2695_v10, %v3013_v47 }
 0x1b1   : > { %v792_v31 = vmul.f32 %v1683_v4, %v3014_v50  ;;  %v1007_v12 = vpack.c.bf16 %v973_v58, %v971_v1  ;;  %v972_v41 = vadd.f32 %v2517_v46, %v896_v34  ;;  %v823_v32 = vmul.f32 %v1685_v27, %v3015_v18 }
 0x1b2   : > { %v943_v61 = vadd.f32 %v2513_v33, %v867_v55  ;;  %v945_v42 = vadd.f32 %v2513_v33, %v869_v40  ;;  %v866_v59 = vmul.f32 %v2508_v16, %v790_v54  ;;  %v825_v23 = vmul.f32 %v1687_v29, %v3016_v17 }
 0x1b3   : > { %1226 = vmatmul.mubr.bf16.gmra.mrb[24].mxu0 %v990_v7  ;;  %v868_v62 = vmul.f32 %v2508_v16, %v792_v31  ;;  %1289 = vmatprep.mubr.bf16.mxu1 %v1007_v12  ;;  %v1006_v10 = vpack.c.bf16 %v972_v41, %v970_v49  ;;  %v899_v4 = vmul.f32 %v2510_v56, %v823_v32 }
 0x1b4   : > { %v822_v14 = vmul.f32 %v1685_v27, %v3017_v30  ;;  %v824_v25 = vmul.f32 %v1687_v29, %v3018_v57  ;;  %v993_v9 = vpack.c.bf16 %v945_v42, %v943_v61  ;;  %v942_v52 = vadd.f32 %v2517_v46, %v866_v59 }
 0x1b5   : > { %v944_v63 = vadd.f32 %v2517_v46, %v868_v62  ;;  %v901_v22 = vmul.f32 %v2510_v56, %v825_v23  ;;  %v975_v2 = vadd.f32 %v2513_v33, %v899_v4  ;;  %v2777_v56 = vld [vmem:[%s2897_s4] ss:$0 sm:$0xff] }
 0x1b6   : > { %v898_v39 = vmul.f32 %v2508_v16, %v822_v14  ;;  %v900_v53 = vmul.f32 %v2508_v16, %v824_v25  ;;  %1233 = vmatprep.mubr.bf16.mxu0 %v993_v9 }
 0x1b7   : > { %v992_v8 = vpack.c.bf16 %v944_v63, %v942_v52  ;;  %v977_v27 = vadd.f32 %v2513_v33, %v901_v22  ;;  %1290 = vmatmul.mubr.bf16.gmra.mrb[24].mxu1 %v1006_v10 }
 0x1b8   : > { %v976_v29 = vadd.f32 %v2517_v46, %v900_v53  ;;  %v974_v38 = vadd.f32 %v2517_v46, %v898_v39 }
 0x1b9   : > { %v1009_v20 = vpack.c.bf16 %v977_v27, %v975_v2 }
 0x1ba   : > { %v1008_v28 = vpack.c.bf16 %v976_v29, %v974_v38 }
 0x1bb   : > { %1234 = vmatmul.mubr.bf16.gmra.mrb[28].mxu0 %v992_v8  ;;  %1297 = vmatprep.mubr.bf16.mxu1 %v1009_v20 }
 0x1bf   : > { %1298 = vmatmul.mubr.bf16.gmra.mrb[28].mxu1 %v1008_v28 }
 0x24a   : > { %v1455_v16 = vpop.f32.mrb[0].mxu0 }
 0x24b   : > { %v1456_v33 = vpop.f32.mrb[1].mxu0 }
 0x24c   : > { %v1457_v51 = vadd.f32 %v1456_v33, %v1455_v16  ;;  %v1458_v24 = vpop.f32.mrb[2].mxu0 }
 0x24d   : > { %v1459_v46 = vpop.f32.mrb[3].mxu0 }
 0x24e   : > { %v1180_v6 = vadd.f32 %v1457_v51, %v2777_v56  ;;  %v1460_v11 = vadd.f32 %v1459_v46, %v1458_v24 }
 0x24f   : > { %v1503_v36 = vpop.f32.mrb[0].mxu1 }
 0x250   : > { %1307 = vst.msk [vmem:[%s2782_s12] sm:$0xff] %vm1306_vm0, %v1180_v6  ;;  %v1183_v3 = vadd.f32 %v1460_v11, %v2777_v56  ;;  %v1504_v35 = vpop.f32.mrb[1].mxu1 }
 0x251   : > { %v1505_v37 = vadd.f32 %v1504_v35, %v1503_v36  ;;  %v1506_v44 = vpop.f32.mrb[2].mxu1 }
 0x252   : > { %1308 = vst.msk [vmem:[%s2782_s12 + $0x8] sm:$0xff] %vm1306_vm0, %v1183_v3  ;;  %v1507_v15 = vpop.f32.mrb[3].mxu1 }
 0x253   : > { %v1244_v13 = vadd.f32 %v1505_v37, %v2777_v56  ;;  %v1508_v5 = vadd.f32 %v1507_v15, %v1506_v44 }
 0x255   : > { %1323 = vst.msk [vmem:[%s2782_s12 + $0x80] sm:$0xff] %vm1306_vm0, %v1244_v13  ;;  %v1247_v60 = vadd.f32 %v1508_v5, %v2777_v56  ;;  %v1461_v0 = vpop.f32.mrb[4].mxu0 }
 0x256   : > { %v1462_v43 = vpop.f32.mrb[5].mxu0 }
 0x257   : > { %1324 = vst.msk [vmem:[%s2782_s12 + $0x88] sm:$0xff] %vm1306_vm0, %v1247_v60  ;;  %v1463_v19 = vadd.f32 %v1462_v43, %v1461_v0  ;;  %v1464_v48 = vpop.f32.mrb[6].mxu0 }
 0x258   : > { %v1465_v7 = vpop.f32.mrb[7].mxu0 }
 0x259   : > { %v1188_v1 = vadd.f32 %v1463_v19, %v2777_v56  ;;  %v1466_v45 = vadd.f32 %v1465_v7, %v1464_v48 }
 0x25a   : > { %v1509_v21 = vpop.f32.mrb[4].mxu1 }
 0x25b   : > { %1309 = vst.msk [vmem:[%s2782_s12 + $0x10] sm:$0xff] %vm1306_vm0, %v1188_v1  ;;  %v1191_v26 = vadd.f32 %v1466_v45, %v2777_v56  ;;  %v1510_v58 = vpop.f32.mrb[5].mxu1 }
 0x25c   : > { %v1511_v34 = vadd.f32 %v1510_v58, %v1509_v21  ;;  %v1512_v55 = vpop.f32.mrb[6].mxu1 }
 0x25d   : > { %1310 = vst.msk [vmem:[%s2782_s12 + $0x18] sm:$0xff] %vm1306_vm0, %v1191_v26  ;;  %v1513_v49 = vpop.f32.mrb[7].mxu1 }
 0x25e   : > { %v1252_v40 = vadd.f32 %v1511_v34, %v2777_v56  ;;  %v1514_v47 = vadd.f32 %v1513_v49, %v1512_v55 }
 0x260   : > { %v1467_v54 = vpop.f32.mrb[8].mxu0  ;;  %1325 = vst.msk [vmem:[%s2782_s12 + $0x90] sm:$0xff] %vm1306_vm0, %v1252_v40  ;;  %v1255_v50 = vadd.f32 %v1514_v47, %v2777_v56 }
 0x261   : > { %v1468_v31 = vpop.f32.mrb[9].mxu0 }
 0x262   : > { %v1469_v12 = vadd.f32 %v1468_v31, %v1467_v54  ;;  %v1470_v41 = vpop.f32.mrb[10].mxu0  ;;  %1326 = vst.msk [vmem:[%s2782_s12 + $0x98] sm:$0xff] %vm1306_vm0, %v1255_v50 }
 0x263   : > { %v1471_v61 = vpop.f32.mrb[11].mxu0 }
 0x264   : > { %v1196_v18 = vadd.f32 %v1469_v12, %v2777_v56  ;;  %v1472_v32 = vadd.f32 %v1471_v61, %v1470_v41 }
 0x266   : > { %1311 = vst.msk [vmem:[%s2782_s12 + $0x20] sm:$0xff] %vm1306_vm0, %v1196_v18  ;;  %v1199_v42 = vadd.f32 %v1472_v32, %v2777_v56  ;;  %v1515_v59 = vpop.f32.mrb[8].mxu1 }
 0x267   : > { %v1516_v62 = vpop.f32.mrb[9].mxu1 }
 0x268   : > { %1312 = vst.msk [vmem:[%s2782_s12 + $0x28] sm:$0xff] %vm1306_vm0, %v1199_v42  ;;  %v1517_v17 = vadd.f32 %v1516_v62, %v1515_v59  ;;  %v1518_v23 = vpop.f32.mrb[10].mxu1 }
 0x269   : > { %v1519_v10 = vpop.f32.mrb[11].mxu1 }
 0x26a   : > { %v1260_v4 = vadd.f32 %v1517_v17, %v2777_v56  ;;  %v1520_v30 = vadd.f32 %v1519_v10, %v1518_v23 }
 0x26b   : > { %v1473_v57 = vpop.f32.mrb[12].mxu0 }
 0x26c   : > { %1327 = vst.msk [vmem:[%s2782_s12 + $0xa0] sm:$0xff] %vm1306_vm0, %v1260_v4  ;;  %v1263_v14 = vadd.f32 %v1520_v30, %v2777_v56  ;;  %v1474_v25 = vpop.f32.mrb[13].mxu0 }
 0x26d   : > { %v1475_v9 = vadd.f32 %v1474_v25, %v1473_v57  ;;  %v1476_v52 = vpop.f32.mrb[14].mxu0 }
 0x26e   : > { %1328 = vst.msk [vmem:[%s2782_s12 + $0xa8] sm:$0xff] %vm1306_vm0, %v1263_v14  ;;  %v1477_v63 = vpop.f32.mrb[15].mxu0 }
 0x26f   : > { %v1204_v22 = vadd.f32 %v1475_v9, %v2777_v56  ;;  %v1478_v39 = vadd.f32 %v1477_v63, %v1476_v52 }
 0x270   : > { %v1521_v53 = vpop.f32.mrb[12].mxu1 }
 0x271   : > { %1313 = vst.msk [vmem:[%s2782_s12 + $0x30] sm:$0xff] %vm1306_vm0, %v1204_v22  ;;  %v1207_v8 = vadd.f32 %v1478_v39, %v2777_v56  ;;  %v1522_v2 = vpop.f32.mrb[13].mxu1 }
 0x272   : > { %v1523_v27 = vadd.f32 %v1522_v2, %v1521_v53  ;;  %v1524_v29 = vpop.f32.mrb[14].mxu1 }
 0x273   : > { %1314 = vst.msk [vmem:[%s2782_s12 + $0x38] sm:$0xff] %vm1306_vm0, %v1207_v8  ;;  %v1525_v20 = vpop.f32.mrb[15].mxu1 }
 0x274   : > { %v1268_v38 = vadd.f32 %v1523_v27, %v2777_v56  ;;  %v1526_v28 = vadd.f32 %v1525_v20, %v1524_v29 }
 0x276   : > { %v1479_v16 = vpop.f32.mrb[16].mxu0  ;;  %1329 = vst.msk [vmem:[%s2782_s12 + $0xb0] sm:$0xff] %vm1306_vm0, %v1268_v38  ;;  %v1271_v33 = vadd.f32 %v1526_v28, %v2777_v56 }
 0x277   : > { %v1480_v51 = vpop.f32.mrb[17].mxu0 }
 0x278   : > { %v1481_v24 = vadd.f32 %v1480_v51, %v1479_v16  ;;  %v1482_v46 = vpop.f32.mrb[18].mxu0  ;;  %1330 = vst.msk [vmem:[%s2782_s12 + $0xb8] sm:$0xff] %vm1306_vm0, %v1271_v33 }
 0x279   : > { %v1483_v6 = vpop.f32.mrb[19].mxu0 }
 0x27a   : > { %v1212_v11 = vadd.f32 %v1481_v24, %v2777_v56  ;;  %v1484_v36 = vadd.f32 %v1483_v6, %v1482_v46  ;;  %v1527_v3 = vpop.f32.mrb[16].mxu1 }
 0x27b   : > { %v1528_v37 = vpop.f32.mrb[17].mxu1 }
 0x27c   : > { %1315 = vst.msk [vmem:[%s2782_s12 + $0x40] sm:$0xff] %vm1306_vm0, %v1212_v11  ;;  %v1215_v35 = vadd.f32 %v1484_v36, %v2777_v56  ;;  %v1529_v44 = vadd.f32 %v1528_v37, %v1527_v3  ;;  %v1530_v15 = vpop.f32.mrb[18].mxu1 }
 0x27d   : > { %v1531_v13 = vpop.f32.mrb[19].mxu1 }
 0x27e   : > { %1316 = vst.msk [vmem:[%s2782_s12 + $0x48] sm:$0xff] %vm1306_vm0, %v1215_v35  ;;  %v1485_v5 = vpop.f32.mrb[20].mxu0  ;;  %v1276_v60 = vadd.f32 %v1529_v44, %v2777_v56  ;;  %v1532_v0 = vadd.f32 %v1531_v13, %v1530_v15 }
 0x27f   : > { %v1486_v43 = vpop.f32.mrb[21].mxu0 }
 0x280   : > { %v1487_v19 = vadd.f32 %v1486_v43, %v1485_v5  ;;  %v1488_v48 = vpop.f32.mrb[22].mxu0  ;;  %1331 = vst.msk [vmem:[%s2782_s12 + $0xc0] sm:$0xff] %vm1306_vm0, %v1276_v60  ;;  %v1279_v7 = vadd.f32 %v1532_v0, %v2777_v56 }
 0x281   : > { %v1489_v1 = vpop.f32.mrb[23].mxu0 }
 0x282   : > { %v1220_v45 = vadd.f32 %v1487_v19, %v2777_v56  ;;  %v1490_v21 = vadd.f32 %v1489_v1, %v1488_v48  ;;  %1332 = vst.msk [vmem:[%s2782_s12 + $0xc8] sm:$0xff] %vm1306_vm0, %v1279_v7  ;;  %v1533_v26 = vpop.f32.mrb[20].mxu1 }
 0x283   : > { %v1534_v34 = vpop.f32.mrb[21].mxu1 }
 0x284   : > { %1317 = vst.msk [vmem:[%s2782_s12 + $0x50] sm:$0xff] %vm1306_vm0, %v1220_v45  ;;  %v1223_v58 = vadd.f32 %v1490_v21, %v2777_v56  ;;  %v1535_v55 = vadd.f32 %v1534_v34, %v1533_v26  ;;  %v1536_v49 = vpop.f32.mrb[22].mxu1 }
 0x285   : > { %v1537_v40 = vpop.f32.mrb[23].mxu1 }
 0x286   : > { %1318 = vst.msk [vmem:[%s2782_s12 + $0x58] sm:$0xff] %vm1306_vm0, %v1223_v58  ;;  %v1491_v47 = vpop.f32.mrb[24].mxu0  ;;  %v1284_v54 = vadd.f32 %v1535_v55, %v2777_v56  ;;  %v1538_v50 = vadd.f32 %v1537_v40, %v1536_v49 }
 0x287   : > { %v1492_v31 = vpop.f32.mrb[25].mxu0 }
 0x288   : > { %v1493_v12 = vadd.f32 %v1492_v31, %v1491_v47  ;;  %v1494_v41 = vpop.f32.mrb[26].mxu0  ;;  %1333 = vst.msk [vmem:[%s2782_s12 + $0xd0] sm:$0xff] %vm1306_vm0, %v1284_v54  ;;  %v1287_v61 = vadd.f32 %v1538_v50, %v2777_v56 }
 0x289   : > { %v1495_v18 = vpop.f32.mrb[27].mxu0 }
 0x28a   : > { %v1228_v32 = vadd.f32 %v1493_v12, %v2777_v56  ;;  %v1496_v42 = vadd.f32 %v1495_v18, %v1494_v41  ;;  %1334 = vst.msk [vmem:[%s2782_s12 + $0xd8] sm:$0xff] %vm1306_vm0, %v1287_v61  ;;  %v1539_v59 = vpop.f32.mrb[24].mxu1 }
 0x28b   : > { %v1540_v17 = vpop.f32.mrb[25].mxu1 }
 0x28c   : > { %1319 = vst.msk [vmem:[%s2782_s12 + $0x60] sm:$0xff] %vm1306_vm0, %v1228_v32  ;;  %v1231_v62 = vadd.f32 %v1496_v42, %v2777_v56  ;;  %v1541_v23 = vadd.f32 %v1540_v17, %v1539_v59  ;;  %v1542_v10 = vpop.f32.mrb[26].mxu1 }
 0x28d   : > { %v1543_v4 = vpop.f32.mrb[27].mxu1 }
 0x28e   : > { %1320 = vst.msk [vmem:[%s2782_s12 + $0x68] sm:$0xff] %vm1306_vm0, %v1231_v62  ;;  %v1497_v30 = vpop.f32.mrb[28].mxu0  ;;  %v1292_v14 = vadd.f32 %v1541_v23, %v2777_v56  ;;  %v1544_v57 = vadd.f32 %v1543_v4, %v1542_v10 }
 0x28f   : > { %v1498_v25 = vpop.f32.mrb[29].mxu0 }
 0x290   : > { %v1499_v9 = vadd.f32 %v1498_v25, %v1497_v30  ;;  %v1500_v52 = vpop.f32.mrb[30].mxu0  ;;  %1335 = vst.msk [vmem:[%s2782_s12 + $0xe0] sm:$0xff] %vm1306_vm0, %v1292_v14  ;;  %v1295_v63 = vadd.f32 %v1544_v57, %v2777_v56 }
 0x291   : > { %v1501_v22 = vpop.f32.mrb[31].mxu0 }
 0x292   : > { %v1236_v39 = vadd.f32 %v1499_v9, %v2777_v56  ;;  %v1502_v53 = vadd.f32 %v1501_v22, %v1500_v52  ;;  %1336 = vst.msk [vmem:[%s2782_s12 + $0xe8] sm:$0xff] %vm1306_vm0, %v1295_v63  ;;  %v1545_v8 = vpop.f32.mrb[28].mxu1 }
 0x293   : > { %v1546_v27 = vpop.f32.mrb[29].mxu1 }
 0x294   : > { %1321 = vst.msk [vmem:[%s2782_s12 + $0x70] sm:$0xff] %vm1306_vm0, %v1236_v39  ;;  %v1239_v2 = vadd.f32 %v1502_v53, %v2777_v56  ;;  %v1547_v29 = vadd.f32 %v1546_v27, %v1545_v8  ;;  %v1548_v20 = vpop.f32.mrb[30].mxu1 }
 0x295   : > { %v1549_v38 = vpop.f32.mrb[31].mxu1 }
 0x296   : > { %1322 = vst.msk [vmem:[%s2782_s12 + $0x78] sm:$0xff] %vm1306_vm0, %v1239_v2  ;;  %v1300_v28 = vadd.f32 %v1547_v29, %v2777_v56  ;;  %v1550_v16 = vadd.f32 %v1549_v38, %v1548_v20 }
 0x298   : > { %1337 = vst.msk [vmem:[%s2782_s12 + $0xf0] sm:$0xff] %vm1306_vm0, %v1300_v28  ;;  %v1303_v33 = vadd.f32 %v1550_v16, %v2777_v56 }
 0x29a   : > { %1338 = vst.msk [vmem:[%s2782_s12 + $0xf8] sm:$0xff] %vm1306_vm0, %v1303_v33 }
 0x29b PF: > { %p15_p8 = scmp.ge.s32.totalorder %s1807_s23, 4   ;;  %s3019_s18 = smov %s1744_s19 }
 0x29c   : > { %s3020_s19 = smov %s1748_s20  ;;  %s3021_s20 = smov %s1817_s26 }
 0x29d   : > { %s3022_s21 = smov %s1807_s23  ;;  %17 = sbr.rel (!%p15_p8) target bundleno = 3 (0x3), region = 80 }
 0x2a4   :  { %1361 = vsyncpa [#allocation3], 1 }
 0x2a5   :  { %1363 = vsyncpa [#allocation3 + $0x1], 1 }

// kernel: gpt2_block_forward.5
= control target key start
LH: loop header
LB: loop body
LE: loop exit
PB: predicated region body
PF: predicated region fallthrough
CT: control target
= control target key end

     0   :  { %13 = vsyncpa [#allocation3], 0  ;;  %s4013_s0 = inlined_call_operand.vmem [shape: f32[512,256], index: 0, kind: input, shape index: {}]   ;;  %s4014_s1 = inlined_call_operand.vmem [shape: f32[512,256], index: 1, kind: input, shape index: {}]   ;;  %s4015_s2 = inlined_call_operand.vmem [shape: f32[1,256], index: 2, kind: input, shape index: {}]   ;;  %s4016_s3 = inlined_call_operand.vmem [shape: f32[1,256], index: 3, kind: input, shape index: {}]   ;;  %s4017_s4 = inlined_call_operand.vmem [shape: bf16[256,64], index: 4, kind: input, shape index: {}]   ;;  %s4018_s5 = inlined_call_operand.vmem [shape: f32[1,64], index: 5, kind: input, shape index: {}]   ;;  %s4019_s6 = inlined_call_operand.vmem [shape: bf16[64,256], index: 6, kind: input, shape index: {}]   ;;  %s4020_s7 = inlined_call_operand.vmem [shape: f32[1,256], index: 7, kind: input, shape index: {}]   ;;  %s4021_s8 = inlined_call_operand.hbm [shape: f32[512,256], index: 8, kind: output, shape index: {}]  }
   0x1   :  { %15 = vsyncpa [#allocation3 + $0x1], 0  ;;  %s2701_s27 = smov 0   ;;  %s2703_s28 = smov 0  }
   0x2   :  { %s2705_s29 = smov 0   ;;  %s2707_s30 = smov 0  }
   0x3 LB: > { %s2722_s9 = sadd.s32 4294967295, %s2650_s30   ;;  %s2216_s10 = sadd.s32 4294967294, %s2650_s30   ;;  %s2650_s30 = sphi %s2707_s30, %s4316_s30   ;;  %s2646_s29 = sphi %s2705_s29, %s4315_s29   ;;  %s2642_s28 = sphi %s2703_s28, %s4314_s28   ;;  %s2638_s27 = sphi %s2701_s27, %s4313_s27  }
   0x4   : > { %s2726_s11 = sadd.s32 1, %s2650_s30   ;;  %s206_s12 = sadd.s32 1, %s2646_s29 }
   0x5   : > { %s203_s13 = ssub.s32 %s2650_s30, %s2726_s11  ;;  %p216_p0 = scmp.ne.s32.totalorder %s2646_s29, %s2642_s28 }
   0x6   : > { %p204_p1 = scmp.eq.s32.totalorder %s203_s13, 0  ;;  %p217_p2 = scmp.eq.s32.totalorder %s2722_s9, 1 }
   0x7   : > { %p222_p3 = scmp.ne.s32.totalorder %s2642_s28, %s2638_s27  ;;  %p223_p4 = scmp.eq.s32.totalorder %s2216_s10, 1 }
   0x8   : > { %s2737_s14 = scalar_select %p204_p1, %s2646_s29, %s206_s12  }
   0x9   : > { %p2739_p5 = por %p217_p2, %p216_p0  ;;  %p2743_p6 = por %p223_p4, %p222_p3 }
   0xa   : > { %p2219_p7 = scmp.ge.s32.totalorder %s2650_s30, 1  ;;  %p279_p8 = scmp.lt.s32.totalorder %s2650_s30, 3 }
   0xc   : > { %p280_p9 = pnand %p2219_p7, %p279_p8 }
   0xe   : > { %283 = sbr.rel (%p280_p9) target bundleno = 1012 (0x3f4), region = 52 }
  0x15   : > { %s2221_s17 = sshll.u32 %s2722_s9, 5  ;;  %vm1757_vm0 = vcmask 523264   ;;  %s2653_s10 = smov [#allocation2]  }
  0x16   : > { %p321_p10 = scmp.lt.s32.totalorder %s2221_s17, 63  ;;  %s2592_s12 = sshll.u32 %s2653_s10, 4  ;;  %s2593_s12 = int_to_ptr.vmem [resolvable:$false] %s2592_s12 }
  0x17   : > { %s2594_s13 = scalar_lea.vmem %s2593_s12, 16384 }
  0x18   : > { %s4318_s17 = smov (!%p321_p10, %s2221_s17), 63 }
  0x19   : > { %s2274_s18 = sshll.u32 %s4318_s17, 4 }
  0x1a   : > { %s2753_s21 = scalar_lea.vmem %s4013_s0, %s2274_s18  ;;  %s2758_s24 = scalar_lea.vmem %s4014_s1, %s2274_s18 }
  0x1b   : > { %v336_v0 = vld [vmem:[%s2753_s21] sm:$0xff]  ;;  %v337_v1 = vld [vmem:[%s2753_s21 + $0x8] sm:$0xff]  ;;  %v338_v5 = vld [vmem:[%s2753_s21 + $0x10] sm:$0xff]  ;;  %s317_s18 = sand.u32 1, %s2642_s28  }
  0x1c   : > { %v400_v2 = vld [vmem:[%s2758_s24] sm:$0xff]  ;;  %v401_v3 = vld [vmem:[%s2758_s24 + $0x8] sm:$0xff]  ;;  %v339_v6 = vld [vmem:[%s2753_s21 + $0x18] sm:$0xff]  ;;  %s2220_s19 = sshll.u32 %s317_s18, 9 }
  0x1d   : > { %v2764_v4 = vadd.f32 %v400_v2, %v336_v0  ;;  %v2768_v7 = vadd.f32 %v401_v3, %v337_v1  ;;  %v402_v8 = vld [vmem:[%s2758_s24 + $0x10] sm:$0xff]  ;;  %v403_v9 = vld [vmem:[%s2758_s24 + $0x18] sm:$0xff]  ;;  %v340_v10 = vld [vmem:[%s2753_s21 + $0x20] sm:$0xff]  ;;  %s3773_s20 = scalar_lea.vmem [#allocation2], %s2220_s19 }
  0x1e   : > { %v2773_v11 = vadd.f32 %v402_v8, %v338_v5  ;;  %v2775_v12 = vadd.f32 %v403_v9, %v339_v6  ;;  %v341_v13 = vld [vmem:[%s2753_s21 + $0x28] sm:$0xff]  ;;  %v404_v14 = vld [vmem:[%s2758_s24 + $0x20] sm:$0xff]  ;;  %v342_v19 = vld [vmem:[%s2753_s21 + $0x30] sm:$0xff] }
  0x1f   : > { %4122 = vst [vmem:[#allocation5_spill] sm:$0xff] %v2764_v4  ;;  %4123 = vst [vmem:[#allocation6_spill] sm:$0xff] %v2768_v7  ;;  %v405_v15 = vld [vmem:[%s2758_s24 + $0x28] sm:$0xff]  ;;  %v528_v16 = vadd.f32 %v2768_v7, %v2764_v4  ;;  %v2782_v17 = vadd.f32 %v404_v14, %v340_v10  ;;  %v343_v20 = vld [vmem:[%s2753_s21 + $0x38] sm:$0xff] }
  0x20   : > { %4124 = vst [vmem:[#allocation7_spill] sm:$0xff] %v2773_v11  ;;  %4125 = vst [vmem:[#allocation8_spill] sm:$0xff] %v2775_v12  ;;  %v2784_v18 = vadd.f32 %v405_v15, %v341_v13  ;;  %v406_v21 = vld [vmem:[%s2758_s24 + $0x30] sm:$0xff]  ;;  %v407_v22 = vld [vmem:[%s2758_s24 + $0x38] sm:$0xff]  ;;  %v531_v26 = vadd.f32 %v2775_v12, %v2773_v11 }
  0x21   : > { %4126 = vst [vmem:[#allocation9_spill] sm:$0xff] %v2782_v17  ;;  %v2790_v23 = vadd.f32 %v406_v21, %v342_v19  ;;  %v344_v24 = vld [vmem:[%s2753_s21 + $0x40] sm:$0xff]  ;;  %v345_v25 = vld [vmem:[%s2753_s21 + $0x48] sm:$0xff]  ;;  %529 = vadd.xlane.f32.xlu0 %v528_v16  ;;  %v2798_v28 = vadd.f32 %v407_v22, %v343_v20  ;;  %v346_v31 = vld [vmem:[%s2753_s21 + $0x50] sm:$0xff] }
  0x22   : > { %4127 = vst [vmem:[#allocation10_spill] sm:$0xff] %v2784_v18  ;;  %v534_v27 = vadd.f32 %v2784_v18, %v2782_v17  ;;  %v408_v29 = vld [vmem:[%s2758_s24 + $0x40] sm:$0xff]  ;;  %v409_v30 = vld [vmem:[%s2758_s24 + $0x48] sm:$0xff]  ;;  %v347_v34 = vld [vmem:[%s2753_s21 + $0x58] sm:$0xff] }
  0x23   : > { %4128 = vst [vmem:[#allocation11_spill] sm:$0xff] %v2790_v23  ;;  %4129 = vst [vmem:[#allocation12_spill] sm:$0xff] %v2798_v28  ;;  %v2803_v32 = vadd.f32 %v408_v29, %v344_v24  ;;  %v2805_v33 = vadd.f32 %v409_v30, %v345_v25  ;;  %v410_v35 = vld [vmem:[%s2758_s24 + $0x50] sm:$0xff]  ;;  %v411_v36 = vld [vmem:[%s2758_s24 + $0x58] sm:$0xff]  ;;  %v537_v37 = vadd.f32 %v2798_v28, %v2790_v23 }
  0x24   : > { %535 = vadd.xlane.f32.xlu1 %v534_v27  ;;  %v2812_v38 = vadd.f32 %v410_v35, %v346_v31  ;;  %v2814_v39 = vadd.f32 %v411_v36, %v347_v34  ;;  %v348_v40 = vld [vmem:[%s2753_s21 + $0x60] sm:$0xff]  ;;  %v349_v41 = vld [vmem:[%s2753_s21 + $0x68] sm:$0xff]  ;;  %v350_v44 = vld [vmem:[%s2753_s21 + $0x70] sm:$0xff] }
  0x25   : > { %4130 = vst [vmem:[#allocation13_spill] sm:$0xff] %v2803_v32  ;;  %4131 = vst [vmem:[#allocation14_spill] sm:$0xff] %v2805_v33  ;;  %v412_v42 = vld [vmem:[%s2758_s24 + $0x60] sm:$0xff]  ;;  %v413_v43 = vld [vmem:[%s2758_s24 + $0x68] sm:$0xff]  ;;  %532 = vadd.xlane.f32.xlu0 %v531_v26  ;;  %v540_v46 = vadd.f32 %v2805_v33, %v2803_v32 }
  0x26   : > { %4132 = vst [vmem:[#allocation15_spill] sm:$0xff] %v2812_v38  ;;  %4133 = vst [vmem:[#allocation16_spill] sm:$0xff] %v2814_v39  ;;  %v351_v45 = vld [vmem:[%s2753_s21 + $0x78] sm:$0xff]  ;;  %v2824_v47 = vadd.f32 %v412_v42, %v348_v40  ;;  %v2826_v48 = vadd.f32 %v413_v43, %v349_v41  ;;  %v414_v49 = vld [vmem:[%s2758_s24 + $0x70] sm:$0xff]  ;;  %v543_v55 = vadd.f32 %v2814_v39, %v2812_v38 }
  0x27   : > { %v415_v50 = vld [vmem:[%s2758_s24 + $0x78] sm:$0xff]  ;;  %v352_v51 = vld [vmem:[%s2753_s21 + $0x80] sm:$0xff]  ;;  %v353_v52 = vld [vmem:[%s2753_s21 + $0x88] sm:$0xff]  ;;  %v2836_v56 = vadd.f32 %v414_v49, %v350_v44 }
  0x28   : > { %4134 = vst [vmem:[#allocation17_spill] sm:$0xff] %v2824_v47  ;;  %4135 = vst [vmem:[#allocation18_spill] sm:$0xff] %v2826_v48  ;;  %v416_v53 = vld [vmem:[%s2758_s24 + $0x80] sm:$0xff]  ;;  %v417_v54 = vld [vmem:[%s2758_s24 + $0x88] sm:$0xff]  ;;  %538 = vadd.xlane.f32.xlu1 %v537_v37  ;;  %v2838_v57 = vadd.f32 %v415_v50, %v351_v45  ;;  %v546_v62 = vadd.f32 %v2826_v48, %v2824_v47 }
  0x29   : > { %4136 = vst [vmem:[#allocation19_spill] sm:$0xff] %v2836_v56  ;;  %v354_v58 = vld [vmem:[%s2753_s21 + $0x90] sm:$0xff]  ;;  %v355_v59 = vld [vmem:[%s2753_s21 + $0x98] sm:$0xff]  ;;  %541 = vadd.xlane.f32.xlu0 %v540_v46  ;;  %v2846_v63 = vadd.f32 %v416_v53, %v352_v51  ;;  %v2848_v0 = vadd.f32 %v417_v54, %v353_v52  ;;  %v356_v1 = vld [vmem:[%s2753_s21 + $0xa0] sm:$0xff] }
  0x2a   : > { %4137 = vst [vmem:[#allocation20_spill] sm:$0xff] %v2838_v57  ;;  %v418_v60 = vld [vmem:[%s2758_s24 + $0x90] sm:$0xff]  ;;  %v419_v61 = vld [vmem:[%s2758_s24 + $0x98] sm:$0xff]  ;;  %v357_v2 = vld [vmem:[%s2753_s21 + $0xa8] sm:$0xff]  ;;  %v549_v6 = vadd.f32 %v2838_v57, %v2836_v56 }
  0x2b   : > { %4138 = vst [vmem:[#allocation21_spill] sm:$0xff] %v2846_v63  ;;  %4139 = vst [vmem:[#allocation22_spill] sm:$0xff] %v2848_v0  ;;  %v420_v3 = vld [vmem:[%s2758_s24 + $0xa0] sm:$0xff]  ;;  %v421_v5 = vld [vmem:[%s2758_s24 + $0xa8] sm:$0xff]  ;;  %v2856_v8 = vadd.f32 %v418_v60, %v354_v58  ;;  %v2858_v9 = vadd.f32 %v419_v61, %v355_v59  ;;  %v552_v16 = vadd.f32 %v2848_v0, %v2846_v63 }
  0x2c   : > { %544 = vadd.xlane.f32.xlu1 %v543_v55  ;;  %v358_v10 = vld [vmem:[%s2753_s21 + $0xb0] sm:$0xff]  ;;  %v359_v13 = vld [vmem:[%s2753_s21 + $0xb8] sm:$0xff]  ;;  %v2866_v19 = vadd.f32 %v420_v3, %v356_v1  ;;  %v2868_v20 = vadd.f32 %v421_v5, %v357_v2  ;;  %v360_v21 = vld [vmem:[%s2753_s21 + $0xc0] sm:$0xff] }
  0x2d   : > { %4140 = vst [vmem:[#allocation23_spill] sm:$0xff] %v2856_v8  ;;  %4141 = vst [vmem:[#allocation24_spill] sm:$0xff] %v2858_v9  ;;  %v422_v14 = vld [vmem:[%s2758_s24 + $0xb0] sm:$0xff]  ;;  %v423_v15 = vld [vmem:[%s2758_s24 + $0xb8] sm:$0xff]  ;;  %547 = vadd.xlane.f32.xlu0 %v546_v62  ;;  %v555_v26 = vadd.f32 %v2858_v9, %v2856_v8 }
  0x2e   : > { %4142 = vst [vmem:[#allocation25_spill] sm:$0xff] %v2866_v19  ;;  %4143 = vst [vmem:[#allocation26_spill] sm:$0xff] %v2868_v20  ;;  %v361_v22 = vld [vmem:[%s2753_s21 + $0xc8] sm:$0xff]  ;;  %v424_v24 = vld [vmem:[%s2758_s24 + $0xc0] sm:$0xff]  ;;  %v2876_v27 = vadd.f32 %v422_v14, %v358_v10  ;;  %v2878_v29 = vadd.f32 %v423_v15, %v359_v13  ;;  %v558_v36 = vadd.f32 %v2868_v20, %v2866_v19 }
  0x2f   : > { %v425_v25 = vld [vmem:[%s2758_s24 + $0xc8] sm:$0xff]  ;;  %v362_v30 = vld [vmem:[%s2753_s21 + $0xd0] sm:$0xff]  ;;  %v363_v31 = vld [vmem:[%s2753_s21 + $0xd8] sm:$0xff]  ;;  %v2886_v37 = vadd.f32 %v424_v24, %v360_v21 }
  0x30   : > { %550 = vadd.xlane.f32.xlu1 %v549_v6  ;;  %4144 = vst [vmem:[#allocation27_spill] sm:$0xff] %v2876_v27  ;;  %4145 = vst [vmem:[#allocation28_spill] sm:$0xff] %v2878_v29  ;;  %v426_v34 = vld [vmem:[%s2758_s24 + $0xd0] sm:$0xff]  ;;  %v427_v35 = vld [vmem:[%s2758_s24 + $0xd8] sm:$0xff]  ;;  %v2888_v40 = vadd.f32 %v425_v25, %v361_v22  ;;  %v561_v45 = vadd.f32 %v2878_v29, %v2876_v27 }
  0x31   : > { %553 = vadd.xlane.f32.xlu0 %v552_v16  ;;  %4146 = vst [vmem:[#allocation29_spill] sm:$0xff] %v2886_v37  ;;  %v364_v41 = vld [vmem:[%s2753_s21 + $0xe0] sm:$0xff]  ;;  %v365_v42 = vld [vmem:[%s2753_s21 + $0xe8] sm:$0xff]  ;;  %v2896_v46 = vadd.f32 %v426_v34, %v362_v30  ;;  %v2898_v49 = vadd.f32 %v427_v35, %v363_v31  ;;  %v366_v50 = vld [vmem:[%s2753_s21 + $0xf0] sm:$0xff] }
  0x32   : > { %4147 = vst [vmem:[#allocation30_spill] sm:$0xff] %v2888_v40  ;;  %v428_v43 = vld [vmem:[%s2758_s24 + $0xe0] sm:$0xff]  ;;  %v429_v44 = vld [vmem:[%s2758_s24 + $0xe8] sm:$0xff]  ;;  %v367_v51 = vld [vmem:[%s2753_s21 + $0xf8] sm:$0xff]  ;;  %v564_v54 = vadd.f32 %v2888_v40, %v2886_v37 }
  0x33   : > { %4148 = vst [vmem:[#allocation31_spill] sm:$0xff] %v2896_v46  ;;  %4149 = vst [vmem:[#allocation32_spill] sm:$0xff] %v2898_v49  ;;  %v430_v52 = vld [vmem:[%s2758_s24 + $0xf0] sm:$0xff]  ;;  %v431_v53 = vld [vmem:[%s2758_s24 + $0xf8] sm:$0xff]  ;;  %v2906_v55 = vadd.f32 %v428_v43, %v364_v41  ;;  %v2908_v58 = vadd.f32 %v429_v44, %v365_v42  ;;  %v567_v1 = vadd.f32 %v2898_v49, %v2896_v46 }
  0x34   : > { %556 = vadd.xlane.f32.xlu1 %v555_v26  ;;  %v368_v59 = vld [vmem:[%s2753_s21 + $0x100] sm:$0xff]  ;;  %v369_v60 = vld [vmem:[%s2753_s21 + $0x108] sm:$0xff]  ;;  %v2916_v2 = vadd.f32 %v430_v52, %v366_v50  ;;  %v2918_v3 = vadd.f32 %v431_v53, %v367_v51  ;;  %v370_v5 = vld [vmem:[%s2753_s21 + $0x110] sm:$0xff] }
  0x35   : > { %559 = vadd.xlane.f32.xlu0 %v558_v36  ;;  %4150 = vst [vmem:[#allocation33_spill] sm:$0xff] %v2906_v55  ;;  %4151 = vst [vmem:[#allocation34_spill] sm:$0xff] %v2908_v58  ;;  %v432_v61 = vld [vmem:[%s2758_s24 + $0x100] sm:$0xff]  ;;  %v433_v62 = vld [vmem:[%s2758_s24 + $0x108] sm:$0xff]  ;;  %v570_v16 = vadd.f32 %v2908_v58, %v2906_v55 }
  0x36   : > { %4152 = vst [vmem:[#allocation35_spill] sm:$0xff] %v2916_v2  ;;  %4153 = vst [vmem:[#allocation36_spill] sm:$0xff] %v2918_v3  ;;  %v371_v6 = vld [vmem:[%s2753_s21 + $0x118] sm:$0xff]  ;;  %v434_v10 = vld [vmem:[%s2758_s24 + $0x110] sm:$0xff]  ;;  %v2928_v21 = vadd.f32 %v432_v61, %v368_v59  ;;  %v2930_v22 = vadd.f32 %v433_v62, %v369_v60  ;;  %v573_v30 = vadd.f32 %v2918_v3, %v2916_v2 }
  0x37   : > { %v435_v13 = vld [vmem:[%s2758_s24 + $0x118] sm:$0xff]  ;;  %v372_v14 = vld [vmem:[%s2753_s21 + $0x120] sm:$0xff]  ;;  %v373_v15 = vld [vmem:[%s2753_s21 + $0x128] sm:$0xff]  ;;  %v2937_v31 = vadd.f32 %v434_v10, %v370_v5 }
  0x38   : > { %562 = vadd.xlane.f32.xlu1 %v561_v45  ;;  %4154 = vst [vmem:[#allocation37_spill] sm:$0xff] %v2928_v21  ;;  %4155 = vst [vmem:[#allocation38_spill] sm:$0xff] %v2930_v22  ;;  %v436_v24 = vld [vmem:[%s2758_s24 + $0x120] sm:$0xff]  ;;  %v437_v25 = vld [vmem:[%s2758_s24 + $0x128] sm:$0xff]  ;;  %v2939_v34 = vadd.f32 %v435_v13, %v371_v6  ;;  %v576_v50 = vadd.f32 %v2930_v22, %v2928_v21 }
  0x39   : > { %565 = vadd.xlane.f32.xlu0 %v564_v54  ;;  %v374_v26 = vld [vmem:[%s2753_s21 + $0x130] sm:$0xff]  ;;  %4156 = vst [vmem:[#allocation39_spill] sm:$0xff] %v2937_v31  ;;  %v375_v35 = vld [vmem:[%s2753_s21 + $0x138] sm:$0xff]  ;;  %v376_v42 = vld [vmem:[%s2753_s21 + $0x140] sm:$0xff]  ;;  %v2950_v51 = vadd.f32 %v436_v24, %v372_v14  ;;  %v2952_v52 = vadd.f32 %v437_v25, %v373_v15 }
  0x3a   : > { %4157 = vst [vmem:[#allocation40_spill] sm:$0xff] %v2939_v34  ;;  %v438_v36 = vld [vmem:[%s2758_s24 + $0x130] sm:$0xff]  ;;  %v439_v41 = vld [vmem:[%s2758_s24 + $0x138] sm:$0xff]  ;;  %v377_v43 = vld [vmem:[%s2753_s21 + $0x148] sm:$0xff]  ;;  %v579_v53 = vadd.f32 %v2939_v34, %v2937_v31 }
  0x3b   : > { %v440_v44 = vld [vmem:[%s2758_s24 + $0x140] sm:$0xff]  ;;  %v441_v45 = vld [vmem:[%s2758_s24 + $0x148] sm:$0xff]  ;;  %4158 = vst [vmem:[#allocation41_spill] sm:$0xff] %v2950_v51  ;;  %4159 = vst [vmem:[#allocation42_spill] sm:$0xff] %v2952_v52  ;;  %v2956_v54 = vadd.f32 %v438_v36, %v374_v26  ;;  %v2958_v59 = vadd.f32 %v439_v41, %v375_v35  ;;  %v582_v5 = vadd.f32 %v2952_v52, %v2950_v51 }
  0x3c   : > { %568 = vadd.xlane.f32.xlu1 %v567_v1  ;;  %v378_v60 = vld [vmem:[%s2753_s21 + $0x150] sm:$0xff]  ;;  %v379_v61 = vld [vmem:[%s2753_s21 + $0x158] sm:$0xff]  ;;  %v2966_v6 = vadd.f32 %v440_v44, %v376_v42  ;;  %v2968_v10 = vadd.f32 %v441_v45, %v377_v43  ;;  %v2432_v25 = vld [vmem:[%s4017_s4 + $0x40] sm:$0xff]  }
  0x3d   : > { %571 = vadd.xlane.f32.xlu0 %v570_v16  ;;  %4160 = vst [vmem:[#allocation43_spill] sm:$0xff] %v2956_v54  ;;  %4161 = vst [vmem:[#allocation44_spill] sm:$0xff] %v2958_v59  ;;  %v442_v62 = vld [vmem:[%s2758_s24 + $0x150] sm:$0xff]  ;;  %v443_v1 = vld [vmem:[%s2758_s24 + $0x158] sm:$0xff]  ;;  %v585_v13 = vadd.f32 %v2958_v59, %v2956_v54  ;;  %2278 = vmatprep.subr.bf16.mxu0 %v2432_v25 }
  0x3e   : > { %4162 = vst [vmem:[#allocation45_spill] sm:$0xff] %v2966_v6  ;;  %4163 = vst [vmem:[#allocation46_spill] sm:$0xff] %v2968_v10  ;;  %v2972_v14 = vadd.f32 %v442_v62, %v378_v60  ;;  %v2974_v15 = vadd.f32 %v443_v1, %v379_v61  ;;  %v588_v16 = vadd.f32 %v2968_v10, %v2966_v6  ;;  %v2433_v26 = vld [vmem:[%s4017_s4] sm:$0xff]   ;;  %v382_v61 = vld [vmem:[%s2753_s21 + $0x170] sm:$0xff] }
  0x3f   : > { %2279 = vmatpush3.bf16.msra.mxu0 %v2433_v26  ;;  %v380_v41 = vld [vmem:[%s2753_s21 + $0x160] sm:$0xff] }
  0x40   : > { %574 = vadd.xlane.f32.xlu1 %v573_v30  ;;  %4164 = vst [vmem:[#allocation47_spill] sm:$0xff] %v2972_v14  ;;  %4165 = vst [vmem:[#allocation48_spill] sm:$0xff] %v2974_v15  ;;  %v591_v24 = vadd.f32 %v2974_v15, %v2972_v14  ;;  %v444_v42 = vld [vmem:[%s2758_s24 + $0x160] sm:$0xff] }
  0x41   : > { %577 = vadd.xlane.f32.xlu0 %v576_v50  ;;  %v381_v50 = vld [vmem:[%s2753_s21 + $0x168] sm:$0xff] }
  0x44   : > { %580 = vadd.xlane.f32.xlu1 %v579_v53  ;;  %v445_v53 = vld [vmem:[%s2758_s24 + $0x168] sm:$0xff] }
  0x45   : > { %583 = vadd.xlane.f32.xlu0 %v582_v5  ;;  %v2999_v5 = vadd.f32 %v444_v42, %v380_v41 }
  0x47   : > { %4168 = vst [vmem:[#allocation51_spill] sm:$0xff] %v2999_v5 }
  0x48   : > { %586 = vadd.xlane.f32.xlu1 %v585_v13  ;;  %v383_v13 = vld [vmem:[%s2753_s21 + $0x178] sm:$0xff] }
  0x49   : > { %589 = vadd.xlane.f32.xlu0 %v588_v16  ;;  %v446_v16 = vld [vmem:[%s2758_s24 + $0x170] sm:$0xff] }
  0x4c   : > { %592 = vadd.xlane.f32.xlu1 %v591_v24  ;;  %v447_v24 = vld [vmem:[%s2758_s24 + $0x178] sm:$0xff] }
  0xae   : > { %v530_v30 = vpop.xlane.xlu0 %529 }
  0xaf   : > { %v625_v35 = vmul.f32 0.00390625, %v530_v30 }
  0xb1   : > { %v536_v36 = vpop.xlane.xlu1 %535  ;;  %v2989_v43 = vsub.f32 %v2764_v4, %v625_v35  ;;  %v2992_v44 = vsub.f32 %v2768_v7, %v625_v35 }
  0xb2   : > { %v627_v45 = vmul.f32 0.00390625, %v536_v36  ;;  %v533_v60 = vpop.xlane.xlu0 %532  ;;  %v3012_v36 = vadd.f32 %v445_v53, %v381_v50 }
  0xb3   : > { %4166 = vst [vmem:[#allocation49_spill] sm:$0xff] %v2989_v43  ;;  %4167 = vst [vmem:[#allocation50_spill] sm:$0xff] %v2992_v44  ;;  %v626_v62 = vmul.f32 0.00390625, %v533_v60  ;;  %v721_v1 = vmul.f32 %v2989_v43, %v2989_v43  ;;  %v722_v30 = vmul.f32 %v2992_v44, %v2992_v44  ;;  %v450_v43 = vld [vmem:[%s2758_s24 + $0x190] sm:$0xff] }
  0xb4   : > { %v3005_v25 = vsub.f32 %v2782_v17, %v627_v45  ;;  %v3008_v26 = vsub.f32 %v2784_v18, %v627_v45  ;;  %4171 = vst [vmem:[#allocation54_spill] sm:$0xff] %v3012_v36  ;;  %v3020_v45 = vadd.f32 %v446_v16, %v382_v61  ;;  %v3022_v18 = vadd.f32 %v447_v24, %v383_v13 }
  0xb5   : > { %v539_v35 = vpop.xlane.xlu1 %538  ;;  %v3015_v60 = vsub.f32 %v2773_v11, %v626_v62  ;;  %v3018_v41 = vsub.f32 %v2775_v12, %v626_v62  ;;  %v785_v17 = vadd.f32 %v722_v30, %v721_v1  ;;  %v594_v61 = vadd.f32 %v3012_v36, %v2999_v5  ;;  %v449_v12 = vld [vmem:[%s2758_s24 + $0x188] sm:$0xff]  ;;  %v386_v11 = vld [vmem:[%s2753_s21 + $0x190] sm:$0xff] }
  0xb6   : > { %4169 = vst [vmem:[#allocation52_spill] sm:$0xff] %v3005_v25  ;;  %4170 = vst [vmem:[#allocation53_spill] sm:$0xff] %v3008_v26  ;;  %v628_v42 = vmul.f32 0.00390625, %v539_v35  ;;  %v542_v7 = vpop.xlane.xlu0 %541  ;;  %v725_v13 = vmul.f32 %v3005_v25, %v3005_v25  ;;  %v726_v24 = vmul.f32 %v3008_v26, %v3008_v26  ;;  %v384_v35 = vld [vmem:[%s2753_s21 + $0x180] sm:$0xff] }
  0xb7   : > { %4172 = vst [vmem:[#allocation55_spill] sm:$0xff] %v3015_v60  ;;  %4173 = vst [vmem:[#allocation56_spill] sm:$0xff] %v3018_v41  ;;  %v723_v62 = vmul.f32 %v3015_v60, %v3015_v60  ;;  %v724_v1 = vmul.f32 %v3018_v41, %v3018_v41  ;;  %786 = vadd.xlane.f32.xlu0 %v785_v17  ;;  %v629_v16 = vmul.f32 0.00390625, %v542_v7  ;;  %v387_v41 = vld [vmem:[%s2753_s21 + $0x198] sm:$0xff] }
  0xb8   : > { %4174 = vst [vmem:[#allocation57_spill] sm:$0xff] %v3020_v45  ;;  %4175 = vst [vmem:[#allocation58_spill] sm:$0xff] %v3022_v18  ;;  %v3025_v50 = vsub.f32 %v2790_v23, %v628_v42  ;;  %v3028_v53 = vsub.f32 %v2798_v28, %v628_v42  ;;  %v448_v42 = vld [vmem:[%s2758_s24 + $0x180] sm:$0xff]  ;;  %v385_v23 = vld [vmem:[%s2753_s21 + $0x188] sm:$0xff]  ;;  %v597_v17 = vadd.f32 %v3022_v18, %v3020_v45 }
  0xb9   : > { %v545_v30 = vpop.xlane.xlu1 %544  ;;  %v788_v28 = vadd.f32 %v724_v1, %v723_v62  ;;  %v3047_v4 = vadd.f32 %v448_v42, %v384_v35  ;;  %v451_v62 = vld [vmem:[%s2758_s24 + $0x198] sm:$0xff]  ;;  %v3057_v1 = vsub.f32 %v2803_v32, %v629_v16  ;;  %v3060_v44 = vsub.f32 %v2805_v33, %v629_v16 }
  0xba   : > { %4176 = vst [vmem:[#allocation59_spill] sm:$0xff] %v3025_v50  ;;  %4177 = vst [vmem:[#allocation60_spill] sm:$0xff] %v3028_v53  ;;  %v630_v7 = vmul.f32 0.00390625, %v545_v30  ;;  %v727_v25 = vmul.f32 %v3025_v50, %v3025_v50  ;;  %v728_v26 = vmul.f32 %v3028_v53, %v3028_v53  ;;  %v548_v60 = vpop.xlane.xlu0 %547  ;;  %v3062_v30 = vadd.f32 %v449_v12, %v385_v23  ;;  %v391_v32 = vld [vmem:[%s2753_s21 + $0x1b8] sm:$0xff] }
  0xbb   : > { %789 = vadd.xlane.f32.xlu1 %v788_v28  ;;  %4178 = vst [vmem:[#allocation61_spill] sm:$0xff] %v3047_v4  ;;  %595 = vadd.xlane.f32.xlu0 %v594_v61  ;;  %4179 = vst [vmem:[#allocation62_spill] sm:$0xff] %v3057_v1  ;;  %v791_v28 = vadd.f32 %v726_v24, %v725_v13  ;;  %v3064_v35 = vadd.f32 %v450_v43, %v386_v11  ;;  %v631_v11 = vmul.f32 0.00390625, %v548_v60  ;;  %v452_v24 = vld [vmem:[%s2758_s24 + $0x1a0] sm:$0xff] }
  0xbc   : > { %4180 = vst [vmem:[#allocation63_spill] sm:$0xff] %v3060_v44  ;;  %4181 = vst [vmem:[#allocation64_spill] sm:$0xff] %v3062_v30  ;;  %v3066_v42 = vadd.f32 %v451_v62, %v387_v41  ;;  %v3069_v61 = vsub.f32 %v2812_v38, %v630_v7  ;;  %v3072_v16 = vsub.f32 %v2814_v39, %v630_v7  ;;  %v388_v41 = vld [vmem:[%s2753_s21 + $0x1a0] sm:$0xff]  ;;  %v453_v7 = vld [vmem:[%s2758_s24 + $0x1a8] sm:$0xff] }
  0xbd   : > { %4182 = vst [vmem:[#allocation65_spill] sm:$0xff] %v3064_v35  ;;  %v551_v50 = vpop.xlane.xlu1 %550  ;;  %v794_v33 = vadd.f32 %v728_v26, %v727_v25  ;;  %v600_v12 = vadd.f32 %v3062_v30, %v3047_v4  ;;  %v729_v23 = vmul.f32 %v3057_v1, %v3057_v1  ;;  %v730_v43 = vmul.f32 %v3060_v44, %v3060_v44  ;;  %v390_v26 = vld [vmem:[%s2753_s21 + $0x1b0] sm:$0xff]  ;;  %v455_v44 = vld [vmem:[%s2758_s24 + $0x1b8] sm:$0xff] }
  0xbe   : > { %4183 = vst [vmem:[#allocation66_spill] sm:$0xff] %v3066_v42  ;;  %4184 = vst [vmem:[#allocation67_spill] sm:$0xff] %v3069_v61  ;;  %v554_v13 = vpop.xlane.xlu0 %553  ;;  %v603_v25 = vadd.f32 %v3066_v42, %v3064_v35  ;;  %v731_v60 = vmul.f32 %v3069_v61, %v3069_v61  ;;  %v732_v39 = vmul.f32 %v3072_v16, %v3072_v16  ;;  %v454_v1 = vld [vmem:[%s2758_s24 + $0x1b0] sm:$0xff]  ;;  %v2434_v61 = vld [vmem:[%s4017_s4 + $0x48] sm:$0xff]  }
  0xbf   : > { %598 = vadd.xlane.f32.xlu1 %v597_v17  ;;  %4185 = vst [vmem:[#allocation68_spill] sm:$0xff] %v3072_v16  ;;  %792 = vadd.xlane.f32.xlu0 %v791_v28  ;;  %v389_v17 = vld [vmem:[%s2753_s21 + $0x1a8] sm:$0xff]  ;;  %v632_v28 = vmul.f32 0.00390625, %v551_v50  ;;  %v3091_v38 = vadd.f32 %v452_v24, %v388_v41  ;;  %v3097_v30 = vsub.f32 %v2824_v47, %v631_v11  ;;  %v459_v16 = vld [vmem:[%s2758_s24 + $0x1d8] sm:$0xff] }
  0xc0   : > { %v3100_v42 = vsub.f32 %v2826_v48, %v631_v11  ;;  %v3102_v50 = vadd.f32 %v453_v7, %v389_v17  ;;  %v2435_v41 = vld [vmem:[%s4017_s4 + $0x8] sm:$0xff]   ;;  %v3112_v24 = vadd.f32 %v455_v44, %v391_v32  ;;  %2280 = vmatprep.subr.bf16.mxu0 %v2434_v61  ;;  %v800_v17 = vadd.f32 %v732_v39, %v731_v60  ;;  %v392_v7 = vld [vmem:[%s2753_s21 + $0x1c0] sm:$0xff]  ;;  %v2436_v39 = vld [vmem:[%s4017_s4 + $0x50] sm:$0xff]  }
  0xc1   : > { %v557_v62 = vpop.xlane.xlu1 %556  ;;  %4186 = vst [vmem:[#allocation69_spill] sm:$0xff] %v3091_v38  ;;  %4187 = vst [vmem:[#allocation70_spill] sm:$0xff] %v3097_v30  ;;  %2281 = vmatpush3.bf16.msra.mxu0 %v2435_v41  ;;  %v633_v32 = vmul.f32 0.00390625, %v554_v13  ;;  %v733_v44 = vmul.f32 %v3097_v30, %v3097_v30  ;;  %v2437_v13 = vld [vmem:[%s4017_s4 + $0x10] sm:$0xff]   ;;  %v395_v30 = vld [vmem:[%s2753_s21 + $0x1d8] sm:$0xff] }
  0xc2   : > { %v560_v53 = vpop.xlane.xlu0 %559  ;;  %4188 = vst [vmem:[#allocation71_spill] sm:$0xff] %v3100_v42  ;;  %4189 = vst [vmem:[#allocation72_spill] sm:$0xff] %v3102_v50  ;;  %v734_v61 = vmul.f32 %v3100_v42, %v3100_v42  ;;  %v394_v41 = vld [vmem:[%s2753_s21 + $0x1d0] sm:$0xff]  ;;  %2282 = vmatprep.subr.bf16.mxu0 %v2436_v39 }
  0xc3   : > { %795 = vadd.xlane.f32.xlu1 %v794_v33  ;;  %601 = vadd.xlane.f32.xlu0 %v600_v12  ;;  %v797_v33 = vadd.f32 %v730_v43, %v729_v23  ;;  %v3110_v12 = vadd.f32 %v454_v1, %v390_v26  ;;  %4191 = vst [vmem:[#allocation74_spill] sm:$0xff] %v3112_v24  ;;  %v393_v26 = vld [vmem:[%s2753_s21 + $0x1c8] sm:$0xff]  ;;  %v458_v42 = vld [vmem:[%s2758_s24 + $0x1d0] sm:$0xff] }
  0xc4   : > { %v3115_v23 = vsub.f32 %v2836_v56, %v632_v28  ;;  %v3118_v43 = vsub.f32 %v2838_v57, %v632_v28  ;;  %v606_v1 = vadd.f32 %v3102_v50, %v3091_v38  ;;  %v457_v28 = vld [vmem:[%s2758_s24 + $0x1c8] sm:$0xff]  ;;  %v634_v57 = vmul.f32 0.00390625, %v557_v62 }
  0xc5   : > { %4190 = vst [vmem:[#allocation73_spill] sm:$0xff] %v3110_v12  ;;  %v563_v11 = vpop.xlane.xlu1 %562  ;;  %2283 = vmatpush3.bf16.msra.mxu0 %v2437_v13  ;;  %v803_v62 = vadd.f32 %v734_v61, %v733_v44  ;;  %v3154_v39 = vadd.f32 %v457_v28, %v393_v26  ;;  %v3162_v13 = vadd.f32 %v458_v42, %v394_v41  ;;  %v396_v26 = vld [vmem:[%s2753_s21 + $0x1e0] sm:$0xff] }
  0xc6   : > { %4192 = vst [vmem:[#allocation75_spill] sm:$0xff] %v3115_v23  ;;  %4193 = vst [vmem:[#allocation76_spill] sm:$0xff] %v3118_v43  ;;  %v566_v60 = vpop.xlane.xlu0 %565  ;;  %v735_v56 = vmul.f32 %v3115_v23, %v3115_v23  ;;  %v736_v48 = vmul.f32 %v3118_v43, %v3118_v43  ;;  %v3170_v44 = vsub.f32 %v2858_v9, %v634_v57  ;;  %v2441_v41 = vld [vmem:[%s4017_s4 + $0x20] sm:$0xff]   ;;  %v399_v9 = vld [vmem:[%s2753_s21 + $0x1f8] sm:$0xff] }
  0xc7   : > { %604 = vadd.xlane.f32.xlu1 %v603_v25  ;;  %798 = vadd.xlane.f32.xlu0 %v797_v33  ;;  %v456_v25 = vld [vmem:[%s2758_s24 + $0x1c0] sm:$0xff]  ;;  %v609_v33 = vadd.f32 %v3112_v24, %v3110_v12  ;;  %v3149_v24 = vsub.f32 %v2846_v63, %v633_v32  ;;  %4197 = vst [vmem:[#allocation80_spill] sm:$0xff] %v3154_v39  ;;  %4198 = vst [vmem:[#allocation81_spill] sm:$0xff] %v3162_v13  ;;  %v637_v43 = vmul.f32 0.00390625, %v566_v60 }
  0xc8   : > { %v3143_v47 = vadd.f32 %v456_v25, %v392_v7  ;;  %v2438_v7 = vld [vmem:[%s4017_s4 + $0x58] sm:$0xff]   ;;  %v3164_v63 = vadd.f32 %v459_v16, %v395_v30  ;;  %v806_v61 = vadd.f32 %v736_v48, %v735_v56  ;;  %v397_v16 = vld [vmem:[%s2753_s21 + $0x1e8] sm:$0xff]  ;;  %v2440_v48 = vld [vmem:[%s4017_s4 + $0x60] sm:$0xff]  }
  0xc9   : > { %4195 = vst [vmem:[#allocation78_spill] sm:$0xff] %v3149_v24  ;;  %v569_v23 = vpop.xlane.xlu1 %568  ;;  %v2439_v25 = vld [vmem:[%s4017_s4 + $0x18] sm:$0xff]   ;;  %2284 = vmatprep.subr.bf16.mxu0 %v2438_v7  ;;  %v737_v30 = vmul.f32 %v3149_v24, %v3149_v24  ;;  %v461_v56 = vld [vmem:[%s2758_s24 + $0x1e8] sm:$0xff] }
  0xca   : > { %4194 = vst [vmem:[#allocation77_spill] sm:$0xff] %v3143_v47  ;;  %4199 = vst [vmem:[#allocation82_spill] sm:$0xff] %v3164_v63  ;;  %v572_v28 = vpop.xlane.xlu0 %571  ;;  %2285 = vmatpush3.bf16.msra.mxu0 %v2439_v25  ;;  %v636_v25 = vmul.f32 0.00390625, %v563_v11 }
  0xcb   : > { %801 = vadd.xlane.f32.xlu1 %v800_v17  ;;  %607 = vadd.xlane.f32.xlu0 %v606_v1  ;;  %v3152_v17 = vsub.f32 %v2848_v0, %v633_v32  ;;  %v635_v1 = vmul.f32 0.00390625, %v560_v53  ;;  %v3167_v32 = vsub.f32 %v2856_v8, %v634_v57  ;;  %v612_v53 = vadd.f32 %v3154_v39, %v3143_v47  ;;  %v460_v57 = vld [vmem:[%s2758_s24 + $0x1e0] sm:$0xff]  ;;  %v462_v8 = vld [vmem:[%s2758_s24 + $0x1f0] sm:$0xff]  ;;  %v463_v0 = vld [vmem:[%s2758_s24 + $0x1f8] sm:$0xff]  ;;  %s2142_s24 = sshll.u32 %s3773_s20, 4  ;;  %s3964_s24 = int_to_ptr.vmem [resolvable:$true] %s2142_s24 }
  0xcc   : > { %2286 = vmatprep.subr.bf16.mxu0 %v2440_v48  ;;  %v3204_v11 = vadd.f32 %v460_v57, %v396_v26  ;;  %v3213_v60 = vadd.f32 %v463_v0, %v399_v9  ;;  %v3222_v26 = vsub.f32 %v2878_v29, %v636_v25  ;;  %v3229_v0 = vsub.f32 %v2886_v37, %v637_v43  ;;  %s2588_s26 = scalar_lea.vmem %s3964_s24, 8192  ;;  %p2595_p0 = scmp.lt.s32.totalorder %s3964_s24, %s2593_s12 }
  0xcd   : > { %4196 = vst [vmem:[#allocation79_spill] sm:$0xff] %v3152_v17  ;;  %4200 = vst [vmem:[#allocation83_spill] sm:$0xff] %v3167_v32  ;;  %v738_v42 = vmul.f32 %v3152_v17, %v3152_v17  ;;  %v3193_v7 = vsub.f32 %v2868_v20, %v635_v1  ;;  %v575_v24 = vpop.xlane.xlu1 %574  ;;  %v615_v17 = vadd.f32 %v3164_v63, %v3162_v13  ;;  %p2589_p11 = scmp.ne.s32.totalorder %s3964_s24, %s2588_s26  ;;  %p2596_p1 = scmp.lt.s32.totalorder %s2594_s13, %s2588_s26 }
  0xce   : > { %v739_v39 = vmul.f32 %v3167_v32, %v3167_v32  ;;  %2287 = vmatpush3.bf16.msra.mxu0 %v2441_v41  ;;  %4201 = vst [vmem:[#allocation84_spill] sm:$0xff] %v3204_v11  ;;  %v3206_v20 = vadd.f32 %v461_v56, %v397_v16  ;;  %4204 = vst [vmem:[#allocation87_spill] sm:$0xff] %v3213_v60  ;;  %v578_v63 = vpop.xlane.xlu0 %577  ;;  %v2443_v32 = vld [vmem:[%s4017_s4 + $0x28] sm:$0xff]   ;;  %v3232_v16 = vsub.f32 %v2888_v40, %v637_v43  ;;  %v2444_v41 = vld [vmem:[%s4017_s4 + $0x70] sm:$0xff]  }
  0xcf   : > { %610 = vadd.xlane.f32.xlu1 %v609_v33  ;;  %804 = vadd.xlane.f32.xlu0 %v803_v62  ;;  %v398_v33 = vld [vmem:[%s2753_s21 + $0x1f0] sm:$0xff]  ;;  %v3190_v62 = vsub.f32 %v2866_v19, %v635_v1  ;;  %v740_v19 = vmul.f32 %v3170_v44, %v3170_v44  ;;  %v809_v1 = vadd.f32 %v738_v42, %v737_v30  ;;  %v638_v42 = vmul.f32 0.00390625, %v569_v23  ;;  %s2277_s21 = sshll.u32 %s2722_s9, 13  ;;  %s3972_s9 = scalar_lea.sflag [#allocation3], %s317_s18 }
  0xd0   : > { %4202 = vst [vmem:[#allocation85_spill] sm:$0xff] %v3206_v20  ;;  %v3211_v48 = vadd.f32 %v462_v8, %v398_v33  ;;  %v742_v8 = vmul.f32 %v3193_v7, %v3193_v7  ;;  %v618_v57 = vadd.f32 %v3206_v20, %v3204_v11  ;;  %v639_v56 = vmul.f32 0.00390625, %v572_v28  ;;  %s3962_s25 = scalar_lea.hbm %s4021_s8, %s2277_s21  ;;  %p2590_p12 = pnand %p2589_p11, %p2739_p5 }
  0xd1   : > { %v741_v30 = vmul.f32 %v3190_v62, %v3190_v62  ;;  %v812_v9 = vadd.f32 %v740_v19, %v739_v39  ;;  %v581_v33 = vpop.xlane.xlu1 %580  ;;  %v2445_v19 = vld [vmem:[%s4017_s4 + $0x30] sm:$0xff]   ;;  %v640_v39 = vmul.f32 0.00390625, %v575_v24  ;;  %v3249_v28 = vsub.f32 %v2896_v46, %v638_v42  ;;  %p2597_p2 = por %p2596_p1, %p2595_p0 }
  0xd2   : > { %4203 = vst [vmem:[#allocation86_spill] sm:$0xff] %v3211_v48  ;;  %v3257_v24 = vsub.f32 %v2906_v55, %v639_v56  ;;  %p2591_p13 = pneg %p2590_p12 }
  0xd3   : > { %807 = vadd.xlane.f32.xlu1 %v806_v61  ;;  %613 = vadd.xlane.f32.xlu0 %v612_v53  ;;  %v2442_v61 = vld [vmem:[%s4017_s4 + $0x68] sm:$0xff]   ;;  %v3219_v53 = vsub.f32 %v2876_v27, %v636_v25  ;;  %v815_v23 = vadd.f32 %v742_v8, %v741_v30  ;;  %v3252_v25 = vsub.f32 %v2898_v49, %v638_v42  ;;  %v584_v30 = vpop.xlane.xlu0 %583  ;;  %v2446_v42 = vld [vmem:[%s4017_s4 + $0x78] sm:$0xff]  }
  0xd4   : > { %2288 = vmatprep.subr.bf16.mxu0 %v2442_v61  ;;  %v745_v61 = vmul.f32 %v3229_v0, %v3229_v0  ;;  %v3260_v8 = vsub.f32 %v2908_v58, %v639_v56  ;;  %v642_v58 = vmul.f32 0.00390625, %v581_v33  ;;  %v747_v46 = vmul.f32 %v3249_v28, %v3249_v28  ;;  %v4215_v27 = vld [vmem:[#allocation56_spill] sm:$0xff]  ;;  %p2598_p3 = pnand %p2597_p2, %p2591_p13 }
  0xd5   : > { %2289 = vmatpush3.bf16.msra.mxu0 %v2443_v32  ;;  %v743_v43 = vmul.f32 %v3219_v53, %v3219_v53  ;;  %v744_v32 = vmul.f32 %v3222_v26, %v3222_v26  ;;  %v587_v55 = vpop.xlane.xlu1 %586  ;;  %v749_v33 = vmul.f32 %v3257_v24, %v3257_v24 }
  0xd6   : > { %2290 = vmatprep.subr.bf16.mxu0 %v2444_v41  ;;  %v3274_v41 = vsub.f32 %v2918_v3, %v640_v39  ;;  %v643_v3 = vmul.f32 0.00390625, %v584_v30  ;;  %v644_v30 = vmul.f32 0.00390625, %v587_v55 }
  0xd7   : > { %616 = vadd.xlane.f32.xlu1 %v615_v17  ;;  %810 = vadd.xlane.f32.xlu0 %v809_v1  ;;  %v621_v17 = vadd.f32 %v3213_v60, %v3211_v48  ;;  %v641_v1 = vmul.f32 0.00390625, %v578_v63  ;;  %v2447_v63 = vld [vmem:[%s4017_s4 + $0x38] sm:$0xff]   ;;  %v818_v56 = vadd.f32 %v744_v32, %v743_v43  ;;  %v590_v43 = vpop.xlane.xlu0 %589  ;;  %v3291_v32 = vsub.f32 %v2937_v31, %v642_v58 }
  0xd8   : > { %v3305_v31 = vsub.f32 %v2950_v51, %v643_v3 }
  0xd9   : > { %2291 = vmatpush3.bf16.msra.mxu0 %v2445_v19  ;;  %v3277_v19 = vsub.f32 %v2928_v21, %v641_v1  ;;  %v3280_v49 = vsub.f32 %v2930_v22, %v641_v1  ;;  %v3294_v1 = vsub.f32 %v2939_v34, %v642_v58  ;;  %v3308_v58 = vsub.f32 %v2952_v52, %v643_v3  ;;  %v593_v21 = vpop.xlane.xlu1 %592 }
  0xda   : > { %2292 = vmatprep.subr.bf16.mxu0 %v2446_v42  ;;  %v645_v22 = vmul.f32 0.00390625, %v590_v43  ;;  %v646_v3 = vmul.f32 0.00390625, %v593_v21  ;;  %v757_v43 = vmul.f32 %v3305_v31, %v3305_v31 }
  0xdb   : > { %813 = vadd.xlane.f32.xlu1 %v812_v9  ;;  %619 = vadd.xlane.f32.xlu0 %v618_v57  ;;  %v746_v9 = vmul.f32 %v3232_v16, %v3232_v16  ;;  %v3271_v57 = vsub.f32 %v2916_v2, %v640_v39  ;;  %v748_v2 = vmul.f32 %v3252_v25, %v3252_v25 }
  0xdc   : > { %v756_v55 = vmul.f32 %v3294_v1, %v3294_v1  ;;  %v3334_v21 = vsub.f32 %v2974_v15, %v646_v3 }
  0xdd   : > { %v821_v39 = vadd.f32 %v746_v9, %v745_v61  ;;  %2293 = vmatpush3.bf16.msra.mxu0 %v2447_v63  ;;  %v751_v42 = vmul.f32 %v3271_v57, %v3271_v57  ;;  %v824_v61 = vadd.f32 %v748_v2, %v747_v46  ;;  %v753_v9 = vmul.f32 %v3277_v19, %v3277_v19 }
  0xde   : > { %v754_v63 = vmul.f32 %v3280_v49, %v3280_v49  ;;  %v755_v46 = vmul.f32 %v3291_v32, %v3291_v32  ;;  %v3315_v2 = vsub.f32 %v2956_v54, %v644_v30 }
  0xdf   : > { %622 = vadd.xlane.f32.xlu1 %v621_v17  ;;  %816 = vadd.xlane.f32.xlu0 %v815_v23  ;;  %v750_v17 = vmul.f32 %v3260_v8, %v3260_v8  ;;  %v752_v23 = vmul.f32 %v3274_v41, %v3274_v41 }
  0xe1   : > { %v827_v34 = vadd.f32 %v750_v17, %v749_v33  ;;  %v830_v40 = vadd.f32 %v752_v23, %v751_v42  ;;  %v3321_v33 = vsub.f32 %v2966_v6, %v645_v22  ;;  %v3324_v17 = vsub.f32 %v2968_v10, %v645_v22 }
  0xe2   : > { %v758_v42 = vmul.f32 %v3308_v58, %v3308_v58  ;;  %v836_v23 = vadd.f32 %v756_v55, %v755_v46  ;;  %v764_v55 = vmul.f32 %v3334_v21, %v3334_v21 }
  0xe3   : > { %819 = vadd.xlane.f32.xlu1 %v818_v56  ;;  %822 = vadd.xlane.f32.xlu0 %v821_v39  ;;  %v3318_v56 = vsub.f32 %v2958_v59, %v644_v30  ;;  %v833_v39 = vadd.f32 %v754_v63, %v753_v9  ;;  %v761_v9 = vmul.f32 %v3321_v33, %v3321_v33 }
  0xe4   : > { %v839_v30 = vadd.f32 %v758_v42, %v757_v43  ;;  %v1043_v42 = vlaneseq }
  0xe5   : > { %v760_v22 = vmul.f32 %v3318_v56, %v3318_v56 }
  0xe6   : > { %v1044_v59 = vshrl.u32 %v1043_v42, 7 }
  0xe7   : > { %825 = vadd.xlane.f32.xlu1 %v824_v61  ;;  %828 = vadd.xlane.f32.xlu0 %v827_v34  ;;  %v3331_v61 = vsub.f32 %v2972_v14, %v646_v3  ;;  %v759_v34 = vmul.f32 %v3315_v2, %v3315_v2 }
  0xe9   : > { %v842_v63 = vadd.f32 %v760_v22, %v759_v34  ;;  %v763_v46 = vmul.f32 %v3331_v61, %v3331_v61 }
  0xeb   : > { %831 = vadd.xlane.f32.xlu1 %v830_v40  ;;  %834 = vadd.xlane.f32.xlu0 %v833_v39  ;;  %v762_v40 = vmul.f32 %v3324_v17, %v3324_v17  ;;  %v848_v15 = vadd.f32 %v764_v55, %v763_v46  ;;  %v3364_v55 = vsub.s32 0, %v1044_v59 }
  0xed   : > { %v845_v3 = vadd.f32 %v762_v40, %v761_v9  ;;  %4205 = vst [vmem:[#allocation88_spill] sm:$0xff] %v3364_v55 }
  0xef   : > { %837 = vadd.xlane.f32.xlu1 %v836_v23  ;;  %840 = vadd.xlane.f32.xlu0 %v839_v30 }
  0xf3   : > { %843 = vadd.xlane.f32.xlu1 %v842_v63  ;;  %846 = vadd.xlane.f32.xlu0 %v845_v3  ;;  %v3366_v3 = vsub.s32 1, %v1044_v59  ;;  %v1117_v59 = vld [vmem:[%s4016_s3] sm:$0x3] }
  0xf5   : > { %4206 = vst [vmem:[#allocation89_spill] sm:$0xff] %v3366_v3 }
  0xf7   : > { %849 = vadd.xlane.f32.xlu1 %v848_v15 }
 0x144   : > { %v787_v39 = vpop.xlane.xlu0 %786 }
 0x145   : > { %v881_v43 = vmul.f32 0.00390625, %v787_v39 }
 0x147   : > { %v913_v14 = vadd.f32 1e-05, %v881_v43 }
 0x148   : > { %v790_v10 = vpop.xlane.xlu1 %789  ;;  %v596_v23 = vpop.xlane.xlu0 %595 }
 0x149   : > { %v882_v6 = vmul.f32 0.00390625, %v790_v10  ;;  %2460 = vrsqrt.f32 %v913_v14  ;;  %v647_v34 = vmul.f32 0.00390625, %v596_v23  ;;  %v1041_v23 = vld [vmem:[%s4015_s2] sm:$0x3] }
 0x14b   : > { %v914_v22 = vadd.f32 1e-05, %v882_v6  ;;  %v3349_v54 = vsub.f32 %v2999_v5, %v647_v34  ;;  %v3352_v30 = vsub.f32 %v3012_v36, %v647_v34  ;;  %v4208_v36 = vld [vmem:[#allocation64_spill] sm:$0xff] }
 0x14c   : > { %v599_v9 = vpop.xlane.xlu1 %598  ;;  %v793_v40 = vpop.xlane.xlu0 %792 }
 0x14d   : > { %2462 = vrsqrt.f32 %v914_v22  ;;  %v648_v15 = vmul.f32 0.00390625, %v599_v9  ;;  %v883_v63 = vmul.f32 0.00390625, %v793_v40  ;;  %v765_v46 = vmul.f32 %v3349_v54, %v3349_v54 }
 0x14e   : > { %v766_v10 = vmul.f32 %v3352_v30, %v3352_v30 }
 0x14f   : > { %v3359_v6 = vsub.f32 %v3020_v45, %v648_v15  ;;  %v3362_v14 = vsub.f32 %v3022_v18, %v648_v15  ;;  %v915_v39 = vadd.f32 1e-05, %v883_v63 }
 0x150   : > { %v796_v43 = vpop.xlane.xlu1 %795  ;;  %v851_v42 = vadd.f32 %v766_v10, %v765_v46  ;;  %v602_v22 = vpop.xlane.xlu0 %601  ;;  %v3379_v10 = vrot.slane %v1041_v23, %v3364_v55 }
 0x151   : > { %v884_v34 = vmul.f32 0.00390625, %v796_v43  ;;  %v767_v9 = vmul.f32 %v3359_v6, %v3359_v6  ;;  %v768_v15 = vmul.f32 %v3362_v14, %v3362_v14  ;;  %2464 = vrsqrt.f32 %v915_v39 }
 0x152   : > { %v649_v40 = vmul.f32 0.00390625, %v602_v22  ;;  %852 = vadd.xlane.f32.xlu0 %v851_v42  ;;  %v3382_v43 = vrot.slane %v1041_v23, %v3366_v3  ;;  %v3391_v39 = vrot.slane %v1117_v59, %v3364_v55  ;;  %v4210_v22 = vld [vmem:[#allocation50_spill] sm:$0xff] }
 0x153   : > { %v916_v63 = vadd.f32 1e-05, %v884_v34  ;;  %v854_v46 = vadd.f32 %v768_v15, %v767_v9  ;;  %v2461_v18 = vpop.eup %2460  ;;  %v4211_v15 = vld [vmem:[#allocation49_spill] sm:$0xff] }
 0x154   : > { %v3385_v45 = vsub.f32 %v3047_v4, %v649_v40  ;;  %v3388_v5 = vsub.f32 %v4208_v36, %v649_v40  ;;  %v605_v52 = vpop.xlane.xlu1 %604  ;;  %v799_v34 = vpop.xlane.xlu0 %798  ;;  %v978_v9 = vmul.f32 %v2461_v18, %v4210_v22  ;;  %v977_v23 = vmul.f32 %v2461_v18, %v4211_v15 }
 0x155   : > { %2466 = vrsqrt.f32 %v916_v63  ;;  %v650_v42 = vmul.f32 0.00390625, %v605_v52  ;;  %855 = vadd.xlane.f32.xlu1 %v854_v46  ;;  %v885_v51 = vmul.f32 0.00390625, %v799_v34  ;;  %v3400_v36 = vrot.slane %v1117_v59, %v3366_v3  ;;  %v4213_v52 = vld [vmem:[#allocation66_spill] sm:$0xff] }
 0x156   : > { %4207 = vst [vmem:[#allocation90_spill] sm:$0xff] %v3385_v45  ;;  %4209 = vst [vmem:[#allocation91_spill] sm:$0xff] %v3388_v5  ;;  %v769_v4 = vmul.f32 %v3385_v45, %v3385_v45  ;;  %v770_v40 = vmul.f32 %v3388_v5, %v3388_v5  ;;  %v1054_v22 = vmul.f32 %v3382_v43, %v978_v9  ;;  %v4216_v45 = vld [vmem:[#allocation55_spill] sm:$0xff] }
 0x157   : > { %v2463_v37 = vpop.eup %2462  ;;  %v3403_v63 = vsub.f32 %v3064_v35, %v650_v42  ;;  %v3406_v46 = vsub.f32 %v4213_v52, %v650_v42  ;;  %v1053_v18 = vmul.f32 %v3379_v10, %v977_v23  ;;  %v917_v34 = vadd.f32 1e-05, %v885_v51 }
 0x158   : > { %v802_v15 = vpop.xlane.xlu1 %801  ;;  %v857_v29 = vadd.f32 %v770_v40, %v769_v4  ;;  %v980_v55 = vmul.f32 %v2463_v37, %v4215_v27  ;;  %v979_v5 = vmul.f32 %v2463_v37, %v4216_v45  ;;  %v608_v3 = vpop.xlane.xlu0 %607  ;;  %v1130_v27 = vadd.f32 %v3400_v36, %v1054_v22 }
 0x159   : > { %4212 = vst [vmem:[#allocation50_spill] sm:$0xff] %v3403_v63  ;;  %4214 = vst [vmem:[#allocation49_spill] sm:$0xff] %v3406_v46  ;;  %v886_v59 = vmul.f32 0.00390625, %v802_v15  ;;  %v771_v35 = vmul.f32 %v3403_v63, %v3403_v63  ;;  %v772_v42 = vmul.f32 %v3406_v46, %v3406_v46  ;;  %2468 = vrsqrt.f32 %v917_v34 }
 0x15a   : > { %v651_v52 = vmul.f32 0.00390625, %v608_v3  ;;  %858 = vadd.xlane.f32.xlu0 %v857_v29  ;;  %v1056_v9 = vmul.f32 %v3382_v43, %v980_v55  ;;  %v1055_v51 = vmul.f32 %v3379_v10, %v979_v5  ;;  %v1129_v37 = vadd.f32 %v3391_v39, %v1053_v18 }
 0x15b   : > { %v918_v4 = vadd.f32 1e-05, %v886_v59  ;;  %v860_v23 = vadd.f32 %v772_v42, %v771_v35  ;;  %v2465_v45 = vpop.eup %2464  ;;  %v4217_v35 = vld [vmem:[#allocation53_spill] sm:$0xff]  ;;  %v4218_v59 = vld [vmem:[#allocation52_spill] sm:$0xff] }
 0x15c   : > { %v3421_v40 = vsub.f32 %v3091_v38, %v651_v52  ;;  %v3424_v15 = vsub.f32 %v3102_v50, %v651_v52  ;;  %v611_v34 = vpop.xlane.xlu1 %610  ;;  %v1132_v29 = vadd.f32 %v3400_v36, %v1056_v9  ;;  %v1131_v55 = vadd.f32 %v3391_v39, %v1055_v51  ;;  %v805_v3 = vpop.xlane.xlu0 %804  ;;  %v4220_v9 = vld [vmem:[#allocation74_spill] sm:$0xff] }
 0x15d   : > { %2470 = vrsqrt.f32 %v918_v4  ;;  %v652_v5 = vmul.f32 0.00390625, %v611_v34  ;;  %861 = vadd.xlane.f32.xlu1 %v860_v23  ;;  %v982_v22 = vmul.f32 %v2465_v45, %v4217_v35  ;;  %v981_v18 = vmul.f32 %v2465_v45, %v4218_v59 }
 0x15e   : > { %v887_v42 = vmul.f32 0.00390625, %v805_v3  ;;  %v1194_v63 = vpack.c.bf16 %v1132_v29, %v1130_v27  ;;  %v1193_v38 = vpack.c.bf16 %v1131_v55, %v1129_v37  ;;  %v773_v52 = vmul.f32 %v3421_v40, %v3421_v40  ;;  %v4222_v27 = vld [vmem:[#allocation60_spill] sm:$0xff]  ;;  %v4223_v29 = vld [vmem:[#allocation59_spill] sm:$0xff] }
 0x15f   : > { %v2467_v50 = vpop.eup %2466  ;;  %v3433_v46 = vsub.f32 %v3110_v12, %v652_v5  ;;  %v3436_v51 = vsub.f32 %v4220_v9, %v652_v5  ;;  %v774_v4 = vmul.f32 %v3424_v15, %v3424_v15  ;;  %v1058_v23 = vmul.f32 %v3382_v43, %v982_v22 }
 0x160   : > { %v919_v34 = vadd.f32 1e-05, %v887_v42  ;;  %v808_v45 = vpop.xlane.xlu1 %807  ;;  %1392 = vmatprep.mubr.bf16.mxu0 %v1194_v63  ;;  %v984_v37 = vmul.f32 %v2467_v50, %v4222_v27  ;;  %v983_v55 = vmul.f32 %v2467_v50, %v4223_v29  ;;  %v1057_v3 = vmul.f32 %v3379_v10, %v981_v18  ;;  %v614_v59 = vpop.xlane.xlu0 %613 }
 0x161   : > { %4219 = vst [vmem:[#allocation56_spill] sm:$0xff] %v3433_v46  ;;  %4221 = vst [vmem:[#allocation55_spill] sm:$0xff] %v3436_v51  ;;  %v888_v35 = vmul.f32 0.00390625, %v808_v45  ;;  %1393 = vmatmul.mubr.bf16.vlgmr.msra.gmra.mrb[0].mxu0 %v1193_v38  ;;  %v863_v12 = vadd.f32 %v774_v4, %v773_v52  ;;  %v775_v5 = vmul.f32 %v3433_v46, %v3433_v46  ;;  %v653_v22 = vmul.f32 0.00390625, %v614_v59  ;;  %v4225_v52 = vld [vmem:[#allocation80_spill] sm:$0xff] }
 0x162   : > { %v776_v9 = vmul.f32 %v3436_v51, %v3436_v51  ;;  %2472 = vrsqrt.f32 %v919_v34  ;;  %v1060_v63 = vmul.f32 %v3382_v43, %v984_v37  ;;  %v1134_v50 = vadd.f32 %v3400_v36, %v1058_v23  ;;  %v4227_v23 = vld [vmem:[#allocation63_spill] sm:$0xff] }
 0x163   : > { %v920_v42 = vadd.f32 1e-05, %v888_v35  ;;  %864 = vadd.xlane.f32.xlu0 %v863_v12  ;;  %v1059_v18 = vmul.f32 %v3379_v10, %v983_v55  ;;  %v2469_v45 = vpop.eup %2468  ;;  %v3452_v38 = vsub.f32 %v3143_v47, %v653_v22  ;;  %v3455_v4 = vsub.f32 %v4225_v52, %v653_v22 }
 0x164   : > { %v866_v27 = vadd.f32 %v776_v9, %v775_v5  ;;  %v617_v29 = vpop.xlane.xlu1 %616  ;;  %v1136_v34 = vadd.f32 %v3400_v36, %v1060_v63  ;;  %v1133_v59 = vadd.f32 %v3391_v39, %v1057_v3  ;;  %v811_v12 = vpop.xlane.xlu0 %810  ;;  %v986_v55 = vmul.f32 %v2469_v45, %v4227_v23  ;;  %v4228_v3 = vld [vmem:[#allocation82_spill] sm:$0xff] }
 0x165   : > { %4224 = vst [vmem:[#allocation53_spill] sm:$0xff] %v3452_v38  ;;  %4226 = vst [vmem:[#allocation52_spill] sm:$0xff] %v3455_v4  ;;  %2474 = vrsqrt.f32 %v920_v42  ;;  %v654_v37 = vmul.f32 0.00390625, %v617_v29  ;;  %v1135_v9 = vadd.f32 %v3391_v39, %v1059_v18  ;;  %v889_v35 = vmul.f32 0.00390625, %v811_v12 }
 0x166   : > { %867 = vadd.xlane.f32.xlu1 %v866_v27  ;;  %v1196_v5 = vpack.c.bf16 %v1136_v34, %v1134_v50  ;;  %v777_v47 = vmul.f32 %v3452_v38, %v3452_v38  ;;  %v778_v22 = vmul.f32 %v3455_v4, %v3455_v4  ;;  %v1062_v18 = vmul.f32 %v3382_v43, %v986_v55  ;;  %v4229_v34 = vld [vmem:[#allocation68_spill] sm:$0xff]  ;;  %v4230_v38 = vld [vmem:[#allocation62_spill] sm:$0xff]  ;;  %v4231_v55 = vld [vmem:[#allocation67_spill] sm:$0xff] }
 0x167   : > { %v2471_v52 = vpop.eup %2470  ;;  %v3466_v63 = vsub.f32 %v3162_v13, %v654_v37  ;;  %v3469_v42 = vsub.f32 %v4228_v3, %v654_v37  ;;  %v1195_v27 = vpack.c.bf16 %v1135_v9, %v1133_v59  ;;  %v921_v29 = vadd.f32 1e-05, %v889_v35 }
 0x168   : > { %v814_v23 = vpop.xlane.xlu1 %813  ;;  %1400 = vmatprep.mubr.bf16.mxu0 %v1196_v5  ;;  %v869_v50 = vadd.f32 %v778_v22, %v777_v47  ;;  %v988_v12 = vmul.f32 %v2471_v52, %v4229_v34  ;;  %v985_v46 = vmul.f32 %v2469_v45, %v4230_v38  ;;  %v620_v4 = vpop.xlane.xlu0 %619  ;;  %v987_v47 = vmul.f32 %v2471_v52, %v4231_v55 }
 0x169   : > { %v890_v51 = vmul.f32 0.00390625, %v814_v23  ;;  %1401 = vmatmul.mubr.bf16.gmra.mrb[4].mxu0 %v1195_v27  ;;  %v779_v13 = vmul.f32 %v3466_v63, %v3466_v63  ;;  %v780_v37 = vmul.f32 %v3469_v42, %v3469_v42  ;;  %2476 = vrsqrt.f32 %v921_v29 }
 0x16a   : > { %v655_v59 = vmul.f32 0.00390625, %v620_v4  ;;  %870 = vadd.xlane.f32.xlu0 %v869_v50  ;;  %v1064_v9 = vmul.f32 %v3382_v43, %v988_v12  ;;  %v1138_v45 = vadd.f32 %v3400_v36, %v1062_v18  ;;  %v1061_v38 = vmul.f32 %v3379_v10, %v985_v46  ;;  %v4232_v18 = vld [vmem:[#allocation71_spill] sm:$0xff] }
 0x16b   : > { %v922_v35 = vadd.f32 1e-05, %v890_v51  ;;  %v872_v5 = vadd.f32 %v780_v37, %v779_v13  ;;  %v1063_v50 = vmul.f32 %v3379_v10, %v987_v47 }
 0x16c   : > { %v2473_v22 = vpop.eup %2472  ;;  %v3483_v27 = vsub.f32 %v3204_v11, %v655_v59  ;;  %v3486_v23 = vsub.f32 %v3206_v20, %v655_v59  ;;  %v623_v29 = vpop.xlane.xlu1 %622  ;;  %v1140_v4 = vadd.f32 %v3400_v36, %v1064_v9  ;;  %v1137_v13 = vadd.f32 %v3391_v39, %v1061_v38 }
 0x16d   : > { %2478 = vrsqrt.f32 %v922_v35  ;;  %v656_v52 = vmul.f32 0.00390625, %v623_v29  ;;  %v817_v51 = vpop.xlane.xlu0 %816  ;;  %873 = vadd.xlane.f32.xlu1 %v872_v5  ;;  %v990_v46 = vmul.f32 %v2473_v22, %v4232_v18  ;;  %v1139_v37 = vadd.f32 %v3391_v39, %v1063_v50 }
 0x16e   : > { %v891_v34 = vmul.f32 0.00390625, %v817_v51  ;;  %v1198_v12 = vpack.c.bf16 %v1140_v4, %v1138_v45  ;;  %v781_v59 = vmul.f32 %v3483_v27, %v3483_v27  ;;  %v782_v35 = vmul.f32 %v3486_v23, %v3486_v23  ;;  %v4233_v4 = vld [vmem:[#allocation76_spill] sm:$0xff]  ;;  %v4234_v51 = vld [vmem:[#allocation70_spill] sm:$0xff] }
 0x16f   : > { %v2475_v55 = vpop.eup %2474  ;;  %v3496_v9 = vsub.f32 %v3211_v48, %v656_v52  ;;  %v3499_v47 = vsub.f32 %v3213_v60, %v656_v52  ;;  %v1066_v5 = vmul.f32 %v3382_v43, %v990_v46  ;;  %v1197_v45 = vpack.c.bf16 %v1139_v37, %v1137_v13 }
 0x170   : > { %v923_v38 = vadd.f32 1e-05, %v891_v34  ;;  %v820_v29 = vpop.xlane.xlu1 %819  ;;  %1408 = vmatprep.mubr.bf16.mxu0 %v1198_v12  ;;  %v992_v50 = vmul.f32 %v2475_v55, %v4233_v4  ;;  %v989_v18 = vmul.f32 %v2473_v22, %v4234_v51  ;;  %v875_v48 = vadd.f32 %v782_v35, %v781_v59  ;;  %v4235_v12 = vld [vmem:[#allocation75_spill] sm:$0xff] }
 0x171   : > { %v892_v20 = vmul.f32 0.00390625, %v820_v29  ;;  %v823_v11 = vpop.xlane.xlu0 %822  ;;  %v783_v52 = vmul.f32 %v3496_v9, %v3496_v9  ;;  %v784_v60 = vmul.f32 %v3499_v47, %v3499_v47  ;;  %1409 = vmatmul.mubr.bf16.gmra.mrb[8].mxu0 %v1197_v45  ;;  %v991_v37 = vmul.f32 %v2475_v55, %v4235_v12 }
 0x172   : > { %2480 = vrsqrt.f32 %v923_v38  ;;  %v893_v3 = vmul.f32 0.00390625, %v823_v11  ;;  %v1068_v46 = vmul.f32 %v3382_v43, %v992_v50  ;;  %876 = vadd.xlane.f32.xlu0 %v875_v48  ;;  %v1065_v22 = vmul.f32 %v3379_v10, %v989_v18 }
 0x173   : > { %v924_v34 = vadd.f32 1e-05, %v892_v20  ;;  %v878_v13 = vadd.f32 %v784_v60, %v783_v52  ;;  %v2477_v29 = vpop.eup %2476  ;;  %v1142_v4 = vadd.f32 %v3400_v36, %v1066_v5  ;;  %v1067_v45 = vmul.f32 %v3379_v10, %v991_v37  ;;  %v4236_v60 = vld [vmem:[#allocation79_spill] sm:$0xff]  ;;  %v4237_v5 = vld [vmem:[#allocation78_spill] sm:$0xff] }
 0x174   : > { %v925_v59 = vadd.f32 1e-05, %v893_v3  ;;  %v826_v35 = vpop.xlane.xlu1 %825  ;;  %v1144_v51 = vadd.f32 %v3400_v36, %v1068_v46  ;;  %v994_v55 = vmul.f32 %v2477_v29, %v4236_v60  ;;  %v1141_v3 = vadd.f32 %v3391_v39, %v1065_v22 }
 0x175   : > { %2482 = vrsqrt.f32 %v924_v34  ;;  %v894_v38 = vmul.f32 0.00390625, %v826_v35  ;;  %v829_v11 = vpop.xlane.xlu0 %828  ;;  %879 = vadd.xlane.f32.xlu1 %v878_v13  ;;  %v1143_v52 = vadd.f32 %v3391_v39, %v1067_v45  ;;  %v993_v12 = vmul.f32 %v2477_v29, %v4237_v5 }
 0x176   : > { %2484 = vrsqrt.f32 %v925_v59  ;;  %v895_v20 = vmul.f32 0.00390625, %v829_v11  ;;  %v1200_v48 = vpack.c.bf16 %v1144_v51, %v1142_v4  ;;  %v1070_v37 = vmul.f32 %v3382_v43, %v994_v55  ;;  %v4238_v59 = vld [vmem:[#allocation83_spill] sm:$0xff] }
 0x177   : > { %v2479_v50 = vpop.eup %2478  ;;  %v926_v18 = vadd.f32 1e-05, %v894_v38  ;;  %v1199_v11 = vpack.c.bf16 %v1143_v52, %v1141_v3  ;;  %v1069_v38 = vmul.f32 %v3379_v10, %v993_v12 }
 0x178   : > { %v927_v46 = vadd.f32 1e-05, %v895_v20  ;;  %v832_v34 = vpop.xlane.xlu1 %831  ;;  %1416 = vmatprep.mubr.bf16.mxu0 %v1200_v48  ;;  %v996_v13 = vmul.f32 %v2479_v50, %v3170_v44  ;;  %v995_v35 = vmul.f32 %v2479_v50, %v4238_v59  ;;  %v1146_v60 = vadd.f32 %v3400_v36, %v1070_v37 }
 0x179   : > { %2486 = vrsqrt.f32 %v926_v18  ;;  %v896_v4 = vmul.f32 0.00390625, %v832_v34  ;;  %v835_v51 = vpop.xlane.xlu0 %834  ;;  %1417 = vmatmul.mubr.bf16.gmra.mrb[12].mxu0 %v1199_v11  ;;  %v1145_v50 = vadd.f32 %v3391_v39, %v1069_v38 }
 0x17a   : > { %v1072_v22 = vmul.f32 %v3382_v43, %v996_v13  ;;  %2488 = vrsqrt.f32 %v927_v46  ;;  %v897_v29 = vmul.f32 0.00390625, %v835_v51  ;;  %v1071_v20 = vmul.f32 %v3379_v10, %v995_v35 }
 0x17b   : > { %v928_v45 = vadd.f32 1e-05, %v896_v4 }
 0x17c   : > { %v2481_v48 = vpop.eup %2480  ;;  %v838_v44 = vpop.xlane.xlu1 %837  ;;  %v1148_v55 = vadd.f32 %v3400_v36, %v1072_v22  ;;  %v1147_v3 = vadd.f32 %v3391_v39, %v1071_v20  ;;  %v929_v34 = vadd.f32 1e-05, %v897_v29 }
 0x17d   : > { %2490 = vrsqrt.f32 %v928_v45  ;;  %v898_v18 = vmul.f32 0.00390625, %v838_v44  ;;  %v998_v52 = vmul.f32 %v2481_v48, %v3193_v7  ;;  %v997_v12 = vmul.f32 %v2481_v48, %v3190_v62  ;;  %v841_v4 = vpop.xlane.xlu0 %840 }
 0x17e   : > { %v1202_v5 = vpack.c.bf16 %v1148_v55, %v1146_v60  ;;  %v1201_v59 = vpack.c.bf16 %v1147_v3, %v1145_v50  ;;  %v899_v48 = vmul.f32 0.00390625, %v841_v4 }
 0x17f   : > { %v2483_v46 = vpop.eup %2482  ;;  %v930_v13 = vadd.f32 1e-05, %v898_v18  ;;  %v1074_v35 = vmul.f32 %v3382_v43, %v998_v52  ;;  %v1073_v7 = vmul.f32 %v3379_v10, %v997_v12 }
 0x180   : > { %v2485_v37 = vpop.eup %2484  ;;  %v844_v51 = vpop.xlane.xlu1 %843  ;;  %1424 = vmatprep.mubr.bf16.mxu0 %v1202_v5  ;;  %v1000_v11 = vmul.f32 %v2483_v46, %v3222_v26  ;;  %v999_v38 = vmul.f32 %v2483_v46, %v3219_v53 }
 0x181   : > { %2492 = vrsqrt.f32 %v930_v13  ;;  %v900_v22 = vmul.f32 0.00390625, %v844_v51  ;;  %v1002_v62 = vmul.f32 %v2485_v37, %v3232_v16  ;;  %1425 = vmatmul.mubr.bf16.gmra.mrb[16].mxu0 %v1201_v59  ;;  %v1150_v44 = vadd.f32 %v3400_v36, %v1074_v35  ;;  %v847_v35 = vpop.xlane.xlu0 %846 }
 0x182   : > { %v1076_v45 = vmul.f32 %v3382_v43, %v1000_v11  ;;  %v1075_v29 = vmul.f32 %v3379_v10, %v999_v38  ;;  %2494 = vrsqrt.f32 %v929_v34  ;;  %v1149_v18 = vadd.f32 %v3391_v39, %v1073_v7 }
 0x183   : > { %v2487_v20 = vpop.eup %2486  ;;  %v1078_v55 = vmul.f32 %v3382_v43, %v1002_v62  ;;  %v932_v16 = vadd.f32 1e-05, %v900_v22  ;;  %v931_v34 = vadd.f32 1e-05, %v899_v48  ;;  %v1001_v59 = vmul.f32 %v2485_v37, %v3229_v0 }
 0x184   : > { %v1152_v26 = vadd.f32 %v3400_v36, %v1076_v45  ;;  %v1151_v53 = vadd.f32 %v3391_v39, %v1075_v29  ;;  %v1004_v60 = vmul.f32 %v2487_v20, %v3252_v25  ;;  %v2489_v50 = vpop.eup %2488  ;;  %v1003_v3 = vmul.f32 %v2487_v20, %v3249_v28  ;;  %v850_v52 = vpop.xlane.xlu1 %849 }
 0x185   : > { %v1154_v25 = vadd.f32 %v3400_v36, %v1078_v55  ;;  %v1006_v51 = vmul.f32 %v2489_v50, %v3260_v8  ;;  %2496 = vrsqrt.f32 %v932_v16  ;;  %v902_v28 = vmul.f32 0.00390625, %v850_v52 }
 0x186   : > { %v1204_v5 = vpack.c.bf16 %v1152_v26, %v1150_v44  ;;  %v1080_v12 = vmul.f32 %v3382_v43, %v1004_v60  ;;  %v1203_v13 = vpack.c.bf16 %v1151_v53, %v1149_v18  ;;  %v1079_v38 = vmul.f32 %v3379_v10, %v1003_v3 }
 0x187   : > { %v2491_v46 = vpop.eup %2490  ;;  %2498 = vrsqrt.f32 %v931_v34  ;;  %v901_v0 = vmul.f32 0.00390625, %v847_v35  ;;  %v1077_v37 = vmul.f32 %v3379_v10, %v1001_v59  ;;  %v1082_v45 = vmul.f32 %v3382_v43, %v1006_v51 }
 0x188   : > { %1432 = vmatprep.mubr.bf16.mxu0 %v1204_v5  ;;  %v1156_v4 = vadd.f32 %v3400_v36, %v1080_v12  ;;  %v1008_v11 = vmul.f32 %v2491_v46, %v3274_v41  ;;  %v934_v8 = vadd.f32 1e-05, %v902_v28  ;;  %v1155_v41 = vadd.f32 %v3391_v39, %v1079_v38 }
 0x189   : > { %1433 = vmatmul.mubr.bf16.gmra.mrb[20].mxu0 %v1203_v13  ;;  %v1007_v20 = vmul.f32 %v2491_v46, %v3271_v57  ;;  %v933_v26 = vadd.f32 1e-05, %v901_v0  ;;  %v1153_v53 = vadd.f32 %v3391_v39, %v1077_v37  ;;  %v1005_v60 = vmul.f32 %v2489_v50, %v3257_v24 }
 0x18a   : > { %v1206_v22 = vpack.c.bf16 %v1156_v4, %v1154_v25  ;;  %v1084_v7 = vmul.f32 %v3382_v43, %v1008_v11  ;;  %v1158_v55 = vadd.f32 %v3400_v36, %v1082_v45  ;;  %2500 = vrsqrt.f32 %v934_v8 }
 0x18b   : > { %v2493_v62 = vpop.eup %2492  ;;  %v1205_v18 = vpack.c.bf16 %v1155_v41, %v1153_v53  ;;  %v1083_v3 = vmul.f32 %v3379_v10, %v1007_v20  ;;  %2502 = vrsqrt.f32 %v933_v26 }
 0x18c   : > { %1440 = vmatprep.mubr.bf16.mxu0 %v1206_v22  ;;  %v2495_v29 = vpop.eup %2494  ;;  %v1160_v48 = vadd.f32 %v3400_v36, %v1084_v7  ;;  %v1012_v44 = vmul.f32 %v2493_v62, %v3294_v1  ;;  %v1081_v1 = vmul.f32 %v3379_v10, %v1005_v60 }
 0x18d   : > { %v1010_v16 = vmul.f32 %v2495_v29, %v3280_v49  ;;  %v1159_v50 = vadd.f32 %v3391_v39, %v1083_v3  ;;  %v1011_v49 = vmul.f32 %v2493_v62, %v3291_v32  ;;  %v1009_v59 = vmul.f32 %v2495_v29, %v3277_v19 }
 0x18e   : > { %v1208_v52 = vpack.c.bf16 %v1160_v48, %v1158_v55  ;;  %v1088_v57 = vmul.f32 %v3382_v43, %v1012_v44  ;;  %v1157_v13 = vadd.f32 %v3391_v39, %v1081_v1  ;;  %v2451_v1 = vld [vmem:[%s4019_s6 + $0x14] ss:$8 sps:$4 sm:$0xff]  }
 0x18f   : > { %v2497_v5 = vpop.eup %2496  ;;  %v1086_v12 = vmul.f32 %v3382_v43, %v1010_v16  ;;  %v1087_v51 = vmul.f32 %v3379_v10, %v1011_v49  ;;  %v1085_v32 = vmul.f32 %v3379_v10, %v1009_v59  ;;  %v2457_v49 = vld [vmem:[%s4019_s6 + $0x34] ss:$8 sps:$4 sm:$0xff]  }
 0x190   : > { %v1164_v46 = vadd.f32 %v3400_v36, %v1088_v57  ;;  %v1016_v34 = vmul.f32 %v2497_v5, %v3318_v56  ;;  %v1207_v4 = vpack.c.bf16 %v1159_v50, %v1157_v13  ;;  %v1015_v7 = vmul.f32 %v2497_v5, %v3315_v2  ;;  %v2450_v5 = vld [vmem:[%s4019_s6] ss:$8 sps:$4 sm:$0xff]  }
 0x191   : > { %1441 = vmatmul.mubr.bf16.gmra.mrb[24].mxu0 %v1205_v18  ;;  %v2499_v24 = vpop.eup %2498  ;;  %v1162_v35 = vadd.f32 %v3400_v36, %v1086_v12  ;;  %v1163_v19 = vadd.f32 %v3391_v39, %v1087_v51  ;;  %v1161_v0 = vadd.f32 %v3391_v39, %v1085_v32  ;;  %v2453_v12 = vld [vmem:[%s4019_s6 + $0x10] ss:$8 sps:$4 sm:$0xff]   ;;  %v2456_v50 = vld [vmem:[%s4019_s6 + $0x20] ss:$8 sps:$4 sm:$0xff]  }
 0x192   : > { %1448 = vmatprep.mubr.bf16.mxu0 %v1208_v52  ;;  %v1014_v25 = vmul.f32 %v2499_v24, %v3308_v58  ;;  %v1092_v28 = vmul.f32 %v3382_v43, %v1016_v34  ;;  %v1013_v37 = vmul.f32 %v2499_v24, %v3305_v31  ;;  %v1091_v41 = vmul.f32 %v3379_v10, %v1015_v7  ;;  %v2454_v24 = vld [vmem:[%s4019_s6 + $0x24] ss:$8 sps:$4 sm:$0xff]  }
 0x193   : > { %v1210_v11 = vpack.c.bf16 %v1164_v46, %v1162_v35  ;;  %v1209_v8 = vpack.c.bf16 %v1163_v19, %v1161_v0  ;;  %v2459_v46 = vld [vmem:[%s4019_s6 + $0x30] ss:$8 sps:$4 sm:$0xff]   ;;  %v2652_v34 = vmov 0  }
 0x194   : > { %v2501_v38 = vpop.eup %2500  ;;  %v1090_v56 = vmul.f32 %v3382_v43, %v1014_v25  ;;  %v1168_v58 = vadd.f32 %v3400_v36, %v1092_v28  ;;  %v1089_v2 = vmul.f32 %v3379_v10, %v1013_v37  ;;  %v1167_v44 = vadd.f32 %v3391_v39, %v1091_v41  ;;  %1838 = vmatprep.mubr.bf16.mxu1 %v2652_v34 }
 0x195   : > { %v2503_v22 = vpop.eup %2502  ;;  %v1020_v62 = vmul.f32 %v2501_v38, %v3334_v21  ;;  %v1019_v31 = vmul.f32 %v2501_v38, %v3331_v61 }
 0x196   : > { %v1166_v45 = vadd.f32 %v3400_v36, %v1090_v56  ;;  %v1018_v29 = vmul.f32 %v2503_v22, %v3324_v17  ;;  %v1165_v17 = vadd.f32 %v3391_v39, %v1089_v2  ;;  %v1017_v53 = vmul.f32 %v2503_v22, %v3321_v33  ;;  %v2448_v33 = vld [vmem:[%s4019_s6 + $0x4] ss:$8 sps:$4 sm:$0xff]  }
 0x197   : > { %v1096_v48 = vmul.f32 %v3382_v43, %v1020_v62  ;;  %v1095_v16 = vmul.f32 %v3379_v10, %v1019_v31  ;;  %1806 = vmatprep.subr.bf16.mxu1 %v2448_v33 }
 0x198   : > { %v1212_v20 = vpack.c.bf16 %v1168_v58, %v1166_v45  ;;  %v1094_v21 = vmul.f32 %v3382_v43, %v1018_v29  ;;  %v1211_v55 = vpack.c.bf16 %v1167_v44, %v1165_v17  ;;  %v1093_v3 = vmul.f32 %v3379_v10, %v1017_v53  ;;  %1807 = vmatpush1.bf16.msra.mxu1 %v2450_v5  ;;  %v4239_v53 = vld [vmem:[#allocation91_spill] sm:$0xff] }
 0x199   : > { %1449 = vmatmul.mubr.bf16.gmra.mrb[28].mxu0 %v1207_v4  ;;  %v1172_v26 = vadd.f32 %v3400_v36, %v1096_v48  ;;  %v1171_v52 = vadd.f32 %v3391_v39, %v1095_v16  ;;  %1808 = vmatprep.subr.bf16.mxu1 %v2451_v1  ;;  %v4241_v1 = vld [vmem:[#allocation49_spill] sm:$0xff] }
 0x19a   : > { %1456 = vmatprep.mubr.bf16.mxu0 %v1210_v11  ;;  %v1170_v60 = vadd.f32 %v3400_v36, %v1094_v21  ;;  %v1169_v61 = vadd.f32 %v3391_v39, %v1093_v3 }
 0x19c   : > { %v1214_v18 = vpack.c.bf16 %v1172_v26, %v1170_v60  ;;  %v1213_v57 = vpack.c.bf16 %v1171_v52, %v1169_v61  ;;  %1809 = vmatpush1.bf16.msra.mxu1 %v2453_v12 }
 0x19d   : > { %1810 = vmatprep.subr.bf16.mxu1 %v2454_v24  ;;  %v4242_v24 = vld [vmem:[#allocation50_spill] sm:$0xff] }
 0x1a0   : > { %1811 = vmatpush1.bf16.msra.mxu1 %v2456_v50 }
 0x1a1   : > { %1457 = vmatmul.mubr.bf16.gmra.mrb[32].mxu0 %v1209_v8  ;;  %1812 = vmatprep.subr.bf16.mxu1 %v2457_v49 }
 0x1a2   : > { %1464 = vmatprep.mubr.bf16.mxu0 %v1212_v20 }
 0x1a4   : > { %1813 = vmatpush1.bf16.msra.mxu1 %v2459_v46 }
 0x1a9   : > { %1465 = vmatmul.mubr.bf16.gmra.mrb[36].mxu0 %v1211_v55  ;;  %v4240_v55 = vld [vmem:[#allocation90_spill] sm:$0xff] }
 0x1aa   : > { %1472 = vmatprep.mubr.bf16.mxu0 %v1214_v18 }
 0x1b1   : > { %1473 = vmatmul.mubr.bf16.gmra.mrb[40].mxu0 %v1213_v57 }
 0x1df   : > { %v853_v13 = vpop.xlane.xlu0 %852 }
 0x1e0   : > { %v903_v59 = vmul.f32 0.00390625, %v853_v13 }
 0x1e2   : > { %v935_v35 = vadd.f32 1e-05, %v903_v59  ;;  %v856_v25 = vpop.xlane.xlu1 %855 }
 0x1e3   : > { %v904_v4 = vmul.f32 0.00390625, %v856_v25 }
 0x1e4   : > { %2504 = vrsqrt.f32 %v935_v35 }
 0x1e5   : > { %v936_v51 = vadd.f32 1e-05, %v904_v4 }
 0x1e7   : > { %2506 = vrsqrt.f32 %v936_v51  ;;  %v859_v11 = vpop.xlane.xlu0 %858 }
 0x1e8   : > { %v905_v28 = vmul.f32 0.00390625, %v859_v11 }
 0x1ea   : > { %v937_v38 = vadd.f32 1e-05, %v905_v28  ;;  %v862_v32 = vpop.xlane.xlu1 %861 }
 0x1eb   : > { %v906_v56 = vmul.f32 0.00390625, %v862_v32 }
 0x1ec   : > { %2508 = vrsqrt.f32 %v937_v38 }
 0x1ed   : > { %v938_v22 = vadd.f32 1e-05, %v906_v56 }
 0x1ee   : > { %v2505_v19 = vpop.eup %2504 }
 0x1ef   : > { %2510 = vrsqrt.f32 %v938_v22  ;;  %v1022_v7 = vmul.f32 %v2505_v19, %v3352_v30  ;;  %v1021_v58 = vmul.f32 %v2505_v19, %v3349_v54 }
 0x1f0   : > { %v865_v62 = vpop.xlane.xlu0 %864 }
 0x1f1   : > { %v2507_v0 = vpop.eup %2506  ;;  %v907_v37 = vmul.f32 0.00390625, %v865_v62  ;;  %v1098_v8 = vmul.f32 %v3382_v43, %v1022_v7  ;;  %v1097_v20 = vmul.f32 %v3379_v10, %v1021_v58 }
 0x1f2   : > { %v1024_v29 = vmul.f32 %v2507_v0, %v3362_v14  ;;  %v1023_v41 = vmul.f32 %v2507_v0, %v3359_v6  ;;  %v4243_v0 = vld [vmem:[#allocation55_spill] sm:$0xff] }
 0x1f3   : > { %v868_v45 = vpop.xlane.xlu1 %867  ;;  %v939_v48 = vadd.f32 1e-05, %v907_v37  ;;  %v1174_v31 = vadd.f32 %v3400_v36, %v1098_v8  ;;  %v1173_v14 = vadd.f32 %v3391_v39, %v1097_v20 }
 0x1f4   : > { %v908_v2 = vmul.f32 0.00390625, %v868_v45  ;;  %v1100_v21 = vmul.f32 %v3382_v43, %v1024_v29  ;;  %v1099_v30 = vmul.f32 %v3379_v10, %v1023_v41  ;;  %v4244_v29 = vld [vmem:[#allocation56_spill] sm:$0xff] }
 0x1f5   : > { %2512 = vrsqrt.f32 %v939_v48 }
 0x1f6   : > { %v940_v54 = vadd.f32 1e-05, %v908_v2  ;;  %v2509_v44 = vpop.eup %2508  ;;  %v1176_v26 = vadd.f32 %v3400_v36, %v1100_v21  ;;  %v1175_v17 = vadd.f32 %v3391_v39, %v1099_v30 }
 0x1f7   : > { %v871_v6 = vpop.xlane.xlu0 %870  ;;  %v1026_v60 = vmul.f32 %v2509_v44, %v4239_v53  ;;  %v1025_v16 = vmul.f32 %v2509_v44, %v4240_v55 }
 0x1f8   : > { %2514 = vrsqrt.f32 %v940_v54  ;;  %v909_v18 = vmul.f32 0.00390625, %v871_v6  ;;  %v1216_v3 = vpack.c.bf16 %v1176_v26, %v1174_v31  ;;  %v1215_v52 = vpack.c.bf16 %v1175_v17, %v1173_v14  ;;  %v4245_v26 = vld [vmem:[#allocation52_spill] sm:$0xff]  ;;  %v4246_v17 = vld [vmem:[#allocation53_spill] sm:$0xff] }
 0x1f9   : > { %v2511_v61 = vpop.eup %2510  ;;  %v1102_v57 = vmul.f32 %v3382_v43, %v1026_v60  ;;  %v1101_v49 = vmul.f32 %v3379_v10, %v1025_v16 }
 0x1fa   : > { %v941_v33 = vadd.f32 1e-05, %v909_v18  ;;  %v874_v5 = vpop.xlane.xlu1 %873  ;;  %1480 = vmatprep.mubr.bf16.mxu0 %v1216_v3  ;;  %v1028_v12 = vmul.f32 %v2511_v61, %v4241_v1  ;;  %v1027_v50 = vmul.f32 %v2511_v61, %v4242_v24 }
 0x1fb   : > { %v910_v46 = vmul.f32 0.00390625, %v874_v5  ;;  %1481 = vmatmul.mubr.bf16.gmra.mrb[44].mxu0 %v1215_v52  ;;  %v1178_v25 = vadd.f32 %v3400_v36, %v1102_v57  ;;  %v1177_v51 = vadd.f32 %v3391_v39, %v1101_v49 }
 0x1fc   : > { %2516 = vrsqrt.f32 %v941_v33  ;;  %v1104_v13 = vmul.f32 %v3382_v43, %v1028_v12  ;;  %v1103_v59 = vmul.f32 %v3379_v10, %v1027_v50 }
 0x1fd   : > { %v942_v35 = vadd.f32 1e-05, %v910_v46 }
 0x1fe   : > { %v1180_v4 = vadd.f32 %v3400_v36, %v1104_v13  ;;  %v1179_v11 = vadd.f32 %v3391_v39, %v1103_v59 }
 0x1ff   : > { %v2513_v28 = vpop.eup %2512  ;;  %2518 = vrsqrt.f32 %v942_v35  ;;  %v877_v38 = vpop.xlane.xlu0 %876 }
 0x200   : > { %v1218_v32 = vpack.c.bf16 %v1180_v4, %v1178_v25  ;;  %v1217_v56 = vpack.c.bf16 %v1179_v11, %v1177_v51  ;;  %v1030_v22 = vmul.f32 %v2513_v28, %v3424_v15  ;;  %v1029_v19 = vmul.f32 %v2513_v28, %v3421_v40 }
 0x201   : > { %v911_v58 = vmul.f32 0.00390625, %v877_v38 }
 0x202   : > { %v2515_v7 = vpop.eup %2514  ;;  %v880_v62 = vpop.xlane.xlu1 %879  ;;  %1488 = vmatprep.mubr.bf16.mxu0 %v1218_v32  ;;  %v1106_v45 = vmul.f32 %v3382_v43, %v1030_v22  ;;  %v1105_v41 = vmul.f32 %v3379_v10, %v1029_v19  ;;  %v3690_v32 = vld [vmem:[%s4018_s5] ss:$0 sm:$0xff] }
 0x203   : > { %v1032_v37 = vmul.f32 %v2515_v7, %v4243_v0  ;;  %v1031_v8 = vmul.f32 %v2515_v7, %v4244_v29  ;;  %v943_v20 = vadd.f32 1e-05, %v911_v58  ;;  %v912_v48 = vmul.f32 0.00390625, %v880_v62  ;;  %1489 = vmatmul.mubr.bf16.gmra.mrb[48].mxu0 %v1217_v56 }
 0x204   : > { %v1182_v30 = vadd.f32 %v3400_v36, %v1106_v45  ;;  %v1181_v44 = vadd.f32 %v3391_v39, %v1105_v41 }
 0x205   : > { %v1108_v2 = vmul.f32 %v3382_v43, %v1032_v37  ;;  %v1107_v15 = vmul.f32 %v3379_v10, %v1031_v8  ;;  %2520 = vrsqrt.f32 %v943_v20  ;;  %v944_v40 = vadd.f32 1e-05, %v912_v48 }
 0x206   : > { %v2517_v21 = vpop.eup %2516 }
 0x207   : > { %v1184_v54 = vadd.f32 %v3400_v36, %v1108_v2  ;;  %v1183_v31 = vadd.f32 %v3391_v39, %v1107_v15  ;;  %2522 = vrsqrt.f32 %v944_v40  ;;  %v1034_v14 = vmul.f32 %v2517_v21, %v4245_v26 }
 0x208   : > { %v1033_v6 = vmul.f32 %v2517_v21, %v4246_v17 }
 0x209   : > { %v1220_v53 = vpack.c.bf16 %v1184_v54, %v1182_v30  ;;  %v1219_v60 = vpack.c.bf16 %v1183_v31, %v1181_v44  ;;  %v2519_v55 = vpop.eup %2518  ;;  %v1110_v18 = vmul.f32 %v3382_v43, %v1034_v14 }
 0x20a   : > { %v1036_v16 = vmul.f32 %v2519_v55, %v3469_v42  ;;  %v1035_v3 = vmul.f32 %v2519_v55, %v3466_v63  ;;  %v1109_v52 = vmul.f32 %v3379_v10, %v1033_v6 }
 0x20b   : > { %1496 = vmatprep.mubr.bf16.mxu0 %v1220_v53  ;;  %v1186_v33 = vadd.f32 %v3400_v36, %v1110_v18 }
 0x20c   : > { %1497 = vmatmul.mubr.bf16.gmra.mrb[52].mxu0 %v1219_v60  ;;  %v1112_v61 = vmul.f32 %v3382_v43, %v1036_v16  ;;  %v1111_v57 = vmul.f32 %v3379_v10, %v1035_v3  ;;  %v1185_v1 = vadd.f32 %v3391_v39, %v1109_v52 }
 0x20e   : > { %v1188_v5 = vadd.f32 %v3400_v36, %v1112_v61  ;;  %v1187_v12 = vadd.f32 %v3391_v39, %v1111_v57 }
 0x20f   : > { %v2521_v42 = vpop.eup %2520 }
 0x210   : > { %v1222_v24 = vpack.c.bf16 %v1188_v5, %v1186_v33  ;;  %v1221_v50 = vpack.c.bf16 %v1187_v12, %v1185_v1  ;;  %v1038_v63 = vmul.f32 %v2521_v42, %v3486_v23  ;;  %v1037_v49 = vmul.f32 %v2521_v42, %v3483_v27 }
 0x211   : > { %v2523_v46 = vpop.eup %2522 }
 0x212   : > { %1504 = vmatprep.mubr.bf16.mxu0 %v1222_v24  ;;  %v1040_v13 = vmul.f32 %v2523_v46, %v3499_v47  ;;  %v1114_v59 = vmul.f32 %v3382_v43, %v1038_v63  ;;  %v1039_v35 = vmul.f32 %v2523_v46, %v3496_v9  ;;  %v1113_v25 = vmul.f32 %v3379_v10, %v1037_v49 }
 0x214   : > { %1505 = vmatmul.mubr.bf16.gmra.mrb[56].mxu0 %v1221_v50  ;;  %v1116_v4 = vmul.f32 %v3382_v43, %v1040_v13  ;;  %v1115_v51 = vmul.f32 %v3379_v10, %v1039_v35  ;;  %v1190_v11 = vadd.f32 %v3400_v36, %v1114_v59  ;;  %v1189_v27 = vadd.f32 %v3391_v39, %v1113_v25 }
 0x216   : > { %v1192_v23 = vadd.f32 %v3400_v36, %v1116_v4  ;;  %v1191_v28 = vadd.f32 %v3391_v39, %v1115_v51 }
 0x218   : > { %v1224_v47 = vpack.c.bf16 %v1192_v23, %v1190_v11  ;;  %v1223_v38 = vpack.c.bf16 %v1191_v28, %v1189_v27 }
 0x21a   : > { %1512 = vmatprep.mubr.bf16.mxu0 %v1224_v47 }
 0x21c   : > { %1513 = vmatmul.mubr.bf16.gmra.mrb[60].mxu0 %v1223_v38 }
 0x234   : > { %v2294_v9 = vpop.f32.mrb[0].mxu0 }
 0x235   : > { %v2295_v43 = vpop.f32.mrb[1].mxu0 }
 0x236   : > { %v2296_v10 = vadd.f32 %v2295_v43, %v2294_v9  ;;  %v2297_v56 = vpop.f32.mrb[2].mxu0 }
 0x237   : > { %v2298_v22 = vpop.f32.mrb[3].mxu0 }
 0x238   : > { %v1395_v36 = vadd.f32 %v2296_v10, %v3690_v32  ;;  %v2299_v19 = vadd.f32 %v2298_v22, %v2297_v56 }
 0x23a   : > { %v1553_v7 = vmul.f32 0.70710677, %v1395_v36  ;;  %v1398_v39 = vadd.f32 %v2299_v19, %v3690_v32  ;;  %v1521_v26 = vmul.f32 0.5, %v1395_v36 }
 0x23c   : > { %2524 = verf.f32 %v1553_v7  ;;  %v1554_v58 = vmul.f32 0.70710677, %v1398_v39  ;;  %v2300_v62 = vpop.f32.mrb[4].mxu0  ;;  %v1522_v17 = vmul.f32 0.5, %v1398_v39 }
 0x23d   : > { %v2301_v0 = vpop.f32.mrb[5].mxu0 }
 0x23e   : > { %2526 = verf.f32 %v1554_v58  ;;  %v2302_v37 = vadd.f32 %v2301_v0, %v2300_v62  ;;  %v2303_v45 = vpop.f32.mrb[6].mxu0 }
 0x23f   : > { %v2304_v29 = vpop.f32.mrb[7].mxu0 }
 0x240   : > { %v1403_v8 = vadd.f32 %v2302_v37, %v3690_v32  ;;  %v2305_v41 = vadd.f32 %v2304_v29, %v2303_v45 }
 0x242   : > { %v1555_v20 = vmul.f32 0.70710677, %v1403_v8  ;;  %v1406_v48 = vadd.f32 %v2305_v41, %v3690_v32  ;;  %v1523_v50 = vmul.f32 0.5, %v1403_v8 }
 0x244   : > { %2528 = verf.f32 %v1555_v20  ;;  %v1556_v2 = vmul.f32 0.70710677, %v1406_v48  ;;  %v2306_v15 = vpop.f32.mrb[8].mxu0  ;;  %v1524_v63 = vmul.f32 0.5, %v1406_v48 }
 0x245   : > { %v2307_v21 = vpop.f32.mrb[9].mxu0 }
 0x246   : > { %v2525_v40 = vpop.eup %2524  ;;  %2530 = verf.f32 %v1556_v2  ;;  %v2308_v54 = vadd.f32 %v2307_v21, %v2306_v15  ;;  %v2309_v44 = vpop.f32.mrb[10].mxu0 }
 0x247   : > { %v1617_v30 = vadd.f32 1.0, %v2525_v40  ;;  %v2310_v14 = vpop.f32.mrb[11].mxu0 }
 0x248   : > { %v2527_v31 = vpop.eup %2526  ;;  %v1411_v53 = vadd.f32 %v2308_v54, %v3690_v32  ;;  %v2311_v60 = vadd.f32 %v2310_v14, %v2309_v44 }
 0x249   : > { %v1618_v6 = vadd.f32 1.0, %v2527_v31  ;;  %v1649_v55 = vmul.f32 %v1617_v30, %v1521_v26 }
 0x24a   : > { %v1557_v18 = vmul.f32 0.70710677, %v1411_v53  ;;  %v1414_v3 = vadd.f32 %v2311_v60, %v3690_v32  ;;  %v1525_v56 = vmul.f32 0.5, %v1411_v53 }
 0x24b   : > { %v1650_v16 = vmul.f32 %v1618_v6, %v1522_v17 }
 0x24c   : > { %2532 = verf.f32 %v1557_v18  ;;  %v1558_v52 = vmul.f32 0.70710677, %v1414_v3  ;;  %v2312_v33 = vpop.f32.mrb[12].mxu0  ;;  %v1526_v36 = vmul.f32 0.5, %v1414_v3 }
 0x24d   : > { %v1681_v61 = vpack.c.bf16 %v1650_v16, %v1649_v55  ;;  %v2313_v1 = vpop.f32.mrb[13].mxu0 }
 0x24e   : > { %v2529_v57 = vpop.eup %2528  ;;  %2534 = verf.f32 %v1558_v52  ;;  %v2314_v42 = vadd.f32 %v2313_v1, %v2312_v33  ;;  %v2315_v24 = vpop.f32.mrb[14].mxu0 }
 0x24f   : > { %v1619_v5 = vadd.f32 1.0, %v2529_v57  ;;  %2252 = vmatmul.mubr.msk.bf16.vlgmr.msra.gmra.mrb[0].mxu1 %vm1757_vm0, %v1681_v61  ;;  %v2316_v46 = vpop.f32.mrb[15].mxu0 }
 0x250   : > { %v2531_v12 = vpop.eup %2530  ;;  %1848 = vmatprep.mubr.bf16.mxu1 %v2652_v34  ;;  %v1419_v13 = vadd.f32 %v2314_v42, %v3690_v32  ;;  %v2317_v59 = vadd.f32 %v2316_v46, %v2315_v24 }
 0x251   : > { %v1620_v49 = vadd.f32 1.0, %v2531_v12  ;;  %v1651_v35 = vmul.f32 %v1619_v5, %v1523_v50 }
 0x252   : > { %v1559_v4 = vmul.f32 0.70710677, %v1419_v13  ;;  %v1422_v51 = vadd.f32 %v2317_v59, %v3690_v32  ;;  %v1527_v44 = vmul.f32 0.5, %v1419_v13 }
 0x253   : > { %v1652_v25 = vmul.f32 %v1620_v49, %v1524_v63 }
 0x254   : > { %2536 = verf.f32 %v1559_v4  ;;  %v1560_v23 = vmul.f32 0.70710677, %v1422_v51  ;;  %v2318_v27 = vpop.f32.mrb[16].mxu0  ;;  %v1528_v31 = vmul.f32 0.5, %v1422_v51 }
 0x255   : > { %v1682_v11 = vpack.c.bf16 %v1652_v25, %v1651_v35  ;;  %v2319_v47 = vpop.f32.mrb[17].mxu0 }
 0x256   : > { %v2533_v28 = vpop.eup %2532  ;;  %2538 = verf.f32 %v1560_v23  ;;  %v2320_v9 = vadd.f32 %v2319_v47, %v2318_v27  ;;  %v2321_v43 = vpop.f32.mrb[18].mxu0 }
 0x257   : > { %2253 = vmatmul.mubr.msk.bf16.gmra.mrb[4].mxu1 %vm1757_vm0, %v1682_v11  ;;  %v1621_v38 = vadd.f32 1.0, %v2533_v28  ;;  %v2322_v22 = vpop.f32.mrb[19].mxu0 }
 0x258   : > { %1858 = vmatprep.mubr.bf16.mxu1 %v2652_v34  ;;  %v2535_v10 = vpop.eup %2534  ;;  %v1427_v7 = vadd.f32 %v2320_v9, %v3690_v32  ;;  %v2323_v39 = vadd.f32 %v2322_v22, %v2321_v43 }
 0x259   : > { %v1622_v19 = vadd.f32 1.0, %v2535_v10  ;;  %v1653_v58 = vmul.f32 %v1621_v38, %v1525_v56 }
 0x25a   : > { %v1561_v0 = vmul.f32 0.70710677, %v1427_v7  ;;  %v1430_v37 = vadd.f32 %v2323_v39, %v3690_v32  ;;  %v1529_v42 = vmul.f32 0.5, %v1427_v7 }
 0x25b   : > { %v1654_v62 = vmul.f32 %v1622_v19, %v1526_v36 }
 0x25c   : > { %2540 = verf.f32 %v1561_v0  ;;  %v1562_v45 = vmul.f32 0.70710677, %v1430_v37  ;;  %v2324_v29 = vpop.f32.mrb[20].mxu0  ;;  %v1530_v24 = vmul.f32 0.5, %v1430_v37 }
 0x25d   : > { %v1683_v8 = vpack.c.bf16 %v1654_v62, %v1653_v58  ;;  %v2325_v41 = vpop.f32.mrb[21].mxu0 }
 0x25e   : > { %v2537_v20 = vpop.eup %2536  ;;  %2542 = verf.f32 %v1562_v45  ;;  %v2326_v48 = vadd.f32 %v2325_v41, %v2324_v29  ;;  %v2327_v2 = vpop.f32.mrb[22].mxu0 }
 0x25f   : > { %2254 = vmatmul.mubr.msk.bf16.gmra.mrb[8].mxu1 %vm1757_vm0, %v1683_v8  ;;  %v1623_v15 = vadd.f32 1.0, %v2537_v20  ;;  %v2328_v40 = vpop.f32.mrb[23].mxu0 }
 0x260   : > { %1868 = vmatprep.mubr.bf16.mxu1 %v2652_v34  ;;  %v2539_v21 = vpop.eup %2538  ;;  %v1435_v30 = vadd.f32 %v2326_v48, %v3690_v32  ;;  %v2329_v54 = vadd.f32 %v2328_v40, %v2327_v2 }
 0x261   : > { %v1624_v26 = vadd.f32 1.0, %v2539_v21  ;;  %v1655_v6 = vmul.f32 %v1623_v15, %v1527_v44 }
 0x262   : > { %v1563_v14 = vmul.f32 0.70710677, %v1435_v30  ;;  %v1438_v17 = vadd.f32 %v2329_v54, %v3690_v32  ;;  %v1531_v43 = vmul.f32 0.5, %v1435_v30 }
 0x263   : > { %v1656_v53 = vmul.f32 %v1624_v26, %v1528_v31 }
 0x264   : > { %2544 = verf.f32 %v1563_v14  ;;  %v1564_v60 = vmul.f32 0.70710677, %v1438_v17  ;;  %v2330_v55 = vpop.f32.mrb[24].mxu0  ;;  %v1532_v10 = vmul.f32 0.5, %v1438_v17 }
 0x265   : > { %v2331_v16 = vpop.f32.mrb[25].mxu0  ;;  %v1684_v18 = vpack.c.bf16 %v1656_v53, %v1655_v6 }
 0x266   : > { %v2541_v3 = vpop.eup %2540  ;;  %2546 = verf.f32 %v1564_v60  ;;  %v2332_v52 = vadd.f32 %v2331_v16, %v2330_v55  ;;  %v2333_v61 = vpop.f32.mrb[26].mxu0 }
 0x267   : > { %v1625_v57 = vadd.f32 1.0, %v2541_v3  ;;  %v2334_v33 = vpop.f32.mrb[27].mxu0  ;;  %2255 = vmatmul.mubr.msk.bf16.gmra.mrb[12].mxu1 %vm1757_vm0, %v1684_v18 }
 0x268   : > { %v2543_v5 = vpop.eup %2542  ;;  %v1443_v1 = vadd.f32 %v2332_v52, %v3690_v32  ;;  %v2335_v12 = vadd.f32 %v2334_v33, %v2333_v61  ;;  %1878 = vmatprep.mubr.bf16.mxu1 %v2652_v34 }
 0x269   : > { %v1626_v50 = vadd.f32 1.0, %v2543_v5  ;;  %v1657_v46 = vmul.f32 %v1625_v57, %v1529_v42 }
 0x26a   : > { %v1565_v63 = vmul.f32 0.70710677, %v1443_v1  ;;  %v1446_v49 = vadd.f32 %v2335_v12, %v3690_v32  ;;  %v1533_v15 = vmul.f32 0.5, %v1443_v1 }
 0x26b   : > { %v1658_v13 = vmul.f32 %v1626_v50, %v1530_v24 }
 0x26c   : > { %2548 = verf.f32 %v1565_v63  ;;  %v1566_v59 = vmul.f32 0.70710677, %v1446_v49  ;;  %v2336_v35 = vpop.f32.mrb[28].mxu0  ;;  %v1534_v40 = vmul.f32 0.5, %v1446_v49 }
 0x26d   : > { %v2337_v25 = vpop.f32.mrb[29].mxu0  ;;  %v1685_v4 = vpack.c.bf16 %v1658_v13, %v1657_v46 }
 0x26e   : > { %v2545_v51 = vpop.eup %2544  ;;  %2550 = verf.f32 %v1566_v59  ;;  %v2338_v11 = vadd.f32 %v2337_v25, %v2336_v35  ;;  %v2339_v23 = vpop.f32.mrb[30].mxu0 }
 0x26f   : > { %v1627_v27 = vadd.f32 1.0, %v2545_v51  ;;  %v2340_v28 = vpop.f32.mrb[31].mxu0  ;;  %2256 = vmatmul.mubr.msk.bf16.gmra.mrb[16].mxu1 %vm1757_vm0, %v1685_v4 }
 0x270   : > { %v2547_v47 = vpop.eup %2546  ;;  %v1451_v38 = vadd.f32 %v2338_v11, %v3690_v32  ;;  %v2341_v9 = vadd.f32 %v2340_v28, %v2339_v23  ;;  %1888 = vmatprep.mubr.bf16.mxu1 %v2652_v34 }
 0x271   : > { %v1628_v56 = vadd.f32 1.0, %v2547_v47  ;;  %v1659_v19 = vmul.f32 %v1627_v27, %v1531_v43 }
 0x272   : > { %v1567_v22 = vmul.f32 0.70710677, %v1451_v38  ;;  %v1454_v36 = vadd.f32 %v2341_v9, %v3690_v32  ;;  %v1535_v57 = vmul.f32 0.5, %v1451_v38 }
 0x273   : > { %v1660_v7 = vmul.f32 %v1628_v56, %v1532_v10 }
 0x274   : > { %2552 = verf.f32 %v1567_v22  ;;  %v1568_v39 = vmul.f32 0.70710677, %v1454_v36  ;;  %v2342_v58 = vpop.f32.mrb[32].mxu0  ;;  %v1536_v33 = vmul.f32 0.5, %v1454_v36 }
 0x275   : > { %v2343_v62 = vpop.f32.mrb[33].mxu0  ;;  %v1686_v0 = vpack.c.bf16 %v1660_v7, %v1659_v19 }
 0x276   : > { %v2549_v37 = vpop.eup %2548  ;;  %2554 = verf.f32 %v1568_v39  ;;  %v2344_v45 = vadd.f32 %v2343_v62, %v2342_v58  ;;  %v2345_v29 = vpop.f32.mrb[34].mxu0 }
 0x277   : > { %v1629_v8 = vadd.f32 1.0, %v2549_v37  ;;  %v2346_v41 = vpop.f32.mrb[35].mxu0  ;;  %2257 = vmatmul.mubr.msk.bf16.gmra.mrb[20].mxu1 %vm1757_vm0, %v1686_v0 }
 0x278   : > { %v2551_v20 = vpop.eup %2550  ;;  %v1459_v48 = vadd.f32 %v2344_v45, %v3690_v32  ;;  %v2347_v2 = vadd.f32 %v2346_v41, %v2345_v29  ;;  %1898 = vmatprep.mubr.bf16.mxu1 %v2652_v34 }
 0x279   : > { %v1630_v21 = vadd.f32 1.0, %v2551_v20  ;;  %v1661_v44 = vmul.f32 %v1629_v8, %v1533_v15 }
 0x27a   : > { %v1569_v30 = vmul.f32 0.70710677, %v1459_v48  ;;  %v1462_v54 = vadd.f32 %v2347_v2, %v3690_v32  ;;  %v1537_v27 = vmul.f32 0.5, %v1459_v48 }
 0x27b   : > { %v1662_v31 = vmul.f32 %v1630_v21, %v1534_v40 }
 0x27c   : > { %2556 = verf.f32 %v1569_v30  ;;  %v1570_v26 = vmul.f32 0.70710677, %v1462_v54  ;;  %v2348_v14 = vpop.f32.mrb[36].mxu0  ;;  %v1538_v28 = vmul.f32 0.5, %v1462_v54 }
 0x27d   : > { %v2349_v17 = vpop.f32.mrb[37].mxu0  ;;  %v1687_v6 = vpack.c.bf16 %v1662_v31, %v1661_v44 }
 0x27e   : > { %v2553_v53 = vpop.eup %2552  ;;  %2558 = verf.f32 %v1570_v26  ;;  %v2350_v60 = vadd.f32 %v2349_v17, %v2348_v14  ;;  %v2351_v55 = vpop.f32.mrb[38].mxu0 }
 0x27f   : > { %v1631_v16 = vadd.f32 1.0, %v2553_v53  ;;  %v2352_v18 = vpop.f32.mrb[39].mxu0  ;;  %2258 = vmatmul.mubr.msk.bf16.gmra.mrb[24].mxu1 %vm1757_vm0, %v1687_v6 }
 0x280   : > { %v2555_v3 = vpop.eup %2554  ;;  %v1467_v52 = vadd.f32 %v2350_v60, %v3690_v32  ;;  %v2353_v61 = vadd.f32 %v2352_v18, %v2351_v55  ;;  %1908 = vmatprep.mubr.bf16.mxu1 %v2652_v34 }
 0x281   : > { %v1632_v5 = vadd.f32 1.0, %v2555_v3  ;;  %v1663_v42 = vmul.f32 %v1631_v16, %v1535_v57 }
 0x282   : > { %v1571_v1 = vmul.f32 0.70710677, %v1467_v52  ;;  %v1470_v12 = vadd.f32 %v2353_v61, %v3690_v32  ;;  %v1539_v39 = vmul.f32 0.5, %v1467_v52 }
 0x283   : > { %v1664_v24 = vmul.f32 %v1632_v5, %v1536_v33 }
 0x284   : > { %2560 = verf.f32 %v1571_v1  ;;  %v1572_v50 = vmul.f32 0.70710677, %v1470_v12  ;;  %v2354_v63 = vpop.f32.mrb[40].mxu0  ;;  %v1540_v58 = vmul.f32 0.5, %v1470_v12 }
 0x285   : > { %v2355_v49 = vpop.f32.mrb[41].mxu0  ;;  %v1688_v46 = vpack.c.bf16 %v1664_v24, %v1663_v42 }
 0x286   : > { %v2557_v13 = vpop.eup %2556  ;;  %2562 = verf.f32 %v1572_v50  ;;  %v2356_v59 = vadd.f32 %v2355_v49, %v2354_v63  ;;  %v2357_v35 = vpop.f32.mrb[42].mxu0 }
 0x287   : > { %v1633_v25 = vadd.f32 1.0, %v2557_v13  ;;  %v2358_v4 = vpop.f32.mrb[43].mxu0  ;;  %2259 = vmatmul.mubr.msk.bf16.gmra.mrb[28].mxu1 %vm1757_vm0, %v1688_v46 }
 0x288   : > { %v2559_v51 = vpop.eup %2558  ;;  %v1475_v11 = vadd.f32 %v2356_v59, %v3690_v32  ;;  %v2359_v23 = vadd.f32 %v2358_v4, %v2357_v35  ;;  %1918 = vmatprep.mubr.bf16.mxu1 %v2652_v34 }
 0x289   : > { %v1634_v47 = vadd.f32 1.0, %v2559_v51  ;;  %v1665_v43 = vmul.f32 %v1633_v25, %v1537_v27 }
 0x28a   : > { %v1573_v38 = vmul.f32 0.70710677, %v1475_v11  ;;  %v1478_v9 = vadd.f32 %v2359_v23, %v3690_v32  ;;  %v1541_v20 = vmul.f32 0.5, %v1475_v11 }
 0x28b   : > { %v1666_v10 = vmul.f32 %v1634_v47, %v1538_v28 }
 0x28c   : > { %2564 = verf.f32 %v1573_v38  ;;  %v1574_v56 = vmul.f32 0.70710677, %v1478_v9  ;;  %v1542_v48 = vmul.f32 0.5, %v1478_v9 }
 0x28d   : > { %v1689_v22 = vpack.c.bf16 %v1666_v10, %v1665_v43 }
 0x28e   : > { %v2561_v36 = vpop.eup %2560  ;;  %2566 = verf.f32 %v1574_v56 }
 0x28f   : > { %v1635_v19 = vadd.f32 1.0, %v2561_v36  ;;  %2260 = vmatmul.mubr.msk.bf16.gmra.mrb[32].mxu1 %vm1757_vm0, %v1689_v22 }
 0x290   : > { %v2563_v7 = vpop.eup %2562  ;;  %1928 = vmatprep.mubr.bf16.mxu1 %v2652_v34 }
 0x291   : > { %v1636_v62 = vadd.f32 1.0, %v2563_v7  ;;  %v1667_v0 = vmul.f32 %v1635_v19, %v1539_v39 }
 0x293   : > { %v1668_v37 = vmul.f32 %v1636_v62, %v1540_v58 }
 0x295   : > { %v1690_v45 = vpack.c.bf16 %v1668_v37, %v1667_v0 }
 0x296   : > { %v2565_v29 = vpop.eup %2564 }
 0x297   : > { %v1637_v8 = vadd.f32 1.0, %v2565_v29  ;;  %2261 = vmatmul.mubr.msk.bf16.gmra.mrb[36].mxu1 %vm1757_vm0, %v1690_v45 }
 0x298   : > { %v2567_v41 = vpop.eup %2566  ;;  %1938 = vmatprep.mubr.bf16.mxu1 %v2652_v34 }
 0x299   : > { %v1638_v2 = vadd.f32 1.0, %v2567_v41  ;;  %v1669_v15 = vmul.f32 %v1637_v8, %v1541_v20 }
 0x29b   : > { %v1670_v40 = vmul.f32 %v1638_v2, %v1542_v48 }
 0x29d   : > { %v1691_v21 = vpack.c.bf16 %v1670_v40, %v1669_v15 }
 0x29f   : > { %2262 = vmatmul.mubr.msk.bf16.gmra.mrb[40].mxu1 %vm1757_vm0, %v1691_v21 }
 0x2a0   : > { %1948 = vmatprep.mubr.bf16.mxu1 %v2652_v34 }
 0x2ce   : > { %v2360_v30 = vpop.f32.mrb[44].mxu0 }
 0x2cf   : > { %v2361_v54 = vpop.f32.mrb[45].mxu0 }
 0x2d0   : > { %v2362_v44 = vadd.f32 %v2361_v54, %v2360_v30  ;;  %v2363_v31 = vpop.f32.mrb[46].mxu0 }
 0x2d1   : > { %v2364_v26 = vpop.f32.mrb[47].mxu0 }
 0x2d2   : > { %v1483_v14 = vadd.f32 %v2362_v44, %v3690_v32  ;;  %v2365_v17 = vadd.f32 %v2364_v26, %v2363_v31 }
 0x2d4   : > { %v1575_v6 = vmul.f32 0.70710677, %v1483_v14  ;;  %v1486_v53 = vadd.f32 %v2365_v17, %v3690_v32  ;;  %v1543_v25 = vmul.f32 0.5, %v1483_v14 }
 0x2d6   : > { %2568 = verf.f32 %v1575_v6  ;;  %v1576_v60 = vmul.f32 0.70710677, %v1486_v53  ;;  %v2366_v55 = vpop.f32.mrb[48].mxu0  ;;  %v1544_v4 = vmul.f32 0.5, %v1486_v53 }
 0x2d7   : > { %v2367_v16 = vpop.f32.mrb[49].mxu0 }
 0x2d8   : > { %2570 = verf.f32 %v1576_v60  ;;  %v2368_v18 = vadd.f32 %v2367_v16, %v2366_v55  ;;  %v2369_v3 = vpop.f32.mrb[50].mxu0 }
 0x2d9   : > { %v2370_v52 = vpop.f32.mrb[51].mxu0 }
 0x2da   : > { %v1491_v61 = vadd.f32 %v2368_v18, %v3690_v32  ;;  %v2371_v57 = vadd.f32 %v2370_v52, %v2369_v3 }
 0x2dc   : > { %v1577_v33 = vmul.f32 0.70710677, %v1491_v61  ;;  %v1494_v5 = vadd.f32 %v2371_v57, %v3690_v32  ;;  %v1545_v62 = vmul.f32 0.5, %v1491_v61 }
 0x2de   : > { %2572 = verf.f32 %v1577_v33  ;;  %v1578_v1 = vmul.f32 0.70710677, %v1494_v5  ;;  %v1546_v0 = vmul.f32 0.5, %v1494_v5 }
 0x2df   : > { %v2372_v12 = vpop.f32.mrb[52].mxu0 }
 0x2e0   : > { %v2373_v42 = vpop.f32.mrb[53].mxu0  ;;  %v2569_v24 = vpop.eup %2568  ;;  %2574 = verf.f32 %v1578_v1 }
 0x2e1   : > { %v2374_v50 = vadd.f32 %v2373_v42, %v2372_v12  ;;  %v2375_v63 = vpop.f32.mrb[54].mxu0  ;;  %v1639_v49 = vadd.f32 1.0, %v2569_v24 }
 0x2e2   : > { %v2376_v46 = vpop.f32.mrb[55].mxu0  ;;  %v2571_v13 = vpop.eup %2570 }
 0x2e3   : > { %v1499_v59 = vadd.f32 %v2374_v50, %v3690_v32  ;;  %v2377_v35 = vadd.f32 %v2376_v46, %v2375_v63  ;;  %v1640_v51 = vadd.f32 1.0, %v2571_v13  ;;  %v1671_v27 = vmul.f32 %v1639_v49, %v1543_v25 }
 0x2e5   : > { %v1579_v11 = vmul.f32 0.70710677, %v1499_v59  ;;  %v1502_v23 = vadd.f32 %v2377_v35, %v3690_v32  ;;  %v1672_v28 = vmul.f32 %v1640_v51, %v1544_v4  ;;  %v1547_v17 = vmul.f32 0.5, %v1499_v59  ;;  %v1705_v51 = vld [vmem:[%s4020_s7] sm:$0x3] }
 0x2e7   : > { %2576 = verf.f32 %v1579_v11  ;;  %v1580_v47 = vmul.f32 0.70710677, %v1502_v23  ;;  %v2378_v38 = vpop.f32.mrb[56].mxu0  ;;  %v1692_v43 = vpack.c.bf16 %v1672_v28, %v1671_v27  ;;  %v1548_v6 = vmul.f32 0.5, %v1502_v23  ;;  %v4247_v11 = vld [vmem:[#allocation88_spill] sm:$0xff]  ;;  %v4248_v27 = vld [vmem:[#allocation89_spill] sm:$0xff] }
 0x2e8   : > { %v2379_v9 = vpop.f32.mrb[57].mxu0  ;;  %v2573_v10 = vpop.eup %2572  ;;  %v3760_v23 = vrot.slane %v1705_v51, %v4247_v11  ;;  %v3763_v28 = vrot.slane %v1705_v51, %v4248_v27  ;;  %v4263_v11 = vld [vmem:[#allocation19_spill] sm:$0xff] }
 0x2e9   : > { %2578 = verf.f32 %v1580_v47  ;;  %v2380_v56 = vadd.f32 %v2379_v9, %v2378_v38  ;;  %v2381_v22 = vpop.f32.mrb[58].mxu0  ;;  %v1641_v36 = vadd.f32 1.0, %v2573_v10  ;;  %2263 = vmatmul.mubr.msk.bf16.gmra.mrb[44].mxu1 %vm1757_vm0, %v1692_v43  ;;  %v4249_v10 = vld [vmem:[#allocation5_spill] sm:$0xff] }
 0x2ea   : > { %v2382_v19 = vpop.f32.mrb[59].mxu0  ;;  %v2575_v7 = vpop.eup %2574  ;;  %1958 = vmatprep.mubr.bf16.mxu1 %v2652_v34 }
 0x2eb   : > { %v1507_v39 = vadd.f32 %v2380_v56, %v3690_v32  ;;  %v2383_v58 = vadd.f32 %v2382_v19, %v2381_v22  ;;  %v1642_v37 = vadd.f32 1.0, %v2575_v7  ;;  %v1673_v8 = vmul.f32 %v1641_v36, %v1545_v62  ;;  %v4250_v19 = vld [vmem:[#allocation6_spill] sm:$0xff] }
 0x2ed   : > { %v1581_v45 = vmul.f32 0.70710677, %v1507_v39  ;;  %v1510_v29 = vadd.f32 %v2383_v58, %v3690_v32  ;;  %v1674_v41 = vmul.f32 %v1642_v37, %v1546_v0  ;;  %v1549_v5 = vmul.f32 0.5, %v1507_v39  ;;  %v4251_v58 = vld [vmem:[#allocation7_spill] sm:$0xff]  ;;  %v4252_v0 = vld [vmem:[#allocation8_spill] sm:$0xff] }
 0x2ef   : > { %2580 = verf.f32 %v1581_v45  ;;  %v1582_v20 = vmul.f32 0.70710677, %v1510_v29  ;;  %v2384_v48 = vpop.f32.mrb[60].mxu0  ;;  %v1693_v15 = vpack.c.bf16 %v1674_v41, %v1673_v8  ;;  %v1550_v1 = vmul.f32 0.5, %v1510_v29 }
 0x2f0   : > { %v2385_v2 = vpop.f32.mrb[61].mxu0 }
 0x2f1   : > { %v2577_v40 = vpop.eup %2576  ;;  %2582 = verf.f32 %v1582_v20  ;;  %v2386_v21 = vadd.f32 %v2385_v2, %v2384_v48  ;;  %v2387_v30 = vpop.f32.mrb[62].mxu0  ;;  %2264 = vmatmul.mubr.msk.bf16.gmra.mrb[48].mxu1 %vm1757_vm0, %v1693_v15  ;;  %v4253_v48 = vld [vmem:[#allocation9_spill] sm:$0xff] }
 0x2f2   : > { %v1643_v54 = vadd.f32 1.0, %v2577_v40  ;;  %v2388_v44 = vpop.f32.mrb[63].mxu0  ;;  %1968 = vmatprep.mubr.bf16.mxu1 %v2652_v34 }
 0x2f3   : > { %v2579_v31 = vpop.eup %2578  ;;  %v1515_v26 = vadd.f32 %v2386_v21, %v3690_v32  ;;  %v2389_v14 = vadd.f32 %v2388_v44, %v2387_v30  ;;  %v4254_v21 = vld [vmem:[#allocation10_spill] sm:$0xff]  ;;  %v4255_v44 = vld [vmem:[#allocation11_spill] sm:$0xff] }
 0x2f4   : > { %v1644_v53 = vadd.f32 1.0, %v2579_v31  ;;  %v1675_v16 = vmul.f32 %v1643_v54, %v1547_v17 }
 0x2f5   : > { %v1583_v60 = vmul.f32 0.70710677, %v1515_v26  ;;  %v1518_v55 = vadd.f32 %v2389_v14, %v3690_v32  ;;  %v1551_v46 = vmul.f32 0.5, %v1515_v26  ;;  %v4256_v26 = vld [vmem:[#allocation12_spill] sm:$0xff] }
 0x2f6   : > { %v1676_v18 = vmul.f32 %v1644_v53, %v1548_v6 }
 0x2f7   : > { %2584 = verf.f32 %v1583_v60  ;;  %v1584_v3 = vmul.f32 0.70710677, %v1518_v55  ;;  %v1552_v13 = vmul.f32 0.5, %v1518_v55 }
 0x2f8   : > { %v1694_v52 = vpack.c.bf16 %v1676_v18, %v1675_v16  ;;  %v4257_v16 = vld [vmem:[#allocation13_spill] sm:$0xff] }
 0x2f9   : > { %v2581_v61 = vpop.eup %2580  ;;  %2586 = verf.f32 %v1584_v3 }
 0x2fa   : > { %v1645_v57 = vadd.f32 1.0, %v2581_v61  ;;  %2265 = vmatmul.mubr.msk.bf16.gmra.mrb[52].mxu1 %vm1757_vm0, %v1694_v52  ;;  %v4258_v61 = vld [vmem:[#allocation14_spill] sm:$0xff] }
 0x2fb   : > { %v2583_v33 = vpop.eup %2582  ;;  %1978 = vmatprep.mubr.bf16.mxu1 %v2652_v34 }
 0x2fc   : > { %v1646_v12 = vadd.f32 1.0, %v2583_v33  ;;  %v1677_v42 = vmul.f32 %v1645_v57, %v1549_v5  ;;  %v4259_v5 = vld [vmem:[#allocation15_spill] sm:$0xff] }
 0x2fe   : > { %v1678_v24 = vmul.f32 %v1646_v12, %v1550_v1  ;;  %v4260_v12 = vld [vmem:[#allocation16_spill] sm:$0xff] }
 0x300   : > { %v1695_v32 = vpack.c.bf16 %v1678_v24, %v1677_v42 }
 0x301   : > { %v2585_v50 = vpop.eup %2584 }
 0x302   : > { %v1647_v63 = vadd.f32 1.0, %v2585_v50  ;;  %2266 = vmatmul.mubr.msk.bf16.gmra.mrb[56].mxu1 %vm1757_vm0, %v1695_v32 }
 0x303   : > { %v2587_v49 = vpop.eup %2586  ;;  %1988 = vmatprep.mubr.bf16.mxu1 %v2652_v34 }
 0x304   : > { %v1648_v59 = vadd.f32 1.0, %v2587_v49  ;;  %v1679_v35 = vmul.f32 %v1647_v63, %v1551_v46  ;;  %v4261_v46 = vld [vmem:[#allocation17_spill] sm:$0xff] }
 0x306   : > { %v1680_v25 = vmul.f32 %v1648_v59, %v1552_v13 }
 0x308   : > { %v1696_v4 = vpack.c.bf16 %v1680_v25, %v1679_v35  ;;  %v4262_v25 = vld [vmem:[#allocation18_spill] sm:$0xff] }
 0x30a   : > { %2267 = vmatmul.mubr.msk.bf16.gmra.mrb[60].mxu1 %vm1757_vm0, %v1696_v4 }
 0x322   : > { %v1840_v34 = vpop.f32.mrb[0].mxu1 }
 0x323   : > { %v1841_v47 = vadd.f32 %v1840_v34, %v3760_v23  ;;  %v1842_v38 = vpop.f32.mrb[1].mxu1  ;;  %v4264_v34 = vld [vmem:[#allocation20_spill] sm:$0xff] }
 0x324   : > { %v1843_v9 = vadd.f32 %v1842_v38, %v3763_v28  ;;  %v1844_v43 = vpop.f32.mrb[2].mxu1 }
 0x325   : > { %v1999_v56 = vadd.f32 %v1841_v47, %v4249_v10  ;;  %v1845_v22 = vadd.f32 %v1844_v43, %v3760_v23  ;;  %v1846_v36 = vpop.f32.mrb[3].mxu1 }
 0x326   : > { %v2000_v7 = vadd.f32 %v1843_v9, %v4250_v19  ;;  %v1847_v39 = vadd.f32 %v1846_v36, %v3763_v28 }
 0x327   : > { %2063 = vst [vmem:[%s3773_s20] sm:$0xff] %v1999_v56  ;;  %v2001_v62 = vadd.f32 %v1845_v22, %v4251_v58  ;;  %v4265_v22 = vld [vmem:[#allocation21_spill] sm:$0xff] }
 0x328   : > { %2064 = vst [vmem:[%s3773_s20 + $0x8] sm:$0xff] %v2000_v7  ;;  %v2002_v37 = vadd.f32 %v1847_v39, %v4252_v0  ;;  %v4266_v39 = vld [vmem:[#allocation22_spill] sm:$0xff]  ;;  %v4267_v0 = vld [vmem:[#allocation23_spill] sm:$0xff] }
 0x329   : > { %2065 = vst [vmem:[%s3773_s20 + $0x10] sm:$0xff] %v2001_v62 }
 0x32a   : > { %2066 = vst [vmem:[%s3773_s20 + $0x18] sm:$0xff] %v2002_v37  ;;  %v1850_v45 = vpop.f32.mrb[4].mxu1 }
 0x32b   : > { %v1851_v29 = vadd.f32 %v1850_v45, %v3760_v23  ;;  %v1852_v8 = vpop.f32.mrb[5].mxu1  ;;  %v4268_v45 = vld [vmem:[#allocation24_spill] sm:$0xff] }
 0x32c   : > { %v1853_v41 = vadd.f32 %v1852_v8, %v3763_v28  ;;  %v1854_v20 = vpop.f32.mrb[6].mxu1 }
 0x32d   : > { %v2003_v2 = vadd.f32 %v1851_v29, %v4253_v48  ;;  %v1855_v15 = vadd.f32 %v1854_v20, %v3760_v23  ;;  %v1856_v40 = vpop.f32.mrb[7].mxu1 }
 0x32e   : > { %v2004_v30 = vadd.f32 %v1853_v41, %v4254_v21  ;;  %v1857_v54 = vadd.f32 %v1856_v40, %v3763_v28 }
 0x32f   : > { %2067 = vst [vmem:[%s3773_s20 + $0x20] sm:$0xff] %v2003_v2  ;;  %v2005_v31 = vadd.f32 %v1855_v15, %v4255_v44  ;;  %v4269_v15 = vld [vmem:[#allocation25_spill] sm:$0xff] }
 0x330   : > { %2068 = vst [vmem:[%s3773_s20 + $0x28] sm:$0xff] %v2004_v30  ;;  %v2006_v14 = vadd.f32 %v1857_v54, %v4256_v26  ;;  %v4270_v54 = vld [vmem:[#allocation26_spill] sm:$0xff]  ;;  %v4271_v26 = vld [vmem:[#allocation27_spill] sm:$0xff] }
 0x331   : > { %2069 = vst [vmem:[%s3773_s20 + $0x30] sm:$0xff] %v2005_v31 }
 0x332   : > { %2070 = vst [vmem:[%s3773_s20 + $0x38] sm:$0xff] %v2006_v14  ;;  %v1860_v17 = vpop.f32.mrb[8].mxu1 }
 0x333   : > { %v1861_v6 = vadd.f32 %v1860_v17, %v3760_v23  ;;  %v1862_v53 = vpop.f32.mrb[9].mxu1  ;;  %v4272_v17 = vld [vmem:[#allocation28_spill] sm:$0xff] }
 0x334   : > { %v1863_v60 = vadd.f32 %v1862_v53, %v3763_v28  ;;  %v1864_v55 = vpop.f32.mrb[10].mxu1 }
 0x335   : > { %v2007_v18 = vadd.f32 %v1861_v6, %v4257_v16  ;;  %v1865_v3 = vadd.f32 %v1864_v55, %v3760_v23  ;;  %v1866_v52 = vpop.f32.mrb[11].mxu1 }
 0x336   : > { %v2008_v57 = vadd.f32 %v1863_v60, %v4258_v61  ;;  %v1867_v33 = vadd.f32 %v1866_v52, %v3763_v28 }
 0x337   : > { %2071 = vst [vmem:[%s3773_s20 + $0x40] sm:$0xff] %v2007_v18  ;;  %v2009_v1 = vadd.f32 %v1865_v3, %v4259_v5  ;;  %v4273_v3 = vld [vmem:[#allocation29_spill] sm:$0xff] }
 0x338   : > { %2072 = vst [vmem:[%s3773_s20 + $0x48] sm:$0xff] %v2008_v57  ;;  %v2010_v42 = vadd.f32 %v1867_v33, %v4260_v12  ;;  %v4274_v33 = vld [vmem:[#allocation30_spill] sm:$0xff]  ;;  %v4275_v12 = vld [vmem:[#allocation31_spill] sm:$0xff] }
 0x339   : > { %2073 = vst [vmem:[%s3773_s20 + $0x50] sm:$0xff] %v2009_v1 }
 0x33a   : > { %2074 = vst [vmem:[%s3773_s20 + $0x58] sm:$0xff] %v2010_v42  ;;  %v1870_v24 = vpop.f32.mrb[12].mxu1 }
 0x33b   : > { %v1871_v32 = vadd.f32 %v1870_v24, %v3760_v23  ;;  %v1872_v50 = vpop.f32.mrb[13].mxu1  ;;  %v4276_v24 = vld [vmem:[#allocation32_spill] sm:$0xff] }
 0x33c   : > { %v1873_v63 = vadd.f32 %v1872_v50, %v3763_v28  ;;  %v1874_v49 = vpop.f32.mrb[14].mxu1 }
 0x33d   : > { %v2011_v13 = vadd.f32 %v1871_v32, %v4261_v46  ;;  %v1875_v59 = vadd.f32 %v1874_v49, %v3760_v23  ;;  %v1876_v35 = vpop.f32.mrb[15].mxu1 }
 0x33e   : > { %v2012_v4 = vadd.f32 %v1873_v63, %v4262_v25  ;;  %v1877_v51 = vadd.f32 %v1876_v35, %v3763_v28 }
 0x33f   : > { %2075 = vst [vmem:[%s3773_s20 + $0x60] sm:$0xff] %v2011_v13  ;;  %v2013_v27 = vadd.f32 %v1875_v59, %v4263_v11  ;;  %v4277_v59 = vld [vmem:[#allocation33_spill] sm:$0xff] }
 0x340   : > { %2076 = vst [vmem:[%s3773_s20 + $0x68] sm:$0xff] %v2012_v4  ;;  %v2014_v47 = vadd.f32 %v1877_v51, %v4264_v34  ;;  %v4278_v51 = vld [vmem:[#allocation34_spill] sm:$0xff]  ;;  %v4279_v34 = vld [vmem:[#allocation35_spill] sm:$0xff] }
 0x341   : > { %2077 = vst [vmem:[%s3773_s20 + $0x70] sm:$0xff] %v2013_v27 }
 0x342   : > { %2078 = vst [vmem:[%s3773_s20 + $0x78] sm:$0xff] %v2014_v47  ;;  %v1880_v38 = vpop.f32.mrb[16].mxu1 }
 0x343   : > { %v1881_v9 = vadd.f32 %v1880_v38, %v3760_v23  ;;  %v1882_v43 = vpop.f32.mrb[17].mxu1  ;;  %v4280_v38 = vld [vmem:[#allocation36_spill] sm:$0xff] }
 0x344   : > { %v1883_v10 = vadd.f32 %v1882_v43, %v3763_v28  ;;  %v1884_v56 = vpop.f32.mrb[18].mxu1 }
 0x345   : > { %v2015_v36 = vadd.f32 %v1881_v9, %v4265_v22  ;;  %v1885_v19 = vadd.f32 %v1884_v56, %v3760_v23  ;;  %v1886_v7 = vpop.f32.mrb[19].mxu1 }
 0x346   : > { %v2016_v58 = vadd.f32 %v1883_v10, %v4266_v39  ;;  %v1887_v62 = vadd.f32 %v1886_v7, %v3763_v28 }
 0x347   : > { %2079 = vst [vmem:[%s3773_s20 + $0x80] sm:$0xff] %v2015_v36  ;;  %v2017_v37 = vadd.f32 %v1885_v19, %v4267_v0  ;;  %v4281_v19 = vld [vmem:[#allocation37_spill] sm:$0xff] }
 0x348   : > { %2080 = vst [vmem:[%s3773_s20 + $0x88] sm:$0xff] %v2016_v58  ;;  %v2018_v29 = vadd.f32 %v1887_v62, %v4268_v45  ;;  %v4282_v62 = vld [vmem:[#allocation38_spill] sm:$0xff]  ;;  %v4283_v45 = vld [vmem:[#allocation39_spill] sm:$0xff] }
 0x349   : > { %2081 = vst [vmem:[%s3773_s20 + $0x90] sm:$0xff] %v2017_v37 }
 0x34a   : > { %2082 = vst [vmem:[%s3773_s20 + $0x98] sm:$0xff] %v2018_v29  ;;  %v1890_v8 = vpop.f32.mrb[20].mxu1 }
 0x34b   : > { %v1891_v41 = vadd.f32 %v1890_v8, %v3760_v23  ;;  %v1892_v20 = vpop.f32.mrb[21].mxu1  ;;  %v4284_v8 = vld [vmem:[#allocation40_spill] sm:$0xff] }
 0x34c   : > { %v1893_v48 = vadd.f32 %v1892_v20, %v3763_v28  ;;  %v1894_v2 = vpop.f32.mrb[22].mxu1 }
 0x34d   : > { %v2019_v40 = vadd.f32 %v1891_v41, %v4269_v15  ;;  %v1895_v21 = vadd.f32 %v1894_v2, %v3760_v23  ;;  %v1896_v30 = vpop.f32.mrb[23].mxu1 }
 0x34e   : > { %v2020_v44 = vadd.f32 %v1893_v48, %v4270_v54  ;;  %v1897_v31 = vadd.f32 %v1896_v30, %v3763_v28 }
 0x34f   : > { %2083 = vst [vmem:[%s3773_s20 + $0xa0] sm:$0xff] %v2019_v40  ;;  %v2021_v14 = vadd.f32 %v1895_v21, %v4271_v26  ;;  %v4285_v21 = vld [vmem:[#allocation41_spill] sm:$0xff] }
 0x350   : > { %2084 = vst [vmem:[%s3773_s20 + $0xa8] sm:$0xff] %v2020_v44  ;;  %v2022_v6 = vadd.f32 %v1897_v31, %v4272_v17  ;;  %v4286_v31 = vld [vmem:[#allocation42_spill] sm:$0xff]  ;;  %v4287_v17 = vld [vmem:[#allocation43_spill] sm:$0xff] }
 0x351   : > { %2085 = vst [vmem:[%s3773_s20 + $0xb0] sm:$0xff] %v2021_v14 }
 0x352   : > { %2086 = vst [vmem:[%s3773_s20 + $0xb8] sm:$0xff] %v2022_v6  ;;  %v1900_v53 = vpop.f32.mrb[24].mxu1 }
 0x353   : > { %v1901_v60 = vadd.f32 %v1900_v53, %v3760_v23  ;;  %v1902_v55 = vpop.f32.mrb[25].mxu1  ;;  %v4288_v53 = vld [vmem:[#allocation44_spill] sm:$0xff] }
 0x354   : > { %v1903_v16 = vadd.f32 %v1902_v55, %v3763_v28  ;;  %v1904_v18 = vpop.f32.mrb[26].mxu1 }
 0x355   : > { %v2023_v52 = vadd.f32 %v1901_v60, %v4273_v3  ;;  %v1905_v61 = vadd.f32 %v1904_v18, %v3760_v23  ;;  %v1906_v57 = vpop.f32.mrb[27].mxu1 }
 0x356   : > { %v2024_v5 = vadd.f32 %v1903_v16, %v4274_v33  ;;  %v1907_v1 = vadd.f32 %v1906_v57, %v3763_v28 }
 0x357   : > { %2087 = vst [vmem:[%s3773_s20 + $0xc0] sm:$0xff] %v2023_v52  ;;  %v2025_v42 = vadd.f32 %v1905_v61, %v4275_v12  ;;  %v4289_v61 = vld [vmem:[#allocation45_spill] sm:$0xff] }
 0x358   : > { %2088 = vst [vmem:[%s3773_s20 + $0xc8] sm:$0xff] %v2024_v5  ;;  %v2026_v32 = vadd.f32 %v1907_v1, %v4276_v24  ;;  %v4290_v1 = vld [vmem:[#allocation46_spill] sm:$0xff]  ;;  %v4291_v24 = vld [vmem:[#allocation47_spill] sm:$0xff] }
 0x359   : > { %2089 = vst [vmem:[%s3773_s20 + $0xd0] sm:$0xff] %v2025_v42 }
 0x35a   : > { %2090 = vst [vmem:[%s3773_s20 + $0xd8] sm:$0xff] %v2026_v32  ;;  %v1910_v50 = vpop.f32.mrb[28].mxu1 }
 0x35b   : > { %v1911_v63 = vadd.f32 %v1910_v50, %v3760_v23  ;;  %v1912_v49 = vpop.f32.mrb[29].mxu1  ;;  %v4292_v50 = vld [vmem:[#allocation48_spill] sm:$0xff] }
 0x35c   : > { %v1913_v46 = vadd.f32 %v1912_v49, %v3763_v28  ;;  %v1914_v13 = vpop.f32.mrb[30].mxu1 }
 0x35d   : > { %v2027_v35 = vadd.f32 %v1911_v63, %v4277_v59  ;;  %v1915_v25 = vadd.f32 %v1914_v13, %v3760_v23  ;;  %v1916_v4 = vpop.f32.mrb[31].mxu1 }
 0x35e   : > { %v2028_v11 = vadd.f32 %v1913_v46, %v4278_v51  ;;  %v1917_v27 = vadd.f32 %v1916_v4, %v3763_v28 }
 0x35f   : > { %2091 = vst [vmem:[%s3773_s20 + $0xe0] sm:$0xff] %v2027_v35  ;;  %v2029_v47 = vadd.f32 %v1915_v25, %v4279_v34  ;;  %v4293_v25 = vld [vmem:[#allocation51_spill] sm:$0xff] }
 0x360   : > { %2092 = vst [vmem:[%s3773_s20 + $0xe8] sm:$0xff] %v2028_v11  ;;  %v2030_v9 = vadd.f32 %v1917_v27, %v4280_v38  ;;  %v4294_v27 = vld [vmem:[#allocation54_spill] sm:$0xff]  ;;  %v4295_v38 = vld [vmem:[#allocation57_spill] sm:$0xff] }
 0x361   : > { %2093 = vst [vmem:[%s3773_s20 + $0xf0] sm:$0xff] %v2029_v47 }
 0x362   : > { %2094 = vst [vmem:[%s3773_s20 + $0xf8] sm:$0xff] %v2030_v9  ;;  %v1920_v43 = vpop.f32.mrb[32].mxu1 }
 0x363   : > { %v1921_v10 = vadd.f32 %v1920_v43, %v3760_v23  ;;  %v1922_v56 = vpop.f32.mrb[33].mxu1  ;;  %v4296_v43 = vld [vmem:[#allocation58_spill] sm:$0xff] }
 0x364   : > { %v1923_v22 = vadd.f32 %v1922_v56, %v3763_v28  ;;  %v1924_v36 = vpop.f32.mrb[34].mxu1 }
 0x365   : > { %v2031_v7 = vadd.f32 %v1921_v10, %v4281_v19  ;;  %v1925_v39 = vadd.f32 %v1924_v36, %v3760_v23  ;;  %v1926_v58 = vpop.f32.mrb[35].mxu1 }
 0x366   : > { %v2032_v0 = vadd.f32 %v1923_v22, %v4282_v62  ;;  %v1927_v37 = vadd.f32 %v1926_v58, %v3763_v28 }
 0x367   : > { %2095 = vst [vmem:[%s3773_s20 + $0x100] sm:$0xff] %v2031_v7  ;;  %v2033_v29 = vadd.f32 %v1925_v39, %v4283_v45  ;;  %v4297_v39 = vld [vmem:[#allocation61_spill] sm:$0xff] }
 0x368   : > { %2096 = vst [vmem:[%s3773_s20 + $0x108] sm:$0xff] %v2032_v0  ;;  %v2034_v41 = vadd.f32 %v1927_v37, %v4284_v8  ;;  %v4298_v37 = vld [vmem:[#allocation64_spill] sm:$0xff]  ;;  %v4299_v8 = vld [vmem:[#allocation65_spill] sm:$0xff] }
 0x369   : > { %2097 = vst [vmem:[%s3773_s20 + $0x110] sm:$0xff] %v2033_v29 }
 0x36a   : > { %2098 = vst [vmem:[%s3773_s20 + $0x118] sm:$0xff] %v2034_v41  ;;  %v1930_v20 = vpop.f32.mrb[36].mxu1 }
 0x36b   : > { %v1931_v48 = vadd.f32 %v1930_v20, %v3760_v23  ;;  %v1932_v2 = vpop.f32.mrb[37].mxu1  ;;  %v4300_v20 = vld [vmem:[#allocation66_spill] sm:$0xff] }
 0x36c   : > { %v1933_v15 = vadd.f32 %v1932_v2, %v3763_v28  ;;  %v1934_v40 = vpop.f32.mrb[38].mxu1 }
 0x36d   : > { %v2035_v30 = vadd.f32 %v1931_v48, %v4285_v21  ;;  %v1935_v54 = vadd.f32 %v1934_v40, %v3760_v23  ;;  %v1936_v44 = vpop.f32.mrb[39].mxu1 }
 0x36e   : > { %v2036_v26 = vadd.f32 %v1933_v15, %v4286_v31  ;;  %v1937_v14 = vadd.f32 %v1936_v44, %v3763_v28 }
 0x36f   : > { %2099 = vst [vmem:[%s3773_s20 + $0x120] sm:$0xff] %v2035_v30  ;;  %v2037_v6 = vadd.f32 %v1935_v54, %v4287_v17  ;;  %v4301_v54 = vld [vmem:[#allocation69_spill] sm:$0xff] }
 0x370   : > { %2100 = vst [vmem:[%s3773_s20 + $0x128] sm:$0xff] %v2036_v26  ;;  %v2038_v60 = vadd.f32 %v1937_v14, %v4288_v53  ;;  %v4302_v14 = vld [vmem:[#allocation72_spill] sm:$0xff]  ;;  %v4303_v53 = vld [vmem:[#allocation73_spill] sm:$0xff] }
 0x371   : > { %2101 = vst [vmem:[%s3773_s20 + $0x130] sm:$0xff] %v2037_v6 }
 0x372   : > { %2102 = vst [vmem:[%s3773_s20 + $0x138] sm:$0xff] %v2038_v60  ;;  %v1940_v55 = vpop.f32.mrb[40].mxu1 }
 0x373   : > { %v1941_v16 = vadd.f32 %v1940_v55, %v3760_v23  ;;  %v1942_v18 = vpop.f32.mrb[41].mxu1  ;;  %v4304_v55 = vld [vmem:[#allocation74_spill] sm:$0xff] }
 0x374   : > { %v1943_v3 = vadd.f32 %v1942_v18, %v3763_v28  ;;  %v1944_v52 = vpop.f32.mrb[42].mxu1 }
 0x375   : > { %v2039_v57 = vadd.f32 %v1941_v16, %v4289_v61  ;;  %v1945_v33 = vadd.f32 %v1944_v52, %v3760_v23  ;;  %v1946_v5 = vpop.f32.mrb[43].mxu1 }
 0x376   : > { %v2040_v12 = vadd.f32 %v1943_v3, %v4290_v1  ;;  %v1947_v42 = vadd.f32 %v1946_v5, %v3763_v28 }
 0x377   : > { %2103 = vst [vmem:[%s3773_s20 + $0x140] sm:$0xff] %v2039_v57  ;;  %v2041_v32 = vadd.f32 %v1945_v33, %v4291_v24  ;;  %v4305_v33 = vld [vmem:[#allocation77_spill] sm:$0xff] }
 0x378   : > { %2104 = vst [vmem:[%s3773_s20 + $0x148] sm:$0xff] %v2040_v12  ;;  %v2042_v63 = vadd.f32 %v1947_v42, %v4292_v50  ;;  %v4306_v42 = vld [vmem:[#allocation80_spill] sm:$0xff]  ;;  %v4307_v50 = vld [vmem:[#allocation81_spill] sm:$0xff] }
 0x379   : > { %2105 = vst [vmem:[%s3773_s20 + $0x150] sm:$0xff] %v2041_v32 }
 0x37a   : > { %2106 = vst [vmem:[%s3773_s20 + $0x158] sm:$0xff] %v2042_v63 }
 0x3bc   : > { %v1950_v49 = vpop.f32.mrb[44].mxu1 }
 0x3bd   : > { %v1951_v46 = vadd.f32 %v1950_v49, %v3760_v23  ;;  %v1952_v13 = vpop.f32.mrb[45].mxu1  ;;  %v4308_v49 = vld [vmem:[#allocation82_spill] sm:$0xff] }
 0x3be   : > { %v1953_v59 = vadd.f32 %v1952_v13, %v3763_v28  ;;  %v1954_v35 = vpop.f32.mrb[46].mxu1 }
 0x3bf   : > { %v2043_v4 = vadd.f32 %v1951_v46, %v4293_v25  ;;  %v1955_v51 = vadd.f32 %v1954_v35, %v3760_v23  ;;  %v1956_v11 = vpop.f32.mrb[47].mxu1 }
 0x3c0   : > { %v2044_v34 = vadd.f32 %v1953_v59, %v4294_v27  ;;  %v1957_v47 = vadd.f32 %v1956_v11, %v3763_v28 }
 0x3c1   : > { %2107 = vst [vmem:[%s3773_s20 + $0x160] sm:$0xff] %v2043_v4  ;;  %v2045_v9 = vadd.f32 %v1955_v51, %v4295_v38  ;;  %v4309_v51 = vld [vmem:[#allocation84_spill] sm:$0xff] }
 0x3c2   : > { %2108 = vst [vmem:[%s3773_s20 + $0x168] sm:$0xff] %v2044_v34  ;;  %v2046_v10 = vadd.f32 %v1957_v47, %v4296_v43  ;;  %v4310_v47 = vld [vmem:[#allocation85_spill] sm:$0xff]  ;;  %v4311_v43 = vld [vmem:[#allocation86_spill] sm:$0xff] }
 0x3c3   : > { %2109 = vst [vmem:[%s3773_s20 + $0x170] sm:$0xff] %v2045_v9 }
 0x3c4   : > { %2110 = vst [vmem:[%s3773_s20 + $0x178] sm:$0xff] %v2046_v10  ;;  %v1960_v56 = vpop.f32.mrb[48].mxu1 }
 0x3c5   : > { %v1961_v22 = vadd.f32 %v1960_v56, %v3760_v23  ;;  %v1962_v36 = vpop.f32.mrb[49].mxu1 }
 0x3c6   : > { %v1963_v19 = vadd.f32 %v1962_v36, %v3763_v28  ;;  %v1964_v7 = vpop.f32.mrb[50].mxu1 }
 0x3c7   : > { %v2047_v58 = vadd.f32 %v1961_v22, %v4297_v39  ;;  %v1965_v62 = vadd.f32 %v1964_v7, %v3760_v23  ;;  %v1966_v0 = vpop.f32.mrb[51].mxu1 }
 0x3c8   : > { %v2048_v45 = vadd.f32 %v1963_v19, %v4298_v37  ;;  %v1967_v29 = vadd.f32 %v1966_v0, %v3763_v28 }
 0x3c9   : > { %2111 = vst [vmem:[%s3773_s20 + $0x180] sm:$0xff] %v2047_v58  ;;  %v2049_v41 = vadd.f32 %v1965_v62, %v4299_v8 }
 0x3ca   : > { %2112 = vst [vmem:[%s3773_s20 + $0x188] sm:$0xff] %v2048_v45  ;;  %v2050_v48 = vadd.f32 %v1967_v29, %v4300_v20 }
 0x3cb   : > { %2113 = vst [vmem:[%s3773_s20 + $0x190] sm:$0xff] %v2049_v41 }
 0x3cc   : > { %2114 = vst [vmem:[%s3773_s20 + $0x198] sm:$0xff] %v2050_v48 }
 0x3cd   : > { %v1970_v2 = vpop.f32.mrb[52].mxu1 }
 0x3ce   : > { %v1971_v15 = vadd.f32 %v1970_v2, %v3760_v23  ;;  %v1972_v40 = vpop.f32.mrb[53].mxu1 }
 0x3cf   : > { %v1973_v21 = vadd.f32 %v1972_v40, %v3763_v28  ;;  %v1974_v30 = vpop.f32.mrb[54].mxu1 }
 0x3d0   : > { %v2051_v44 = vadd.f32 %v1971_v15, %v4301_v54  ;;  %v1975_v31 = vadd.f32 %v1974_v30, %v3760_v23  ;;  %v1976_v26 = vpop.f32.mrb[55].mxu1 }
 0x3d1   : > { %v2052_v17 = vadd.f32 %v1973_v21, %v4302_v14  ;;  %v1977_v6 = vadd.f32 %v1976_v26, %v3763_v28 }
 0x3d2   : > { %2115 = vst [vmem:[%s3773_s20 + $0x1a0] sm:$0xff] %v2051_v44  ;;  %v2053_v60 = vadd.f32 %v1975_v31, %v4303_v53 }
 0x3d3   : > { %2116 = vst [vmem:[%s3773_s20 + $0x1a8] sm:$0xff] %v2052_v17  ;;  %v2054_v16 = vadd.f32 %v1977_v6, %v4304_v55 }
 0x3d4   : > { %2117 = vst [vmem:[%s3773_s20 + $0x1b0] sm:$0xff] %v2053_v60 }
 0x3d5   : > { %2118 = vst [vmem:[%s3773_s20 + $0x1b8] sm:$0xff] %v2054_v16  ;;  %v1980_v18 = vpop.f32.mrb[56].mxu1 }
 0x3d6   : > { %v1981_v3 = vadd.f32 %v1980_v18, %v3760_v23  ;;  %v1982_v52 = vpop.f32.mrb[57].mxu1 }
 0x3d7   : > { %v1983_v61 = vadd.f32 %v1982_v52, %v3763_v28  ;;  %v1984_v57 = vpop.f32.mrb[58].mxu1 }
 0x3d8   : > { %v2055_v5 = vadd.f32 %v1981_v3, %v4305_v33  ;;  %v1985_v1 = vadd.f32 %v1984_v57, %v3760_v23  ;;  %v1986_v12 = vpop.f32.mrb[59].mxu1 }
 0x3d9   : > { %v2056_v24 = vadd.f32 %v1983_v61, %v4306_v42  ;;  %v1987_v32 = vadd.f32 %v1986_v12, %v3763_v28 }
 0x3da   : > { %2119 = vst [vmem:[%s3773_s20 + $0x1c0] sm:$0xff] %v2055_v5  ;;  %v2057_v63 = vadd.f32 %v1985_v1, %v4307_v50 }
 0x3db   : > { %2120 = vst [vmem:[%s3773_s20 + $0x1c8] sm:$0xff] %v2056_v24  ;;  %v2058_v46 = vadd.f32 %v1987_v32, %v4308_v49 }
 0x3dc   : > { %2121 = vst [vmem:[%s3773_s20 + $0x1d0] sm:$0xff] %v2057_v63 }
 0x3dd   : > { %2122 = vst [vmem:[%s3773_s20 + $0x1d8] sm:$0xff] %v2058_v46  ;;  %v1990_v13 = vpop.f32.mrb[60].mxu1 }
 0x3de   : > { %v1991_v59 = vadd.f32 %v1990_v13, %v3760_v23  ;;  %v1992_v35 = vpop.f32.mrb[61].mxu1 }
 0x3df   : > { %v1993_v25 = vadd.f32 %v1992_v35, %v3763_v28  ;;  %v1994_v4 = vpop.f32.mrb[62].mxu1 }
 0x3e0   : > { %v2059_v11 = vadd.f32 %v1991_v59, %v4309_v51  ;;  %v1995_v27 = vadd.f32 %v1994_v4, %v3760_v23  ;;  %v1996_v34 = vpop.f32.mrb[63].mxu1  ;;  %v4312_v23 = vld [vmem:[#allocation87_spill] sm:$0xff] }
 0x3e1   : > { %v2060_v38 = vadd.f32 %v1993_v25, %v4310_v47  ;;  %v1997_v9 = vadd.f32 %v1996_v34, %v3763_v28 }
 0x3e2   : > { %2123 = vst [vmem:[%s3773_s20 + $0x1e0] sm:$0xff] %v2059_v11  ;;  %v2061_v10 = vadd.f32 %v1995_v27, %v4311_v43 }
 0x3e3   : > { %2124 = vst [vmem:[%s3773_s20 + $0x1e8] sm:$0xff] %v2060_v38  ;;  %v2062_v56 = vadd.f32 %v1997_v9, %v4312_v23 }
 0x3e4   : > { %2125 = vst [vmem:[%s3773_s20 + $0x1f0] sm:$0xff] %v2061_v10 }
 0x3e5   : > { %2126 = vst [vmem:[%s3773_s20 + $0x1f8] sm:$0xff] %v2062_v56 }
 0x3e6   : > { %2601 = shalt.err (!%p2598_p3)
}
 0x3e7   : > { %s2602_s17 = scalar_lea.hbm %s3962_s25, 8192  ;;  %s2606_s20 = scalar_lea.hbm %s4021_s8, 16384 }
 0x3e8   : > { %p2603_p4 = scmp.ne.s32.totalorder %s3962_s25, %s2602_s17  ;;  %p2607_p9 = scmp.lt.u32.totalorder %s3962_s25, %s4021_s8 }
 0x3e9   : > { %p2608_p10 = scmp.lt.u32.totalorder %s2606_s20, %s2602_s17  ;;  %p2610_p12 = scmp.lt.u32.totalorder %s2602_s17, %s3962_s25 }
 0x3ea   : > { %p2604_p7 = pnand %p2603_p4, %p2739_p5 }
 0x3eb   : > { %p2609_p11 = por %p2608_p10, %p2607_p9 }
 0x3ec   : > { %p2605_p8 = pneg %p2604_p7 }
 0x3ed   : > { %p2611_p13 = por %p2610_p12, %p2609_p11 }
 0x3ef   : > { %p2612_p0 = pnand %p2611_p13, %p2605_p8 }
 0x3f1   : > { %2615 = shalt.err (!%p2612_p0)
}
 0x3f2   : > { %s2654_s23 = smov 256   ;;  %s2655_s26 = smov 16  }
 0x3f3   : > { %2390 = dma.vmem_to_hbm [thread:$0]  (%p2739_p5), %s3964_s24, 8192, %s3962_s25, %s3972_s9, %s2654_s23, %s2654_s23, %s2655_s26  }
 0x3f4 PF: > { %p2396_p1 = scmp.ge.s32.totalorder %s2650_s30, 2  ;;  %s2157_s10 = sand.u32 1, %s2638_s27  }
 0x3f5   : > { %s2158_s12 = scalar_lea.sflag [#allocation3], %s2157_s10 }
 0x3f6   : > { %p2393_p2 = pnand %p2396_p1, %p2743_p6 }
 0x3f8   : > { %2633 = dma.done.wait (!%p2393_p2), %s2158_s12, 8192  }
 0x3f9   : > { %2635 = vsyncadd (!%p2393_p2), %s2158_s12, 4294959104  ;;  %p18_p3 = scmp.ge.s32.totalorder %s2726_s11, 4   ;;  %s4313_s27 = smov %s2642_s28 }
 0x3fa   : > { %s4314_s28 = smov %s2646_s29  ;;  %s4315_s29 = smov %s2737_s14 }
 0x3fb   : > { %s4316_s30 = smov %s2726_s11  ;;  %20 = sbr.rel (!%p18_p3) target bundleno = 3 (0x3), region = 90 }
 0x402   :  { %2163 = vsyncpa [#allocation3], 1 }
 0x403   :  { %2165 = vsyncpa [#allocation3 + $0x1], 1 }

// kernel: gpt2_block_forward.4
= control target key start
LH: loop header
LB: loop body
LE: loop exit
PB: predicated region body
PF: predicated region fallthrough
CT: control target
= control target key end

     0   :  { %s4386_s12 = smov 0   ;;  %s6633_s0 = inlined_call_operand.vmem [shape: f32[2,256,48], index: 0, kind: input, shape index: {}]   ;;  %s6634_s1 = inlined_call_operand.vmem [shape: bf16[16,256], index: 1, kind: input, shape index: {}]   ;;  %s6635_s2 = inlined_call_operand.vmem [shape: f32[1,256], index: 2, kind: input, shape index: {}]   ;;  %s6636_s3 = inlined_call_operand.vmem [shape: f32[2,256,256], index: 3, kind: output, shape index: {}]  }
   0x1 LB: > { %s3443_s13 = sadd.s32 4294967295, %s4358_s12   ;;  %p3447_p0 = scmp.ge.s32.totalorder %s4358_s12, 1  ;;  %s4358_s12 = sphi %s4386_s12, %s13_s12  }
   0x2   : > { %p137_p1 = scmp.lt.s32.totalorder %s4358_s12, 3 }
   0x4   : > { %p138_p2 = pnand %p3447_p0, %p137_p1 }
   0x6   : > { %141 = sbr.rel (%p138_p2) target bundleno = 2374 (0x946), region = 32 }
   0xd   : > { %p161_p3 = scmp.lt.s32.totalorder %s3443_s13, 1  ;;  %vm370_vm0 = vcmask 64512   ;;  %s4360_s18 = smov 112  }
   0xe   : > { %s4361_s19 = smov 104   ;;  %s4362_s20 = smov 96  }
   0xf   : > { %s7161_s13 = smov (!%p161_p3, %s3443_s13), 1  ;;  %s4363_s21 = smov 120  }
  0x10   : > { %s3524_s14 = sshll.u32 %s7161_s13, 8  ;;  %s4364_s22 = smov 88  }
  0x11   : > { %s4400_s17 = scalar_lea.vmem %s6633_s0, %s3524_s14  ;;  %s3525_s29 = sshll.u32 %s7161_s13, 9 }
  0x12   : > { %v172_v0 = vld [vmem:[%s4400_s17] sm:$0xff]  ;;  %v173_v1 = vld [vmem:[%s4400_s17 + $0x8] sm:$0xff]  ;;  %v174_v5 = vld [vmem:[%s4400_s17 + $0x10] sm:$0xff]  ;;  %s6500_s5 = scalar_lea.vmem %s6636_s3, %s3525_s29 }
  0x13   : > { %v188_v2 = vld [vmem:[%s4400_s17 + $0x80] sm:$0xff]  ;;  %v4405_v3 = vpack.c.bf16 %v173_v1, %v172_v0  ;;  %v189_v4 = vld [vmem:[%s4400_s17 + $0x88] sm:$0xff]  ;;  %v175_v6 = vld [vmem:[%s4400_s17 + $0x18] sm:$0xff] }
  0x14   : > { %v4410_v7 = vpack.c.bf16 %v175_v6, %v174_v5  ;;  %v190_v8 = vld [vmem:[%s4400_s17 + $0x90] sm:$0xff]  ;;  %v191_v9 = vld [vmem:[%s4400_s17 + $0x98] sm:$0xff]  ;;  %v4416_v10 = vpack.c.bf16 %v189_v4, %v188_v2  ;;  %v176_v12 = vld [vmem:[%s4400_s17 + $0x20] sm:$0xff] }
  0x15   : > { %6817 = vst [vmem:[#allocation2_spill] sm:$0xff] %v4405_v3  ;;  %338 = vrot.lane.b32.xlu0 %v4405_v3, %s4360_s18  ;;  %3542 = vmatprep.mubr.msk.bf16.mxu0 %vm370_vm0, %v4405_v3  ;;  %v4422_v11 = vpack.c.bf16 %v191_v9, %v190_v8  ;;  %v177_v13 = vld [vmem:[%s4400_s17 + $0x28] sm:$0xff]  ;;  %v192_v14 = vld [vmem:[%s4400_s17 + $0xa0] sm:$0xff]  ;;  %v178_v18 = vld [vmem:[%s4400_s17 + $0x30] sm:$0xff] }
  0x16   : > { %6818 = vst [vmem:[#allocation3_spill] sm:$0xff] %v4410_v7  ;;  %6819 = vst [vmem:[#allocation4_spill] sm:$0xff] %v4416_v10  ;;  %340 = vrot.lane.b32.xlu1 %v4410_v7, %s4360_s18  ;;  %v193_v15 = vld [vmem:[%s4400_s17 + $0xa8] sm:$0xff]  ;;  %v4430_v16 = vpack.c.bf16 %v177_v13, %v176_v12  ;;  %v179_v19 = vld [vmem:[%s4400_s17 + $0x38] sm:$0xff] }
  0x17   : > { %6820 = vst [vmem:[#allocation5_spill] sm:$0xff] %v4422_v11  ;;  %v4434_v17 = vpack.c.bf16 %v193_v15, %v192_v14  ;;  %v194_v20 = vld [vmem:[%s4400_s17 + $0xb0] sm:$0xff]  ;;  %v195_v21 = vld [vmem:[%s4400_s17 + $0xb8] sm:$0xff]  ;;  %v4442_v22 = vpack.c.bf16 %v179_v19, %v178_v18  ;;  %v180_v24 = vld [vmem:[%s4400_s17 + $0x40] sm:$0xff] }
  0x18   : > { %6821 = vst [vmem:[#allocation6_spill] sm:$0xff] %v4430_v16  ;;  %v4446_v23 = vpack.c.bf16 %v195_v21, %v194_v20  ;;  %v181_v25 = vld [vmem:[%s4400_s17 + $0x48] sm:$0xff]  ;;  %v196_v26 = vld [vmem:[%s4400_s17 + $0xc0] sm:$0xff]  ;;  %v182_v30 = vld [vmem:[%s4400_s17 + $0x50] sm:$0xff] }
  0x19   : > { %354 = vrot.lane.b32.xlu0 %v4416_v10, %s4360_s18  ;;  %6822 = vst [vmem:[#allocation7_spill] sm:$0xff] %v4434_v17  ;;  %6823 = vst [vmem:[#allocation8_spill] sm:$0xff] %v4442_v22  ;;  %v197_v27 = vld [vmem:[%s4400_s17 + $0xc8] sm:$0xff]  ;;  %v4454_v28 = vpack.c.bf16 %v181_v25, %v180_v24  ;;  %v183_v31 = vld [vmem:[%s4400_s17 + $0x58] sm:$0xff] }
  0x1a   : > { %356 = vrot.lane.b32.xlu1 %v4422_v11, %s4360_s18  ;;  %6824 = vst [vmem:[#allocation9_spill] sm:$0xff] %v4446_v23  ;;  %v4458_v29 = vpack.c.bf16 %v197_v27, %v196_v26  ;;  %v198_v32 = vld [vmem:[%s4400_s17 + $0xd0] sm:$0xff]  ;;  %v199_v33 = vld [vmem:[%s4400_s17 + $0xd8] sm:$0xff]  ;;  %v4466_v34 = vpack.c.bf16 %v183_v31, %v182_v30  ;;  %v184_v36 = vld [vmem:[%s4400_s17 + $0x60] sm:$0xff] }
  0x1b   : > { %v4470_v35 = vpack.c.bf16 %v199_v33, %v198_v32  ;;  %v185_v37 = vld [vmem:[%s4400_s17 + $0x68] sm:$0xff]  ;;  %v200_v38 = vld [vmem:[%s4400_s17 + $0xe0] sm:$0xff]  ;;  %v186_v42 = vld [vmem:[%s4400_s17 + $0x70] sm:$0xff] }
  0x1c   : > { %6825 = vst [vmem:[#allocation10_spill] sm:$0xff] %v4458_v29  ;;  %6826 = vst [vmem:[#allocation11_spill] sm:$0xff] %v4466_v34  ;;  %v201_v39 = vld [vmem:[%s4400_s17 + $0xe8] sm:$0xff]  ;;  %v4478_v40 = vpack.c.bf16 %v185_v37, %v184_v36  ;;  %v187_v43 = vld [vmem:[%s4400_s17 + $0x78] sm:$0xff] }
  0x1d   : > { %342 = vrot.lane.b32.xlu0 %v4430_v16, %s4360_s18  ;;  %6827 = vst [vmem:[#allocation12_spill] sm:$0xff] %v4470_v35  ;;  %v4482_v41 = vpack.c.bf16 %v201_v39, %v200_v38  ;;  %v202_v44 = vld [vmem:[%s4400_s17 + $0xf0] sm:$0xff]  ;;  %v203_v45 = vld [vmem:[%s4400_s17 + $0xf8] sm:$0xff]  ;;  %v4490_v46 = vpack.c.bf16 %v187_v43, %v186_v42 }
  0x1e   : > { %358 = vrot.lane.b32.xlu1 %v4434_v17, %s4360_s18  ;;  %v4494_v47 = vpack.c.bf16 %v203_v45, %v202_v44 }
  0x1f   : > { %6828 = vst [vmem:[#allocation13_spill] sm:$0xff] %v4482_v41  ;;  %6829 = vst [vmem:[#allocation14_spill] sm:$0xff] %v4490_v46 }
  0x20   : > { %6830 = vst [vmem:[#allocation15_spill] sm:$0xff] %v4494_v47 }
  0x21   : > { %344 = vrot.lane.b32.xlu0 %v4442_v22, %s4360_s18 }
  0x22   : > { %360 = vrot.lane.b32.xlu1 %v4446_v23, %s4360_s18 }
  0x25   : > { %346 = vrot.lane.b32.xlu0 %v4454_v28, %s4360_s18 }
  0x26   : > { %362 = vrot.lane.b32.xlu1 %v4458_v29, %s4360_s18 }
  0x29   : > { %348 = vrot.lane.b32.xlu0 %v4466_v34, %s4360_s18 }
  0x2a   : > { %364 = vrot.lane.b32.xlu1 %v4470_v35, %s4360_s18 }
  0x2d   : > { %350 = vrot.lane.b32.xlu0 %v4478_v40, %s4360_s18 }
  0x2e   : > { %366 = vrot.lane.b32.xlu1 %v4482_v41, %s4360_s18 }
  0x31   : > { %352 = vrot.lane.b32.xlu0 %v4490_v46, %s4360_s18 }
  0x32   : > { %368 = vrot.lane.b32.xlu1 %v4494_v47, %s4360_s18 }
  0x35   : > { %1573 = vrot.lane.b32.xlu0 %v4416_v10, %s4361_s19 }
  0x36   : > { %1557 = vrot.lane.b32.xlu1 %v4405_v3, %s4361_s19 }
  0x39   : > { %1575 = vrot.lane.b32.xlu0 %v4422_v11, %s4361_s19 }
  0x3a   : > { %1559 = vrot.lane.b32.xlu1 %v4410_v7, %s4361_s19 }
  0x3d   : > { %1561 = vrot.lane.b32.xlu0 %v4430_v16, %s4361_s19 }
  0x3e   : > { %1316 = vrot.lane.b32.xlu1 %v4416_v10, %s4362_s20 }
  0x41   : > { %1300 = vrot.lane.b32.xlu0 %v4405_v3, %s4362_s20 }
  0x42   : > { %1577 = vrot.lane.b32.xlu1 %v4434_v17, %s4361_s19 }
  0x45   : > { %1302 = vrot.lane.b32.xlu0 %v4410_v7, %s4362_s20 }
  0x46   : > { %1318 = vrot.lane.b32.xlu1 %v4422_v11, %s4362_s20 }
  0x49   : > { %1320 = vrot.lane.b32.xlu0 %v4434_v17, %s4362_s20 }
  0x4a   : > { %1563 = vrot.lane.b32.xlu1 %v4442_v22, %s4361_s19 }
  0x4d   : > { %1579 = vrot.lane.b32.xlu0 %v4446_v23, %s4361_s19 }
  0x4e   : > { %1322 = vrot.lane.b32.xlu1 %v4446_v23, %s4362_s20 }
  0x51   : > { %1304 = vrot.lane.b32.xlu0 %v4430_v16, %s4362_s20 }
  0x52   : > { %1565 = vrot.lane.b32.xlu1 %v4454_v28, %s4361_s19 }
  0x55   : > { %1306 = vrot.lane.b32.xlu0 %v4442_v22, %s4362_s20 }
  0x56   : > { %1326 = vrot.lane.b32.xlu1 %v4470_v35, %s4362_s20 }
  0x59   : > { %1324 = vrot.lane.b32.xlu0 %v4458_v29, %s4362_s20 }
  0x5a   : > { %1567 = vrot.lane.b32.xlu1 %v4466_v34, %s4361_s19 }
  0x5d   : > { %1581 = vrot.lane.b32.xlu0 %v4458_v29, %s4361_s19 }
  0x5e   : > { %1330 = vrot.lane.b32.xlu1 %v4494_v47, %s4362_s20 }
  0x61   : > { %1308 = vrot.lane.b32.xlu0 %v4454_v28, %s4362_s20 }
  0x62   : > { %1585 = vrot.lane.b32.xlu1 %v4482_v41, %s4361_s19 }
  0x65   : > { %1310 = vrot.lane.b32.xlu0 %v4466_v34, %s4362_s20 }
  0x66   : > { %1571 = vrot.lane.b32.xlu1 %v4490_v46, %s4361_s19 }
  0x69   : > { %1328 = vrot.lane.b32.xlu0 %v4482_v41, %s4362_s20 }
  0x6d   : > { %1583 = vrot.lane.b32.xlu0 %v4470_v35, %s4361_s19 }
  0x71   : > { %1312 = vrot.lane.b32.xlu0 %v4478_v40, %s4362_s20 }
  0x75   : > { %1314 = vrot.lane.b32.xlu0 %v4490_v46, %s4362_s20 }
  0x79   : > { %1569 = vrot.lane.b32.xlu0 %v4478_v40, %s4361_s19 }
  0x87   : > { %v339_v48 = vpop.permute.xlu0 %338 }
  0x88   : > { %v341_v49 = vpop.permute.xlu1 %340  ;;  %v420_v51 = vsel %vm370_vm0, %v339_v48, 0 }
  0x89   : > { %v423_v54 = vsel %vm370_vm0, %v341_v49, 0 }
  0x8b   : > { %v355_v50 = vpop.permute.xlu0 %354 }
  0x8c   : > { %3926 = vmatprep.subr.msk.bf16.mxu0 %vm370_vm0, %v355_v50  ;;  %v357_v52 = vpop.permute.xlu1 %356 }
  0x8d   : > { %3527 = vmatpush3.bf16.xpose.msra.mxu0 %v420_v51 }
  0x8e   : > { %3927 = vmatprep.subr.msk.bf16.mxu0 %vm370_vm0, %v357_v52 }
  0x8f   : > { %v343_v55 = vpop.permute.xlu0 %342 }
  0x90   : > { %v359_v53 = vpop.permute.xlu1 %358  ;;  %v426_v56 = vsel %vm370_vm0, %v343_v55, 0 }
  0x93   : > { %v345_v58 = vpop.permute.xlu0 %344 }
  0x94   : > { %v361_v57 = vpop.permute.xlu1 %360  ;;  %v429_v59 = vsel %vm370_vm0, %v345_v58, 0 }
  0x95   : > { %3529 = vmatpush3.bf16.xpose.msra.mxu0 %v423_v54 }
  0x96   : > { %3928 = vmatprep.subr.msk.bf16.mxu0 %vm370_vm0, %v359_v53 }
  0x97   : > { %v347_v61 = vpop.permute.xlu0 %346 }
  0x98   : > { %v363_v60 = vpop.permute.xlu1 %362  ;;  %v432_v62 = vsel %vm370_vm0, %v347_v61, 0  ;;  %v206_v61 = vlaneseq }
  0x9b   : > { %v349_v0 = vpop.permute.xlu0 %348 }
  0x9c   : > { %v365_v63 = vpop.permute.xlu1 %364  ;;  %v435_v1 = vsel %vm370_vm0, %v349_v0, 0 }
  0x9d   : > { %3531 = vmatpush3.bf16.xpose.msra.mxu0 %v426_v56 }
  0x9e   : > { %3929 = vmatprep.subr.msk.bf16.mxu0 %vm370_vm0, %v361_v57 }
  0x9f   : > { %v351_v4 = vpop.permute.xlu0 %350 }
  0xa0   : > { %v367_v2 = vpop.permute.xlu1 %366  ;;  %v438_v5 = vsel %vm370_vm0, %v351_v4, 0 }
  0xa3   : > { %v353_v8 = vpop.permute.xlu0 %352 }
  0xa4   : > { %v369_v6 = vpop.permute.xlu1 %368  ;;  %v441_v9 = vsel %vm370_vm0, %v353_v8, 0 }
  0xa5   : > { %3533 = vmatpush3.bf16.xpose.msra.mxu0 %v429_v59 }
  0xa6   : > { %3930 = vmatprep.subr.msk.bf16.mxu0 %vm370_vm0, %v363_v60 }
  0xa7   : > { %v4610_v12 = vpop.permute.xlu0 %1573 }
  0xa8   : > { %v1558_v20 = vpop.permute.xlu1 %1557 }
  0xa9   : > { %v4629_v21 = vsel %vm370_vm0, %v1558_v20, 0 }
  0xaa   : > { %6832 = vst [vmem:[#allocation17_spill] sm:$0xff] %v4629_v21 }
  0xab   : > { %v4614_v13 = vpop.permute.xlu0 %1575 }
  0xac   : > { %6831 = vst [vmem:[#allocation16_spill] sm:$0xff] %v4614_v13  ;;  %v1560_v25 = vpop.permute.xlu1 %1559 }
  0xad   : > { %3535 = vmatpush3.bf16.xpose.msra.mxu0 %v432_v62  ;;  %v4641_v27 = vsel %vm370_vm0, %v1560_v25, 0  ;;  %v4698_v62 = vshrl.u32 %v206_v61, 7 }
  0xae   : > { %3931 = vmatprep.subr.msk.bf16.mxu0 %vm370_vm0, %v365_v63  ;;  %6834 = vst [vmem:[#allocation19_spill] sm:$0xff] %v4641_v27  ;;  %v4700_v63 = vand.u32 127, %v206_v61 }
  0xaf   : > { %v1562_v14 = vpop.permute.xlu0 %1561  ;;  %6844 = vst [vmem:[#allocation29_spill] sm:$0xff] %v4698_v62  ;;  %v4703_v0 = vadd.s32 8, %v4698_v62 }
  0xb0   : > { %v1317_v30 = vpop.permute.xlu1 %1316  ;;  %v4653_v37 = vsel %vm370_vm0, %v1562_v14, 0  ;;  %6845 = vst [vmem:[#allocation30_spill] sm:$0xff] %v4700_v63  ;;  %vm242_vm1 = vcmp.le.s32.totalorder %v4700_v63, %v4698_v62  ;;  %v4716_v14 = vadd.s32 16, %v4698_v62 }
  0xb1   : > { %3574 = vmatprep.subr.bf16.mxu1 %v1317_v30  ;;  %6836 = vst [vmem:[#allocation21_spill] sm:$0xff] %v4653_v37  ;;  %6846 = vst [vmem:[#allocation31_spill] sm:$0xff] %v4703_v0  ;;  %vm244_vm2 = vcmp.le.s32.totalorder %v4700_v63, %v4703_v0 }
  0xb2   : > { %6847 = vst [vmem:[#allocation32_spill] sm:$0xff] %v4716_v14  ;;  %vm246_vm3 = vcmp.le.s32.totalorder %v4700_v63, %v4716_v14 }
  0xb3   : > { %v1301_v15 = vpop.permute.xlu0 %1300 }
  0xb4   : > { %3575 = vmatpush3.bf16.msra.mxu1 %v1301_v15  ;;  %v4648_v32 = vpop.permute.xlu1 %1577 }
  0xb5   : > { %3537 = vmatpush3.bf16.xpose.msra.mxu0 %v435_v1  ;;  %6835 = vst [vmem:[#allocation20_spill] sm:$0xff] %v4648_v32 }
  0xb6   : > { %3932 = vmatprep.subr.msk.bf16.mxu0 %vm370_vm0, %v367_v2 }
  0xb7   : > { %v1303_v18 = vpop.permute.xlu0 %1302 }
  0xb8   : > { %v1319_v36 = vpop.permute.xlu1 %1318 }
  0xb9   : > { %3576 = vmatprep.subr.bf16.mxu1 %v1319_v36 }
  0xba   : > { %3577 = vmatpush3.bf16.msra.mxu1 %v1303_v18 }
  0xbb   : > { %v1321_v19 = vpop.permute.xlu0 %1320 }
  0xbc   : > { %3578 = vmatprep.subr.bf16.mxu1 %v1321_v19  ;;  %v1564_v39 = vpop.permute.xlu1 %1563  ;;  %v4725_v19 = vadd.s32 24, %v4698_v62 }
  0xbd   : > { %3539 = vmatpush3.bf16.xpose.msra.mxu0 %v438_v5  ;;  %v4665_v44 = vsel %vm370_vm0, %v1564_v39, 0 }
  0xbe   : > { %3933 = vmatprep.subr.msk.bf16.mxu0 %vm370_vm0, %v369_v6  ;;  %6838 = vst [vmem:[#allocation23_spill] sm:$0xff] %v4665_v44  ;;  %6848 = vst [vmem:[#allocation33_spill] sm:$0xff] %v4725_v19  ;;  %vm248_vm4 = vcmp.le.s32.totalorder %v4700_v63, %v4725_v19 }
  0xbf   : > { %v4633_v24 = vpop.permute.xlu0 %1579 }
  0xc0   : > { %6833 = vst [vmem:[#allocation18_spill] sm:$0xff] %v4633_v24  ;;  %v1323_v43 = vpop.permute.xlu1 %1322 }
  0xc3   : > { %v1305_v26 = vpop.permute.xlu0 %1304 }
  0xc4   : > { %3579 = vmatpush3.bf16.msra.mxu1 %v1305_v26  ;;  %v1566_v48 = vpop.permute.xlu1 %1565 }
  0xc5   : > { %3541 = vmatpush3.bf16.xpose.msra.mxu0 %v441_v9  ;;  %3580 = vmatprep.subr.bf16.mxu1 %v1323_v43  ;;  %v4675_v51 = vsel %vm370_vm0, %v1566_v48, 0 }
  0xc6   : > { %3934 = vmatprep.subr.msk.bf16.mxu0 %vm370_vm0, %v4610_v12  ;;  %6839 = vst [vmem:[#allocation24_spill] sm:$0xff] %v4675_v51 }
  0xc7   : > { %v1307_v31 = vpop.permute.xlu0 %1306 }
  0xc8   : > { %3581 = vmatpush3.bf16.msra.mxu1 %v1307_v31  ;;  %v1327_v50 = vpop.permute.xlu1 %1326 }
  0xcb   : > { %v1325_v33 = vpop.permute.xlu0 %1324 }
  0xcc   : > { %3543 = vmatmul.mubr.msk.bf16.vlgmr.msra.gmra.mrb[0].mxu0 %vm370_vm0, %v4405_v3  ;;  %3582 = vmatprep.subr.bf16.mxu1 %v1325_v33  ;;  %v1568_v53 = vpop.permute.xlu1 %1567 }
  0xcd   : > { %3544 = vmatprep.mubr.msk.bf16.mxu0 %vm370_vm0, %v4410_v7  ;;  %3687 = vmatpush3.bf16.xpose.msra.mxu0 %v4629_v21  ;;  %v4685_v56 = vsel %vm370_vm0, %v1568_v53, 0 }
  0xce   : > { %3936 = vmatprep.subr.msk.bf16.mxu0 %vm370_vm0, %v4614_v13  ;;  %6841 = vst [vmem:[#allocation26_spill] sm:$0xff] %v4685_v56 }
  0xcf   : > { %v4657_v38 = vpop.permute.xlu0 %1581 }
  0xd0   : > { %6837 = vst [vmem:[#allocation22_spill] sm:$0xff] %v4657_v38  ;;  %v1331_v55 = vpop.permute.xlu1 %1330 }
  0xd3   : > { %v1309_v42 = vpop.permute.xlu0 %1308 }
  0xd4   : > { %3545 = vmatmul.mubr.msk.bf16.gmra.mrb[4].mxu0 %vm370_vm0, %v4410_v7  ;;  %3583 = vmatpush3.bf16.msra.mxu1 %v1309_v42  ;;  %v4690_v58 = vpop.permute.xlu1 %1585  ;;  %v4738_v42 = vadd.s32 32, %v4698_v62 }
  0xd5   : > { %3546 = vmatprep.mubr.msk.bf16.mxu0 %vm370_vm0, %v4430_v16  ;;  %3689 = vmatpush3.bf16.xpose.msra.mxu0 %v4641_v27  ;;  %6842 = vst [vmem:[#allocation27_spill] sm:$0xff] %v4690_v58 }
  0xd6   : > { %3938 = vmatprep.subr.msk.bf16.mxu0 %vm370_vm0, %v4648_v32  ;;  %3584 = vmatprep.subr.bf16.mxu1 %v1327_v50  ;;  %6849 = vst [vmem:[#allocation34_spill] sm:$0xff] %v4738_v42  ;;  %vm250_vm5 = vcmp.le.s32.totalorder %v4700_v63, %v4738_v42 }
  0xd7   : > { %v1311_v45 = vpop.permute.xlu0 %1310 }
  0xd8   : > { %3585 = vmatpush3.bf16.msra.mxu1 %v1311_v45  ;;  %v4746_v45 = vadd.s32 40, %v4698_v62 }
  0xda   : > { %6850 = vst [vmem:[#allocation35_spill] sm:$0xff] %v4746_v45  ;;  %vm252_vm6 = vcmp.le.s32.totalorder %v4700_v63, %v4746_v45 }
  0xdb   : > { %v1329_v49 = vpop.permute.xlu0 %1328 }
  0xdc   : > { %3547 = vmatmul.mubr.msk.bf16.gmra.mrb[8].mxu0 %vm370_vm0, %v4430_v16  ;;  %3586 = vmatprep.subr.bf16.mxu1 %v1329_v49 }
  0xdd   : > { %3548 = vmatprep.mubr.msk.bf16.mxu0 %vm370_vm0, %v4442_v22  ;;  %3691 = vmatpush3.bf16.xpose.msra.mxu0 %v4653_v37 }
  0xde   : > { %3940 = vmatprep.subr.msk.bf16.mxu0 %vm370_vm0, %v4633_v24 }
  0xdf   : > { %v4679_v52 = vpop.permute.xlu0 %1583 }
  0xe0   : > { %6840 = vst [vmem:[#allocation25_spill] sm:$0xff] %v4679_v52 }
  0xe3   : > { %v1313_v54 = vpop.permute.xlu0 %1312 }
  0xe4   : > { %3549 = vmatmul.mubr.msk.bf16.gmra.mrb[12].mxu0 %vm370_vm0, %v4442_v22  ;;  %3587 = vmatpush3.bf16.msra.mxu1 %v1313_v54 }
  0xe5   : > { %3550 = vmatprep.mubr.msk.bf16.mxu0 %vm370_vm0, %v4454_v28  ;;  %3693 = vmatpush3.bf16.xpose.msra.mxu0 %v4665_v44 }
  0xe6   : > { %3942 = vmatprep.subr.msk.bf16.mxu0 %vm370_vm0, %v4657_v38  ;;  %3588 = vmatprep.subr.bf16.mxu1 %v1331_v55 }
  0xe7   : > { %v1315_v57 = vpop.permute.xlu0 %1314 }
  0xe8   : > { %3589 = vmatpush3.bf16.msra.mxu1 %v1315_v57 }
  0xe9   : > { %3935 = vmatprep.subr.msk.bf16.mxu1 %vm370_vm0, %v4610_v12 }
  0xeb   : > { %v1570_v59 = vpop.permute.xlu0 %1569 }
  0xec   : > { %3551 = vmatmul.mubr.msk.bf16.gmra.mrb[16].mxu0 %vm370_vm0, %v4454_v28  ;;  %v4695_v60 = vsel %vm370_vm0, %v1570_v59, 0 }
  0xed   : > { %3552 = vmatprep.mubr.msk.bf16.mxu0 %vm370_vm0, %v4466_v34  ;;  %3695 = vmatpush3.bf16.xpose.msra.mxu0 %v4675_v51  ;;  %6843 = vst [vmem:[#allocation28_spill] sm:$0xff] %v4695_v60 }
  0xee   : > { %3944 = vmatprep.subr.msk.bf16.mxu0 %vm370_vm0, %v4679_v52 }
  0xf4   : > { %3553 = vmatmul.mubr.msk.bf16.gmra.mrb[20].mxu0 %vm370_vm0, %v4466_v34 }
  0xf5   : > { %3554 = vmatprep.mubr.msk.bf16.mxu0 %vm370_vm0, %v4478_v40  ;;  %3697 = vmatpush3.bf16.xpose.msra.mxu0 %v4685_v56 }
  0xf6   : > { %3946 = vmatprep.subr.msk.bf16.mxu0 %vm370_vm0, %v4690_v58 }
  0xfc   : > { %3555 = vmatmul.mubr.msk.bf16.gmra.mrb[24].mxu0 %vm370_vm0, %v4478_v40 }
  0xfd   : > { %3556 = vmatprep.mubr.msk.bf16.mxu0 %vm370_vm0, %v4490_v46  ;;  %3699 = vmatpush3.bf16.xpose.msra.mxu0 %v4695_v60 }
 0x104   : > { %3557 = vmatmul.mubr.msk.bf16.gmra.mrb[28].mxu0 %vm370_vm0, %v4490_v46 }
 0x105   : > { %3558 = vmatprep.mubr.msk.bf16.mxu0 %vm370_vm0, %v4416_v10 }
 0x10c   : > { %3559 = vmatmul.mubr.msk.bf16.gmra.mrb[32].mxu0 %vm370_vm0, %v4416_v10 }
 0x10d   : > { %3560 = vmatprep.mubr.msk.bf16.mxu0 %vm370_vm0, %v4422_v11 }
 0x114   : > { %3561 = vmatmul.mubr.msk.bf16.gmra.mrb[36].mxu0 %vm370_vm0, %v4422_v11 }
 0x115   : > { %3562 = vmatprep.mubr.msk.bf16.mxu0 %vm370_vm0, %v4434_v17 }
 0x11c   : > { %3563 = vmatmul.mubr.msk.bf16.gmra.mrb[40].mxu0 %vm370_vm0, %v4434_v17 }
 0x11d   : > { %3564 = vmatprep.mubr.msk.bf16.mxu0 %vm370_vm0, %v4446_v23 }
 0x124   : > { %3565 = vmatmul.mubr.msk.bf16.gmra.mrb[44].mxu0 %vm370_vm0, %v4446_v23 }
 0x125   : > { %3566 = vmatprep.mubr.msk.bf16.mxu0 %vm370_vm0, %v4458_v29 }
 0x12c   : > { %3567 = vmatmul.mubr.msk.bf16.gmra.mrb[48].mxu0 %vm370_vm0, %v4458_v29 }
 0x12d   : > { %3568 = vmatprep.mubr.msk.bf16.mxu0 %vm370_vm0, %v4470_v35 }
 0x134   : > { %3569 = vmatmul.mubr.msk.bf16.gmra.mrb[52].mxu0 %vm370_vm0, %v4470_v35 }
 0x135   : > { %3570 = vmatprep.mubr.msk.bf16.mxu0 %vm370_vm0, %v4482_v41 }
 0x13c   : > { %3571 = vmatmul.mubr.msk.bf16.gmra.mrb[56].mxu0 %vm370_vm0, %v4482_v41 }
 0x13d   : > { %3572 = vmatprep.mubr.msk.bf16.mxu0 %vm370_vm0, %v4494_v47 }
 0x144   : > { %3573 = vmatmul.mubr.msk.bf16.gmra.mrb[60].mxu0 %vm370_vm0, %v4494_v47 }
 0x19f   : > { %v501_v1 = vpop.f32.mrb[0].mxu0 }
 0x1a0   : > { %v660_v2 = vmul.f32 0.35355338, %v501_v1  ;;  %v503_v4 = vpop.f32.mrb[1].mxu0  ;;  %v4760_v1 = vadd.s32 48, %v4698_v62 }
 0x1a1   : > { %v505_v5 = vpop.f32.mrb[2].mxu0 }
 0x1a2   : > { %v662_v6 = vmul.f32 0.35355338, %v505_v5  ;;  %v507_v8 = vpop.f32.mrb[3].mxu0  ;;  %v4712_v9 = vsel %vm242_vm1, %v660_v2, -10000.0  ;;  %6851 = vst [vmem:[#allocation36_spill] sm:$0xff] %v4760_v1  ;;  %v4769_v5 = vadd.s32 56, %v4698_v62  ;;  %vm254_vm7 = vcmp.le.s32.totalorder %v4700_v63, %v4760_v1 }
 0x1a3   : > { %v788_v12 = vmax.f32 %v4712_v9, -10000.0 }
 0x1a4   : > { %v4721_v15 = vsel %vm244_vm2, %v662_v6, -10000.0  ;;  %6852 = vst [vmem:[#allocation37_spill] sm:$0xff] %v4769_v5  ;;  %vm256_vm8 = vcmp.le.s32.totalorder %v4700_v63, %v4769_v5 }
 0x1a5   : > { %789 = vmax.xlane.f32.xlu0 %v788_v12  ;;  %v791_v18 = vmax.f32 %v4721_v15, -10000.0 }
 0x1a7   : > { %792 = vmax.xlane.f32.xlu1 %v791_v18  ;;  %v511_v20 = vpop.f32.mrb[4].mxu0 }
 0x1a8   : > { %v664_v25 = vmul.f32 0.35355338, %v511_v20  ;;  %v513_v26 = vpop.f32.mrb[5].mxu0 }
 0x1a9   : > { %v515_v30 = vpop.f32.mrb[6].mxu0 }
 0x1aa   : > { %v666_v31 = vmul.f32 0.35355338, %v515_v30  ;;  %v517_v33 = vpop.f32.mrb[7].mxu0  ;;  %v4734_v36 = vsel %vm246_vm3, %v664_v25, -10000.0 }
 0x1ab   : > { %v794_v39 = vmax.f32 %v4734_v36, -10000.0 }
 0x1ac   : > { %v4743_v43 = vsel %vm248_vm4, %v666_v31, -10000.0  ;;  %v4782_v31 = vadd.s32 64, %v4698_v62 }
 0x1ad   : > { %795 = vmax.xlane.f32.xlu0 %v794_v39  ;;  %v797_v49 = vmax.f32 %v4743_v43, -10000.0 }
 0x1ae   : > { %6853 = vst [vmem:[#allocation38_spill] sm:$0xff] %v4782_v31  ;;  %vm258_vm9 = vcmp.le.s32.totalorder %v4700_v63, %v4782_v31 }
 0x1af   : > { %v521_v48 = vpop.f32.mrb[8].mxu0 }
 0x1b0   : > { %v668_v50 = vmul.f32 0.35355338, %v521_v48  ;;  %v523_v53 = vpop.f32.mrb[9].mxu0  ;;  %v4791_v48 = vadd.s32 72, %v4698_v62 }
 0x1b1   : > { %798 = vmax.xlane.f32.xlu0 %v797_v49  ;;  %v525_v54 = vpop.f32.mrb[10].mxu0 }
 0x1b2   : > { %v670_v55 = vmul.f32 0.35355338, %v525_v54  ;;  %v527_v57 = vpop.f32.mrb[11].mxu0  ;;  %v4756_v59 = vsel %vm250_vm5, %v668_v50, -10000.0  ;;  %6854 = vst [vmem:[#allocation39_spill] sm:$0xff] %v4791_v48  ;;  %vm260_vm10 = vcmp.le.s32.totalorder %v4700_v63, %v4791_v48 }
 0x1b3   : > { %v800_v61 = vmax.f32 %v4756_v59, -10000.0 }
 0x1b4   : > { %v4765_v2 = vsel %vm252_vm6, %v670_v55, -10000.0 }
 0x1b5   : > { %801 = vmax.xlane.f32.xlu1 %v800_v61  ;;  %v803_v4 = vmax.f32 %v4765_v2, -10000.0 }
 0x1b7   : > { %804 = vmax.xlane.f32.xlu0 %v803_v4  ;;  %v531_v6 = vpop.f32.mrb[12].mxu0 }
 0x1b8   : > { %v672_v8 = vmul.f32 0.35355338, %v531_v6  ;;  %v533_v12 = vpop.f32.mrb[13].mxu0  ;;  %v4804_v6 = vadd.s32 80, %v4698_v62 }
 0x1b9   : > { %v535_v18 = vpop.f32.mrb[14].mxu0 }
 0x1ba   : > { %v674_v20 = vmul.f32 0.35355338, %v535_v18  ;;  %v537_v25 = vpop.f32.mrb[15].mxu0  ;;  %v4778_v26 = vsel %vm254_vm7, %v672_v8, -10000.0  ;;  %6855 = vst [vmem:[#allocation40_spill] sm:$0xff] %v4804_v6  ;;  %v4813_v18 = vadd.s32 88, %v4698_v62  ;;  %vm262_vm11 = vcmp.le.s32.totalorder %v4700_v63, %v4804_v6 }
 0x1bb   : > { %v806_v30 = vmax.f32 %v4778_v26, -10000.0 }
 0x1bc   : > { %v4787_v33 = vsel %vm256_vm8, %v674_v20, -10000.0  ;;  %6856 = vst [vmem:[#allocation41_spill] sm:$0xff] %v4813_v18  ;;  %vm264_vm12 = vcmp.le.s32.totalorder %v4700_v63, %v4813_v18 }
 0x1bd   : > { %807 = vmax.xlane.f32.xlu1 %v806_v30  ;;  %v809_v39 = vmax.f32 %v4787_v33, -10000.0 }
 0x1bf   : > { %810 = vmax.xlane.f32.xlu0 %v809_v39  ;;  %v541_v49 = vpop.f32.mrb[16].mxu0 }
 0x1c0   : > { %v676_v50 = vmul.f32 0.35355338, %v541_v49  ;;  %v543_v53 = vpop.f32.mrb[17].mxu0 }
 0x1c1   : > { %v545_v54 = vpop.f32.mrb[18].mxu0 }
 0x1c2   : > { %v678_v55 = vmul.f32 0.35355338, %v545_v54  ;;  %v547_v57 = vpop.f32.mrb[19].mxu0  ;;  %v4800_v61 = vsel %vm258_vm9, %v676_v50, -10000.0 }
 0x1c3   : > { %v812_v4 = vmax.f32 %v4800_v61, -10000.0 }
 0x1c4   : > { %v4809_v8 = vsel %vm260_vm10, %v678_v55, -10000.0  ;;  %v4826_v55 = vadd.s32 96, %v4698_v62 }
 0x1c5   : > { %813 = vmax.xlane.f32.xlu1 %v812_v4  ;;  %v815_v12 = vmax.f32 %v4809_v8, -10000.0 }
 0x1c6   : > { %6857 = vst [vmem:[#allocation42_spill] sm:$0xff] %v4826_v55  ;;  %vm6640_vm13 = vcmp.le.s32.totalorder %v4700_v63, %v4826_v55 }
 0x1c7   : > { %816 = vmax.xlane.f32.xlu0 %v815_v12  ;;  %v551_v20 = vpop.f32.mrb[20].mxu0  ;;  %v4835_v12 = vadd.s32 104, %v4698_v62 }
 0x1c8   : > { %v680_v25 = vmul.f32 0.35355338, %v551_v20  ;;  %v553_v30 = vpop.f32.mrb[21].mxu0 }
 0x1c9   : > { %v555_v39 = vpop.f32.mrb[22].mxu0  ;;  %6858 = vst [vmem:[#allocation43_spill] sm:$0xff] %v4835_v12  ;;  %vm268_vm14 = vcmp.le.s32.totalorder %v4700_v63, %v4835_v12 }
 0x1ca   : > { %v682_v49 = vmul.f32 0.35355338, %v555_v39  ;;  %v557_v50 = vpop.f32.mrb[23].mxu0  ;;  %v4822_v53 = vsel %vm262_vm11, %v680_v25, -10000.0 }
 0x1cb   : > { %v818_v54 = vmax.f32 %v4822_v53, -10000.0 }
 0x1cc   : > { %v4831_v57 = vsel %vm264_vm12, %v682_v49, -10000.0 }
 0x1cd   : > { %819 = vmax.xlane.f32.xlu1 %v818_v54  ;;  %v821_v4 = vmax.f32 %v4831_v57, -10000.0 }
 0x1cf   : > { %822 = vmax.xlane.f32.xlu0 %v821_v4  ;;  %v561_v20 = vpop.f32.mrb[24].mxu0  ;;  %v4848_v4 = vadd.s32 112, %v4698_v62 }
 0x1d0   : > { %v684_v25 = vmul.f32 0.35355338, %v561_v20  ;;  %v563_v30 = vpop.f32.mrb[25].mxu0 }
 0x1d1   : > { %v565_v39 = vpop.f32.mrb[26].mxu0  ;;  %6859 = vst [vmem:[#allocation44_spill] sm:$0xff] %v4848_v4  ;;  %vm6644_vm15 = vcmp.le.s32.totalorder %v4700_v63, %v4848_v4 }
 0x1d2   : > { %v686_v50 = vmul.f32 0.35355338, %v565_v39  ;;  %v567_v49 = vpop.f32.mrb[27].mxu0  ;;  %v4844_v54 = vsel %vm6640_vm13, %v684_v25, -10000.0  ;;  %v4857_v39 = vadd.s32 120, %v4698_v62 }
 0x1d3   : > { %v824_v18 = vmax.f32 %v4844_v54, -10000.0 }
 0x1d4   : > { %v4853_v20 = vsel %vm268_vm14, %v686_v50, -10000.0  ;;  %6860 = vst [vmem:[#allocation45_spill] sm:$0xff] %v4857_v39  ;;  %vm6648_vm13 = vcmp.le.s32.totalorder %v4700_v63, %v4857_v39 }
 0x1d5   : > { %825 = vmax.xlane.f32.xlu1 %v824_v18  ;;  %v827_v30 = vmax.f32 %v4853_v20, -10000.0 }
 0x1d7   : > { %828 = vmax.xlane.f32.xlu0 %v827_v30  ;;  %v571_v49 = vpop.f32.mrb[28].mxu0 }
 0x1d8   : > { %v688_v25 = vmul.f32 0.35355338, %v571_v49  ;;  %v573_v55 = vpop.f32.mrb[29].mxu0  ;;  %v4878_v49 = vadd.s32 128, %v4700_v63 }
 0x1d9   : > { %v575_v6 = vpop.f32.mrb[30].mxu0  ;;  %v4875_v55 = vadd.s32 128, %v4698_v62 }
 0x1da   : > { %v690_v12 = vmul.f32 0.35355338, %v575_v6  ;;  %v577_v50 = vpop.f32.mrb[31].mxu0  ;;  %v4866_v18 = vsel %vm6644_vm15, %v688_v25, -10000.0  ;;  %6862 = vst [vmem:[#allocation47_spill] sm:$0xff] %v4878_v49 }
 0x1db   : > { %v830_v48 = vmax.f32 %v4866_v18, -10000.0  ;;  %6861 = vst [vmem:[#allocation46_spill] sm:$0xff] %v4875_v55  ;;  %v4882_v50 = vadd.s32 136, %v4698_v62  ;;  %vm6652_vm15 = vcmp.le.s32.totalorder %v4878_v49, %v4875_v55 }
 0x1dc   : > { %v4872_v30 = vsel %vm6648_vm13, %v690_v12, -10000.0 }
 0x1dd   : > { %831 = vmax.xlane.f32.xlu1 %v830_v48  ;;  %v833_v6 = vmax.f32 %v4872_v30, -10000.0  ;;  %6863 = vst [vmem:[#allocation48_spill] sm:$0xff] %v4882_v50  ;;  %vm6657_vm13 = vcmp.le.s32.totalorder %v4878_v49, %v4882_v50 }
 0x1df   : > { %834 = vmax.xlane.f32.xlu0 %v833_v6  ;;  %v581_v25 = vpop.f32.mrb[32].mxu0 }
 0x1e0   : > { %v583_v4 = vpop.f32.mrb[33].mxu0  ;;  %v4886_v31 = vmul.f32 0.35355338, %v581_v25 }
 0x1e1   : > { %v693_v12 = vmul.f32 0.35355338, %v583_v4  ;;  %v585_v39 = vpop.f32.mrb[34].mxu0  ;;  %v4900_v4 = vadd.s32 144, %v4698_v62 }
 0x1e2   : > { %v587_v5 = vpop.f32.mrb[35].mxu0  ;;  %v4895_v6 = vmul.f32 0.35355338, %v585_v39 }
 0x1e3   : > { %v695_v48 = vmul.f32 0.35355338, %v587_v5  ;;  %v4893_v1 = vsel %vm6652_vm15, %v693_v12, -10000.0  ;;  %6864 = vst [vmem:[#allocation49_spill] sm:$0xff] %v4900_v4  ;;  %v4910_v12 = vadd.s32 152, %v4698_v62  ;;  %vm6662_vm15 = vcmp.le.s32.totalorder %v4878_v49, %v4900_v4 }
 0x1e4   : > { %v836_v45 = vmax.f32 %v4886_v31, %v4893_v1 }
 0x1e5   : > { %v4905_v25 = vsel %vm6657_vm13, %v695_v48, -10000.0  ;;  %6865 = vst [vmem:[#allocation50_spill] sm:$0xff] %v4910_v12  ;;  %vm6668_vm13 = vcmp.le.s32.totalorder %v4878_v49, %v4910_v12 }
 0x1e6   : > { %837 = vmax.xlane.f32.xlu1 %v836_v45  ;;  %v839_v5 = vmax.f32 %v4895_v6, %v4905_v25 }
 0x1e7   : > { %v591_v39 = vpop.f32.mrb[36].mxu0 }
 0x1e8   : > { %840 = vmax.xlane.f32.xlu0 %v839_v5  ;;  %v593_v55 = vpop.f32.mrb[37].mxu0  ;;  %v4914_v14 = vmul.f32 0.35355338, %v591_v39 }
 0x1e9   : > { %v697_v42 = vmul.f32 0.35355338, %v593_v55  ;;  %v595_v19 = vpop.f32.mrb[38].mxu0  ;;  %v4928_v55 = vadd.s32 160, %v4698_v62 }
 0x1ea   : > { %v597_v50 = vpop.f32.mrb[39].mxu0  ;;  %v4923_v0 = vmul.f32 0.35355338, %v595_v19 }
 0x1eb   : > { %v699_v45 = vmul.f32 0.35355338, %v597_v50  ;;  %v4921_v48 = vsel %vm6662_vm15, %v697_v42, -10000.0  ;;  %6866 = vst [vmem:[#allocation51_spill] sm:$0xff] %v4928_v55  ;;  %v4938_v42 = vadd.s32 168, %v4698_v62  ;;  %vm6674_vm15 = vcmp.le.s32.totalorder %v4878_v49, %v4928_v55 }
 0x1ec   : > { %v842_v5 = vmax.f32 %v4914_v14, %v4921_v48 }
 0x1ed   : > { %v4933_v39 = vsel %vm6668_vm13, %v699_v45, -10000.0  ;;  %6867 = vst [vmem:[#allocation52_spill] sm:$0xff] %v4938_v42  ;;  %vm6680_vm13 = vcmp.le.s32.totalorder %v4878_v49, %v4938_v42 }
 0x1ee   : > { %843 = vmax.xlane.f32.xlu1 %v842_v5  ;;  %v845_v50 = vmax.f32 %v4923_v0, %v4933_v39 }
 0x1ef   : > { %v601_v19 = vpop.f32.mrb[40].mxu0 }
 0x1f0   : > { %v4940_v4 = vmul.f32 0.35355338, %v601_v19  ;;  %846 = vmax.xlane.f32.xlu0 %v845_v50  ;;  %v603_v63 = vpop.f32.mrb[41].mxu0  ;;  %v4956_v19 = vadd.s32 176, %v4698_v62 }
 0x1f1   : > { %v701_v41 = vmul.f32 0.35355338, %v603_v63  ;;  %v605_v35 = vpop.f32.mrb[42].mxu0 }
 0x1f2   : > { %v4944_v12 = vmul.f32 0.35355338, %v605_v35  ;;  %v607_v45 = vpop.f32.mrb[43].mxu0  ;;  %6868 = vst [vmem:[#allocation53_spill] sm:$0xff] %v4956_v19 }
 0x1f3   : > { %v703_v5 = vmul.f32 0.35355338, %v607_v45  ;;  %v4951_v29 = vsel %vm6674_vm15, %v701_v41, -10000.0  ;;  %v4966_v45 = vadd.s32 184, %v4698_v62  ;;  %vm6684_vm15 = vcmp.le.s32.totalorder %v4878_v49, %v4956_v19 }
 0x1f4   : > { %v848_v50 = vmax.f32 %v4940_v4, %v4951_v29 }
 0x1f5   : > { %v4961_v35 = vsel %vm6680_vm13, %v703_v5, -10000.0  ;;  %6869 = vst [vmem:[#allocation54_spill] sm:$0xff] %v4966_v45  ;;  %vm6689_vm13 = vcmp.le.s32.totalorder %v4878_v49, %v4966_v45 }
 0x1f6   : > { %849 = vmax.xlane.f32.xlu1 %v848_v50  ;;  %v851_v63 = vmax.f32 %v4944_v12, %v4961_v35 }
 0x1f7   : > { %v611_v41 = vpop.f32.mrb[44].mxu0 }
 0x1f8   : > { %v4968_v55 = vmul.f32 0.35355338, %v611_v41  ;;  %852 = vmax.xlane.f32.xlu0 %v851_v63  ;;  %v613_v23 = vpop.f32.mrb[45].mxu0  ;;  %v4984_v41 = vadd.s32 192, %v4698_v62 }
 0x1f9   : > { %v705_v17 = vmul.f32 0.35355338, %v613_v23  ;;  %v615_v11 = vpop.f32.mrb[46].mxu0 }
 0x1fa   : > { %v4972_v42 = vmul.f32 0.35355338, %v615_v11  ;;  %v617_v5 = vpop.f32.mrb[47].mxu0  ;;  %6870 = vst [vmem:[#allocation55_spill] sm:$0xff] %v4984_v41 }
 0x1fb   : > { %v707_v50 = vmul.f32 0.35355338, %v617_v5  ;;  %v4979_v60 = vsel %vm6684_vm15, %v705_v17, -10000.0  ;;  %v4994_v5 = vadd.s32 200, %v4698_v62  ;;  %vm6693_vm15 = vcmp.le.s32.totalorder %v4878_v49, %v4984_v41 }
 0x1fc   : > { %v854_v63 = vmax.f32 %v4968_v55, %v4979_v60 }
 0x1fd   : > { %v4989_v11 = vsel %vm6689_vm13, %v707_v50, -10000.0  ;;  %6871 = vst [vmem:[#allocation56_spill] sm:$0xff] %v4994_v5  ;;  %vm6697_vm13 = vcmp.le.s32.totalorder %v4878_v49, %v4994_v5 }
 0x1fe   : > { %855 = vmax.xlane.f32.xlu1 %v854_v63  ;;  %v857_v23 = vmax.f32 %v4972_v42, %v4989_v11 }
 0x1ff   : > { %v621_v17 = vpop.f32.mrb[48].mxu0 }
 0x200   : > { %v4996_v19 = vmul.f32 0.35355338, %v621_v17  ;;  %858 = vmax.xlane.f32.xlu0 %v857_v23  ;;  %v623_v58 = vpop.f32.mrb[49].mxu0  ;;  %v5012_v17 = vadd.s32 208, %v4698_v62 }
 0x201   : > { %v709_v56 = vmul.f32 0.35355338, %v623_v58  ;;  %v625_v10 = vpop.f32.mrb[50].mxu0 }
 0x202   : > { %v5000_v45 = vmul.f32 0.35355338, %v625_v10  ;;  %v627_v50 = vpop.f32.mrb[51].mxu0  ;;  %6872 = vst [vmem:[#allocation57_spill] sm:$0xff] %v5012_v17 }
 0x203   : > { %v711_v63 = vmul.f32 0.35355338, %v627_v50  ;;  %v5007_v52 = vsel %vm6693_vm15, %v709_v56, -10000.0  ;;  %v5022_v50 = vadd.s32 216, %v4698_v62  ;;  %vm6702_vm15 = vcmp.le.s32.totalorder %v4878_v49, %v5012_v17 }
 0x204   : > { %v860_v23 = vmax.f32 %v4996_v19, %v5007_v52 }
 0x205   : > { %v5017_v10 = vsel %vm6697_vm13, %v711_v63, -10000.0  ;;  %6873 = vst [vmem:[#allocation58_spill] sm:$0xff] %v5022_v50  ;;  %vm6706_vm13 = vcmp.le.s32.totalorder %v4878_v49, %v5022_v50 }
 0x206   : > { %861 = vmax.xlane.f32.xlu1 %v860_v23  ;;  %v863_v58 = vmax.f32 %v5000_v45, %v5017_v10 }
 0x207   : > { %v631_v56 = vpop.f32.mrb[52].mxu0 }
 0x208   : > { %v5024_v41 = vmul.f32 0.35355338, %v631_v56  ;;  %864 = vmax.xlane.f32.xlu0 %v863_v58  ;;  %v633_v51 = vpop.f32.mrb[53].mxu0  ;;  %v5040_v56 = vadd.s32 224, %v4698_v62 }
 0x209   : > { %v713_v38 = vmul.f32 0.35355338, %v633_v51  ;;  %v635_v44 = vpop.f32.mrb[54].mxu0 }
 0x20a   : > { %v5028_v5 = vmul.f32 0.35355338, %v635_v44  ;;  %v637_v63 = vpop.f32.mrb[55].mxu0  ;;  %6875 = vst [vmem:[#allocation60_spill] sm:$0xff] %v5040_v56 }
 0x20b   : > { %v715_v23 = vmul.f32 0.35355338, %v637_v63  ;;  %v5035_v46 = vsel %vm6702_vm15, %v713_v38, -10000.0  ;;  %v5050_v63 = vadd.s32 232, %v4698_v62  ;;  %vm6709_vm15 = vcmp.le.s32.totalorder %v4878_v49, %v5040_v56 }
 0x20c   : > { %6874 = vst [vmem:[#allocation59_spill] sm:$0xff] %v5028_v5  ;;  %v866_v58 = vmax.f32 %v5024_v41, %v5035_v46 }
 0x20d   : > { %v5045_v44 = vsel %vm6706_vm13, %v715_v23, -10000.0  ;;  %6877 = vst [vmem:[#allocation62_spill] sm:$0xff] %v5050_v63  ;;  %vm301_vm13 = vcmp.le.s32.totalorder %v4878_v49, %v5050_v63 }
 0x20e   : > { %6876 = vst [vmem:[#allocation61_spill] sm:$0xff] %v5045_v44  ;;  %867 = vmax.xlane.f32.xlu1 %v866_v58  ;;  %v869_v51 = vmax.f32 %v5028_v5, %v5045_v44 }
 0x20f   : > { %v641_v38 = vpop.f32.mrb[56].mxu0 }
 0x210   : > { %v5052_v17 = vmul.f32 0.35355338, %v641_v38  ;;  %870 = vmax.xlane.f32.xlu0 %v869_v51  ;;  %v643_v24 = vpop.f32.mrb[57].mxu0  ;;  %v5068_v38 = vadd.s32 240, %v4698_v62 }
 0x211   : > { %v717_v37 = vmul.f32 0.35355338, %v643_v24  ;;  %v645_v32 = vpop.f32.mrb[58].mxu0 }
 0x212   : > { %6878 = vst [vmem:[#allocation63_spill] sm:$0xff] %v5052_v17  ;;  %v5056_v50 = vmul.f32 0.35355338, %v645_v32  ;;  %v647_v23 = vpop.f32.mrb[59].mxu0  ;;  %6881 = vst [vmem:[#allocation66_spill] sm:$0xff] %v5068_v38 }
 0x213   : > { %v719_v58 = vmul.f32 0.35355338, %v647_v23  ;;  %v5063_v44 = vsel %vm6709_vm15, %v717_v37, -10000.0  ;;  %vm6726_vm15 = vcmp.le.s32.totalorder %v4878_v49, %v5068_v38 }
 0x214   : > { %6879 = vst [vmem:[#allocation64_spill] sm:$0xff] %v5056_v50  ;;  %6880 = vst [vmem:[#allocation65_spill] sm:$0xff] %v5063_v44  ;;  %v872_v51 = vmax.f32 %v5052_v17, %v5063_v44 }
 0x215   : > { %v5073_v24 = vsel %vm301_vm13, %v719_v58, -10000.0 }
 0x216   : > { %6882 = vst [vmem:[#allocation67_spill] sm:$0xff] %v5073_v24  ;;  %873 = vmax.xlane.f32.xlu1 %v872_v51  ;;  %v875_v32 = vmax.f32 %v5056_v50, %v5073_v24 }
 0x217   : > { %v651_v23 = vpop.f32.mrb[60].mxu0 }
 0x218   : > { %v5077_v5 = vmul.f32 0.35355338, %v651_v23  ;;  %876 = vmax.xlane.f32.xlu0 %v875_v32  ;;  %v653_v37 = vpop.f32.mrb[61].mxu0  ;;  %v5090_v32 = vpop.permute.xlu1 %1571 }
 0x219   : > { %v721_v56 = vmul.f32 0.35355338, %v653_v37  ;;  %v655_v44 = vpop.f32.mrb[62].mxu0 }
 0x21a   : > { %6883 = vst [vmem:[#allocation68_spill] sm:$0xff] %v5077_v5  ;;  %v657_v17 = vpop.f32.mrb[63].mxu0 }
 0x21b   : > { %v5084_v58 = vsel %vm6726_vm15, %v721_v56, -10000.0  ;;  %v723_v13 = vmul.f32 0.35355338, %v657_v17 }
 0x21c   : > { %6884 = vst [vmem:[#allocation69_spill] sm:$0xff] %v5084_v58  ;;  %v878_v51 = vmax.f32 %v5077_v5, %v5084_v58 }
 0x21e   : > { %879 = vmax.xlane.f32.xlu0 %v878_v51 }
 0x227   : > { %1525 = vrot.lane.b32.xlu1 %v4405_v3, %s4363_s21 }
 0x232   : > { %v790_v23 = vpop.xlane.xlu0 %789 }
 0x233   : > { %v884_v37 = vsub.f32 %v4712_v9, %v790_v23  ;;  %v885_v63 = vsub.f32 -10000.0, %v790_v23 }
 0x234   : > { %1587 = vrot.lane.b32.xlu0 %v4494_v47, %s4361_s19  ;;  %v793_v38 = vpop.xlane.xlu1 %792  ;;  %v5100_v47 = vadd.s32 248, %v4698_v62 }
 0x235   : > { %v948_v58 = vmul.f32 1.442695, %v884_v37  ;;  %v886_v51 = vsub.f32 %v4721_v15, %v793_v38  ;;  %v950_v5 = vmul.f32 1.442695, %v885_v63  ;;  %v887_v24 = vsub.f32 -10000.0, %v793_v38 }
 0x236   : > { %6885 = vst [vmem:[#allocation70_spill] sm:$0xff] %v5100_v47  ;;  %vm305_vm15 = vcmp.le.s32.totalorder %v4878_v49, %v5100_v47  ;;  %v5105_v63 = vmul.f32 0.35355338, %v655_v44 }
 0x237   : > { %3968 = vpow2.f32 %v948_v58  ;;  %v952_v50 = vmul.f32 1.442695, %v886_v51  ;;  %v954_v9 = vmul.f32 1.442695, %v887_v24 }
 0x238   : > { %1527 = vrot.lane.b32.xlu0 %v4410_v7, %s4363_s21  ;;  %3970 = vpow2.f32 %v950_v5  ;;  %6886 = vst [vmem:[#allocation71_spill] sm:$0xff] %v5105_v63  ;;  %v5111_v5 = vsel %vm305_vm15, %v723_v13, -10000.0 }
 0x239   : > { %3972 = vpow2.f32 %v952_v50  ;;  %6887 = vst [vmem:[#allocation72_spill] sm:$0xff] %v5111_v5  ;;  %v881_v24 = vmax.f32 %v5105_v63, %v5111_v5 }
 0x23a   : > { %v796_v56 = vpop.xlane.xlu0 %795  ;;  %3974 = vpow2.f32 %v954_v9 }
 0x23b   : > { %v888_v3 = vsub.f32 %v4734_v36, %v796_v56  ;;  %v889_v27 = vsub.f32 -10000.0, %v796_v56 }
 0x23d   : > { %v956_v21 = vmul.f32 1.442695, %v888_v3  ;;  %v958_v7 = vmul.f32 1.442695, %v889_v27 }
 0x23e   : > { %v799_v23 = vpop.xlane.xlu0 %798 }
 0x23f   : > { %v890_v37 = vsub.f32 %v4743_v43, %v799_v23  ;;  %v891_v36 = vsub.f32 -10000.0, %v799_v23  ;;  %3976 = vpow2.f32 %v956_v21 }
 0x240   : > { %3978 = vpow2.f32 %v958_v7 }
 0x241   : > { %v960_v3 = vmul.f32 1.442695, %v890_v37  ;;  %v962_v17 = vmul.f32 1.442695, %v891_v36  ;;  %v5113_v50 = vpop.eup %3968 }
 0x242   : > { %v802_v15 = vpop.xlane.xlu1 %801  ;;  %v5117_v44 = vpop.eup %3970 }
 0x243   : > { %v892_v38 = vsub.f32 %v4756_v59, %v802_v15  ;;  %v893_v27 = vsub.f32 -10000.0, %v802_v15  ;;  %3980 = vpow2.f32 %v960_v3  ;;  %v5121_v51 = vpop.eup %3972  ;;  %v1076_v9 = vadd.f32 %v5117_v44, %v5113_v50 }
 0x244   : > { %v805_v43 = vpop.xlane.xlu0 %804  ;;  %3982 = vpow2.f32 %v962_v17  ;;  %v5125_v23 = vpop.eup %3974 }
 0x245   : > { %v964_v21 = vmul.f32 1.442695, %v892_v38  ;;  %v894_v59 = vsub.f32 %v4765_v2, %v805_v43  ;;  %v966_v56 = vmul.f32 1.442695, %v893_v27  ;;  %v895_v13 = vsub.f32 -10000.0, %v805_v43 }
 0x247   : > { %3984 = vpow2.f32 %v964_v21  ;;  %v968_v37 = vmul.f32 1.442695, %v894_v59  ;;  %v970_v2 = vmul.f32 1.442695, %v895_v13 }
 0x248   : > { %3986 = vpow2.f32 %v966_v56 }
 0x249   : > { %v5127_v36 = vpop.eup %3976  ;;  %3988 = vpow2.f32 %v968_v37 }
 0x24a   : > { %v808_v58 = vpop.xlane.xlu1 %807  ;;  %v5129_v27 = vpop.eup %3978  ;;  %3990 = vpow2.f32 %v970_v2 }
 0x24b   : > { %882 = vmax.xlane.f32.xlu1 %v881_v24  ;;  %v896_v7 = vsub.f32 %v4778_v26, %v808_v58  ;;  %v897_v15 = vsub.f32 -10000.0, %v808_v58  ;;  %v1079_v26 = vadd.f32 %v5125_v23, %v5121_v51  ;;  %v1082_v13 = vadd.f32 %v5129_v27, %v5127_v36 }
 0x24c   : > { %v811_v3 = vpop.xlane.xlu0 %810 }
 0x24d   : > { %v972_v38 = vmul.f32 1.442695, %v896_v7  ;;  %v974_v43 = vmul.f32 1.442695, %v897_v15  ;;  %v898_v24 = vsub.f32 %v4787_v33, %v811_v3  ;;  %v899_v58 = vsub.f32 -10000.0, %v811_v3  ;;  %v5137_v7 = vpop.eup %3980 }
 0x24e   : > { %v5140_v2 = vpop.eup %3982 }
 0x24f   : > { %1077 = vadd.xlane.f32.xlu1 %v1076_v9  ;;  %3992 = vpow2.f32 %v972_v38  ;;  %v976_v33 = vmul.f32 1.442695, %v898_v24  ;;  %v978_v3 = vmul.f32 1.442695, %v899_v58 }
 0x250   : > { %3994 = vpow2.f32 %v974_v43 }
 0x251   : > { %v5142_v38 = vpop.eup %3984 }
 0x252   : > { %v814_v17 = vpop.xlane.xlu1 %813 }
 0x253   : > { %v900_v21 = vsub.f32 %v4800_v61, %v814_v17  ;;  %v901_v59 = vsub.f32 -10000.0, %v814_v17  ;;  %1080 = vadd.xlane.f32.xlu1 %v1079_v26  ;;  %v5144_v17 = vpop.eup %3986 }
 0x254   : > { %v817_v56 = vpop.xlane.xlu0 %816 }
 0x255   : > { %v980_v9 = vmul.f32 1.442695, %v900_v21  ;;  %v982_v47 = vmul.f32 1.442695, %v901_v59  ;;  %v902_v37 = vsub.f32 %v4809_v8, %v817_v56  ;;  %v903_v15 = vsub.f32 -10000.0, %v817_v56  ;;  %v5149_v59 = vpop.eup %3988 }
 0x256   : > { %v1085_v21 = vadd.f32 %v5140_v2, %v5137_v7  ;;  %v5153_v58 = vpop.eup %3990 }
 0x257   : > { %3996 = vpow2.f32 %v980_v9  ;;  %v984_v61 = vmul.f32 1.442695, %v902_v37  ;;  %v986_v26 = vmul.f32 1.442695, %v903_v15  ;;  %1083 = vadd.xlane.f32.xlu1 %v1082_v13 }
 0x258   : > { %3998 = vpow2.f32 %v982_v47  ;;  %v1088_v47 = vadd.f32 %v5144_v17, %v5142_v38 }
 0x259   : > { %4000 = vpow2.f32 %v984_v61  ;;  %v5156_v61 = vpop.eup %3992 }
 0x25a   : > { %4002 = vpow2.f32 %v986_v26  ;;  %v820_v8 = vpop.xlane.xlu1 %819  ;;  %v5158_v26 = vpop.eup %3994 }
 0x25b   : > { %4004 = vpow2.f32 %v976_v33  ;;  %v904_v43 = vsub.f32 %v4822_v53, %v820_v8  ;;  %v905_v24 = vsub.f32 -10000.0, %v820_v8  ;;  %1086 = vadd.xlane.f32.xlu1 %v1085_v21  ;;  %v1091_v21 = vadd.f32 %v5153_v58, %v5149_v59 }
 0x25c   : > { %4006 = vpow2.f32 %v978_v3  ;;  %v823_v56 = vpop.xlane.xlu0 %822 }
 0x25d   : > { %v988_v13 = vmul.f32 1.442695, %v904_v43  ;;  %v990_v9 = vmul.f32 1.442695, %v905_v24  ;;  %v906_v37 = vsub.f32 %v4831_v57, %v823_v56  ;;  %v907_v15 = vsub.f32 -10000.0, %v823_v56 }
 0x25f   : > { %4008 = vpow2.f32 %v988_v13  ;;  %v992_v53 = vmul.f32 1.442695, %v906_v37  ;;  %v994_v33 = vmul.f32 1.442695, %v907_v15  ;;  %1089 = vadd.xlane.f32.xlu1 %v1088_v47  ;;  %v1094_v37 = vadd.f32 %v5158_v26, %v5156_v61 }
 0x260   : > { %4010 = vpow2.f32 %v990_v9 }
 0x261   : > { %v5160_v3 = vpop.eup %3996  ;;  %4012 = vpow2.f32 %v992_v53 }
 0x262   : > { %6888 = vst [vmem:[#allocation73_spill] sm:$0xff] %v5160_v3  ;;  %v5164_v8 = vpop.eup %3998  ;;  %4014 = vpow2.f32 %v994_v33  ;;  %v826_v57 = vpop.xlane.xlu1 %825 }
 0x263   : > { %6889 = vst [vmem:[#allocation74_spill] sm:$0xff] %v5164_v8  ;;  %v5166_v43 = vpop.eup %4000  ;;  %v908_v24 = vsub.f32 %v4844_v54, %v826_v57  ;;  %v909_v56 = vsub.f32 -10000.0, %v826_v57  ;;  %1092 = vadd.xlane.f32.xlu1 %v1091_v21  ;;  %v1100_v47 = vadd.f32 %v5164_v8, %v5160_v3 }
 0x264   : > { %6890 = vst [vmem:[#allocation75_spill] sm:$0xff] %v5166_v43  ;;  %v5171_v13 = vpop.eup %4002  ;;  %v829_v9 = vpop.xlane.xlu0 %828 }
 0x265   : > { %v5175_v15 = vpop.eup %4004  ;;  %v996_v53 = vmul.f32 1.442695, %v908_v24  ;;  %v998_v33 = vmul.f32 1.442695, %v909_v56  ;;  %v910_v49 = vsub.f32 %v4853_v20, %v829_v9  ;;  %v911_v62 = vsub.f32 -10000.0, %v829_v9  ;;  %1101 = vadd.xlane.f32.xlu0 %v1100_v47 }
 0x266   : > { %v5178_v54 = vpop.eup %4006  ;;  %v1103_v5 = vadd.f32 %v5171_v13, %v5166_v43 }
 0x267   : > { %4016 = vpow2.f32 %v996_v53  ;;  %v1000_v21 = vmul.f32 1.442695, %v910_v49  ;;  %v1002_v57 = vmul.f32 1.442695, %v911_v62  ;;  %1095 = vadd.xlane.f32.xlu1 %v1094_v37  ;;  %v1097_v24 = vadd.f32 %v5178_v54, %v5175_v15 }
 0x268   : > { %4018 = vpow2.f32 %v998_v33 }
 0x269   : > { %v5182_v63 = vpop.eup %4008  ;;  %4020 = vpow2.f32 %v1000_v21  ;;  %1104 = vadd.xlane.f32.xlu0 %v1103_v5 }
 0x26a   : > { %v5186_v20 = vpop.eup %4010  ;;  %4022 = vpow2.f32 %v1002_v57  ;;  %v832_v56 = vpop.xlane.xlu1 %831 }
 0x26b   : > { %v5188_v47 = vpop.eup %4012  ;;  %v912_v62 = vsub.f32 %v4866_v18, %v832_v56  ;;  %v913_v49 = vsub.f32 -10000.0, %v832_v56  ;;  %1098 = vadd.xlane.f32.xlu1 %v1097_v24  ;;  %v1106_v53 = vadd.f32 %v5186_v20, %v5182_v63 }
 0x26c   : > { %v5191_v9 = vpop.eup %4014  ;;  %v835_v37 = vpop.xlane.xlu0 %834 }
 0x26d   : > { %v1004_v5 = vmul.f32 1.442695, %v912_v62  ;;  %v1006_v33 = vmul.f32 1.442695, %v913_v49  ;;  %v914_v21 = vsub.f32 %v4872_v30, %v835_v37  ;;  %v915_v3 = vsub.f32 -10000.0, %v835_v37 }
 0x26e   : > { %v1109_v57 = vadd.f32 %v5191_v9, %v5188_v47 }
 0x26f   : > { %4024 = vpow2.f32 %v1004_v5  ;;  %v1008_v43 = vmul.f32 1.442695, %v914_v21  ;;  %v1010_v8 = vmul.f32 1.442695, %v915_v3  ;;  %1107 = vadd.xlane.f32.xlu1 %v1106_v53 }
 0x270   : > { %4026 = vpow2.f32 %v1006_v33  ;;  %1110 = vadd.xlane.f32.xlu0 %v1109_v57 }
 0x271   : > { %v5198_v18 = vpop.eup %4016  ;;  %4028 = vpow2.f32 %v1008_v43 }
 0x272   : > { %6891 = vst [vmem:[#allocation76_spill] sm:$0xff] %v5198_v18  ;;  %v5200_v24 = vpop.eup %4018  ;;  %4030 = vpow2.f32 %v1010_v8 }
 0x273   : > { %6892 = vst [vmem:[#allocation77_spill] sm:$0xff] %v5200_v24  ;;  %v5202_v56 = vpop.eup %4020  ;;  %v838_v62 = vpop.xlane.xlu1 %837  ;;  %v1112_v30 = vadd.f32 %v5200_v24, %v5198_v18 }
 0x274   : > { %v5206_v49 = vpop.eup %4022  ;;  %v916_v37 = vsub.f32 %v4886_v31, %v838_v62  ;;  %v917_v3 = vsub.f32 %v4893_v1, %v838_v62 }
 0x275   : > { %1113 = vadd.xlane.f32.xlu0 %v1112_v30  ;;  %v841_v53 = vpop.xlane.xlu0 %840  ;;  %v1115_v21 = vadd.f32 %v5206_v49, %v5202_v56 }
 0x276   : > { %v1012_v5 = vmul.f32 1.442695, %v916_v37  ;;  %v1014_v33 = vmul.f32 1.442695, %v917_v3  ;;  %v918_v43 = vsub.f32 %v4895_v6, %v841_v53  ;;  %v919_v8 = vsub.f32 %v4905_v25, %v841_v53 }
 0x278   : > { %4032 = vpow2.f32 %v1012_v5  ;;  %v1016_v57 = vmul.f32 1.442695, %v918_v43  ;;  %v1018_v18 = vmul.f32 1.442695, %v919_v8 }
 0x279   : > { %v5214_v24 = vpop.eup %4024  ;;  %4034 = vpow2.f32 %v1014_v33  ;;  %1116 = vadd.xlane.f32.xlu0 %v1115_v21 }
 0x27a   : > { %6893 = vst [vmem:[#allocation78_spill] sm:$0xff] %v5214_v24  ;;  %v5216_v31 = vpop.eup %4026  ;;  %4036 = vpow2.f32 %v1016_v57 }
 0x27b   : > { %v5218_v1 = vpop.eup %4028  ;;  %4038 = vpow2.f32 %v1018_v18  ;;  %v844_v62 = vpop.xlane.xlu1 %843  ;;  %v1118_v6 = vadd.f32 %v5216_v31, %v5214_v24 }
 0x27c   : > { %v5222_v25 = vpop.eup %4030  ;;  %v920_v30 = vsub.f32 %v4914_v14, %v844_v62  ;;  %v921_v37 = vsub.f32 %v4921_v48, %v844_v62 }
 0x27d   : > { %1119 = vadd.xlane.f32.xlu1 %v1118_v6  ;;  %v1121_v3 = vadd.f32 %v5222_v25, %v5218_v1  ;;  %v847_v6 = vpop.xlane.xlu0 %846 }
 0x27e   : > { %v1020_v53 = vmul.f32 1.442695, %v920_v30  ;;  %v1022_v5 = vmul.f32 1.442695, %v921_v37 }
 0x27f   : > { %1122 = vadd.xlane.f32.xlu0 %v1121_v3 }
 0x280   : > { %4040 = vpow2.f32 %v1020_v53 }
 0x281   : > { %4042 = vpow2.f32 %v1022_v5 }
 0x282   : > { %v5228_v18 = vpop.eup %4032 }
 0x283   : > { %6894 = vst [vmem:[#allocation79_spill] sm:$0xff] %v5228_v18  ;;  %v5230_v33 = vpop.eup %4034  ;;  %v850_v30 = vpop.xlane.xlu1 %849 }
 0x284   : > { %6895 = vst [vmem:[#allocation80_spill] sm:$0xff] %v5230_v33  ;;  %v5232_v43 = vpop.eup %4036  ;;  %v1124_v14 = vadd.f32 %v5230_v33, %v5228_v18 }
 0x285   : > { %6896 = vst [vmem:[#allocation81_spill] sm:$0xff] %v5232_v43  ;;  %v5236_v8 = vpop.eup %4038  ;;  %v853_v37 = vpop.xlane.xlu0 %852 }
 0x286   : > { %1125 = vadd.xlane.f32.xlu0 %v1124_v14  ;;  %v1127_v48 = vadd.f32 %v5236_v8, %v5232_v43  ;;  %v922_v14 = vsub.f32 %v4923_v0, %v847_v6  ;;  %v927_v18 = vsub.f32 %v4961_v35, %v853_v37 }
 0x28a   : > { %v5240_v21 = vpop.eup %4040  ;;  %1128 = vadd.xlane.f32.xlu0 %v1127_v48  ;;  %v923_v48 = vsub.f32 %v4933_v39, %v847_v6  ;;  %v1034_v39 = vmul.f32 1.442695, %v927_v18  ;;  %v5282_v18 = vsel %vm370_vm0, %v5090_v32, 0 }
 0x28b   : > { %6897 = vst [vmem:[#allocation82_spill] sm:$0xff] %v5240_v21  ;;  %v5242_v57 = vpop.eup %4042  ;;  %v856_v3 = vpop.xlane.xlu1 %855 }
 0x28c   : > { %6898 = vst [vmem:[#allocation83_spill] sm:$0xff] %v5242_v57  ;;  %v1130_v62 = vadd.f32 %v5242_v57, %v5240_v21  ;;  %v926_v57 = vsub.f32 %v4944_v12, %v853_v37  ;;  %v924_v12 = vsub.f32 %v4940_v4, %v850_v30  ;;  %v925_v37 = vsub.f32 %v4951_v29, %v850_v30 }
 0x28d   : > { %v5250_v53 = vpop.xlane.xlu0 %858 }
 0x28e   : > { %1131 = vadd.xlane.f32.xlu0 %v1130_v62  ;;  %1529 = vrot.lane.b32.xlu1 %v4430_v16, %s4363_s21  ;;  %v1024_v16 = vmul.f32 1.442695, %v922_v14  ;;  %v1032_v0 = vmul.f32 1.442695, %v926_v57  ;;  %v1028_v14 = vmul.f32 1.442695, %v924_v12 }
 0x28f   : > { %v1030_v57 = vmul.f32 1.442695, %v925_v37 }
 0x290   : > { %4044 = vpow2.f32 %v1024_v16 }
 0x292   : > { %1531 = vrot.lane.b32.xlu1 %v4442_v22, %s4363_s21  ;;  %v1026_v22 = vmul.f32 1.442695, %v923_v48  ;;  %v928_v48 = vsub.f32 %v4968_v55, %v856_v3 }
 0x293   : > { %v5252_v5 = vpop.xlane.xlu1 %861 }
 0x294   : > { %4046 = vpow2.f32 %v1026_v22  ;;  %v1036_v29 = vmul.f32 1.442695, %v928_v48 }
 0x295   : > { %v5256_v21 = vpop.xlane.xlu0 %864  ;;  %4048 = vpow2.f32 %v1032_v0  ;;  %v929_v0 = vsub.f32 %v4979_v60, %v856_v3 }
 0x296   : > { %4050 = vpow2.f32 %v1034_v39 }
 0x297   : > { %4052 = vpow2.f32 %v1028_v14  ;;  %v1038_v30 = vmul.f32 1.442695, %v929_v0  ;;  %v930_v0 = vsub.f32 %v4972_v42, %v5250_v53 }
 0x298   : > { %4054 = vpow2.f32 %v1030_v57 }
 0x299   : > { %4056 = vpow2.f32 %v1036_v29  ;;  %v931_v29 = vsub.f32 %v4989_v11, %v5250_v53  ;;  %v932_v53 = vsub.f32 %v4996_v19, %v5252_v5 }
 0x29a   : > { %v5278_v22 = vpop.eup %4044  ;;  %4058 = vpow2.f32 %v1038_v30 }
 0x29b   : > { %v5258_v62 = vpop.xlane.xlu1 %867 }
 0x29d   : > { %v5262_v43 = vpop.xlane.xlu0 %870 }
 0x29e   : > { %v5287_v4 = vpop.eup %4046 }
 0x29f   : > { %v5290_v55 = vpop.eup %4048  ;;  %v1133_v32 = vadd.f32 %v5287_v4, %v5278_v22 }
 0x2a0   : > { %v5294_v39 = vpop.eup %4050 }
 0x2a1   : > { %v1139_v3 = vadd.f32 %v5294_v39, %v5290_v55  ;;  %v5300_v12 = vpop.eup %4052 }
 0x2a2   : > { %v5302_v37 = vpop.eup %4054 }
 0x2a3   : > { %v5264_v33 = vpop.xlane.xlu1 %873  ;;  %v5305_v14 = vpop.eup %4056  ;;  %v1136_v48 = vadd.f32 %v5302_v37, %v5300_v12 }
 0x2a4   : > { %1533 = vrot.lane.b32.xlu0 %v4454_v28, %s4363_s21  ;;  %v5309_v57 = vpop.eup %4058 }
 0x2a5   : > { %v5268_v6 = vpop.xlane.xlu0 %876 }
 0x2a7   : > { %v1526_v24 = vpop.permute.xlu1 %1525 }
 0x2a8   : > { %3702 = vmatprep.mubr.msk.bf16.mxu0 %vm370_vm0, %v1526_v24 }
 0x2ab   : > { %v5272_v35 = vpop.xlane.xlu0 %879 }
 0x2af   : > { %v5276_v16 = vpop.permute.xlu0 %1587 }
 0x2b0   : > { %3948 = vmatprep.subr.msk.bf16.mxu0 %vm370_vm0, %v5276_v16 }
 0x2b1   : > { %3701 = vmatpush3.bf16.xpose.msra.mxu0 %v5282_v18 }
 0x2b3   : > { %v1528_v60 = vpop.permute.xlu0 %1527 }
 0x2b6   : > { %1134 = vadd.xlane.f32.xlu1 %v1133_v32  ;;  %v1040_v32 = vmul.f32 1.442695, %v930_v0  ;;  %v1044_v0 = vmul.f32 1.442695, %v932_v53 }
 0x2b8   : > { %3703 = vmatmul.mubr.msk.bf16.vlgmr.msra.gmra.mrb[64].mxu0 %vm370_vm0, %v1526_v24  ;;  %v1142_v24 = vadd.f32 %v5309_v57, %v5305_v14  ;;  %4060 = vpow2.f32 %v1040_v32 }
 0x2b9   : > { %3704 = vmatprep.mubr.msk.bf16.mxu0 %vm370_vm0, %v1528_v60 }
 0x2ba   : > { %1140 = vadd.xlane.f32.xlu1 %v1139_v3  ;;  %v1042_v3 = vmul.f32 1.442695, %v931_v29  ;;  %v937_v29 = vsub.f32 %v5035_v46, %v5258_v62 }
 0x2c0   : > { %3705 = vmatmul.mubr.msk.bf16.gmra.mrb[68].mxu0 %vm370_vm0, %v1528_v60  ;;  %v934_v60 = vsub.f32 %v5000_v45, %v5256_v21 }
 0x2c2   : > { %v5335_v32 = vpop.eup %4060 }
 0x2c3   : > { %1137 = vadd.xlane.f32.xlu0 %v1136_v48  ;;  %v935_v48 = vsub.f32 %v5017_v10, %v5256_v21  ;;  %v933_v10 = vsub.f32 %v5007_v52, %v5252_v5  ;;  %v936_v21 = vsub.f32 %v5024_v41, %v5258_v62  ;;  %v1054_v52 = vmul.f32 1.442695, %v937_v29 }
 0x2c5   : > { %v1050_v42 = vmul.f32 1.442695, %v935_v48  ;;  %v1046_v48 = vmul.f32 1.442695, %v933_v10  ;;  %v1052_v19 = vmul.f32 1.442695, %v936_v21 }
 0x2c7   : > { %1143 = vadd.xlane.f32.xlu0 %v1142_v24 }
 0x2cb   : > { %1535 = vrot.lane.b32.xlu1 %v4466_v34, %s4363_s21  ;;  %v1048_v34 = vmul.f32 1.442695, %v934_v60 }
 0x2d8   : > { %v5319_v30 = vpop.xlane.xlu1 %882 }
 0x2dc   : > { %v1078_v24 = vpop.xlane.xlu1 %1077 }
 0x2dd   : > { %1537 = vrot.lane.b32.xlu0 %v4478_v40, %s4363_s21  ;;  %4062 = vrcp.f32 %v1078_v24 }
 0x2de   : > { %4064 = vpow2.f32 %v1042_v3 }
 0x2e0   : > { %v1081_v11 = vpop.xlane.xlu1 %1080 }
 0x2e1   : > { %4066 = vrcp.f32 %v1081_v11 }
 0x2e2   : > { %4068 = vpow2.f32 %v1048_v34 }
 0x2e3   : > { %4070 = vpow2.f32 %v1050_v42 }
 0x2e4   : > { %v1084_v45 = vpop.xlane.xlu1 %1083 }
 0x2e5   : > { %4072 = vrcp.f32 %v1084_v45 }
 0x2e7   : > { %v4063_v3 = vpop.eup %4062 }
 0x2e8   : > { %v1087_v60 = vpop.xlane.xlu1 %1086  ;;  %v5337_v34 = vpop.eup %4064  ;;  %v1205_v41 = vmul.f32 %v4063_v3, %v5117_v44  ;;  %v1204_v46 = vmul.f32 %v4063_v3, %v5113_v50 }
 0x2e9   : > { %4074 = vrcp.f32 %v1087_v60  ;;  %v1145_v53 = vadd.f32 %v5337_v34, %v5335_v32  ;;  %v6900_v60 = vld [vmem:[#allocation16_spill] sm:$0xff] }
 0x2ea   : > { %4076 = vpow2.f32 %v1044_v0  ;;  %v6899_v0 = vld [vmem:[#allocation17_spill] sm:$0xff] }
 0x2eb   : > { %v4067_v24 = vpop.eup %4066  ;;  %4078 = vpow2.f32 %v1046_v48 }
 0x2ec   : > { %v1090_v5 = vpop.xlane.xlu1 %1089  ;;  %v1207_v42 = vmul.f32 %v4067_v24, %v5125_v23  ;;  %v1206_v62 = vmul.f32 %v4067_v24, %v5121_v51  ;;  %v5343_v11 = vpop.eup %4068  ;;  %4080 = vpow2.f32 %v1052_v19 }
 0x2ed   : > { %v5347_v45 = vpop.eup %4070  ;;  %4082 = vrcp.f32 %v1090_v5 }
 0x2ee   : > { %v1269_v10 = vpack.c.bf16 %v1207_v42, %v1205_v41  ;;  %v1268_v21 = vpack.c.bf16 %v1206_v62, %v1204_v46  ;;  %4084 = vpow2.f32 %v1054_v52  ;;  %v1151_v50 = vadd.f32 %v5347_v45, %v5343_v11 }
 0x2ef   : > { %1146 = vadd.xlane.f32.xlu1 %v1145_v53  ;;  %v4073_v23 = vpop.eup %4072 }
 0x2f0   : > { %1380 = vmatprep.mubr.bf16.mxu1 %v1269_v10  ;;  %v1093_v44 = vpop.xlane.xlu1 %1092  ;;  %v1209_v48 = vmul.f32 %v4073_v23, %v5129_v27  ;;  %v1208_v24 = vmul.f32 %v4073_v23, %v5127_v36 }
 0x2f1   : > { %4086 = vrcp.f32 %v1093_v44  ;;  %1381 = vmatmul.mubr.bf16.vlgmr.msra.gmra.mrb[0].mxu1 %v1268_v21  ;;  %v6902_v44 = vld [vmem:[#allocation20_spill] sm:$0xff] }
 0x2f2   : > { %v1102_v51 = vpop.xlane.xlu0 %1101  ;;  %3854 = vmatpush3.bf16.xpose.msra.mxu1 %v6899_v0 }
 0x2f3   : > { %v4075_v29 = vpop.eup %4074  ;;  %1152 = vadd.xlane.f32.xlu1 %v1151_v50  ;;  %3937 = vmatprep.subr.msk.bf16.mxu1 %vm370_vm0, %v6900_v60 }
 0x2f4   : > { %v1096_v3 = vpop.xlane.xlu1 %1095  ;;  %v1211_v19 = vmul.f32 %v4075_v29, %v5140_v2  ;;  %v1210_v52 = vmul.f32 %v4075_v29, %v5137_v7  ;;  %v5358_v5 = vpop.eup %4076  ;;  %v6901_v7 = vld [vmem:[#allocation19_spill] sm:$0xff] }
 0x2f5   : > { %4088 = vrcp.f32 %v1096_v3  ;;  %v5360_v62 = vpop.eup %4078 }
 0x2f6   : > { %v1105_v41 = vpop.xlane.xlu0 %1104  ;;  %v1271_v42 = vpack.c.bf16 %v1211_v19, %v1209_v48  ;;  %v1270_v46 = vpack.c.bf16 %v1210_v52, %v1208_v24  ;;  %v5362_v53 = vpop.eup %4080  ;;  %v1148_v2 = vadd.f32 %v5360_v62, %v5358_v5 }
 0x2f7   : > { %4090 = vrcp.f32 %v1105_v41  ;;  %v4083_v10 = vpop.eup %4082 }
 0x2f8   : > { %4092 = vrcp.f32 %v1102_v51  ;;  %1388 = vmatprep.mubr.bf16.mxu1 %v1271_v42  ;;  %v1099_v27 = vpop.xlane.xlu1 %1098  ;;  %v5364_v36 = vpop.eup %4084  ;;  %v1213_v50 = vmul.f32 %v4083_v10, %v5144_v17  ;;  %v1212_v0 = vmul.f32 %v4083_v10, %v5142_v38  ;;  %v6904_v42 = vld [vmem:[#allocation18_spill] sm:$0xff] }
 0x2f9   : > { %4094 = vrcp.f32 %v1099_v27  ;;  %1389 = vmatmul.mubr.bf16.gmra.mrb[4].mxu1 %v1270_v46  ;;  %v1154_v3 = vadd.f32 %v5364_v36, %v5362_v53  ;;  %v6905_v46 = vld [vmem:[#allocation14_spill] sm:$0xff] }
 0x2fa   : > { %3855 = vmatpush3.bf16.xpose.msra.mxu1 %v6901_v7 }
 0x2fb   : > { %v4087_v21 = vpop.eup %4086  ;;  %3939 = vmatprep.subr.msk.bf16.mxu1 %vm370_vm0, %v6902_v44 }
 0x2fc   : > { %1149 = vadd.xlane.f32.xlu0 %v1148_v2  ;;  %v1108_v23 = vpop.xlane.xlu1 %1107  ;;  %v1215_v51 = vmul.f32 %v4087_v21, %v5153_v58  ;;  %v1214_v29 = vmul.f32 %v4087_v21, %v5149_v59  ;;  %v6903_v58 = vld [vmem:[#allocation21_spill] sm:$0xff] }
 0x2fd   : > { %v1111_v60 = vpop.xlane.xlu0 %1110  ;;  %4096 = vrcp.f32 %v1108_v23 }
 0x2fe   : > { %v1273_v48 = vpack.c.bf16 %v1215_v51, %v1213_v50  ;;  %v1272_v19 = vpack.c.bf16 %v1214_v29, %v1212_v0  ;;  %4098 = vrcp.f32 %v1111_v60  ;;  %v6906_v50 = vld [vmem:[#allocation74_spill] sm:$0xff]  ;;  %v6907_v60 = vld [vmem:[#allocation23_spill] sm:$0xff] }
 0x2ff   : > { %v4089_v24 = vpop.eup %4088 }
 0x300   : > { %1155 = vadd.xlane.f32.xlu0 %v1154_v3  ;;  %1396 = vmatprep.mubr.bf16.mxu1 %v1273_v48  ;;  %v1217_v59 = vmul.f32 %v4089_v24, %v5158_v26  ;;  %v1216_v10 = vmul.f32 %v4089_v24, %v5156_v61  ;;  %v6908_v61 = vld [vmem:[#allocation22_spill] sm:$0xff]  ;;  %v6910_v24 = vld [vmem:[#allocation73_spill] sm:$0xff] }
 0x301   : > { %v4091_v52 = vpop.eup %4090  ;;  %1397 = vmatmul.mubr.bf16.gmra.mrb[8].mxu1 %v1272_v19 }
 0x302   : > { %v4093_v17 = vpop.eup %4092  ;;  %v1114_v41 = vpop.xlane.xlu0 %1113  ;;  %3856 = vmatpush3.bf16.xpose.msra.mxu1 %v6903_v58  ;;  %v1223_v2 = vmul.f32 %v4091_v52, %v5171_v13  ;;  %v6909_v13 = vld [vmem:[#allocation75_spill] sm:$0xff] }
 0x303   : > { %v4095_v38 = vpop.eup %4094  ;;  %3941 = vmatprep.subr.msk.bf16.mxu1 %vm370_vm0, %v6904_v42  ;;  %v1221_v51 = vmul.f32 %v4093_v17, %v6906_v50  ;;  %v1220_v58 = vmul.f32 %v4093_v17, %v6910_v24 }
 0x304   : > { %1539 = vrot.lane.b32.xlu1 %v6905_v46, %s4363_s21  ;;  %v1219_v27 = vmul.f32 %v4095_v38, %v5178_v54  ;;  %v1218_v7 = vmul.f32 %v4095_v38, %v5175_v15  ;;  %v1222_v15 = vmul.f32 %v4091_v52, %v6909_v13  ;;  %v6911_v38 = vld [vmem:[#allocation59_spill] sm:$0xff]  ;;  %v6917_v13 = vld [vmem:[#allocation4_spill] sm:$0xff] }
 0x305   : > { %v1277_v26 = vpack.c.bf16 %v1223_v2, %v1221_v51  ;;  %v6915_v51 = vld [vmem:[#allocation64_spill] sm:$0xff] }
 0x306   : > { %v1117_v21 = vpop.xlane.xlu0 %1116  ;;  %v1275_v44 = vpack.c.bf16 %v1219_v27, %v1217_v59  ;;  %v1274_v23 = vpack.c.bf16 %v1218_v7, %v1216_v10  ;;  %v6912_v59 = vld [vmem:[#allocation61_spill] sm:$0xff]  ;;  %v1276_v10 = vpack.c.bf16 %v1222_v15, %v1220_v58  ;;  %v6920_v58 = vld [vmem:[#allocation27_spill] sm:$0xff] }
 0x307   : > { %4100 = vrcp.f32 %v1117_v21  ;;  %v4097_v0 = vpop.eup %4096  ;;  %v939_v27 = vsub.f32 %v6912_v59, %v5262_v43  ;;  %v6918_v15 = vld [vmem:[#allocation77_spill] sm:$0xff] }
 0x308   : > { %1404 = vmatprep.mubr.bf16.mxu1 %v1275_v44  ;;  %v4099_v29 = vpop.eup %4098  ;;  %4102 = vrcp.f32 %v1114_v41  ;;  %v1225_v48 = vmul.f32 %v4097_v0, %v5186_v20  ;;  %v938_v41 = vsub.f32 %v6911_v38, %v5262_v43  ;;  %v1224_v43 = vmul.f32 %v4097_v0, %v5182_v63 }
 0x309   : > { %1405 = vmatmul.mubr.bf16.gmra.mrb[12].mxu1 %v1274_v23  ;;  %v1227_v19 = vmul.f32 %v4099_v29, %v5191_v9  ;;  %v6913_v9 = vld [vmem:[#allocation24_spill] sm:$0xff]  ;;  %v1058_v21 = vmul.f32 1.442695, %v939_v27  ;;  %v6914_v23 = vld [vmem:[#allocation25_spill] sm:$0xff]  ;;  %v1226_v50 = vmul.f32 %v4099_v29, %v5188_v47 }
 0x30a   : > { %3857 = vmatpush3.bf16.xpose.msra.mxu1 %v6907_v60  ;;  %v1120_v54 = vpop.xlane.xlu1 %1119  ;;  %1412 = vmatprep.mubr.bf16.mxu1 %v1277_v26  ;;  %v1056_v20 = vmul.f32 1.442695, %v938_v41  ;;  %v942_v26 = vsub.f32 %v6915_v51, %v5268_v6  ;;  %v6922_v27 = vld [vmem:[#allocation76_spill] sm:$0xff] }
 0x30b   : > { %3943 = vmatprep.subr.msk.bf16.mxu1 %vm370_vm0, %v6908_v61  ;;  %v1279_v52 = vpack.c.bf16 %v1227_v19, %v1225_v48  ;;  %v1278_v19 = vpack.c.bf16 %v1226_v50, %v1224_v43  ;;  %v6926_v51 = vld [vmem:[#allocation28_spill] sm:$0xff] }
 0x30c   : > { %v1123_v3 = vpop.xlane.xlu0 %1122  ;;  %v1064_v63 = vmul.f32 1.442695, %v942_v26 }
 0x30d   : > { %4104 = vrcp.f32 %v1123_v3 }
 0x30e   : > { %v1530_v42 = vpop.permute.xlu1 %1529  ;;  %4106 = vrcp.f32 %v1120_v54  ;;  %v6916_v54 = vld [vmem:[#allocation67_spill] sm:$0xff] }
 0x30f   : > { %3706 = vmatprep.mubr.msk.bf16.mxu0 %vm370_vm0, %v1530_v42  ;;  %v943_v61 = vsub.f32 %v6916_v54, %v5268_v6  ;;  %4108 = vpow2.f32 %v1056_v20 }
 0x310   : > { %3707 = vmatmul.mubr.msk.bf16.gmra.mrb[72].mxu0 %vm370_vm0, %v1530_v42  ;;  %4110 = vpow2.f32 %v1058_v21  ;;  %v6921_v42 = vld [vmem:[#allocation63_spill] sm:$0xff] }
 0x311   : > { %v4101_v7 = vpop.eup %4100  ;;  %1413 = vmatmul.mubr.bf16.gmra.mrb[16].mxu1 %v1276_v10  ;;  %v1066_v29 = vmul.f32 1.442695, %v943_v61  ;;  %v940_v59 = vsub.f32 %v6921_v42, %v5264_v33 }
 0x312   : > { %3858 = vmatpush3.bf16.xpose.msra.mxu1 %v6913_v9  ;;  %v1532_v17 = vpop.permute.xlu1 %1531  ;;  %1420 = vmatprep.mubr.bf16.mxu1 %v1279_v52  ;;  %v4103_v2 = vpop.eup %4102  ;;  %v1231_v60 = vmul.f32 %v4101_v7, %v5206_v49  ;;  %v6919_v49 = vld [vmem:[#allocation26_spill] sm:$0xff]  ;;  %v1230_v38 = vmul.f32 %v4101_v7, %v5202_v56  ;;  %v6923_v52 = vld [vmem:[#allocation65_spill] sm:$0xff] }
 0x313   : > { %v1126_v44 = vpop.xlane.xlu0 %1125  ;;  %3945 = vmatprep.subr.msk.bf16.mxu1 %vm370_vm0, %v6914_v23  ;;  %3708 = vmatprep.mubr.msk.bf16.mxu0 %vm370_vm0, %v1532_v17  ;;  %v1229_v3 = vmul.f32 %v4103_v2, %v6918_v15  ;;  %v1228_v10 = vmul.f32 %v4103_v2, %v6922_v27  ;;  %v941_v20 = vsub.f32 %v6923_v52, %v5264_v33  ;;  %v6924_v23 = vld [vmem:[#allocation68_spill] sm:$0xff]  ;;  %v6927_v15 = vld [vmem:[#allocation78_spill] sm:$0xff]  ;;  %v6931_v52 = vld [vmem:[#allocation5_spill] sm:$0xff] }
 0x314   : > { %v944_v43 = vsub.f32 %v6924_v23, %v5272_v35 }
 0x315   : > { %v1281_v47 = vpack.c.bf16 %v1231_v60, %v1229_v3  ;;  %v1280_v21 = vpack.c.bf16 %v1230_v38, %v1228_v10  ;;  %v1062_v33 = vmul.f32 1.442695, %v941_v20 }
 0x316   : > { %1541 = vrot.lane.b32.xlu0 %v6917_v13, %s4363_s21  ;;  %v1068_v61 = vmul.f32 1.442695, %v944_v43 }
 0x317   : > { %v1129_v48 = vpop.xlane.xlu0 %1128  ;;  %v4105_v0 = vpop.eup %4104 }
 0x318   : > { %4112 = vrcp.f32 %v1129_v48  ;;  %3709 = vmatmul.mubr.msk.bf16.gmra.mrb[76].mxu0 %vm370_vm0, %v1532_v17  ;;  %v4107_v6 = vpop.eup %4106  ;;  %v1235_v41 = vmul.f32 %v4105_v0, %v5222_v25  ;;  %v1060_v25 = vmul.f32 1.442695, %v940_v59  ;;  %v1234_v60 = vmul.f32 %v4105_v0, %v5218_v1  ;;  %v6929_v0 = vld [vmem:[#allocation81_spill] sm:$0xff] }
 0x319   : > { %4114 = vrcp.f32 %v1126_v44  ;;  %1421 = vmatmul.mubr.bf16.gmra.mrb[20].mxu1 %v1278_v19  ;;  %v1233_v9 = vmul.f32 %v4107_v6, %v5216_v31  ;;  %v5427_v44 = vpop.eup %4108  ;;  %v6925_v31 = vld [vmem:[#allocation69_spill] sm:$0xff]  ;;  %v1232_v3 = vmul.f32 %v4107_v6, %v6927_v15  ;;  %v6930_v6 = vld [vmem:[#allocation79_spill] sm:$0xff] }
 0x31a   : > { %3859 = vmatpush3.bf16.xpose.msra.mxu1 %v6919_v49  ;;  %1428 = vmatprep.mubr.bf16.mxu1 %v1281_v47  ;;  %4116 = vpow2.f32 %v1064_v63  ;;  %v5430_v7 = vpop.eup %4110  ;;  %v945_v50 = vsub.f32 %v6925_v31, %v5272_v35  ;;  %v6928_v63 = vld [vmem:[#allocation80_spill] sm:$0xff] }
 0x31b   : > { %v1132_v24 = vpop.xlane.xlu0 %1131  ;;  %3947 = vmatprep.subr.msk.bf16.mxu1 %vm370_vm0, %v6920_v58  ;;  %4118 = vpow2.f32 %v1066_v29  ;;  %v1283_v56 = vpack.c.bf16 %v1235_v41, %v1233_v9  ;;  %v1157_v35 = vadd.f32 %v5430_v7, %v5427_v44 }
 0x31c   : > { %4120 = vpow2.f32 %v1060_v25  ;;  %v1070_v19 = vmul.f32 1.442695, %v945_v50  ;;  %v6934_v50 = vld [vmem:[#allocation83_spill] sm:$0xff] }
 0x31d   : > { %4122 = vpow2.f32 %v1062_v33 }
 0x31e   : > { %4124 = vpow2.f32 %v1068_v61 }
 0x31f   : > { %v1534_v17 = vpop.permute.xlu0 %1533  ;;  %4126 = vpow2.f32 %v1070_v19  ;;  %v6937_v19 = vld [vmem:[#allocation9_spill] sm:$0xff] }
 0x320   : > { %3710 = vmatprep.mubr.msk.bf16.mxu0 %vm370_vm0, %v1534_v17  ;;  %4128 = vrcp.f32 %v1132_v24 }
 0x321   : > { %3711 = vmatmul.mubr.msk.bf16.gmra.mrb[80].mxu0 %vm370_vm0, %v1534_v17  ;;  %1429 = vmatmul.mubr.bf16.gmra.mrb[24].mxu1 %v1280_v21  ;;  %v6932_v17 = vld [vmem:[#allocation71_spill] sm:$0xff] }
 0x322   : > { %v4113_v2 = vpop.eup %4112  ;;  %3860 = vmatpush3.bf16.xpose.msra.mxu1 %v6926_v51  ;;  %1436 = vmatprep.mubr.bf16.mxu1 %v1283_v56  ;;  %v946_v21 = vsub.f32 %v6932_v17, %v5319_v30  ;;  %v6933_v56 = vld [vmem:[#allocation72_spill] sm:$0xff] }
 0x323   : > { %v4115_v26 = vpop.eup %4114  ;;  %3949 = vmatprep.subr.msk.bf16.mxu1 %vm370_vm0, %v5276_v16  ;;  %v1239_v54 = vmul.f32 %v4113_v2, %v5236_v8  ;;  %v1282_v16 = vpack.c.bf16 %v1234_v60, %v1232_v3  ;;  %v1238_v49 = vmul.f32 %v4113_v2, %v6929_v0  ;;  %v947_v25 = vsub.f32 %v6933_v56, %v5319_v30  ;;  %v6936_v30 = vld [vmem:[#allocation7_spill] sm:$0xff] }
 0x324   : > { %v5443_v48 = vpop.eup %4116  ;;  %v1237_v47 = vmul.f32 %v4115_v26, %v6928_v63  ;;  %v1236_v58 = vmul.f32 %v4115_v26, %v6930_v6  ;;  %v1072_v2 = vmul.f32 1.442695, %v946_v21  ;;  %v6935_v26 = vld [vmem:[#allocation82_spill] sm:$0xff] }
 0x325   : > { %v5448_v29 = vpop.eup %4118  ;;  %v1074_v31 = vmul.f32 1.442695, %v947_v25 }
 0x326   : > { %v1285_v1 = vpack.c.bf16 %v1239_v54, %v1237_v47  ;;  %v1163_v8 = vadd.f32 %v5448_v29, %v5443_v48  ;;  %v5455_v38 = vpop.eup %4120  ;;  %v1284_v41 = vpack.c.bf16 %v1238_v49, %v1236_v58 }
 0x327   : > { %v5457_v42 = vpop.eup %4122 }
 0x328   : > { %1158 = vadd.xlane.f32.xlu1 %v1157_v35  ;;  %v5459_v59 = vpop.eup %4124 }
 0x329   : > { %1437 = vmatmul.mubr.bf16.gmra.mrb[28].mxu1 %v1282_v16  ;;  %v5463_v27 = vpop.eup %4126 }
 0x32a   : > { %3861 = vmatpush3.bf16.xpose.msra.mxu1 %v5282_v18  ;;  %1444 = vmatprep.mubr.bf16.mxu1 %v1285_v1  ;;  %v1160_v18 = vadd.f32 %v5457_v42, %v5455_v38  ;;  %v1166_v10 = vadd.f32 %v5463_v27, %v5459_v59  ;;  %v4129_v23 = vpop.eup %4128  ;;  %v6939_v1 = vld [vmem:[#allocation12_spill] sm:$0xff] }
 0x32b   : > { %v1241_v24 = vmul.f32 %v4129_v23, %v6934_v50  ;;  %v1240_v60 = vmul.f32 %v4129_v23, %v6935_v26 }
 0x32c   : > { %1164 = vadd.xlane.f32.xlu1 %v1163_v8 }
 0x331   : > { %1445 = vmatmul.mubr.bf16.gmra.mrb[32].mxu1 %v1284_v41 }
 0x335   : > { %1161 = vadd.xlane.f32.xlu0 %v1160_v18 }
 0x339   : > { %1167 = vadd.xlane.f32.xlu0 %v1166_v10 }
 0x33d   : > { %1543 = vrot.lane.b32.xlu1 %v6931_v52, %s4363_s21 }
 0x343   : > { %v1135_v20 = vpop.xlane.xlu1 %1134 }
 0x344   : > { %4130 = vrcp.f32 %v1135_v20  ;;  %v6940_v20 = vld [vmem:[#allocation13_spill] sm:$0xff] }
 0x347   : > { %v1141_v9 = vpop.xlane.xlu1 %1140 }
 0x348   : > { %4132 = vrcp.f32 %v1141_v9  ;;  %v6941_v9 = vld [vmem:[#allocation15_spill] sm:$0xff] }
 0x349   : > { %4134 = vpow2.f32 %v1072_v2 }
 0x34b   : > { %v1536_v43 = vpop.permute.xlu1 %1535 }
 0x34c   : > { %3712 = vmatprep.mubr.msk.bf16.mxu0 %vm370_vm0, %v1536_v43 }
 0x34d   : > { %3713 = vmatmul.mubr.msk.bf16.gmra.mrb[84].mxu0 %vm370_vm0, %v1536_v43 }
 0x34e   : > { %v4131_v33 = vpop.eup %4130 }
 0x34f   : > { %v1243_v51 = vmul.f32 %v4131_v33, %v5287_v4  ;;  %v1242_v54 = vmul.f32 %v4131_v33, %v5278_v22  ;;  %1545 = vrot.lane.b32.xlu0 %v6936_v30, %s4363_s21  ;;  %v6938_v4 = vld [vmem:[#allocation10_spill] sm:$0xff] }
 0x350   : > { %v1138_v61 = vpop.xlane.xlu0 %1137 }
 0x351   : > { %4136 = vrcp.f32 %v1138_v61  ;;  %v1287_v15 = vpack.c.bf16 %v1243_v51, %v1241_v24  ;;  %v1286_v3 = vpack.c.bf16 %v1242_v54, %v1240_v60  ;;  %v6942_v60 = vld [vmem:[#allocation30_spill] sm:$0xff] }
 0x352   : > { %4138 = vpow2.f32 %v1074_v31  ;;  %v4133_v22 = vpop.eup %4132 }
 0x353   : > { %1452 = vmatprep.mubr.bf16.mxu1 %v1287_v15  ;;  %1547 = vrot.lane.b32.xlu0 %v6937_v19, %s4363_s21  ;;  %v5486_v47 = vpop.eup %4134  ;;  %v1247_v49 = vmul.f32 %v4133_v22, %v5294_v39  ;;  %v1246_v58 = vmul.f32 %v4133_v22, %v5290_v55 }
 0x354   : > { %v1144_v35 = vpop.xlane.xlu0 %1143  ;;  %1453 = vmatmul.mubr.bf16.gmra.mrb[36].mxu1 %v1286_v3 }
 0x355   : > { %4140 = vrcp.f32 %v1144_v35 }
 0x357   : > { %1549 = vrot.lane.b32.xlu0 %v6938_v4, %s4363_s21 }
 0x358   : > { %v1538_v63 = vpop.permute.xlu0 %1537 }
 0x359   : > { %3714 = vmatprep.mubr.msk.bf16.mxu0 %vm370_vm0, %v1538_v63 }
 0x35a   : > { %3715 = vmatmul.mubr.msk.bf16.gmra.mrb[88].mxu0 %vm370_vm0, %v1538_v63 }
 0x35b   : > { %v4137_v16 = vpop.eup %4136  ;;  %1551 = vrot.lane.b32.xlu0 %v6939_v1, %s4363_s21 }
 0x35c   : > { %v5491_v8 = vpop.eup %4138  ;;  %v1245_v0 = vmul.f32 %v4137_v16, %v5302_v37  ;;  %v1244_v6 = vmul.f32 %v4137_v16, %v5300_v12 }
 0x35d   : > { %v1169_v10 = vadd.f32 %v5491_v8, %v5486_v47 }
 0x35e   : > { %v1289_v41 = vpack.c.bf16 %v1247_v49, %v1245_v0  ;;  %v1288_v18 = vpack.c.bf16 %v1246_v58, %v1244_v6 }
 0x35f   : > { %1553 = vrot.lane.b32.xlu0 %v6940_v20, %s4363_s21  ;;  %v4141_v37 = vpop.eup %4140 }
 0x360   : > { %1460 = vmatprep.mubr.bf16.mxu1 %v1289_v41  ;;  %v1249_v21 = vmul.f32 %v4141_v37, %v5309_v57  ;;  %v1248_v25 = vmul.f32 %v4141_v37, %v5305_v14 }
 0x361   : > { %1170 = vadd.xlane.f32.xlu1 %v1169_v10  ;;  %1461 = vmatmul.mubr.bf16.gmra.mrb[40].mxu1 %v1288_v18 }
 0x372   : > { %1555 = vrot.lane.b32.xlu1 %v6941_v9, %s4363_s21 }
 0x37c   : > { %v1147_v39 = vpop.xlane.xlu1 %1146 }
 0x37d   : > { %4142 = vrcp.f32 %v1147_v39 }
 0x380   : > { %v1153_v12 = vpop.xlane.xlu1 %1152 }
 0x381   : > { %4144 = vrcp.f32 %v1153_v12 }
 0x384   : > { %v1540_v55 = vpop.permute.xlu1 %1539 }
 0x385   : > { %3716 = vmatprep.mubr.msk.bf16.mxu0 %vm370_vm0, %v1540_v55 }
 0x386   : > { %3717 = vmatmul.mubr.msk.bf16.gmra.mrb[92].mxu0 %vm370_vm0, %v1540_v55 }
 0x387   : > { %v4143_v17 = vpop.eup %4142 }
 0x388   : > { %v1251_v56 = vmul.f32 %v4143_v17, %v5337_v34  ;;  %v1250_v23 = vmul.f32 %v4143_v17, %v5335_v32 }
 0x389   : > { %v1150_v43 = vpop.xlane.xlu0 %1149 }
 0x38a   : > { %4146 = vrcp.f32 %v1150_v43  ;;  %v1291_v2 = vpack.c.bf16 %v1251_v56, %v1249_v21  ;;  %v1290_v33 = vpack.c.bf16 %v1250_v23, %v1248_v25 }
 0x38b   : > { %v1719_v31 = vpop.f32.mrb[64].mxu0  ;;  %v4145_v35 = vpop.eup %4144 }
 0x38c   : > { %1468 = vmatprep.mubr.bf16.mxu1 %v1291_v2  ;;  %v1878_v50 = vmul.f32 0.35355338, %v1719_v31  ;;  %v1721_v24 = vpop.f32.mrb[65].mxu0  ;;  %v1255_v41 = vmul.f32 %v4145_v35, %v5347_v45  ;;  %v1254_v10 = vmul.f32 %v4145_v35, %v5343_v11 }
 0x38d   : > { %v1156_v51 = vpop.xlane.xlu0 %1155  ;;  %1469 = vmatmul.mubr.bf16.gmra.mrb[44].mxu1 %v1290_v33  ;;  %v1723_v26 = vpop.f32.mrb[66].mxu0 }
 0x38e   : > { %v5512_v54 = vsel %vm242_vm1, %v1878_v50, -10000.0  ;;  %v1880_v34 = vmul.f32 0.35355338, %v1723_v26  ;;  %v1725_v14 = vpop.f32.mrb[67].mxu0  ;;  %4148 = vrcp.f32 %v1156_v51 }
 0x38f   : > { %v2006_v32 = vmax.f32 %v5512_v54, -10000.0 }
 0x390   : > { %v5518_v15 = vsel %vm244_vm2, %v1880_v34, -10000.0 }
 0x391   : > { %v1542_v3 = vpop.permute.xlu0 %1541  ;;  %2007 = vmax.xlane.f32.xlu0 %v2006_v32  ;;  %v2009_v16 = vmax.f32 %v5518_v15, -10000.0 }
 0x392   : > { %3718 = vmatprep.mubr.msk.bf16.mxu0 %vm370_vm0, %v1542_v3 }
 0x393   : > { %3719 = vmatmul.mubr.msk.bf16.gmra.mrb[96].mxu0 %vm370_vm0, %v1542_v3  ;;  %v1729_v63 = vpop.f32.mrb[68].mxu0 }
 0x394   : > { %v4147_v22 = vpop.eup %4146  ;;  %v1882_v0 = vmul.f32 0.35355338, %v1729_v63  ;;  %v1731_v49 = vpop.f32.mrb[69].mxu0 }
 0x395   : > { %v1733_v6 = vpop.f32.mrb[70].mxu0  ;;  %v1253_v58 = vmul.f32 %v4147_v22, %v5360_v62  ;;  %v1252_v18 = vmul.f32 %v4147_v22, %v5358_v5 }
 0x396   : > { %v5530_v12 = vsel %vm246_vm3, %v1882_v0, -10000.0  ;;  %v1884_v37 = vmul.f32 0.35355338, %v1733_v6  ;;  %2010 = vmax.xlane.f32.xlu1 %v2009_v16  ;;  %v1735_v55 = vpop.f32.mrb[71].mxu0 }
 0x397   : > { %v2012_v17 = vmax.f32 %v5530_v12, -10000.0  ;;  %v1293_v21 = vpack.c.bf16 %v1255_v41, %v1253_v58  ;;  %v1292_v56 = vpack.c.bf16 %v1254_v10, %v1252_v18 }
 0x398   : > { %v5536_v45 = vsel %vm248_vm4, %v1884_v37, -10000.0  ;;  %v4149_v43 = vpop.eup %4148 }
 0x399   : > { %1476 = vmatprep.mubr.bf16.mxu1 %v1293_v21  ;;  %2013 = vmax.xlane.f32.xlu0 %v2012_v17  ;;  %v2015_v11 = vmax.f32 %v5536_v45, -10000.0  ;;  %v1257_v33 = vmul.f32 %v4149_v43, %v5364_v36  ;;  %v1256_v50 = vmul.f32 %v4149_v43, %v5362_v53 }
 0x39a   : > { %1477 = vmatmul.mubr.bf16.gmra.mrb[48].mxu1 %v1292_v56 }
 0x39d   : > { %2016 = vmax.xlane.f32.xlu0 %v2015_v11 }
 0x3b5   : > { %v1159_v5 = vpop.xlane.xlu1 %1158 }
 0x3b6   : > { %4150 = vrcp.f32 %v1159_v5 }
 0x3b9   : > { %v1165_v25 = vpop.xlane.xlu1 %1164 }
 0x3ba   : > { %4152 = vrcp.f32 %v1165_v25 }
 0x3bd   : > { %v1544_v23 = vpop.permute.xlu1 %1543 }
 0x3be   : > { %3720 = vmatprep.mubr.msk.bf16.mxu0 %vm370_vm0, %v1544_v23 }
 0x3bf   : > { %3721 = vmatmul.mubr.msk.bf16.gmra.mrb[100].mxu0 %vm370_vm0, %v1544_v23 }
 0x3c0   : > { %v4151_v2 = vpop.eup %4150 }
 0x3c1   : > { %v1259_v31 = vmul.f32 %v4151_v2, %v5430_v7  ;;  %v1258_v24 = vmul.f32 %v4151_v2, %v5427_v44 }
 0x3c2   : > { %v1162_v51 = vpop.xlane.xlu0 %1161 }
 0x3c3   : > { %4154 = vrcp.f32 %v1162_v51  ;;  %v1295_v26 = vpack.c.bf16 %v1259_v31, %v1257_v33  ;;  %v1294_v34 = vpack.c.bf16 %v1258_v24, %v1256_v50  ;;  %v6980_v51 = vld [vmem:[#allocation44_spill] sm:$0xff] }
 0x3c4   : > { %v3590_v14 = vpop.f32.mrb[0].mxu1  ;;  %v4153_v7 = vpop.eup %4152  ;;  %vm6981_vm2 = vcmp.le.s32.totalorder %v6942_v60, %v6980_v51 }
 0x3c5   : > { %1484 = vmatprep.mubr.bf16.mxu1 %v1295_v26  ;;  %v3591_v32 = vpop.f32.mrb[1].mxu1  ;;  %v1263_v49 = vmul.f32 %v4153_v7, %v5448_v29  ;;  %v1262_v39 = vmul.f32 %v4153_v7, %v5443_v48 }
 0x3c6   : > { %v5545_v61 = vpop.xlane.xlu0 %1167  ;;  %v5547_v3 = vadd.f32 %v3591_v32, %v3590_v14  ;;  %1485 = vmatmul.mubr.bf16.gmra.mrb[52].mxu1 %v1294_v34  ;;  %v3593_v35 = vpop.f32.mrb[2].mxu1 }
 0x3c7   : > { %v3594_v36 = vpop.f32.mrb[3].mxu1  ;;  %4156 = vrcp.f32 %v5545_v61 }
 0x3c8   : > { %6947 = vst [vmem:[#allocation17_spill] sm:$0xff] %v5547_v3  ;;  %v5549_v63 = vadd.f32 %v3594_v36, %v3593_v35 }
 0x3ca   : > { %6948 = vst [vmem:[#allocation16_spill] sm:$0xff] %v5549_v63  ;;  %v1546_v44 = vpop.permute.xlu0 %1545 }
 0x3cb   : > { %3722 = vmatprep.mubr.msk.bf16.mxu0 %vm370_vm0, %v1546_v44 }
 0x3cc   : > { %3723 = vmatmul.mubr.msk.bf16.gmra.mrb[104].mxu0 %vm370_vm0, %v1546_v44  ;;  %v3596_v22 = vpop.f32.mrb[4].mxu1 }
 0x3cd   : > { %v4155_v16 = vpop.eup %4154  ;;  %v3597_v0 = vpop.f32.mrb[5].mxu1 }
 0x3ce   : > { %v5556_v6 = vadd.f32 %v3597_v0, %v3596_v22  ;;  %v3599_v58 = vpop.f32.mrb[6].mxu1  ;;  %v1548_v41 = vpop.permute.xlu0 %1547  ;;  %v1261_v18 = vmul.f32 %v4155_v16, %v5457_v42  ;;  %v1260_v10 = vmul.f32 %v4155_v16, %v5455_v38 }
 0x3cf   : > { %v3600_v37 = vpop.f32.mrb[7].mxu1  ;;  %3724 = vmatprep.mubr.msk.bf16.mxu0 %vm370_vm0, %v1548_v41 }
 0x3d0   : > { %6949 = vst [vmem:[#allocation19_spill] sm:$0xff] %v5556_v6  ;;  %v5562_v55 = vadd.f32 %v3600_v37, %v3599_v58  ;;  %v1297_v17 = vpack.c.bf16 %v1263_v49, %v1261_v18  ;;  %v1296_v21 = vpack.c.bf16 %v1262_v39, %v1260_v10 }
 0x3d2   : > { %6950 = vst [vmem:[#allocation20_spill] sm:$0xff] %v5562_v55  ;;  %1492 = vmatprep.mubr.bf16.mxu1 %v1297_v17  ;;  %v1550_v42 = vpop.permute.xlu0 %1549 }
 0x3d3   : > { %1493 = vmatmul.mubr.bf16.gmra.mrb[56].mxu1 %v1296_v21 }
 0x3d4   : > { %3725 = vmatmul.mubr.msk.bf16.gmra.mrb[108].mxu0 %vm370_vm0, %v1548_v41  ;;  %v3602_v56 = vpop.f32.mrb[8].mxu1 }
 0x3d5   : > { %v3603_v62 = vpop.f32.mrb[9].mxu1  ;;  %3726 = vmatprep.mubr.msk.bf16.mxu0 %vm370_vm0, %v1550_v42 }
 0x3d6   : > { %v5568_v48 = vadd.f32 %v3603_v62, %v3602_v56  ;;  %v3605_v38 = vpop.f32.mrb[10].mxu1  ;;  %v1552_v43 = vpop.permute.xlu0 %1551 }
 0x3d7   : > { %v3606_v11 = vpop.f32.mrb[11].mxu1 }
 0x3d8   : > { %6951 = vst [vmem:[#allocation21_spill] sm:$0xff] %v5568_v48  ;;  %v5570_v5 = vadd.f32 %v3606_v11, %v3605_v38 }
 0x3da   : > { %6952 = vst [vmem:[#allocation18_spill] sm:$0xff] %v5570_v5 }
 0x3dc   : > { %v3608_v23 = vpop.f32.mrb[12].mxu1  ;;  %3727 = vmatmul.mubr.msk.bf16.gmra.mrb[112].mxu0 %vm370_vm0, %v1550_v42 }
 0x3dd   : > { %v3609_v2 = vpop.f32.mrb[13].mxu1  ;;  %3728 = vmatprep.mubr.msk.bf16.mxu0 %vm370_vm0, %v1552_v43 }
 0x3de   : > { %v5576_v33 = vadd.f32 %v3609_v2, %v3608_v23  ;;  %v3611_v31 = vpop.f32.mrb[14].mxu1 }
 0x3df   : > { %v3612_v50 = vpop.f32.mrb[15].mxu1 }
 0x3e0   : > { %6953 = vst [vmem:[#allocation14_spill] sm:$0xff] %v5576_v33  ;;  %v5578_v24 = vadd.f32 %v3612_v50, %v3611_v31 }
 0x3e2   : > { %6954 = vst [vmem:[#allocation74_spill] sm:$0xff] %v5578_v24 }
 0x3e3   : > { %v1739_v26 = vpop.f32.mrb[72].mxu0 }
 0x3e4   : > { %v1886_v34 = vmul.f32 0.35355338, %v1739_v26  ;;  %v1741_v14 = vpop.f32.mrb[73].mxu0  ;;  %v3614_v32 = vpop.f32.mrb[16].mxu1  ;;  %3729 = vmatmul.mubr.msk.bf16.gmra.mrb[116].mxu0 %vm370_vm0, %v1552_v43 }
 0x3e5   : > { %v1743_v35 = vpop.f32.mrb[74].mxu0  ;;  %v3615_v36 = vpop.f32.mrb[17].mxu1 }
 0x3e6   : > { %v5586_v44 = vsel %vm250_vm5, %v1886_v34, -10000.0  ;;  %v1888_v22 = vmul.f32 0.35355338, %v1743_v35  ;;  %v5588_v16 = vadd.f32 %v3615_v36, %v3614_v32  ;;  %v1745_v0 = vpop.f32.mrb[75].mxu0  ;;  %v3617_v49 = vpop.f32.mrb[18].mxu1 }
 0x3e7   : > { %v2018_v58 = vmax.f32 %v5586_v44, -10000.0  ;;  %v3618_v41 = vpop.f32.mrb[19].mxu1 }
 0x3e8   : > { %6956 = vst [vmem:[#allocation23_spill] sm:$0xff] %v5588_v16  ;;  %v5594_v10 = vsel %vm252_vm6, %v1888_v22, -10000.0  ;;  %v5596_v39 = vadd.f32 %v3618_v41, %v3617_v49  ;;  %v7016_v16 = vld [vmem:[#allocation53_spill] sm:$0xff] }
 0x3e9   : > { %2019 = vmax.xlane.f32.xlu0 %v2018_v58  ;;  %v2021_v17 = vmax.f32 %v5594_v10, -10000.0 }
 0x3ea   : > { %6958 = vst [vmem:[#allocation22_spill] sm:$0xff] %v5596_v39 }
 0x3eb   : > { %v1749_v21 = vpop.f32.mrb[76].mxu0 }
 0x3ec   : > { %v1890_v56 = vmul.f32 0.35355338, %v1749_v21  ;;  %v1751_v42 = vpop.f32.mrb[77].mxu0  ;;  %v3620_v62 = vpop.f32.mrb[20].mxu1 }
 0x3ed   : > { %2022 = vmax.xlane.f32.xlu0 %v2021_v17  ;;  %v1753_v38 = vpop.f32.mrb[78].mxu0  ;;  %v3621_v11 = vpop.f32.mrb[21].mxu1 }
 0x3ee   : > { %v5605_v43 = vsel %vm254_vm7, %v1890_v56, -10000.0  ;;  %v1892_v2 = vmul.f32 0.35355338, %v1753_v38  ;;  %v5607_v31 = vadd.f32 %v3621_v11, %v3620_v62  ;;  %v1755_v50 = vpop.f32.mrb[79].mxu0  ;;  %v1171_v26 = vpop.xlane.xlu1 %1170 }
 0x3ef   : > { %v2024_v34 = vmax.f32 %v5605_v43, -10000.0  ;;  %4158 = vrcp.f32 %v1171_v26  ;;  %v3623_v61 = vpop.f32.mrb[22].mxu1  ;;  %v4157_v17 = vpop.eup %4156 }
 0x3f0   : > { %6960 = vst [vmem:[#allocation75_spill] sm:$0xff] %v5607_v31  ;;  %v5613_v32 = vsel %vm256_vm8, %v1892_v2, -10000.0  ;;  %v3624_v35 = vpop.f32.mrb[23].mxu1 }
 0x3f1   : > { %v2027_v36 = vmax.f32 %v5613_v32, -10000.0  ;;  %v5616_v7 = vadd.f32 %v3624_v35, %v3623_v61  ;;  %2025 = vmax.xlane.f32.xlu0 %v2024_v34  ;;  %v1265_v35 = vmul.f32 %v4157_v17, %v5463_v27 }
 0x3f3   : > { %6962 = vst [vmem:[#allocation73_spill] sm:$0xff] %v5616_v7  ;;  %2028 = vmax.xlane.f32.xlu1 %v2027_v36  ;;  %v1264_v36 = vmul.f32 %v4157_v17, %v5459_v59  ;;  %v1554_v17 = vpop.permute.xlu0 %1553 }
 0x3f4   : > { %v1759_v0 = vpop.f32.mrb[80].mxu0  ;;  %v3626_v49 = vpop.f32.mrb[24].mxu1 }
 0x3f5   : > { %v1894_v58 = vmul.f32 0.35355338, %v1759_v0  ;;  %v1761_v41 = vpop.f32.mrb[81].mxu0  ;;  %v3627_v18 = vpop.f32.mrb[25].mxu1 }
 0x3f6   : > { %v5620_v21 = vadd.f32 %v3627_v18, %v3626_v49  ;;  %v1763_v56 = vpop.f32.mrb[82].mxu0  ;;  %v3629_v42 = vpop.f32.mrb[26].mxu1 }
 0x3f7   : > { %v5625_v38 = vsel %vm258_vm9, %v1894_v58, -10000.0  ;;  %v1896_v11 = vmul.f32 0.35355338, %v1763_v56  ;;  %v1765_v23 = vpop.f32.mrb[83].mxu0  ;;  %v3630_v2 = vpop.f32.mrb[27].mxu1 }
 0x3f8   : > { %6963 = vst [vmem:[#allocation59_spill] sm:$0xff] %v5620_v21  ;;  %v2030_v50 = vmax.f32 %v5625_v38, -10000.0  ;;  %v5628_v26 = vadd.f32 %v3630_v2, %v3629_v42 }
 0x3f9   : > { %v4159_v34 = vpop.eup %4158  ;;  %v5633_v14 = vsel %vm260_vm10, %v1896_v11, -10000.0 }
 0x3fa   : > { %6965 = vst [vmem:[#allocation61_spill] sm:$0xff] %v5628_v26  ;;  %v2033_v0 = vmax.f32 %v5633_v14, -10000.0  ;;  %2031 = vmax.xlane.f32.xlu0 %v2030_v50  ;;  %v1267_v58 = vmul.f32 %v4159_v34, %v5491_v8  ;;  %v1266_v41 = vmul.f32 %v4159_v34, %v5486_v47 }
 0x3fc   : > { %2034 = vmax.xlane.f32.xlu1 %v2033_v0  ;;  %v3632_v18 = vpop.f32.mrb[28].mxu1  ;;  %v1299_v56 = vpack.c.bf16 %v1267_v58, %v1265_v35  ;;  %v1298_v42 = vpack.c.bf16 %v1266_v41, %v1264_v36  ;;  %v1556_v35 = vpop.permute.xlu1 %1555 }
 0x3fd   : > { %v3633_v62 = vpop.f32.mrb[29].mxu1 }
 0x3fe   : > { %v5642_v11 = vadd.f32 %v3633_v62, %v3632_v18  ;;  %1500 = vmatprep.mubr.bf16.mxu1 %v1299_v56  ;;  %v3635_v27 = vpop.f32.mrb[30].mxu1 }
 0x3ff   : > { %1501 = vmatmul.mubr.bf16.gmra.mrb[60].mxu1 %v1298_v42  ;;  %v3636_v59 = vpop.f32.mrb[31].mxu1 }
 0x400   : > { %6967 = vst [vmem:[#allocation24_spill] sm:$0xff] %v5642_v11  ;;  %v5644_v23 = vadd.f32 %v3636_v59, %v3635_v27  ;;  %3730 = vmatprep.mubr.msk.bf16.mxu1 %vm370_vm0, %v1554_v17 }
 0x402   : > { %6968 = vst [vmem:[#allocation25_spill] sm:$0xff] %v5644_v23 }
 0x404   : > { %v3638_v47 = vpop.f32.mrb[32].mxu1 }
 0x405   : > { %v3639_v2 = vpop.f32.mrb[33].mxu1 }
 0x406   : > { %v5649_v50 = vadd.f32 %v3639_v2, %v3638_v47  ;;  %v3641_v34 = vpop.f32.mrb[34].mxu1 }
 0x407   : > { %v3642_v61 = vpop.f32.mrb[35].mxu1  ;;  %3731 = vmatmul.mubr.msk.bf16.vlgmr.msra.gmra.mrb[64].mxu1 %vm370_vm0, %v1554_v17 }
 0x408   : > { %6969 = vst [vmem:[#allocation64_spill] sm:$0xff] %v5649_v50  ;;  %v5652_v36 = vadd.f32 %v3642_v61, %v3641_v34  ;;  %3732 = vmatprep.mubr.msk.bf16.mxu1 %vm370_vm0, %v1556_v35 }
 0x40a   : > { %6970 = vst [vmem:[#allocation67_spill] sm:$0xff] %v5652_v36 }
 0x40f   : > { %3733 = vmatmul.mubr.msk.bf16.gmra.mrb[68].mxu1 %vm370_vm0, %v1556_v35 }
 0x420   : > { %v1769_v58 = vpop.f32.mrb[84].mxu0 }
 0x421   : > { %v1898_v41 = vmul.f32 0.35355338, %v1769_v58  ;;  %v1771_v18 = vpop.f32.mrb[85].mxu0 }
 0x422   : > { %v1773_v62 = vpop.f32.mrb[86].mxu0 }
 0x423   : > { %v5661_v42 = vsel %vm262_vm11, %v1898_v41, -10000.0  ;;  %v1900_v59 = vmul.f32 0.35355338, %v1773_v62  ;;  %v1775_v17 = vpop.f32.mrb[87].mxu0 }
 0x424   : > { %v2036_v27 = vmax.f32 %v5661_v42, -10000.0 }
 0x425   : > { %v5667_v2 = vsel %vm264_vm12, %v1900_v59, -10000.0 }
 0x426   : > { %2037 = vmax.xlane.f32.xlu0 %v2036_v27  ;;  %v2039_v34 = vmax.f32 %v5667_v2, -10000.0  ;;  %v6975_v27 = vld [vmem:[#allocation42_spill] sm:$0xff] }
 0x427   : > { %v3644_v61 = vpop.f32.mrb[36].mxu1  ;;  %vm6976_vm1 = vcmp.le.s32.totalorder %v6942_v60, %v6975_v27 }
 0x428   : > { %v3645_v35 = vpop.f32.mrb[37].mxu1  ;;  %2040 = vmax.xlane.f32.xlu1 %v2039_v34 }
 0x429   : > { %v5670_v58 = vadd.f32 %v3645_v35, %v3644_v61  ;;  %v3647_v41 = vpop.f32.mrb[38].mxu1 }
 0x42a   : > { %v3648_v18 = vpop.f32.mrb[39].mxu1 }
 0x42b   : > { %6973 = vst [vmem:[#allocation4_spill] sm:$0xff] %v5670_v58  ;;  %v5672_v56 = vadd.f32 %v3648_v18, %v3647_v41 }
 0x42d   : > { %6974 = vst [vmem:[#allocation77_spill] sm:$0xff] %v5672_v56  ;;  %v1779_v17 = vpop.f32.mrb[88].mxu0 }
 0x42e   : > { %v1902_v0 = vmul.f32 0.35355338, %v1779_v17  ;;  %v1781_v47 = vpop.f32.mrb[89].mxu0 }
 0x42f   : > { %v1783_v59 = vpop.f32.mrb[90].mxu0 }
 0x430   : > { %v5679_v8 = vsel %vm6976_vm1, %v1902_v0, -10000.0  ;;  %v1904_v49 = vmul.f32 0.35355338, %v1783_v59  ;;  %v1785_v61 = vpop.f32.mrb[91].mxu0 }
 0x431   : > { %v2042_v34 = vmax.f32 %v5679_v8, -10000.0 }
 0x432   : > { %v5685_v41 = vsel %vm268_vm14, %v1904_v49, -10000.0 }
 0x433   : > { %v2045_v18 = vmax.f32 %v5685_v41, -10000.0  ;;  %2043 = vmax.xlane.f32.xlu0 %v2042_v34 }
 0x434   : > { %v3650_v17 = vpop.f32.mrb[40].mxu1 }
 0x435   : > { %v3651_v47 = vpop.f32.mrb[41].mxu1  ;;  %2046 = vmax.xlane.f32.xlu1 %v2045_v18 }
 0x436   : > { %v5688_v62 = vadd.f32 %v3651_v47, %v3650_v17  ;;  %v3653_v27 = vpop.f32.mrb[42].mxu1  ;;  %v6982_v47 = vld [vmem:[#allocation45_spill] sm:$0xff] }
 0x437   : > { %v3654_v0 = vpop.f32.mrb[43].mxu1  ;;  %vm6983_vm3 = vcmp.le.s32.totalorder %v6942_v60, %v6982_v47 }
 0x438   : > { %6978 = vst [vmem:[#allocation26_spill] sm:$0xff] %v5688_v62  ;;  %v5690_v22 = vadd.f32 %v3654_v0, %v3653_v27  ;;  %v6987_v62 = vld [vmem:[#allocation46_spill] sm:$0xff] }
 0x43a   : > { %6979 = vst [vmem:[#allocation27_spill] sm:$0xff] %v5690_v22 }
 0x459   : > { %v1789_v61 = vpop.f32.mrb[92].mxu0 }
 0x45a   : > { %v1906_v37 = vmul.f32 0.35355338, %v1789_v61  ;;  %v1791_v35 = vpop.f32.mrb[93].mxu0 }
 0x45b   : > { %v1793_v49 = vpop.f32.mrb[94].mxu0 }
 0x45c   : > { %v5697_v34 = vsel %vm6981_vm2, %v1906_v37, -10000.0  ;;  %v1908_v25 = vmul.f32 0.35355338, %v1793_v49  ;;  %v1795_v18 = vpop.f32.mrb[95].mxu0 }
 0x45d   : > { %v2048_v17 = vmax.f32 %v5697_v34, -10000.0 }
 0x45e   : > { %v5703_v27 = vsel %vm6983_vm3, %v1908_v25, -10000.0 }
 0x45f   : > { %v2051_v0 = vmax.f32 %v5703_v27, -10000.0  ;;  %2049 = vmax.xlane.f32.xlu0 %v2048_v17  ;;  %v6986_v17 = vld [vmem:[#allocation47_spill] sm:$0xff] }
 0x460   : > { %v3656_v61 = vpop.f32.mrb[44].mxu1  ;;  %vm6988_vm4 = vcmp.le.s32.totalorder %v6986_v17, %v6987_v62  ;;  %vm7017_vm10 = vcmp.le.s32.totalorder %v6986_v17, %v7016_v16 }
 0x461   : > { %v3657_v35 = vpop.f32.mrb[45].mxu1  ;;  %2052 = vmax.xlane.f32.xlu1 %v2051_v0 }
 0x462   : > { %v5706_v59 = vadd.f32 %v3657_v35, %v3656_v61  ;;  %v3659_v51 = vpop.f32.mrb[46].mxu1 }
 0x463   : > { %v3660_v37 = vpop.f32.mrb[47].mxu1 }
 0x464   : > { %6984 = vst [vmem:[#allocation63_spill] sm:$0xff] %v5706_v59  ;;  %v5708_v29 = vadd.f32 %v3660_v37, %v3659_v51  ;;  %v6990_v37 = vld [vmem:[#allocation48_spill] sm:$0xff] }
 0x465   : > { %vm6991_vm5 = vcmp.le.s32.totalorder %v6986_v17, %v6990_v37 }
 0x466   : > { %6985 = vst [vmem:[#allocation76_spill] sm:$0xff] %v5708_v29  ;;  %v1799_v18 = vpop.f32.mrb[96].mxu0 }
 0x467   : > { %v1801_v53 = vpop.f32.mrb[97].mxu0  ;;  %v5712_v47 = vmul.f32 0.35355338, %v1799_v18 }
 0x468   : > { %v1911_v60 = vmul.f32 0.35355338, %v1801_v53  ;;  %v1803_v25 = vpop.f32.mrb[98].mxu0 }
 0x469   : > { %v1805_v57 = vpop.f32.mrb[99].mxu0  ;;  %v5721_v51 = vmul.f32 0.35355338, %v1803_v25 }
 0x46a   : > { %v5717_v0 = vsel %vm6988_vm4, %v1911_v60, -10000.0  ;;  %v1913_v61 = vmul.f32 0.35355338, %v1805_v57 }
 0x46b   : > { %v2054_v35 = vmax.f32 %v5712_v47, %v5717_v0  ;;  %6989 = vst [vmem:[#allocation65_spill] sm:$0xff] %v5721_v51 }
 0x46c   : > { %v5726_v49 = vsel %vm6991_vm5, %v1913_v61, -10000.0 }
 0x46d   : > { %6992 = vst [vmem:[#allocation68_spill] sm:$0xff] %v5726_v49  ;;  %v2057_v53 = vmax.f32 %v5721_v51, %v5726_v49  ;;  %v3662_v18 = vpop.f32.mrb[48].mxu1  ;;  %2055 = vmax.xlane.f32.xlu0 %v2054_v35 }
 0x46e   : > { %v3663_v59 = vpop.f32.mrb[49].mxu1 }
 0x46f   : > { %v5730_v62 = vadd.f32 %v3663_v59, %v3662_v18  ;;  %v3665_v60 = vpop.f32.mrb[50].mxu1  ;;  %2058 = vmax.xlane.f32.xlu1 %v2057_v53  ;;  %v6997_v59 = vld [vmem:[#allocation49_spill] sm:$0xff] }
 0x470   : > { %v3666_v57 = vpop.f32.mrb[51].mxu1  ;;  %vm6998_vm6 = vcmp.le.s32.totalorder %v6986_v17, %v6997_v59 }
 0x471   : > { %6993 = vst [vmem:[#allocation69_spill] sm:$0xff] %v5730_v62  ;;  %v5732_v29 = vadd.f32 %v3666_v57, %v3665_v60  ;;  %v7000_v57 = vld [vmem:[#allocation50_spill] sm:$0xff] }
 0x472   : > { %vm7001_vm7 = vcmp.le.s32.totalorder %v6986_v17, %v7000_v57 }
 0x473   : > { %6994 = vst [vmem:[#allocation28_spill] sm:$0xff] %v5732_v29 }
 0x492   : > { %v1809_v22 = vpop.f32.mrb[100].mxu0 }
 0x493   : > { %v5736_v37 = vmul.f32 0.35355338, %v1809_v22  ;;  %v1811_v61 = vpop.f32.mrb[101].mxu0 }
 0x494   : > { %v1915_v58 = vmul.f32 0.35355338, %v1811_v61  ;;  %v1813_v56 = vpop.f32.mrb[102].mxu0 }
 0x495   : > { %6995 = vst [vmem:[#allocation78_spill] sm:$0xff] %v5736_v37  ;;  %v5738_v50 = vmul.f32 0.35355338, %v1813_v56  ;;  %v1815_v35 = vpop.f32.mrb[103].mxu0 }
 0x496   : > { %v5743_v18 = vsel %vm6998_vm6, %v1915_v58, -10000.0  ;;  %v1917_v53 = vmul.f32 0.35355338, %v1815_v35 }
 0x497   : > { %6996 = vst [vmem:[#allocation80_spill] sm:$0xff] %v5738_v50  ;;  %6999 = vst [vmem:[#allocation81_spill] sm:$0xff] %v5743_v18  ;;  %v2060_v60 = vmax.f32 %v5736_v37, %v5743_v18 }
 0x498   : > { %v5750_v22 = vsel %vm7001_vm7, %v1917_v53, -10000.0 }
 0x499   : > { %7002 = vst [vmem:[#allocation79_spill] sm:$0xff] %v5750_v22  ;;  %v2063_v61 = vmax.f32 %v5738_v50, %v5750_v22  ;;  %v3668_v56 = vpop.f32.mrb[52].mxu1  ;;  %2061 = vmax.xlane.f32.xlu0 %v2060_v60  ;;  %v7006_v60 = vld [vmem:[#allocation51_spill] sm:$0xff] }
 0x49a   : > { %v3669_v25 = vpop.f32.mrb[53].mxu1  ;;  %vm7007_vm8 = vcmp.le.s32.totalorder %v6986_v17, %v7006_v60  ;;  %v7030_v22 = vld [vmem:[#allocation55_spill] sm:$0xff] }
 0x49b   : > { %v5754_v62 = vadd.f32 %v3669_v25, %v3668_v56  ;;  %v3671_v59 = vpop.f32.mrb[54].mxu1  ;;  %2064 = vmax.xlane.f32.xlu1 %v2063_v61  ;;  %vm7031_vm12 = vcmp.le.s32.totalorder %v6986_v17, %v7030_v22 }
 0x49c   : > { %v3672_v58 = vpop.f32.mrb[55].mxu1 }
 0x49d   : > { %7003 = vst [vmem:[#allocation5_spill] sm:$0xff] %v5754_v62  ;;  %v5756_v35 = vadd.f32 %v3672_v58, %v3671_v59  ;;  %v7010_v58 = vld [vmem:[#allocation52_spill] sm:$0xff] }
 0x49e   : > { %vm7011_vm9 = vcmp.le.s32.totalorder %v6986_v17, %v7010_v58 }
 0x49f   : > { %7004 = vst [vmem:[#allocation71_spill] sm:$0xff] %v5756_v35  ;;  %v1819_v36 = vpop.f32.mrb[104].mxu0 }
 0x4a0   : > { %v1821_v57 = vpop.f32.mrb[105].mxu0  ;;  %v5760_v23 = vmul.f32 0.35355338, %v1819_v36 }
 0x4a1   : > { %v1919_v53 = vmul.f32 0.35355338, %v1821_v57  ;;  %v1823_v11 = vpop.f32.mrb[106].mxu0 }
 0x4a2   : > { %7005 = vst [vmem:[#allocation72_spill] sm:$0xff] %v5760_v23  ;;  %v1825_v21 = vpop.f32.mrb[107].mxu0  ;;  %v5769_v59 = vmul.f32 0.35355338, %v1823_v11 }
 0x4a3   : > { %v5765_v25 = vsel %vm7007_vm8, %v1919_v53, -10000.0  ;;  %v1921_v56 = vmul.f32 0.35355338, %v1825_v21 }
 0x4a4   : > { %7008 = vst [vmem:[#allocation83_spill] sm:$0xff] %v5765_v25  ;;  %v2066_v61 = vmax.f32 %v5760_v23, %v5765_v25  ;;  %7009 = vst [vmem:[#allocation82_spill] sm:$0xff] %v5769_v59 }
 0x4a5   : > { %v5774_v29 = vsel %vm7011_vm9, %v1921_v56, -10000.0 }
 0x4a6   : > { %7012 = vst [vmem:[#allocation7_spill] sm:$0xff] %v5774_v29  ;;  %v2069_v36 = vmax.f32 %v5769_v59, %v5774_v29  ;;  %v3674_v57 = vpop.f32.mrb[56].mxu1  ;;  %2067 = vmax.xlane.f32.xlu0 %v2066_v61 }
 0x4a7   : > { %v3675_v62 = vpop.f32.mrb[57].mxu1  ;;  %v1829_v60 = vpop.f32.mrb[108].mxu0 }
 0x4a8   : > { %v5778_v53 = vadd.f32 %v3675_v62, %v3674_v57  ;;  %v3677_v21 = vpop.f32.mrb[58].mxu1  ;;  %2070 = vmax.xlane.f32.xlu1 %v2069_v36  ;;  %v1831_v35 = vpop.f32.mrb[109].mxu0  ;;  %v5780_v7 = vmul.f32 0.35355338, %v1829_v60 }
 0x4a9   : > { %v1923_v26 = vmul.f32 0.35355338, %v1831_v35  ;;  %v3678_v11 = vpop.f32.mrb[59].mxu1  ;;  %v1833_v31 = vpop.f32.mrb[110].mxu0  ;;  %v7019_v35 = vld [vmem:[#allocation54_spill] sm:$0xff] }
 0x4aa   : > { %7013 = vst [vmem:[#allocation9_spill] sm:$0xff] %v5778_v53  ;;  %7014 = vst [vmem:[#allocation10_spill] sm:$0xff] %v5780_v7  ;;  %v5782_v58 = vadd.f32 %v3678_v11, %v3677_v21  ;;  %v1835_v56 = vpop.f32.mrb[111].mxu0  ;;  %vm7020_vm11 = vcmp.le.s32.totalorder %v6986_v17, %v7019_v35  ;;  %v5798_v60 = vmul.f32 0.35355338, %v1833_v31  ;;  %v2008_v35 = vpop.xlane.xlu0 %2007  ;;  %v7023_v31 = vld [vmem:[#allocation2_spill] sm:$0xff] }
 0x4ab   : > { %v5787_v39 = vsel %vm7017_vm10, %v1923_v26, -10000.0  ;;  %v1925_v61 = vmul.f32 0.35355338, %v1835_v56 }
 0x4ac   : > { %7015 = vst [vmem:[#allocation12_spill] sm:$0xff] %v5782_v58  ;;  %7018 = vst [vmem:[#allocation13_spill] sm:$0xff] %v5787_v39  ;;  %v2072_v62 = vmax.f32 %v5780_v7, %v5787_v39 }
 0x4ad   : > { %v5796_v57 = vsel %vm7020_vm11, %v1925_v61, -10000.0  ;;  %7022 = vst [vmem:[#allocation30_spill] sm:$0xff] %v5798_v60  ;;  %v2102_v61 = vsub.f32 %v5512_v54, %v2008_v35 }
 0x4ae   : > { %7021 = vst [vmem:[#allocation15_spill] sm:$0xff] %v5796_v57  ;;  %2073 = vmax.xlane.f32.xlu1 %v2072_v62  ;;  %v2075_v16 = vmax.f32 %v5798_v60, %v5796_v57  ;;  %v2103_v62 = vsub.f32 -10000.0, %v2008_v35 }
 0x4af   : > { %v1839_v21 = vpop.f32.mrb[112].mxu0  ;;  %v2166_v58 = vmul.f32 1.442695, %v2102_v61 }
 0x4b0   : > { %v1841_v26 = vpop.f32.mrb[113].mxu0  ;;  %v5862_v25 = vmul.f32 0.35355338, %v1839_v21 }
 0x4b1   : > { %v5802_v11 = vpop.f32.mrb[114].mxu0  ;;  %4160 = vpow2.f32 %v2166_v58  ;;  %v1927_v39 = vmul.f32 0.35355338, %v1841_v26 }
 0x4b2   : > { %2076 = vmax.xlane.f32.xlu1 %v2075_v16  ;;  %v5804_v56 = vpop.f32.mrb[115].mxu0  ;;  %v2168_v16 = vmul.f32 1.442695, %v2103_v62  ;;  %7029 = vst [vmem:[#allocation35_spill] sm:$0xff] %v5862_v25 }
 0x4b4   : > { %4162 = vpow2.f32 %v2168_v16 }
 0x4b7   : > { %v5811_v36 = vpop.f32.mrb[116].mxu0 }
 0x4b8   : > { %v5813_v53 = vpop.f32.mrb[117].mxu0 }
 0x4b9   : > { %v5815_v33 = vpop.f32.mrb[118].mxu0 }
 0x4ba   : > { %v5817_v24 = vpop.f32.mrb[119].mxu0 }
 0x4bb   : > { %v5822_v63 = vpop.eup %4160 }
 0x4bc   : > { %2534 = vrot.lane.b32.xlu0 %v6917_v13, %s4364_s22  ;;  %v2011_v13 = vpop.xlane.xlu1 %2010 }
 0x4bd   : > { %v2104_v48 = vsub.f32 %v5518_v15, %v2011_v13  ;;  %v2105_v54 = vsub.f32 -10000.0, %v2011_v13  ;;  %v7028_v15 = vld [vmem:[#allocation3_spill] sm:$0xff] }
 0x4be   : > { %v5824_v57 = vpop.eup %4162 }
 0x4bf   : > { %v2170_v6 = vmul.f32 1.442695, %v2104_v48  ;;  %v2172_v35 = vmul.f32 1.442695, %v2105_v54  ;;  %v2294_v48 = vadd.f32 %v5824_v57, %v5822_v63 }
 0x4c1   : > { %4164 = vpow2.f32 %v2170_v6 }
 0x4c2   : > { %4166 = vpow2.f32 %v2172_v35 }
 0x4c3   : > { %2518 = vrot.lane.b32.xlu1 %v7023_v31, %s4364_s22 }
 0x4cb   : > { %v5832_v58 = vpop.eup %4164 }
 0x4cc   : > { %v5836_v16 = vpop.eup %4166 }
 0x4cd   : > { %v2297_v6 = vadd.f32 %v5836_v16, %v5832_v58 }
 0x4d2   : > { %v3680_v5 = vpop.f32.mrb[60].mxu1 }
 0x4d3   : > { %v3681_v31 = vpop.f32.mrb[61].mxu1 }
 0x4d4   : > { %v5820_v55 = vadd.f32 %v3681_v31, %v3680_v5  ;;  %v3683_v3 = vpop.f32.mrb[62].mxu1 }
 0x4d5   : > { %v3684_v61 = vpop.f32.mrb[63].mxu1 }
 0x4d6   : > { %7024 = vst [vmem:[#allocation31_spill] sm:$0xff] %v5820_v55  ;;  %v5826_v62 = vadd.f32 %v3684_v61, %v3683_v3  ;;  %v2014_v55 = vpop.xlane.xlu0 %2013 }
 0x4d7   : > { %v2106_v60 = vsub.f32 %v5530_v12, %v2014_v55 }
 0x4d8   : > { %7025 = vst [vmem:[#allocation32_spill] sm:$0xff] %v5826_v62 }
 0x4d9   : > { %v2174_v29 = vmul.f32 1.442695, %v2106_v60  ;;  %v1929_v60 = vmul.f32 0.35355338, %v5804_v56  ;;  %v5888_v56 = vpop.xlane.xlu1 %2028 }
 0x4da   : > { %v5834_v5 = vpop.f32.mrb[64].mxu1  ;;  %v2017_v62 = vpop.xlane.xlu0 %2016 }
 0x4db   : > { %2295 = vadd.xlane.f32.xlu0 %v2294_v48  ;;  %v5838_v13 = vpop.f32.mrb[65].mxu1  ;;  %v2108_v59 = vsub.f32 %v5536_v45, %v2017_v62  ;;  %4168 = vpow2.f32 %v2174_v29  ;;  %v5873_v45 = vmul.f32 0.35355338, %v5802_v11 }
 0x4dc   : > { %v5840_v54 = vpop.f32.mrb[66].mxu1 }
 0x4dd   : > { %v5842_v3 = vpop.f32.mrb[67].mxu1  ;;  %7033 = vst [vmem:[#allocation37_spill] sm:$0xff] %v5873_v45 }
 0x4de   : > { %v2020_v7 = vpop.xlane.xlu0 %2019 }
 0x4e2   : > { %v5846_v31 = vpop.f32.mrb[68].mxu1  ;;  %v2023_v26 = vpop.xlane.xlu0 %2022 }
 0x4e3   : > { %v5848_v35 = vpop.f32.mrb[69].mxu1 }
 0x4e4   : > { %v5850_v61 = vpop.f32.mrb[70].mxu1 }
 0x4e5   : > { %7026 = vst [vmem:[#allocation33_spill] sm:$0xff] %v5850_v61  ;;  %v5852_v48 = vpop.f32.mrb[71].mxu1  ;;  %v5882_v22 = vpop.eup %4168 }
 0x4e6   : > { %7027 = vst [vmem:[#allocation34_spill] sm:$0xff] %v5852_v48  ;;  %v5875_v21 = vpop.xlane.xlu0 %2025 }
 0x4e7   : > { %2298 = vadd.xlane.f32.xlu1 %v2297_v6  ;;  %v2107_v6 = vsub.f32 -10000.0, %v2014_v55 }
 0x4e9   : > { %v2176_v23 = vmul.f32 1.442695, %v2107_v6 }
 0x4eb   : > { %4170 = vpow2.f32 %v2176_v23 }
 0x4f1   : > { %2536 = vrot.lane.b32.xlu0 %v6931_v52, %s4364_s22  ;;  %v2109_v52 = vsub.f32 -10000.0, %v2017_v62  ;;  %v5890_v62 = vpop.xlane.xlu0 %2031 }
 0x4f3   : > { %v2180_v55 = vmul.f32 1.442695, %v2109_v52 }
 0x4f5   : > { %2538 = vrot.lane.b32.xlu0 %v6936_v30, %s4364_s22  ;;  %v5867_v30 = vsel %vm7031_vm12, %v1927_v39, -10000.0  ;;  %v7034_v39 = vld [vmem:[#allocation56_spill] sm:$0xff] }
 0x4f6   : > { %7032 = vst [vmem:[#allocation36_spill] sm:$0xff] %v5867_v30  ;;  %v2078_v12 = vmax.f32 %v5862_v25, %v5867_v30  ;;  %vm7035_vm14 = vcmp.le.s32.totalorder %v6986_v17, %v7034_v39 }
 0x4f7   : > { %v5880_v29 = vsel %vm7035_vm14, %v1929_v60, -10000.0 }
 0x4f8   : > { %2520 = vrot.lane.b32.xlu1 %v7028_v15, %s4364_s22  ;;  %v2178_v15 = vmul.f32 1.442695, %v2108_v59  ;;  %7036 = vst [vmem:[#allocation38_spill] sm:$0xff] %v5880_v29  ;;  %v2081_v23 = vmax.f32 %v5873_v45, %v5880_v29  ;;  %v5886_v59 = vpop.eup %4170  ;;  %v7037_v45 = vld [vmem:[#allocation6_spill] sm:$0xff] }
 0x4f9   : > { %v2300_v6 = vadd.f32 %v5886_v59, %v5882_v22 }
 0x4fa   : > { %4172 = vpow2.f32 %v2178_v15  ;;  %v5898_v15 = vpop.xlane.xlu1 %2034 }
 0x4fb   : > { %4174 = vpow2.f32 %v2180_v55 }
 0x4fe   : > { %v5904_v60 = vpop.xlane.xlu1 %2040 }
 0x504   : > { %v5892_v11 = vpop.eup %4172 }
 0x505   : > { %v5896_v52 = vpop.eup %4174 }
 0x506   : > { %v2303_v55 = vadd.f32 %v5896_v52, %v5892_v11 }
 0x514   : > { %2079 = vmax.xlane.f32.xlu0 %v2078_v12  ;;  %v5900_v12 = vpop.xlane.xlu0 %2037 }
 0x518   : > { %v5906_v39 = vpop.xlane.xlu0 %2043 }
 0x51c   : > { %2082 = vmax.xlane.f32.xlu1 %v2081_v23  ;;  %v5908_v23 = vpop.xlane.xlu1 %2046  ;;  %v5910_v29 = vpop.xlane.xlu0 %2049 }
 0x520   : > { %2301 = vadd.xlane.f32.xlu1 %v2300_v6  ;;  %v5914_v30 = vpop.xlane.xlu1 %2052  ;;  %v5916_v25 = vpop.xlane.xlu0 %2055  ;;  %v7038_v6 = vld [vmem:[#allocation8_spill] sm:$0xff] }
 0x524   : > { %2304 = vadd.xlane.f32.xlu1 %v2303_v55  ;;  %v5920_v61 = vpop.xlane.xlu1 %2058 }
 0x525   : > { %7039 = vst [vmem:[#allocation39_spill] sm:$0xff] %v5920_v61  ;;  %v2113_v61 = vsub.f32 -10000.0, %v2023_v26 }
 0x526   : > { %v5922_v50 = vpop.xlane.xlu0 %2061 }
 0x527   : > { %7040 = vst [vmem:[#allocation40_spill] sm:$0xff] %v5922_v50  ;;  %v2110_v50 = vsub.f32 %v5586_v44, %v2020_v7 }
 0x528   : > { %v5926_v55 = vpop.xlane.xlu1 %2064 }
 0x529   : > { %7041 = vst [vmem:[#allocation41_spill] sm:$0xff] %v5926_v55  ;;  %v1931_v55 = vmul.f32 0.35355338, %v5813_v53  ;;  %v2182_v51 = vmul.f32 1.442695, %v2110_v50  ;;  %v7047_v53 = vld [vmem:[#allocation58_spill] sm:$0xff] }
 0x52a   : > { %2522 = vrot.lane.b32.xlu0 %v7037_v45, %s4364_s22  ;;  %v1933_v50 = vmul.f32 0.35355338, %v5817_v24  ;;  %vm7048_vm2 = vcmp.le.s32.totalorder %v6986_v17, %v7047_v53 }
 0x52b   : > { %4176 = vpow2.f32 %v2182_v51 }
 0x52e   : > { %2524 = vrot.lane.b32.xlu0 %v7038_v6, %s4364_s22 }
 0x532   : > { %2542 = vrot.lane.b32.xlu0 %v6938_v4, %s4364_s22  ;;  %v2111_v4 = vsub.f32 -10000.0, %v2020_v7  ;;  %v2188_v7 = vmul.f32 1.442695, %v2113_v61 }
 0x533   : > { %v5928_v18 = vpop.xlane.xlu0 %2067 }
 0x534   : > { %7042 = vst [vmem:[#allocation42_spill] sm:$0xff] %v5928_v18  ;;  %v2112_v18 = vsub.f32 %v5594_v10, %v2023_v26  ;;  %v5953_v10 = vmul.f32 0.35355338, %v5815_v33 }
 0x535   : > { %2540 = vrot.lane.b32.xlu1 %v6937_v19, %s4364_s22  ;;  %v5932_v45 = vpop.xlane.xlu1 %2070  ;;  %v5942_v19 = vmul.f32 0.35355338, %v5811_v36  ;;  %v5958_v36 = vsel %vm7048_vm2, %v1933_v50, -10000.0  ;;  %v5960_v51 = vpop.eup %4176 }
 0x536   : > { %7043 = vst [vmem:[#allocation43_spill] sm:$0xff] %v5932_v45  ;;  %v2184_v45 = vmul.f32 1.442695, %v2111_v4  ;;  %v7049_v4 = vld [vmem:[#allocation11_spill] sm:$0xff] }
 0x537   : > { %v2535_v37 = vpop.permute.xlu0 %2534 }
 0x538   : > { %3734 = vmatprep.subr.bf16.mxu0 %v2535_v37  ;;  %v7045_v37 = vld [vmem:[#allocation57_spill] sm:$0xff]  ;;  %4178 = vpow2.f32 %v2184_v45 }
 0x539   : > { %vm7046_vm1 = vcmp.le.s32.totalorder %v6986_v17, %v7045_v37 }
 0x53b   : > { %v5934_v48 = vpop.xlane.xlu1 %2073 }
 0x53c   : > { %7044 = vst [vmem:[#allocation44_spill] sm:$0xff] %v5934_v48  ;;  %v5947_v48 = vsel %vm7046_vm1, %v1931_v55, -10000.0 }
 0x53d   : > { %v2084_v44 = vmax.f32 %v5942_v19, %v5947_v48 }
 0x53f   : > { %v5936_v6 = vpop.xlane.xlu1 %2076 }
 0x542   : > { %v5964_v26 = vpop.eup %4178 }
 0x543   : > { %v2519_v49 = vpop.permute.xlu1 %2518  ;;  %v2306_v61 = vadd.f32 %v5964_v26, %v5960_v51 }
 0x544   : > { %3735 = vmatpush3.bf16.msra.mxu0 %v2519_v49  ;;  %v2186_v49 = vmul.f32 1.442695, %v2112_v18  ;;  %v2087_v18 = vmax.f32 %v5953_v10, %v5958_v36 }
 0x546   : > { %4180 = vpow2.f32 %v2186_v49 }
 0x547   : > { %4182 = vpow2.f32 %v2188_v7 }
 0x550   : > { %v5966_v24 = vpop.eup %4180 }
 0x551   : > { %2085 = vmax.xlane.f32.xlu0 %v2084_v44  ;;  %v5970_v33 = vpop.eup %4182 }
 0x552   : > { %v2309_v55 = vadd.f32 %v5970_v33, %v5966_v24 }
 0x559   : > { %2088 = vmax.xlane.f32.xlu1 %v2087_v18 }
 0x55d   : > { %2307 = vadd.xlane.f32.xlu1 %v2306_v61 }
 0x561   : > { %2310 = vadd.xlane.f32.xlu1 %v2309_v55 }
 0x567   : > { %2526 = vrot.lane.b32.xlu0 %v4454_v28, %s4364_s22 }
 0x568   : > { %v2296_v45 = vpop.xlane.xlu0 %2295 }
 0x569   : > { %4184 = vrcp.f32 %v2296_v45 }
 0x56b   : > { %2528 = vrot.lane.b32.xlu0 %v7049_v4, %s4364_s22  ;;  %v2115_v4 = vsub.f32 -10000.0, %v5875_v21 }
 0x56c   : > { %v2537_v37 = vpop.permute.xlu0 %2536 }
 0x56d   : > { %3736 = vmatprep.subr.bf16.mxu0 %v2537_v37 }
 0x56f   : > { %2546 = vrot.lane.b32.xlu0 %v6940_v20, %s4364_s22 }
 0x570   : > { %v2539_v7 = vpop.permute.xlu0 %2538 }
 0x572   : > { %2544 = vrot.lane.b32.xlu1 %v6939_v1, %s4364_s22  ;;  %v2114_v1 = vsub.f32 %v5605_v43, %v5875_v21  ;;  %v7050_v43 = vld [vmem:[#allocation60_spill] sm:$0xff] }
 0x573   : > { %v4185_v28 = vpop.eup %4184  ;;  %vm7051_vm3 = vcmp.le.s32.totalorder %v6986_v17, %v7050_v43  ;;  %v2118_v43 = vsub.f32 %v5625_v38, %v5890_v62  ;;  %v2122_v38 = vsub.f32 %v5661_v42, %v5900_v12 }
 0x574   : > { %v2299_v49 = vpop.xlane.xlu1 %2298  ;;  %v5983_v53 = vmul.f32 %v4185_v28, %v5822_v63  ;;  %v2423_v20 = vmul.f32 %v4185_v28, %v5824_v57  ;;  %v1935_v63 = vmul.f32 0.35355338, %v5838_v13  ;;  %v2190_v37 = vmul.f32 1.442695, %v2114_v1 }
 0x575   : > { %4186 = vrcp.f32 %v2299_v49  ;;  %v2192_v49 = vmul.f32 1.442695, %v2115_v4  ;;  %v2117_v57 = vsub.f32 -10000.0, %v5888_v56  ;;  %v2206_v42 = vmul.f32 1.442695, %v2122_v38 }
 0x576   : > { %4188 = vpow2.f32 %v2190_v37 }
 0x577   : > { %4190 = vpow2.f32 %v2192_v49 }
 0x578   : > { %v2521_v44 = vpop.permute.xlu1 %2520 }
 0x579   : > { %3737 = vmatpush3.bf16.msra.mxu0 %v2521_v44  ;;  %v6005_v44 = vsel %vm7051_vm3, %v1935_v63, -10000.0 }
 0x57a   : > { %3738 = vmatprep.subr.bf16.mxu0 %v2539_v7  ;;  %v2196_v7 = vmul.f32 1.442695, %v2117_v57 }
 0x57f   : > { %v4187_v50 = vpop.eup %4186 }
 0x580   : > { %v5986_v18 = vmul.f32 %v4187_v50, %v5832_v58  ;;  %v2425_v61 = vmul.f32 %v4187_v50, %v5836_v16  ;;  %v2116_v58 = vsub.f32 %v5613_v32, %v5888_v56  ;;  %v6000_v16 = vmul.f32 0.35355338, %v5834_v5  ;;  %v6018_v50 = vpop.eup %4188 }
 0x581   : > { %v1937_v32 = vmul.f32 0.35355338, %v5842_v3  ;;  %v6011_v5 = vmul.f32 0.35355338, %v5840_v54 }
 0x582   : > { %v2487_v55 = vpack.c.bf16 %v2425_v61, %v2423_v20  ;;  %v2194_v21 = vmul.f32 1.442695, %v2116_v58  ;;  %v2090_v13 = vmax.f32 %v6000_v16, %v6005_v44  ;;  %v6022_v61 = vpop.eup %4190 }
 0x583   : > { %v6016_v28 = vsel %vm301_vm13, %v1937_v32, -10000.0  ;;  %v2312_v1 = vadd.f32 %v6022_v61, %v6018_v50 }
 0x584   : > { %2598 = vmatprep.mubr.bf16.mxu0 %v2487_v55  ;;  %4192 = vpow2.f32 %v2194_v21  ;;  %v2093_v20 = vmax.f32 %v6011_v5, %v6016_v28  ;;  %v2120_v21 = vsub.f32 %v5633_v14, %v5898_v15 }
 0x585   : > { %4194 = vpow2.f32 %v2196_v7 }
 0x58e   : > { %2091 = vmax.xlane.f32.xlu0 %v2090_v13  ;;  %v6024_v3 = vpop.eup %4192  ;;  %v2121_v13 = vsub.f32 -10000.0, %v5898_v15  ;;  %v2124_v15 = vsub.f32 %v5667_v2, %v5904_v60  ;;  %v2126_v2 = vsub.f32 %v5679_v8, %v5906_v39  ;;  %v7053_v8 = vld [vmem:[#allocation66_spill] sm:$0xff] }
 0x58f   : > { %v6028_v54 = vpop.eup %4194  ;;  %vm7054_vm13 = vcmp.le.s32.totalorder %v6986_v17, %v7053_v8 }
 0x590   : > { %v2315_v55 = vadd.f32 %v6028_v54, %v6024_v3 }
 0x596   : > { %2094 = vmax.xlane.f32.xlu1 %v2093_v20 }
 0x59a   : > { %2313 = vadd.xlane.f32.xlu1 %v2312_v1  ;;  %v2204_v1 = vmul.f32 1.442695, %v2121_v13 }
 0x59e   : > { %2316 = vadd.xlane.f32.xlu1 %v2315_v55 }
 0x5a1   : > { %v6032_v4 = vpop.xlane.xlu0 %2079 }
 0x5a4   : > { %2530 = vrot.lane.b32.xlu0 %v4478_v40, %s4364_s22  ;;  %v2119_v40 = vsub.f32 -10000.0, %v5890_v62  ;;  %v2123_v62 = vsub.f32 -10000.0, %v5900_v12  ;;  %v2125_v12 = vsub.f32 -10000.0, %v5904_v60  ;;  %v6077_v60 = vmul.f32 0.35355338, %v5846_v31 }
 0x5a5   : > { %v2523_v63 = vpop.permute.xlu0 %2522  ;;  %v2131_v31 = vsub.f32 -10000.0, %v5910_v29 }
 0x5a6   : > { %3739 = vmatpush3.bf16.msra.mxu0 %v2523_v63  ;;  %v2200_v32 = vmul.f32 1.442695, %v2119_v40  ;;  %v2128_v40 = vsub.f32 %v5685_v41, %v5908_v23 }
 0x5a8   : > { %2532 = vrot.lane.b32.xlu0 %v6905_v46, %s4364_s22  ;;  %v2198_v46 = vmul.f32 1.442695, %v2118_v43  ;;  %v2208_v43 = vmul.f32 1.442695, %v2123_v62 }
 0x5a9   : > { %v6038_v37 = vpop.xlane.xlu1 %2082  ;;  %v2525_v49 = vpop.permute.xlu0 %2524 }
 0x5ad   : > { %v2302_v58 = vpop.xlane.xlu1 %2301  ;;  %v2543_v56 = vpop.permute.xlu0 %2542 }
 0x5ae   : > { %4196 = vrcp.f32 %v2302_v58 }
 0x5af   : > { %2548 = vrot.lane.b32.xlu1 %v6941_v9, %s4364_s22  ;;  %v2202_v9 = vmul.f32 1.442695, %v2120_v21  ;;  %v2129_v21 = vsub.f32 -10000.0, %v5908_v23  ;;  %v2132_v23 = vsub.f32 %v5703_v27, %v5914_v30  ;;  %v2135_v27 = vsub.f32 %v5717_v0, %v5916_v25 }
 0x5b1   : > { %v2305_v57 = vpop.xlane.xlu1 %2304  ;;  %v2232_v8 = vmul.f32 1.442695, %v2135_v27 }
 0x5b2   : > { %4198 = vrcp.f32 %v2305_v57  ;;  %v1939_v57 = vmul.f32 0.35355338, %v5848_v35  ;;  %v2212_v35 = vmul.f32 1.442695, %v2125_v12  ;;  %v7056_v12 = vld [vmem:[#allocation65_spill] sm:$0xff] }
 0x5b3   : > { %4200 = vpow2.f32 %v2198_v46  ;;  %v2214_v46 = vmul.f32 1.442695, %v2126_v2 }
 0x5b4   : > { %4202 = vpow2.f32 %v2200_v32 }
 0x5b5   : > { %v2541_v7 = vpop.permute.xlu1 %2540  ;;  %4204 = vpow2.f32 %v2202_v9 }
 0x5b6   : > { %3740 = vmatprep.subr.bf16.mxu0 %v2541_v7  ;;  %4206 = vpow2.f32 %v2204_v1  ;;  %v6083_v7 = vsel %vm7054_vm13, %v1939_v57, -10000.0  ;;  %v2220_v1 = vmul.f32 1.442695, %v2129_v21  ;;  %v7060_v21 = vld [vmem:[#allocation78_spill] sm:$0xff] }
 0x5b7   : > { %3741 = vmatpush3.bf16.msra.mxu0 %v2525_v49  ;;  %4208 = vpow2.f32 %v2206_v42  ;;  %v2096_v9 = vmax.f32 %v6077_v60, %v6083_v7  ;;  %v7055_v42 = vld [vmem:[#allocation39_spill] sm:$0xff] }
 0x5b8   : > { %3742 = vmatprep.subr.bf16.mxu0 %v2543_v56  ;;  %v4197_v20 = vpop.eup %4196  ;;  %4210 = vpow2.f32 %v2208_v43  ;;  %v2218_v56 = vmul.f32 1.442695, %v2128_v40  ;;  %v2136_v57 = vsub.f32 %v7056_v12, %v7055_v42 }
 0x5b9   : > { %v6054_v55 = vmul.f32 %v4197_v20, %v5886_v59  ;;  %v6060_v58 = vmul.f32 %v4197_v20, %v5882_v22  ;;  %v7079_v59 = vld [vmem:[#allocation36_spill] sm:$0xff] }
 0x5bc   : > { %v4199_v14 = vpop.eup %4198 }
 0x5bd   : > { %v6057_v63 = vmul.f32 %v4199_v14, %v5896_v52  ;;  %v6063_v49 = vmul.f32 %v4199_v14, %v5892_v11  ;;  %v2127_v52 = vsub.f32 -10000.0, %v5906_v39  ;;  %v2210_v11 = vmul.f32 1.442695, %v2124_v15  ;;  %v6087_v13 = vpop.eup %4200 }
 0x5be   : > { %v2130_v39 = vsub.f32 %v5697_v34, %v5910_v29  ;;  %v6090_v32 = vpop.eup %4202  ;;  %v2133_v34 = vsub.f32 -10000.0, %v5914_v30  ;;  %v2134_v29 = vsub.f32 %v5712_v47, %v5916_v25  ;;  %v2224_v14 = vmul.f32 1.442695, %v2131_v31  ;;  %v7057_v47 = vld [vmem:[#allocation68_spill] sm:$0xff] }
 0x5bf   : > { %v2216_v41 = vmul.f32 1.442695, %v2127_v52  ;;  %4212 = vpow2.f32 %v2210_v11  ;;  %v6096_v20 = vpop.eup %4204  ;;  %v2226_v15 = vmul.f32 1.442695, %v2132_v23  ;;  %v2318_v30 = vadd.f32 %v6090_v32, %v6087_v13  ;;  %v7058_v52 = vld [vmem:[#allocation34_spill] sm:$0xff]  ;;  %v7062_v23 = vld [vmem:[#allocation41_spill] sm:$0xff] }
 0x5c0   : > { %4214 = vpow2.f32 %v2212_v35  ;;  %v2222_v38 = vmul.f32 1.442695, %v2130_v39  ;;  %v6101_v62 = vpop.eup %4206  ;;  %v2228_v43 = vmul.f32 1.442695, %v2133_v34  ;;  %v2137_v2 = vsub.f32 %v7057_v47, %v7055_v42  ;;  %v7059_v35 = vld [vmem:[#allocation40_spill] sm:$0xff]  ;;  %v7064_v34 = vld [vmem:[#allocation33_spill] sm:$0xff] }
 0x5c1   : > { %4216 = vpow2.f32 %v2214_v46  ;;  %v1941_v11 = vmul.f32 0.35355338, %v7058_v52  ;;  %v2230_v40 = vmul.f32 1.442695, %v2134_v29  ;;  %v2138_v0 = vsub.f32 %v7060_v21, %v7059_v35  ;;  %v6114_v25 = vpop.eup %4208  ;;  %v7061_v46 = vld [vmem:[#allocation81_spill] sm:$0xff]  ;;  %v7068_v47 = vld [vmem:[#allocation72_spill] sm:$0xff] }
 0x5c2   : > { %4218 = vpow2.f32 %v2216_v41  ;;  %v2139_v39 = vsub.f32 %v7061_v46, %v7059_v35  ;;  %v2321_v41 = vadd.f32 %v6101_v62, %v6096_v20  ;;  %v6120_v31 = vpop.eup %4210  ;;  %v2236_v29 = vmul.f32 1.442695, %v2137_v2  ;;  %v7069_v2 = vld [vmem:[#allocation83_spill] sm:$0xff] }
 0x5c3   : > { %4220 = vpow2.f32 %v2218_v56  ;;  %v2234_v56 = vmul.f32 1.442695, %v2136_v57  ;;  %v6132_v12 = vsel %vm305_vm15, %v1941_v11, -10000.0  ;;  %v7067_v57 = vld [vmem:[#allocation42_spill] sm:$0xff]  ;;  %v2324_v17 = vadd.f32 %v6120_v31, %v6114_v25 }
 0x5c4   : > { %4222 = vpow2.f32 %v2220_v1  ;;  %v2142_v52 = vsub.f32 %v7068_v47, %v7067_v57  ;;  %v2143_v21 = vsub.f32 %v7069_v2, %v7067_v57  ;;  %v7073_v57 = vld [vmem:[#allocation44_spill] sm:$0xff]  ;;  %vm2796_vm15 = vcmask 1043456  }
 0x5c5   : > { %4224 = vpow2.f32 %v2222_v38  ;;  %v6125_v38 = vmul.f32 0.35355338, %v7064_v34 }
 0x5c6   : > { %4226 = vpow2.f32 %v2224_v14  ;;  %v7065_v14 = vld [vmem:[#allocation79_spill] sm:$0xff]  ;;  %v2246_v42 = vmul.f32 1.442695, %v2142_v52  ;;  %v2248_v2 = vmul.f32 1.442695, %v2143_v21  ;;  %v7076_v52 = vld [vmem:[#allocation30_spill] sm:$0xff] }
 0x5c7   : > { %2097 = vmax.xlane.f32.xlu0 %v2096_v9  ;;  %4228 = vpow2.f32 %v2226_v15  ;;  %v7063_v9 = vld [vmem:[#allocation80_spill] sm:$0xff]  ;;  %v2141_v27 = vsub.f32 %v7065_v14, %v7062_v23  ;;  %v2238_v15 = vmul.f32 1.442695, %v2138_v0  ;;  %v7071_v0 = vld [vmem:[#allocation82_spill] sm:$0xff]  ;;  %v7077_v21 = vld [vmem:[#allocation15_spill] sm:$0xff] }
 0x5c8   : > { %v2140_v1 = vsub.f32 %v7063_v9, %v7062_v23  ;;  %4230 = vpow2.f32 %v2228_v43  ;;  %v2240_v43 = vmul.f32 1.442695, %v2139_v39  ;;  %v7072_v39 = vld [vmem:[#allocation7_spill] sm:$0xff] }
 0x5c9   : > { %4232 = vpow2.f32 %v2230_v40  ;;  %v7070_v40 = vld [vmem:[#allocation43_spill] sm:$0xff] }
 0x5ca   : > { %4234 = vpow2.f32 %v2232_v8  ;;  %v2242_v46 = vmul.f32 1.442695, %v2140_v1  ;;  %v2144_v23 = vsub.f32 %v7071_v0, %v7070_v40  ;;  %v2244_v8 = vmul.f32 1.442695, %v2141_v27  ;;  %v7075_v0 = vld [vmem:[#allocation13_spill] sm:$0xff] }
 0x5cb   : > { %2319 = vadd.xlane.f32.xlu0 %v2318_v30  ;;  %v6134_v30 = vpop.eup %4212  ;;  %4236 = vpow2.f32 %v2234_v56  ;;  %v2145_v34 = vsub.f32 %v7072_v39, %v7070_v40  ;;  %v7074_v56 = vld [vmem:[#allocation10_spill] sm:$0xff]  ;;  %v2148_v39 = vsub.f32 %v7076_v52, %v5936_v6 }
 0x5cc   : > { %v6138_v35 = vpop.eup %4214  ;;  %4238 = vpow2.f32 %v2236_v29  ;;  %v2146_v1 = vsub.f32 %v7074_v56, %v7073_v57  ;;  %v2147_v29 = vsub.f32 %v7075_v0, %v7073_v57  ;;  %v2149_v57 = vsub.f32 %v7077_v21, %v5936_v6 }
 0x5cd   : > { %v6144_v11 = vpop.eup %4216  ;;  %4240 = vpow2.f32 %v2238_v15  ;;  %v2327_v27 = vadd.f32 %v6138_v35, %v6134_v30  ;;  %v2250_v15 = vmul.f32 1.442695, %v2144_v23 }
 0x5ce   : > { %v6150_v9 = vpop.eup %4218  ;;  %4242 = vpow2.f32 %v2240_v43  ;;  %v2252_v43 = vmul.f32 1.442695, %v2145_v34  ;;  %v2254_v0 = vmul.f32 1.442695, %v2146_v1  ;;  %v2256_v22 = vmul.f32 1.442695, %v2147_v29 }
 0x5cf   : > { %2322 = vadd.xlane.f32.xlu0 %v2321_v41  ;;  %v2099_v41 = vmax.f32 %v6125_v38, %v6132_v12  ;;  %v6154_v14 = vpop.eup %4220  ;;  %4244 = vpow2.f32 %v2242_v46  ;;  %v7078_v46 = vld [vmem:[#allocation35_spill] sm:$0xff]  ;;  %v7080_v1 = vld [vmem:[#allocation37_spill] sm:$0xff]  ;;  %v7081_v29 = vld [vmem:[#allocation38_spill] sm:$0xff] }
 0x5d0   : > { %v6158_v47 = vpop.eup %4222  ;;  %4246 = vpow2.f32 %v2244_v8  ;;  %v2150_v23 = vsub.f32 %v7078_v46, %v6032_v4  ;;  %v2151_v8 = vsub.f32 %v7079_v59, %v6032_v4  ;;  %v2152_v21 = vsub.f32 %v7080_v1, %v6038_v37 }
 0x5d1   : > { %v6164_v40 = vpop.eup %4224  ;;  %4248 = vpow2.f32 %v2246_v42  ;;  %v2333_v34 = vadd.f32 %v6158_v47, %v6154_v14  ;;  %v2258_v42 = vmul.f32 1.442695, %v2148_v39  ;;  %v2153_v4 = vsub.f32 %v7081_v29, %v6038_v37 }
 0x5d2   : > { %4250 = vpow2.f32 %v2248_v2  ;;  %v2260_v2 = vmul.f32 1.442695, %v2149_v57  ;;  %v2262_v46 = vmul.f32 1.442695, %v2150_v23  ;;  %v2264_v39 = vmul.f32 1.442695, %v2151_v8 }
 0x5d3   : > { %2100 = vmax.xlane.f32.xlu1 %v2099_v41  ;;  %2325 = vadd.xlane.f32.xlu0 %v2324_v17  ;;  %v2330_v17 = vadd.f32 %v6150_v9, %v6144_v11  ;;  %v6170_v41 = vpop.eup %4226  ;;  %4252 = vpow2.f32 %v2250_v15  ;;  %v2266_v45 = vmul.f32 1.442695, %v2152_v21 }
 0x5d4   : > { %v6174_v56 = vpop.eup %4228  ;;  %4254 = vpow2.f32 %v2252_v43 }
 0x5d5   : > { %v6178_v52 = vpop.eup %4230  ;;  %4256 = vpow2.f32 %v2254_v0  ;;  %v2268_v0 = vmul.f32 1.442695, %v2153_v4 }
 0x5d6   : > { %v6184_v6 = vpop.eup %4232  ;;  %4258 = vpow2.f32 %v2256_v22  ;;  %v2339_v37 = vadd.f32 %v6178_v52, %v6174_v56 }
 0x5d7   : > { %2331 = vadd.xlane.f32.xlu0 %v2330_v17  ;;  %2328 = vadd.xlane.f32.xlu1 %v2327_v27  ;;  %v2336_v27 = vadd.f32 %v6170_v41, %v6164_v40  ;;  %v6190_v17 = vpop.eup %4234  ;;  %4260 = vpow2.f32 %v2258_v42 }
 0x5d8   : > { %v6194_v59 = vpop.eup %4236  ;;  %v2342_v43 = vadd.f32 %v6190_v17, %v6184_v6  ;;  %4262 = vpow2.f32 %v2260_v2 }
 0x5d9   : > { %v6196_v15 = vpop.eup %4238  ;;  %4264 = vpow2.f32 %v2262_v46 }
 0x5da   : > { %v6198_v1 = vpop.eup %4240  ;;  %4266 = vpow2.f32 %v2264_v39  ;;  %v2345_v21 = vadd.f32 %v6196_v15, %v6194_v59 }
 0x5db   : > { %2337 = vadd.xlane.f32.xlu0 %v2336_v27  ;;  %2334 = vadd.xlane.f32.xlu1 %v2333_v34  ;;  %7082 = vst [vmem:[#allocation45_spill] sm:$0xff] %v6198_v1  ;;  %v6204_v57 = vpop.eup %4242  ;;  %4268 = vpow2.f32 %v2266_v45 }
 0x5dc   : > { %v6206_v34 = vpop.eup %4244  ;;  %v2348_v4 = vadd.f32 %v6204_v57, %v6198_v1  ;;  %4270 = vpow2.f32 %v2268_v0 }
 0x5dd   : > { %7083 = vst [vmem:[#allocation47_spill] sm:$0xff] %v6206_v34  ;;  %v6210_v42 = vpop.eup %4246 }
 0x5de   : > { %v2086_v23 = vpop.xlane.xlu0 %2085  ;;  %v6214_v27 = vpop.eup %4248 }
 0x5df   : > { %v2154_v22 = vsub.f32 %v5942_v19, %v2086_v23  ;;  %v2155_v8 = vsub.f32 %v5947_v48, %v2086_v23  ;;  %2343 = vadd.xlane.f32.xlu0 %v2342_v43  ;;  %2340 = vadd.xlane.f32.xlu1 %v2339_v37  ;;  %7084 = vst [vmem:[#allocation46_spill] sm:$0xff] %v6214_v27  ;;  %v6218_v46 = vpop.eup %4250 }
 0x5e0   : > { %7085 = vst [vmem:[#allocation48_spill] sm:$0xff] %v6218_v46  ;;  %v6220_v19 = vpop.eup %4252  ;;  %v2354_v45 = vadd.f32 %v6218_v46, %v6214_v27  ;;  %v2351_v37 = vadd.f32 %v6210_v42, %v6206_v34 }
 0x5e1   : > { %v2270_v2 = vmul.f32 1.442695, %v2154_v22  ;;  %v2272_v29 = vmul.f32 1.442695, %v2155_v8  ;;  %v6222_v39 = vpop.eup %4254 }
 0x5e2   : > { %v2527_v48 = vpop.permute.xlu0 %2526  ;;  %v6224_v43 = vpop.eup %4256  ;;  %v2357_v27 = vadd.f32 %v6222_v39, %v6220_v19 }
 0x5e3   : > { %4272 = vpow2.f32 %v2270_v2  ;;  %2349 = vadd.xlane.f32.xlu0 %v2348_v4  ;;  %2346 = vadd.xlane.f32.xlu1 %v2345_v21  ;;  %7086 = vst [vmem:[#allocation49_spill] sm:$0xff] %v6224_v43  ;;  %v6230_v23 = vpop.eup %4258 }
 0x5e4   : > { %4274 = vpow2.f32 %v2272_v29  ;;  %3743 = vmatpush3.bf16.msra.mxu0 %v2527_v48  ;;  %v6232_v22 = vpop.eup %4260  ;;  %v2360_v46 = vadd.f32 %v6230_v23, %v6224_v43 }
 0x5e5   : > { %7087 = vst [vmem:[#allocation50_spill] sm:$0xff] %v6232_v22  ;;  %v6236_v2 = vpop.eup %4262 }
 0x5e6   : > { %v2089_v0 = vpop.xlane.xlu1 %2088  ;;  %v6238_v29 = vpop.eup %4264 }
 0x5e7   : > { %v2156_v8 = vsub.f32 %v5953_v10, %v2089_v0  ;;  %v2157_v21 = vsub.f32 %v5958_v36, %v2089_v0  ;;  %2355 = vadd.xlane.f32.xlu0 %v2354_v45  ;;  %2352 = vadd.xlane.f32.xlu1 %v2351_v37  ;;  %7088 = vst [vmem:[#allocation51_spill] sm:$0xff] %v6238_v29  ;;  %v6244_v1 = vpop.eup %4266  ;;  %v2529_v43 = vpop.permute.xlu0 %2528 }
 0x5e8   : > { %7089 = vst [vmem:[#allocation52_spill] sm:$0xff] %v6244_v1  ;;  %v6246_v10 = vpop.eup %4268  ;;  %v2366_v37 = vadd.f32 %v6244_v1, %v6238_v29  ;;  %v2363_v0 = vadd.f32 %v6236_v2, %v6232_v22 }
 0x5e9   : > { %v2274_v4 = vmul.f32 1.442695, %v2156_v8  ;;  %v2276_v48 = vmul.f32 1.442695, %v2157_v21  ;;  %7090 = vst [vmem:[#allocation53_spill] sm:$0xff] %v6246_v10  ;;  %v6248_v36 = vpop.eup %4270 }
 0x5ea   : > { %v2308_v34 = vpop.xlane.xlu1 %2307  ;;  %7091 = vst [vmem:[#allocation54_spill] sm:$0xff] %v6248_v36 }
 0x5eb   : > { %4276 = vpow2.f32 %v2274_v4  ;;  %2358 = vadd.xlane.f32.xlu1 %v2357_v27  ;;  %2361 = vadd.xlane.f32.xlu0 %v2360_v46  ;;  %v2369_v46 = vadd.f32 %v6248_v36, %v6246_v10  ;;  %v2547_v29 = vpop.permute.xlu0 %2546 }
 0x5ec   : > { %4278 = vpow2.f32 %v2276_v48 }
 0x5ed   : > { %v6250_v45 = vpop.eup %4272 }
 0x5ee   : > { %7092 = vst [vmem:[#allocation2_spill] sm:$0xff] %v6250_v45  ;;  %v6256_v8 = vpop.eup %4274  ;;  %v2311_v21 = vpop.xlane.xlu1 %2310 }
 0x5ef   : > { %7093 = vst [vmem:[#allocation3_spill] sm:$0xff] %v6256_v8  ;;  %2367 = vadd.xlane.f32.xlu0 %v2366_v37  ;;  %2364 = vadd.xlane.f32.xlu1 %v2363_v0  ;;  %v2372_v27 = vadd.f32 %v6256_v8, %v6250_v45 }
 0x5f2   : > { %v2545_v4 = vpop.permute.xlu1 %2544 }
 0x5f3   : > { %2373 = vadd.xlane.f32.xlu0 %v2372_v27  ;;  %2370 = vadd.xlane.f32.xlu1 %v2369_v46 }
 0x5f4   : > { %3744 = vmatprep.subr.bf16.mxu0 %v2545_v4 }
 0x5f5   : > { %v6262_v48 = vpop.eup %4276  ;;  %3745 = vmatpush3.bf16.msra.mxu0 %v2529_v43 }
 0x5f6   : > { %7094 = vst [vmem:[#allocation55_spill] sm:$0xff] %v6262_v48  ;;  %v6264_v1 = vpop.eup %4278  ;;  %3746 = vmatprep.subr.bf16.mxu0 %v2547_v29 }
 0x5f7   : > { %v2375_v37 = vadd.f32 %v6264_v1, %v6262_v48 }
 0x5f9   : > { %2376 = vadd.xlane.f32.xlu1 %v2375_v37 }
 0x61b   : > { %v2092_v0 = vpop.xlane.xlu0 %2091 }
 0x61c   : > { %v2158_v45 = vsub.f32 %v6000_v16, %v2092_v0  ;;  %v2159_v8 = vsub.f32 %v6005_v44, %v2092_v0 }
 0x61e   : > { %v2278_v10 = vmul.f32 1.442695, %v2158_v45  ;;  %v2280_v27 = vmul.f32 1.442695, %v2159_v8  ;;  %v7095_v8 = vpack.c.bf16 %v5986_v18, %v5983_v53 }
 0x61f   : > { %v2531_v46 = vpop.permute.xlu0 %2530 }
 0x620   : > { %4280 = vpow2.f32 %v2278_v10  ;;  %3747 = vmatpush3.bf16.msra.mxu0 %v2531_v46 }
 0x621   : > { %4282 = vpow2.f32 %v2280_v27 }
 0x623   : > { %v2095_v4 = vpop.xlane.xlu1 %2094 }
 0x624   : > { %v2160_v43 = vsub.f32 %v6011_v5, %v2095_v4  ;;  %v2161_v29 = vsub.f32 %v6016_v28, %v2095_v4  ;;  %v2533_v5 = vpop.permute.xlu0 %2532 }
 0x626   : > { %v2282_v36 = vmul.f32 1.442695, %v2160_v43  ;;  %v2284_v22 = vmul.f32 1.442695, %v2161_v29 }
 0x627   : > { %v2314_v48 = vpop.xlane.xlu1 %2313 }
 0x628   : > { %4284 = vpow2.f32 %v2282_v36 }
 0x629   : > { %4286 = vpow2.f32 %v2284_v22 }
 0x62a   : > { %v6272_v37 = vpop.eup %4280  ;;  %4288 = vrcp.f32 %v2311_v21  ;;  %v7096_v21 = vpack.c.bf16 %v6057_v63, %v6054_v55 }
 0x62b   : > { %v6274_v16 = vpop.eup %4282  ;;  %v2317_v44 = vpop.xlane.xlu1 %2316  ;;  %4290 = vrcp.f32 %v2308_v34 }
 0x62c   : > { %v2378_v10 = vadd.f32 %v6274_v16, %v6272_v37  ;;  %4292 = vrcp.f32 %v2317_v44 }
 0x62d   : > { %4294 = vrcp.f32 %v2314_v48  ;;  %v7097_v48 = vpack.c.bf16 %v6063_v49, %v6060_v58 }
 0x62e   : > { %2379 = vadd.xlane.f32.xlu0 %v2378_v10 }
 0x62f   : > { %v2549_v45 = vpop.permute.xlu1 %2548 }
 0x630   : > { %3748 = vmatprep.subr.bf16.mxu0 %v2549_v45 }
 0x631   : > { %3749 = vmatpush3.bf16.msra.mxu0 %v2533_v5 }
 0x632   : > { %v6278_v28 = vpop.eup %4284 }
 0x633   : > { %v6280_v36 = vpop.eup %4286 }
 0x634   : > { %v4289_v22 = vpop.eup %4288  ;;  %2599 = vmatmul.mubr.bf16.vlgmr.msra.gmra.mrb[120].mxu0 %v7095_v8  ;;  %v2381_v34 = vadd.f32 %v6280_v36, %v6278_v28 }
 0x635   : > { %2606 = vmatprep.mubr.bf16.mxu0 %v7096_v21  ;;  %v4291_v0 = vpop.eup %4290  ;;  %v2433_v27 = vmul.f32 %v4289_v22, %v5970_v33  ;;  %v2432_v18 = vmul.f32 %v4289_v22, %v5966_v24 }
 0x636   : > { %2382 = vadd.xlane.f32.xlu1 %v2381_v34  ;;  %v2431_v46 = vmul.f32 %v4291_v0, %v5964_v26  ;;  %v4293_v43 = vpop.eup %4292  ;;  %v2430_v55 = vmul.f32 %v4291_v0, %v5960_v51 }
 0x637   : > { %v4295_v53 = vpop.eup %4294  ;;  %v2437_v29 = vmul.f32 %v4293_v43, %v6028_v54  ;;  %v2436_v26 = vmul.f32 %v4293_v43, %v6024_v3 }
 0x638   : > { %v2491_v4 = vpack.c.bf16 %v2433_v27, %v2431_v46  ;;  %v2435_v63 = vmul.f32 %v4295_v53, %v6022_v61  ;;  %v2490_v44 = vpack.c.bf16 %v2432_v18, %v2430_v55  ;;  %v2434_v10 = vmul.f32 %v4295_v53, %v6018_v50 }
 0x63a   : > { %v2493_v33 = vpack.c.bf16 %v2437_v29, %v2435_v63  ;;  %v2492_v58 = vpack.c.bf16 %v2436_v26, %v2434_v10 }
 0x63c   : > { %2607 = vmatmul.mubr.bf16.gmra.mrb[124].mxu0 %v7097_v48 }
 0x63d   : > { %2614 = vmatprep.mubr.bf16.mxu0 %v2491_v4 }
 0x644   : > { %2615 = vmatmul.mubr.bf16.gmra.mrb[128].mxu0 %v2490_v44 }
 0x645   : > { %2622 = vmatprep.mubr.bf16.mxu0 %v2493_v33 }
 0x64c   : > { %2623 = vmatmul.mubr.bf16.gmra.mrb[132].mxu0 %v2492_v58 }
 0x654   : > { %v2098_v49 = vpop.xlane.xlu0 %2097 }
 0x655   : > { %v2162_v45 = vsub.f32 %v6077_v60, %v2098_v49  ;;  %v2163_v24 = vsub.f32 %v6083_v7, %v2098_v49 }
 0x657   : > { %v2286_v54 = vmul.f32 1.442695, %v2162_v45  ;;  %v2288_v5 = vmul.f32 1.442695, %v2163_v24 }
 0x658   : > { %v2320_v51 = vpop.xlane.xlu0 %2319 }
 0x659   : > { %4296 = vpow2.f32 %v2286_v54 }
 0x65a   : > { %4298 = vpow2.f32 %v2288_v5 }
 0x65b   : > { %4300 = vrcp.f32 %v2320_v51 }
 0x65c   : > { %v2323_v61 = vpop.xlane.xlu0 %2322 }
 0x65d   : > { %4302 = vrcp.f32 %v2323_v61 }
 0x660   : > { %v2326_v22 = vpop.xlane.xlu0 %2325  ;;  %v2101_v8 = vpop.xlane.xlu1 %2100 }
 0x661   : > { %v2164_v3 = vsub.f32 %v6125_v38, %v2101_v8  ;;  %v2165_v50 = vsub.f32 %v6132_v12, %v2101_v8  ;;  %4304 = vrcp.f32 %v2326_v22 }
 0x663   : > { %v6305_v34 = vpop.eup %4296  ;;  %v2290_v21 = vmul.f32 1.442695, %v2164_v3  ;;  %v2292_v60 = vmul.f32 1.442695, %v2165_v50 }
 0x664   : > { %v6307_v0 = vpop.eup %4298  ;;  %v2332_v7 = vpop.xlane.xlu0 %2331 }
 0x665   : > { %v2329_v27 = vpop.xlane.xlu1 %2328  ;;  %v4301_v46 = vpop.eup %4300  ;;  %4306 = vpow2.f32 %v2290_v21  ;;  %v2384_v4 = vadd.f32 %v6307_v0, %v6305_v34 }
 0x666   : > { %4308 = vpow2.f32 %v2292_v60  ;;  %v2439_v38 = vmul.f32 %v4301_v46, %v6090_v32  ;;  %v2438_v53 = vmul.f32 %v4301_v46, %v6087_v13 }
 0x667   : > { %v4303_v43 = vpop.eup %4302  ;;  %4310 = vrcp.f32 %v2332_v7  ;;  %2385 = vadd.xlane.f32.xlu0 %v2384_v4 }
 0x668   : > { %4312 = vrcp.f32 %v2329_v27  ;;  %v2441_v48 = vmul.f32 %v4303_v43, %v6101_v62  ;;  %v2440_v18 = vmul.f32 %v4303_v43, %v6096_v20  ;;  %v2338_v44 = vpop.xlane.xlu0 %2337 }
 0x669   : > { %v2335_v12 = vpop.xlane.xlu1 %2334 }
 0x66a   : > { %4314 = vrcp.f32 %v2335_v12  ;;  %v2495_v29 = vpack.c.bf16 %v2441_v48, %v2439_v38  ;;  %v2494_v55 = vpack.c.bf16 %v2440_v18, %v2438_v53 }
 0x66b   : > { %v4305_v33 = vpop.eup %4304 }
 0x66c   : > { %2630 = vmatprep.mubr.bf16.mxu0 %v2495_v29  ;;  %v2443_v58 = vmul.f32 %v4305_v33, %v6120_v31  ;;  %v2442_v45 = vmul.f32 %v4305_v33, %v6114_v25  ;;  %v2344_v5 = vpop.xlane.xlu0 %2343 }
 0x66d   : > { %v2341_v63 = vpop.xlane.xlu1 %2340  ;;  %2631 = vmatmul.mubr.bf16.gmra.mrb[136].mxu0 %v2494_v55 }
 0x66e   : > { %4316 = vrcp.f32 %v2341_v63 }
 0x66f   : > { %v6315_v26 = vpop.eup %4306  ;;  %4318 = vrcp.f32 %v2338_v44 }
 0x670   : > { %v6317_v32 = vpop.eup %4308  ;;  %v2350_v60 = vpop.xlane.xlu0 %2349 }
 0x671   : > { %v4311_v10 = vpop.eup %4310  ;;  %v2387_v13 = vadd.f32 %v6317_v32, %v6315_v26  ;;  %v2347_v20 = vpop.xlane.xlu1 %2346 }
 0x672   : > { %v4313_v62 = vpop.eup %4312  ;;  %v2447_v22 = vmul.f32 %v4311_v10, %v6150_v9  ;;  %4320 = vrcp.f32 %v2347_v20  ;;  %v2446_v21 = vmul.f32 %v4311_v10, %v6144_v11  ;;  %v4365_v10 = vmov 0  }
 0x673   : > { %2388 = vadd.xlane.f32.xlu1 %v2387_v13  ;;  %v2445_v49 = vmul.f32 %v4313_v62, %v6138_v35  ;;  %v2444_v24 = vmul.f32 %v4313_v62, %v6134_v30  ;;  %4322 = vrcp.f32 %v2344_v5  ;;  %2835 = vmatprep.mubr.bf16.mxu1 %v4365_v10  ;;  %v7098_v62 = vld [vmem:[#allocation47_spill] sm:$0xff] }
 0x674   : > { %v4315_v54 = vpop.eup %4314  ;;  %v2356_v38 = vpop.xlane.xlu0 %2355 }
 0x675   : > { %v2497_v51 = vpack.c.bf16 %v2445_v49, %v2443_v58  ;;  %v2496_v61 = vpack.c.bf16 %v2444_v24, %v2442_v45  ;;  %v2449_v8 = vmul.f32 %v4315_v54, %v6158_v47  ;;  %v2448_v25 = vmul.f32 %v4315_v54, %v6154_v14  ;;  %v2353_v35 = vpop.xlane.xlu1 %2352  ;;  %v7099_v49 = vld [vmem:[#allocation45_spill] sm:$0xff]  ;;  %v7100_v54 = vld [vmem:[#allocation48_spill] sm:$0xff] }
 0x676   : > { %4324 = vrcp.f32 %v2353_v35 }
 0x677   : > { %2638 = vmatprep.mubr.bf16.mxu0 %v2497_v51  ;;  %v2499_v3 = vpack.c.bf16 %v2449_v8, %v2447_v22  ;;  %v2498_v47 = vpack.c.bf16 %v2448_v25, %v2446_v21  ;;  %4326 = vrcp.f32 %v2350_v60  ;;  %v7101_v25 = vld [vmem:[#allocation46_spill] sm:$0xff] }
 0x678   : > { %v4317_v50 = vpop.eup %4316  ;;  %2639 = vmatmul.mubr.bf16.gmra.mrb[140].mxu0 %v2496_v61  ;;  %v2362_v63 = vpop.xlane.xlu0 %2361 }
 0x679   : > { %2646 = vmatprep.mubr.bf16.mxu0 %v2499_v3  ;;  %v4319_v31 = vpop.eup %4318  ;;  %v2453_v30 = vmul.f32 %v4317_v50, %v6178_v52  ;;  %v2452_v4 = vmul.f32 %v4317_v50, %v6174_v56  ;;  %v2359_v43 = vpop.xlane.xlu1 %2358 }
 0x67a   : > { %v2451_v9 = vmul.f32 %v4319_v31, %v6170_v41  ;;  %v2450_v52 = vmul.f32 %v4319_v31, %v6164_v40  ;;  %4328 = vrcp.f32 %v2359_v43  ;;  %v205_v40 = vld [vmem:[%s6634_s1 + $0x8] sm:$0xff] }
 0x67b   : > { %4330 = vrcp.f32 %v2356_v38  ;;  %v3484_v55 = vcombine.low %v205_v40, %v205_v40 }
 0x67c   : > { %v2501_v7 = vpack.c.bf16 %v2453_v30, %v2451_v9  ;;  %v4321_v27 = vpop.eup %4320  ;;  %v2500_v41 = vpack.c.bf16 %v2452_v4, %v2450_v52  ;;  %v2368_v24 = vpop.xlane.xlu0 %2367  ;;  %v7104_v4 = vld [vmem:[#allocation49_spill] sm:$0xff] }
 0x67d   : > { %v4323_v46 = vpop.eup %4322  ;;  %v2457_v14 = vmul.f32 %v4321_v27, %v6196_v15  ;;  %v2456_v18 = vmul.f32 %v4321_v27, %v6194_v59  ;;  %v2365_v29 = vpop.xlane.xlu1 %2364  ;;  %v2798_v59 = vsel %vm2796_vm15, %v3484_v55, 0 }
 0x67e   : > { %v2455_v11 = vmul.f32 %v4323_v46, %v6190_v17  ;;  %v2454_v15 = vmul.f32 %v4323_v46, %v6184_v6  ;;  %v3485_v17 = vcombine.high %v205_v40, %v205_v40  ;;  %4332 = vrcp.f32 %v2365_v29  ;;  %v7103_v46 = vld [vmem:[#allocation54_spill] sm:$0xff]  ;;  %v7108_v29 = vld [vmem:[#allocation3_spill] sm:$0xff] }
 0x67f   : > { %4334 = vrcp.f32 %v2362_v63  ;;  %v7110_v63 = vld [vmem:[#allocation2_spill] sm:$0xff] }
 0x680   : > { %2647 = vmatmul.mubr.bf16.gmra.mrb[144].mxu0 %v2498_v47  ;;  %v2503_v12 = vpack.c.bf16 %v2457_v14, %v2455_v11  ;;  %v4325_v48 = vpop.eup %4324  ;;  %v2502_v33 = vpack.c.bf16 %v2456_v18, %v2454_v15  ;;  %3486 = vmatprep.subr.msk.bf16.mxu1 %vm2796_vm15, %v3485_v17  ;;  %v2374_v35 = vpop.xlane.xlu0 %2373  ;;  %v7109_v17 = vld [vmem:[#allocation55_spill] sm:$0xff] }
 0x681   : > { %2654 = vmatprep.mubr.bf16.mxu0 %v2501_v7  ;;  %v4327_v53 = vpop.eup %4326  ;;  %v2461_v56 = vmul.f32 %v4325_v48, %v6210_v42  ;;  %2804 = vmatpush1.bf16.msra.mxu1 %v2798_v59  ;;  %v2460_v20 = vmul.f32 %v4325_v48, %v7098_v62  ;;  %v7102_v7 = vld [vmem:[#allocation50_spill] sm:$0xff] }
 0x682   : > { %v2459_v44 = vmul.f32 %v4327_v53, %v6204_v57  ;;  %v2371_v57 = vpop.xlane.xlu1 %2370  ;;  %v2458_v45 = vmul.f32 %v4327_v53, %v7099_v49  ;;  %v7107_v53 = vld [vmem:[#allocation51_spill] sm:$0xff] }
 0x683   : > { %4336 = vrcp.f32 %v2371_v57 }
 0x684   : > { %v2505_v42 = vpack.c.bf16 %v2461_v56, %v2459_v44  ;;  %v4329_v13 = vpop.eup %4328  ;;  %v2504_v51 = vpack.c.bf16 %v2460_v20, %v2458_v45  ;;  %4338 = vrcp.f32 %v2368_v24  ;;  %v204_v45 = vld [vmem:[%s6634_s1] sm:$0xff] }
 0x685   : > { %v4331_v6 = vpop.eup %4330  ;;  %v2465_v58 = vmul.f32 %v4329_v13, %v6222_v39  ;;  %v2464_v3 = vmul.f32 %v4329_v13, %v6220_v19  ;;  %v3504_v24 = vcombine.high %v204_v45, %v204_v45 }
 0x686   : > { %v2463_v5 = vmul.f32 %v4331_v6, %v7100_v54  ;;  %v2377_v50 = vpop.xlane.xlu1 %2376  ;;  %v2462_v39 = vmul.f32 %v4331_v6, %v7101_v25 }
 0x687   : > { %4340 = vrcp.f32 %v2377_v50  ;;  %3505 = vmatprep.subr.msk.bf16.mxu1 %vm2796_vm15, %v3504_v24 }
 0x688   : > { %2655 = vmatmul.mubr.bf16.gmra.mrb[148].mxu0 %v2500_v41  ;;  %v2507_v61 = vpack.c.bf16 %v2465_v58, %v2463_v5  ;;  %v4333_v22 = vpop.eup %4332  ;;  %v2506_v21 = vpack.c.bf16 %v2464_v3, %v2462_v39  ;;  %4342 = vrcp.f32 %v2374_v35  ;;  %v7106_v41 = vld [vmem:[#allocation53_spill] sm:$0xff] }
 0x689   : > { %2662 = vmatprep.mubr.bf16.mxu0 %v2503_v12  ;;  %v4335_v8 = vpop.eup %4334  ;;  %v2469_v31 = vmul.f32 %v4333_v22, %v6236_v2  ;;  %v2468_v27 = vmul.f32 %v4333_v22, %v7102_v7  ;;  %v7105_v2 = vld [vmem:[#allocation52_spill] sm:$0xff]  ;;  %v3503_v22 = vcombine.low %v204_v45, %v204_v45 }
 0x68a   : > { %v2467_v30 = vmul.f32 %v4335_v8, %v6230_v23  ;;  %v2466_v43 = vmul.f32 %v4335_v8, %v7104_v4 }
 0x68c   : > { %v2509_v60 = vpack.c.bf16 %v2469_v31, %v2467_v30  ;;  %v2508_v52 = vpack.c.bf16 %v2468_v27, %v2466_v43 }
 0x68d   : > { %v4337_v9 = vpop.eup %4336 }
 0x68e   : > { %v4339_v47 = vpop.eup %4338  ;;  %v2473_v19 = vmul.f32 %v4337_v9, %v7103_v46  ;;  %v2472_v12 = vmul.f32 %v4337_v9, %v7106_v41 }
 0x68f   : > { %v2471_v14 = vmul.f32 %v4339_v47, %v7105_v2  ;;  %v2470_v18 = vmul.f32 %v4339_v47, %v7107_v53 }
 0x690   : > { %2663 = vmatmul.mubr.bf16.gmra.mrb[152].mxu0 %v2502_v33 }
 0x691   : > { %2670 = vmatprep.mubr.bf16.mxu0 %v2505_v42  ;;  %v2511_v38 = vpack.c.bf16 %v2473_v19, %v2471_v14  ;;  %v4341_v11 = vpop.eup %4340  ;;  %v2510_v40 = vpack.c.bf16 %v2472_v12, %v2470_v18 }
 0x692   : > { %v4343_v23 = vpop.eup %4342  ;;  %v2477_v48 = vmul.f32 %v4341_v11, %v6264_v1  ;;  %v2476_v55 = vmul.f32 %v4341_v11, %v7109_v17 }
 0x693   : > { %v2475_v56 = vmul.f32 %v4343_v23, %v7108_v29  ;;  %v2474_v44 = vmul.f32 %v4343_v23, %v7110_v63 }
 0x695   : > { %v2513_v15 = vpack.c.bf16 %v2477_v48, %v2475_v56  ;;  %v2512_v33 = vpack.c.bf16 %v2476_v55, %v2474_v44 }
 0x698   : > { %2671 = vmatmul.mubr.bf16.gmra.mrb[156].mxu0 %v2504_v51 }
 0x699   : > { %2678 = vmatprep.mubr.bf16.mxu0 %v2507_v61 }
 0x6a0   : > { %2679 = vmatmul.mubr.bf16.gmra.mrb[160].mxu0 %v2506_v21 }
 0x6a1   : > { %2686 = vmatprep.mubr.bf16.mxu0 %v2509_v60  ;;  %v3050_v60 = vsel %vm2796_vm15, %v3503_v22, 0 }
 0x6a8   : > { %2687 = vmatmul.mubr.bf16.gmra.mrb[164].mxu0 %v2508_v52 }
 0x6a9   : > { %2694 = vmatprep.mubr.bf16.mxu0 %v2511_v38 }
 0x6b0   : > { %2695 = vmatmul.mubr.bf16.gmra.mrb[168].mxu0 %v2510_v40 }
 0x6b1   : > { %2702 = vmatprep.mubr.bf16.mxu0 %v2513_v15 }
 0x6b8   : > { %2703 = vmatmul.mubr.bf16.gmra.mrb[172].mxu0 %v2512_v33 }
 0x6bb   : > { %v2380_v59 = vpop.xlane.xlu0 %2379 }
 0x6bc   : > { %4344 = vrcp.f32 %v2380_v59 }
 0x6c3   : > { %v2383_v42 = vpop.xlane.xlu1 %2382 }
 0x6c4   : > { %4346 = vrcp.f32 %v2383_v42 }
 0x6c6   : > { %v4345_v13 = vpop.eup %4344 }
 0x6c7   : > { %v2479_v6 = vmul.f32 %v4345_v13, %v6274_v16  ;;  %v2478_v20 = vmul.f32 %v4345_v13, %v6272_v37 }
 0x6ce   : > { %v4347_v1 = vpop.eup %4346 }
 0x6cf   : > { %v2481_v62 = vmul.f32 %v4347_v1, %v6280_v36  ;;  %v2480_v57 = vmul.f32 %v4347_v1, %v6278_v28 }
 0x6d1   : > { %v2515_v58 = vpack.c.bf16 %v2481_v62, %v2479_v6  ;;  %v2514_v49 = vpack.c.bf16 %v2480_v57, %v2478_v20 }
 0x6d3   : > { %2710 = vmatprep.mubr.bf16.mxu0 %v2515_v58 }
 0x6d4   : > { %2711 = vmatmul.mubr.bf16.gmra.mrb[176].mxu0 %v2514_v49 }
 0x6f4   : > { %v2386_v54 = vpop.xlane.xlu0 %2385 }
 0x6f5   : > { %4348 = vrcp.f32 %v2386_v54 }
 0x6ff   : > { %v4349_v37 = vpop.eup %4348 }
 0x700   : > { %v2389_v16 = vpop.xlane.xlu1 %2388  ;;  %v2483_v50 = vmul.f32 %v4349_v37, %v6307_v0  ;;  %v2482_v25 = vmul.f32 %v4349_v37, %v6305_v34 }
 0x701   : > { %4350 = vrcp.f32 %v2389_v16 }
 0x707   : > { %v3750_v36 = vpop.f32.mrb[120].mxu0 }
 0x708   : > { %v3751_v5 = vpop.f32.mrb[121].mxu0 }
 0x709   : > { %v3752_v51 = vadd.f32 %v3751_v5, %v3750_v36  ;;  %v3753_v28 = vpop.f32.mrb[122].mxu0 }
 0x70a   : > { %v3754_v61 = vpop.f32.mrb[123].mxu0 }
 0x70b   : > { %v4351_v8 = vpop.eup %4350  ;;  %v3755_v3 = vadd.f32 %v3754_v61, %v3753_v28 }
 0x70c   : > { %v2485_v31 = vmul.f32 %v4351_v8, %v6317_v32  ;;  %v2484_v39 = vmul.f32 %v4351_v8, %v6315_v26 }
 0x70d   : > { %v2727_v35 = vpack.c.bf16 %v3755_v3, %v3752_v51 }
 0x70e   : > { %v2517_v30 = vpack.c.bf16 %v2485_v31, %v2483_v50  ;;  %v2516_v21 = vpack.c.bf16 %v2484_v39, %v2482_v25 }
 0x70f   : > { %v3756_v9 = vpop.f32.mrb[124].mxu0  ;;  %3487 = vmatmul.mubr.msk.bf16.vlgmr.msra.gmra.mrb[72].mxu1 %vm370_vm0, %v2727_v35 }
 0x710   : > { %2718 = vmatprep.mubr.bf16.mxu0 %v2517_v30  ;;  %v3757_v47 = vpop.f32.mrb[125].mxu0  ;;  %2845 = vmatprep.mubr.bf16.mxu1 %v4365_v10 }
 0x711   : > { %v3758_v7 = vadd.f32 %v3757_v47, %v3756_v9  ;;  %2719 = vmatmul.mubr.bf16.gmra.mrb[180].mxu0 %v2516_v21  ;;  %v3759_v0 = vpop.f32.mrb[126].mxu0  ;;  %3056 = vmatpush1.bf16.msra.mxu1 %v3050_v60 }
 0x712   : > { %v3760_v32 = vpop.f32.mrb[127].mxu0 }
 0x713   : > { %v3761_v34 = vadd.f32 %v3760_v32, %v3759_v0 }
 0x715   : > { %v2728_v27 = vpack.c.bf16 %v3761_v34, %v3758_v7 }
 0x717   : > { %v3762_v26 = vpop.f32.mrb[128].mxu0  ;;  %3488 = vmatmul.mubr.msk.bf16.gmra.mrb[76].mxu1 %vm370_vm0, %v2728_v27 }
 0x718   : > { %v3763_v46 = vpop.f32.mrb[129].mxu0  ;;  %2855 = vmatprep.mubr.bf16.mxu1 %v4365_v10 }
 0x719   : > { %v3764_v19 = vadd.f32 %v3763_v46, %v3762_v26  ;;  %v3765_v4 = vpop.f32.mrb[130].mxu0 }
 0x71a   : > { %v3766_v43 = vpop.f32.mrb[131].mxu0 }
 0x71b   : > { %v3767_v2 = vadd.f32 %v3766_v43, %v3765_v4 }
 0x71d   : > { %v2729_v14 = vpack.c.bf16 %v3767_v2, %v3764_v19 }
 0x71f   : > { %v3768_v52 = vpop.f32.mrb[132].mxu0  ;;  %3489 = vmatmul.mubr.msk.bf16.gmra.mrb[80].mxu1 %vm370_vm0, %v2729_v14 }
 0x720   : > { %v3769_v38 = vpop.f32.mrb[133].mxu0  ;;  %2865 = vmatprep.mubr.bf16.mxu1 %v4365_v10 }
 0x721   : > { %v3770_v11 = vadd.f32 %v3769_v38, %v3768_v52  ;;  %v3771_v23 = vpop.f32.mrb[134].mxu0 }
 0x722   : > { %v3772_v41 = vpop.f32.mrb[135].mxu0 }
 0x723   : > { %v3773_v12 = vadd.f32 %v3772_v41, %v3771_v23 }
 0x725   : > { %v2730_v48 = vpack.c.bf16 %v3773_v12, %v3770_v11 }
 0x727   : > { %3490 = vmatmul.mubr.msk.bf16.gmra.mrb[84].mxu1 %vm370_vm0, %v2730_v48 }
 0x728   : > { %2875 = vmatprep.mubr.bf16.mxu1 %v4365_v10 }
 0x740   : > { %v3774_v53 = vpop.f32.mrb[136].mxu0 }
 0x741   : > { %v3775_v18 = vpop.f32.mrb[137].mxu0 }
 0x742   : > { %v3776_v29 = vadd.f32 %v3775_v18, %v3774_v53  ;;  %v3777_v56 = vpop.f32.mrb[138].mxu0 }
 0x743   : > { %v3778_v40 = vpop.f32.mrb[139].mxu0 }
 0x744   : > { %v3779_v15 = vadd.f32 %v3778_v40, %v3777_v56 }
 0x746   : > { %v2731_v17 = vpack.c.bf16 %v3779_v15, %v3776_v29 }
 0x748   : > { %3491 = vmatmul.mubr.msk.bf16.gmra.mrb[88].mxu1 %vm370_vm0, %v2731_v17 }
 0x749   : > { %2885 = vmatprep.mubr.bf16.mxu1 %v4365_v10 }
 0x74b   : > { %v3780_v55 = vpop.f32.mrb[140].mxu0 }
 0x74c   : > { %v3781_v63 = vpop.f32.mrb[141].mxu0 }
 0x74d   : > { %v3782_v44 = vadd.f32 %v3781_v63, %v3780_v55  ;;  %v3783_v33 = vpop.f32.mrb[142].mxu0 }
 0x74e   : > { %v3784_v59 = vpop.f32.mrb[143].mxu0 }
 0x74f   : > { %v3785_v42 = vadd.f32 %v3784_v59, %v3783_v33 }
 0x751   : > { %v2732_v13 = vpack.c.bf16 %v3785_v42, %v3782_v44 }
 0x753   : > { %v3786_v1 = vpop.f32.mrb[144].mxu0  ;;  %3492 = vmatmul.mubr.msk.bf16.gmra.mrb[92].mxu1 %vm370_vm0, %v2732_v13 }
 0x754   : > { %v3787_v6 = vpop.f32.mrb[145].mxu0  ;;  %2895 = vmatprep.mubr.bf16.mxu1 %v4365_v10 }
 0x755   : > { %v3788_v62 = vadd.f32 %v3787_v6, %v3786_v1  ;;  %v3789_v20 = vpop.f32.mrb[146].mxu0 }
 0x756   : > { %v3790_v57 = vpop.f32.mrb[147].mxu0 }
 0x757   : > { %v3791_v58 = vadd.f32 %v3790_v57, %v3789_v20 }
 0x759   : > { %v2733_v49 = vpack.c.bf16 %v3791_v58, %v3788_v62 }
 0x75b   : > { %v3792_v45 = vpop.f32.mrb[148].mxu0  ;;  %3493 = vmatmul.mubr.msk.bf16.gmra.mrb[96].mxu1 %vm370_vm0, %v2733_v49 }
 0x75c   : > { %v3793_v24 = vpop.f32.mrb[149].mxu0  ;;  %2905 = vmatprep.mubr.bf16.mxu1 %v4365_v10 }
 0x75d   : > { %v3794_v54 = vadd.f32 %v3793_v24, %v3792_v45  ;;  %v3795_v16 = vpop.f32.mrb[150].mxu0  ;;  %v7111_v45 = vld [vmem:[#allocation16_spill] sm:$0xff]  ;;  %v7112_v24 = vld [vmem:[#allocation17_spill] sm:$0xff] }
 0x75e   : > { %v3796_v36 = vpop.f32.mrb[151].mxu0 }
 0x75f   : > { %v3797_v5 = vadd.f32 %v3796_v36, %v3795_v16  ;;  %v7114_v16 = vld [vmem:[#allocation20_spill] sm:$0xff]  ;;  %v7115_v36 = vld [vmem:[#allocation19_spill] sm:$0xff] }
 0x761   : > { %v2734_v37 = vpack.c.bf16 %v3797_v5, %v3794_v54  ;;  %v7113_v54 = vpack.c.bf16 %v7111_v45, %v7112_v24  ;;  %v7116_v5 = vpack.c.bf16 %v7114_v16, %v7115_v36 }
 0x763   : > { %v3798_v51 = vpop.f32.mrb[152].mxu0  ;;  %3494 = vmatmul.mubr.msk.bf16.gmra.mrb[100].mxu1 %vm370_vm0, %v2734_v37  ;;  %v7117_v37 = vld [vmem:[#allocation18_spill] sm:$0xff] }
 0x764   : > { %v3799_v28 = vpop.f32.mrb[153].mxu0  ;;  %2915 = vmatprep.mubr.bf16.mxu1 %v4365_v10 }
 0x765   : > { %v3800_v61 = vadd.f32 %v3799_v28, %v3798_v51  ;;  %v3801_v22 = vpop.f32.mrb[154].mxu0  ;;  %v7118_v51 = vld [vmem:[#allocation21_spill] sm:$0xff] }
 0x766   : > { %v3802_v8 = vpop.f32.mrb[155].mxu0  ;;  %v7119_v28 = vpack.c.bf16 %v7117_v37, %v7118_v51 }
 0x767   : > { %v3803_v3 = vadd.f32 %v3802_v8, %v3801_v22  ;;  %v7121_v22 = vld [vmem:[#allocation14_spill] sm:$0xff] }
 0x769   : > { %v2735_v50 = vpack.c.bf16 %v3803_v3, %v3800_v61  ;;  %v7120_v61 = vld [vmem:[#allocation74_spill] sm:$0xff] }
 0x76a   : > { %v7122_v8 = vpack.c.bf16 %v7120_v61, %v7121_v22  ;;  %v7123_v3 = vld [vmem:[#allocation22_spill] sm:$0xff] }
 0x76b   : > { %v3804_v31 = vpop.f32.mrb[156].mxu0  ;;  %3495 = vmatmul.mubr.msk.bf16.gmra.mrb[104].mxu1 %vm370_vm0, %v2735_v50  ;;  %v7124_v50 = vld [vmem:[#allocation23_spill] sm:$0xff] }
 0x76c   : > { %v3805_v25 = vpop.f32.mrb[157].mxu0  ;;  %2925 = vmatprep.mubr.bf16.mxu1 %v4365_v10 }
 0x76d   : > { %v3806_v39 = vadd.f32 %v3805_v25, %v3804_v31  ;;  %v3807_v35 = vpop.f32.mrb[158].mxu0  ;;  %v7125_v31 = vpack.c.bf16 %v7123_v3, %v7124_v50  ;;  %v7126_v25 = vld [vmem:[#allocation73_spill] sm:$0xff] }
 0x76e   : > { %v3808_v30 = vpop.f32.mrb[159].mxu0 }
 0x76f   : > { %v3809_v21 = vadd.f32 %v3808_v30, %v3807_v35  ;;  %v7129_v30 = vld [vmem:[#allocation61_spill] sm:$0xff] }
 0x771   : > { %v2736_v60 = vpack.c.bf16 %v3809_v21, %v3806_v39  ;;  %v7127_v39 = vld [vmem:[#allocation75_spill] sm:$0xff] }
 0x772   : > { %v7128_v35 = vpack.c.bf16 %v7126_v25, %v7127_v39  ;;  %v7130_v21 = vld [vmem:[#allocation59_spill] sm:$0xff] }
 0x773   : > { %v3810_v9 = vpop.f32.mrb[160].mxu0  ;;  %3496 = vmatmul.mubr.msk.bf16.gmra.mrb[108].mxu1 %vm370_vm0, %v2736_v60  ;;  %v7131_v60 = vpack.c.bf16 %v7129_v30, %v7130_v21 }
 0x774   : > { %v3811_v47 = vpop.f32.mrb[161].mxu0  ;;  %2935 = vmatprep.mubr.bf16.mxu1 %v4365_v10 }
 0x775   : > { %v3812_v7 = vadd.f32 %v3811_v47, %v3810_v9  ;;  %v3813_v0 = vpop.f32.mrb[162].mxu0  ;;  %v7132_v9 = vld [vmem:[#allocation25_spill] sm:$0xff]  ;;  %v7133_v47 = vld [vmem:[#allocation24_spill] sm:$0xff] }
 0x776   : > { %v3814_v32 = vpop.f32.mrb[163].mxu0 }
 0x777   : > { %v3815_v34 = vadd.f32 %v3814_v32, %v3813_v0  ;;  %v7135_v0 = vld [vmem:[#allocation67_spill] sm:$0xff]  ;;  %v7136_v32 = vld [vmem:[#allocation64_spill] sm:$0xff] }
 0x779   : > { %v2737_v27 = vpack.c.bf16 %v3815_v34, %v3812_v7  ;;  %v7134_v7 = vpack.c.bf16 %v7132_v9, %v7133_v47  ;;  %v7137_v34 = vpack.c.bf16 %v7135_v0, %v7136_v32 }
 0x77b   : > { %v3816_v26 = vpop.f32.mrb[164].mxu0  ;;  %3497 = vmatmul.mubr.msk.bf16.gmra.mrb[112].mxu1 %vm370_vm0, %v2737_v27  ;;  %v7138_v27 = vld [vmem:[#allocation77_spill] sm:$0xff] }
 0x77c   : > { %v3817_v46 = vpop.f32.mrb[165].mxu0  ;;  %2945 = vmatprep.mubr.bf16.mxu1 %v4365_v10 }
 0x77d   : > { %v3818_v19 = vadd.f32 %v3817_v46, %v3816_v26  ;;  %v3819_v4 = vpop.f32.mrb[166].mxu0  ;;  %v7139_v26 = vld [vmem:[#allocation4_spill] sm:$0xff] }
 0x77e   : > { %v3820_v43 = vpop.f32.mrb[167].mxu0  ;;  %v7140_v46 = vpack.c.bf16 %v7138_v27, %v7139_v26 }
 0x77f   : > { %v3821_v2 = vadd.f32 %v3820_v43, %v3819_v4  ;;  %v7142_v4 = vld [vmem:[#allocation26_spill] sm:$0xff] }
 0x781   : > { %v2738_v14 = vpack.c.bf16 %v3821_v2, %v3818_v19  ;;  %v7141_v19 = vld [vmem:[#allocation27_spill] sm:$0xff]  ;;  %v7144_v2 = vld [vmem:[#allocation76_spill] sm:$0xff] }
 0x782   : > { %v7143_v43 = vpack.c.bf16 %v7141_v19, %v7142_v4 }
 0x783   : > { %v3822_v52 = vpop.f32.mrb[168].mxu0  ;;  %3498 = vmatmul.mubr.msk.bf16.gmra.mrb[116].mxu1 %vm370_vm0, %v2738_v14  ;;  %v7145_v14 = vld [vmem:[#allocation63_spill] sm:$0xff] }
 0x784   : > { %v3823_v38 = vpop.f32.mrb[169].mxu0  ;;  %2955 = vmatprep.mubr.bf16.mxu1 %v4365_v10 }
 0x785   : > { %v3824_v11 = vadd.f32 %v3823_v38, %v3822_v52  ;;  %v3825_v23 = vpop.f32.mrb[170].mxu0  ;;  %v7146_v52 = vpack.c.bf16 %v7144_v2, %v7145_v14  ;;  %v7147_v38 = vld [vmem:[#allocation28_spill] sm:$0xff] }
 0x786   : > { %v3826_v41 = vpop.f32.mrb[171].mxu0 }
 0x787   : > { %v3827_v12 = vadd.f32 %v3826_v41, %v3825_v23  ;;  %v7150_v41 = vld [vmem:[#allocation71_spill] sm:$0xff] }
 0x789   : > { %v2739_v48 = vpack.c.bf16 %v3827_v12, %v3824_v11  ;;  %v7148_v11 = vld [vmem:[#allocation69_spill] sm:$0xff] }
 0x78a   : > { %v7149_v23 = vpack.c.bf16 %v7147_v38, %v7148_v11  ;;  %v7151_v12 = vld [vmem:[#allocation5_spill] sm:$0xff] }
 0x78b   : > { %v3828_v53 = vpop.f32.mrb[172].mxu0  ;;  %3499 = vmatmul.mubr.msk.bf16.gmra.mrb[120].mxu1 %vm370_vm0, %v2739_v48  ;;  %v7152_v48 = vpack.c.bf16 %v7150_v41, %v7151_v12 }
 0x78c   : > { %v3829_v18 = vpop.f32.mrb[173].mxu0  ;;  %2965 = vmatprep.mubr.bf16.mxu1 %v4365_v10 }
 0x78d   : > { %v3830_v29 = vadd.f32 %v3829_v18, %v3828_v53  ;;  %v3831_v56 = vpop.f32.mrb[174].mxu0  ;;  %v7153_v53 = vld [vmem:[#allocation12_spill] sm:$0xff]  ;;  %v7154_v18 = vld [vmem:[#allocation9_spill] sm:$0xff] }
 0x78e   : > { %v3832_v40 = vpop.f32.mrb[175].mxu0 }
 0x78f   : > { %v3833_v15 = vadd.f32 %v3832_v40, %v3831_v56  ;;  %v7156_v56 = vld [vmem:[#allocation32_spill] sm:$0xff]  ;;  %v7157_v40 = vld [vmem:[#allocation31_spill] sm:$0xff] }
 0x791   : > { %v2740_v17 = vpack.c.bf16 %v3833_v15, %v3830_v29  ;;  %v7155_v29 = vpack.c.bf16 %v7153_v53, %v7154_v18  ;;  %v7158_v15 = vpack.c.bf16 %v7156_v56, %v7157_v40 }
 0x793   : > { %3500 = vmatmul.mubr.msk.bf16.gmra.mrb[124].mxu1 %vm370_vm0, %v2740_v17  ;;  %v7159_v17 = vld [vmem:[#allocation29_spill] sm:$0xff] }
 0x794   : > { %2975 = vmatprep.mubr.bf16.mxu1 %v4365_v10 }
 0x7a7   : > { %v3834_v55 = vpop.f32.mrb[176].mxu0 }
 0x7a8   : > { %v3835_v63 = vpop.f32.mrb[177].mxu0 }
 0x7a9   : > { %v3836_v44 = vadd.f32 %v3835_v63, %v3834_v55  ;;  %v3837_v33 = vpop.f32.mrb[178].mxu0  ;;  %v3252_v55 = vsub.s32 0, %v7159_v17  ;;  %v3248_v63 = vld [vmem:[%s6635_s2] sm:$0x3] }
 0x7aa   : > { %v3838_v59 = vpop.f32.mrb[179].mxu0 }
 0x7ab   : > { %v3839_v42 = vadd.f32 %v3838_v59, %v3837_v33  ;;  %v6493_v33 = vrot.slane %v3248_v63, %v3252_v55 }
 0x7ad   : > { %v2741_v13 = vpack.c.bf16 %v3839_v42, %v3836_v44  ;;  %v3256_v44 = vsub.s32 1, %v7159_v17 }
 0x7af   : > { %3501 = vmatmul.mubr.msk.bf16.gmra.mrb[128].mxu1 %vm370_vm0, %v2741_v13  ;;  %v6495_v59 = vrot.slane %v3248_v63, %v3256_v44 }
 0x7b0   : > { %2985 = vmatprep.mubr.bf16.mxu1 %v4365_v10 }
 0x7e4   : > { %v3840_v1 = vpop.f32.mrb[180].mxu0 }
 0x7e5   : > { %v3841_v6 = vpop.f32.mrb[181].mxu0 }
 0x7e6   : > { %v3842_v62 = vadd.f32 %v3841_v6, %v3840_v1  ;;  %v3843_v20 = vpop.f32.mrb[182].mxu0 }
 0x7e7   : > { %v3844_v57 = vpop.f32.mrb[183].mxu0 }
 0x7e8   : > { %v3845_v58 = vadd.f32 %v3844_v57, %v3843_v20 }
 0x7ea   : > { %v2742_v49 = vpack.c.bf16 %v3845_v58, %v3842_v62 }
 0x7ec   : > { %3502 = vmatmul.mubr.msk.bf16.gmra.mrb[132].mxu1 %vm370_vm0, %v2742_v49 }
 0x7ed   : > { %3087 = vmatprep.mubr.bf16.mxu1 %v4365_v10 }
 0x7f4   : > { %3506 = vmatmul.mubr.msk.bf16.vlgmr.msra.gmra.mrb[72].mxu1 %vm370_vm0, %v7113_v54 }
 0x7f5   : > { %3097 = vmatprep.mubr.bf16.mxu1 %v4365_v10 }
 0x7fc   : > { %3507 = vmatmul.mubr.msk.bf16.gmra.mrb[76].mxu1 %vm370_vm0, %v7116_v5 }
 0x7fd   : > { %3107 = vmatprep.mubr.bf16.mxu1 %v4365_v10 }
 0x804   : > { %3508 = vmatmul.mubr.msk.bf16.gmra.mrb[80].mxu1 %vm370_vm0, %v7119_v28 }
 0x805   : > { %3117 = vmatprep.mubr.bf16.mxu1 %v4365_v10 }
 0x80c   : > { %3509 = vmatmul.mubr.msk.bf16.gmra.mrb[84].mxu1 %vm370_vm0, %v7122_v8 }
 0x80d   : > { %3127 = vmatprep.mubr.bf16.mxu1 %v4365_v10 }
 0x814   : > { %3510 = vmatmul.mubr.msk.bf16.gmra.mrb[88].mxu1 %vm370_vm0, %v7125_v31 }
 0x815   : > { %3137 = vmatprep.mubr.bf16.mxu1 %v4365_v10 }
 0x81c   : > { %3511 = vmatmul.mubr.msk.bf16.gmra.mrb[92].mxu1 %vm370_vm0, %v7128_v35 }
 0x81d   : > { %3147 = vmatprep.mubr.bf16.mxu1 %v4365_v10 }
 0x824   : > { %3512 = vmatmul.mubr.msk.bf16.gmra.mrb[96].mxu1 %vm370_vm0, %v7131_v60 }
 0x825   : > { %3157 = vmatprep.mubr.bf16.mxu1 %v4365_v10 }
 0x82c   : > { %3513 = vmatmul.mubr.msk.bf16.gmra.mrb[100].mxu1 %vm370_vm0, %v7134_v7 }
 0x82d   : > { %3167 = vmatprep.mubr.bf16.mxu1 %v4365_v10 }
 0x834   : > { %3514 = vmatmul.mubr.msk.bf16.gmra.mrb[104].mxu1 %vm370_vm0, %v7137_v34 }
 0x835   : > { %3177 = vmatprep.mubr.bf16.mxu1 %v4365_v10 }
 0x83c   : > { %3515 = vmatmul.mubr.msk.bf16.gmra.mrb[108].mxu1 %vm370_vm0, %v7140_v46 }
 0x83d   : > { %3187 = vmatprep.mubr.bf16.mxu1 %v4365_v10 }
 0x844   : > { %3516 = vmatmul.mubr.msk.bf16.gmra.mrb[112].mxu1 %vm370_vm0, %v7143_v43 }
 0x845   : > { %3197 = vmatprep.mubr.bf16.mxu1 %v4365_v10 }
 0x84c   : > { %3517 = vmatmul.mubr.msk.bf16.gmra.mrb[116].mxu1 %vm370_vm0, %v7146_v52 }
 0x84d   : > { %3207 = vmatprep.mubr.bf16.mxu1 %v4365_v10 }
 0x854   : > { %3518 = vmatmul.mubr.msk.bf16.gmra.mrb[120].mxu1 %vm370_vm0, %v7149_v23 }
 0x855   : > { %3217 = vmatprep.mubr.bf16.mxu1 %v4365_v10 }
 0x85c   : > { %3519 = vmatmul.mubr.msk.bf16.gmra.mrb[124].mxu1 %vm370_vm0, %v7152_v48 }
 0x85d   : > { %3227 = vmatprep.mubr.bf16.mxu1 %v4365_v10 }
 0x864   : > { %3520 = vmatmul.mubr.msk.bf16.gmra.mrb[128].mxu1 %vm370_vm0, %v7155_v29 }
 0x865   : > { %3237 = vmatprep.mubr.bf16.mxu1 %v4365_v10 }
 0x86c   : > { %3521 = vmatmul.mubr.msk.bf16.gmra.mrb[132].mxu1 %vm370_vm0, %v7158_v15 }
 0x8c7   : > { %v3089_v10 = vpop.f32.mrb[72].mxu1 }
 0x8c8   : > { %v3260_v42 = vadd.f32 %v6493_v33, %v3089_v10  ;;  %v3091_v13 = vpop.f32.mrb[73].mxu1 }
 0x8c9   : > { %v3261_v1 = vadd.f32 %v6495_v59, %v3091_v13  ;;  %v3093_v6 = vpop.f32.mrb[74].mxu1 }
 0x8ca   : > { %3324 = vst [vmem:[%s6500_s5] sm:$0xff] %v3260_v42  ;;  %v3262_v62 = vadd.f32 %v6493_v33, %v3093_v6  ;;  %v3095_v20 = vpop.f32.mrb[75].mxu1 }
 0x8cb   : > { %3325 = vst [vmem:[%s6500_s5 + $0x8] sm:$0xff] %v3261_v1  ;;  %v3263_v57 = vadd.f32 %v6495_v59, %v3095_v20 }
 0x8cc   : > { %3326 = vst [vmem:[%s6500_s5 + $0x10] sm:$0xff] %v3262_v62 }
 0x8cd   : > { %3327 = vst [vmem:[%s6500_s5 + $0x18] sm:$0xff] %v3263_v57 }
 0x8cf   : > { %v3099_v58 = vpop.f32.mrb[76].mxu1 }
 0x8d0   : > { %v3264_v49 = vadd.f32 %v6493_v33, %v3099_v58  ;;  %v3101_v45 = vpop.f32.mrb[77].mxu1 }
 0x8d1   : > { %v3265_v24 = vadd.f32 %v6495_v59, %v3101_v45  ;;  %v3103_v54 = vpop.f32.mrb[78].mxu1 }
 0x8d2   : > { %3328 = vst [vmem:[%s6500_s5 + $0x20] sm:$0xff] %v3264_v49  ;;  %v3266_v16 = vadd.f32 %v6493_v33, %v3103_v54  ;;  %v3105_v36 = vpop.f32.mrb[79].mxu1 }
 0x8d3   : > { %3329 = vst [vmem:[%s6500_s5 + $0x28] sm:$0xff] %v3265_v24  ;;  %v3267_v5 = vadd.f32 %v6495_v59, %v3105_v36 }
 0x8d4   : > { %3330 = vst [vmem:[%s6500_s5 + $0x30] sm:$0xff] %v3266_v16 }
 0x8d5   : > { %3331 = vst [vmem:[%s6500_s5 + $0x38] sm:$0xff] %v3267_v5 }
 0x8d7   : > { %v3109_v37 = vpop.f32.mrb[80].mxu1 }
 0x8d8   : > { %v3268_v51 = vadd.f32 %v6493_v33, %v3109_v37  ;;  %v3111_v28 = vpop.f32.mrb[81].mxu1 }
 0x8d9   : > { %v3269_v61 = vadd.f32 %v6495_v59, %v3111_v28  ;;  %v3113_v22 = vpop.f32.mrb[82].mxu1 }
 0x8da   : > { %3332 = vst [vmem:[%s6500_s5 + $0x40] sm:$0xff] %v3268_v51  ;;  %v3270_v8 = vadd.f32 %v6493_v33, %v3113_v22  ;;  %v3115_v3 = vpop.f32.mrb[83].mxu1 }
 0x8db   : > { %3333 = vst [vmem:[%s6500_s5 + $0x48] sm:$0xff] %v3269_v61  ;;  %v3271_v50 = vadd.f32 %v6495_v59, %v3115_v3 }
 0x8dc   : > { %3334 = vst [vmem:[%s6500_s5 + $0x50] sm:$0xff] %v3270_v8 }
 0x8dd   : > { %3335 = vst [vmem:[%s6500_s5 + $0x58] sm:$0xff] %v3271_v50 }
 0x8df   : > { %v3119_v31 = vpop.f32.mrb[84].mxu1 }
 0x8e0   : > { %v3272_v25 = vadd.f32 %v6493_v33, %v3119_v31  ;;  %v3121_v39 = vpop.f32.mrb[85].mxu1 }
 0x8e1   : > { %v3273_v35 = vadd.f32 %v6495_v59, %v3121_v39  ;;  %v3123_v30 = vpop.f32.mrb[86].mxu1 }
 0x8e2   : > { %3336 = vst [vmem:[%s6500_s5 + $0x60] sm:$0xff] %v3272_v25  ;;  %v3274_v21 = vadd.f32 %v6493_v33, %v3123_v30  ;;  %v3125_v60 = vpop.f32.mrb[87].mxu1 }
 0x8e3   : > { %3337 = vst [vmem:[%s6500_s5 + $0x68] sm:$0xff] %v3273_v35  ;;  %v3275_v9 = vadd.f32 %v6495_v59, %v3125_v60 }
 0x8e4   : > { %3338 = vst [vmem:[%s6500_s5 + $0x70] sm:$0xff] %v3274_v21 }
 0x8e5   : > { %3339 = vst [vmem:[%s6500_s5 + $0x78] sm:$0xff] %v3275_v9 }
 0x8e7   : > { %v3129_v47 = vpop.f32.mrb[88].mxu1 }
 0x8e8   : > { %v3276_v7 = vadd.f32 %v6493_v33, %v3129_v47  ;;  %v3131_v0 = vpop.f32.mrb[89].mxu1 }
 0x8e9   : > { %v3277_v32 = vadd.f32 %v6495_v59, %v3131_v0  ;;  %v3133_v34 = vpop.f32.mrb[90].mxu1 }
 0x8ea   : > { %3340 = vst [vmem:[%s6500_s5 + $0x80] sm:$0xff] %v3276_v7  ;;  %v3278_v27 = vadd.f32 %v6493_v33, %v3133_v34  ;;  %v3135_v26 = vpop.f32.mrb[91].mxu1 }
 0x8eb   : > { %3341 = vst [vmem:[%s6500_s5 + $0x88] sm:$0xff] %v3277_v32  ;;  %v3279_v46 = vadd.f32 %v6495_v59, %v3135_v26 }
 0x8ec   : > { %3342 = vst [vmem:[%s6500_s5 + $0x90] sm:$0xff] %v3278_v27 }
 0x8ed   : > { %3343 = vst [vmem:[%s6500_s5 + $0x98] sm:$0xff] %v3279_v46 }
 0x8ef   : > { %v3139_v19 = vpop.f32.mrb[92].mxu1 }
 0x8f0   : > { %v3280_v4 = vadd.f32 %v6493_v33, %v3139_v19  ;;  %v3141_v43 = vpop.f32.mrb[93].mxu1 }
 0x8f1   : > { %v3281_v2 = vadd.f32 %v6495_v59, %v3141_v43  ;;  %v3143_v14 = vpop.f32.mrb[94].mxu1 }
 0x8f2   : > { %3344 = vst [vmem:[%s6500_s5 + $0xa0] sm:$0xff] %v3280_v4  ;;  %v3282_v52 = vadd.f32 %v6493_v33, %v3143_v14  ;;  %v3145_v38 = vpop.f32.mrb[95].mxu1 }
 0x8f3   : > { %3345 = vst [vmem:[%s6500_s5 + $0xa8] sm:$0xff] %v3281_v2  ;;  %v3283_v11 = vadd.f32 %v6495_v59, %v3145_v38 }
 0x8f4   : > { %3346 = vst [vmem:[%s6500_s5 + $0xb0] sm:$0xff] %v3282_v52 }
 0x8f5   : > { %3347 = vst [vmem:[%s6500_s5 + $0xb8] sm:$0xff] %v3283_v11 }
 0x8f7   : > { %v3149_v23 = vpop.f32.mrb[96].mxu1 }
 0x8f8   : > { %v3284_v41 = vadd.f32 %v6493_v33, %v3149_v23  ;;  %v3151_v12 = vpop.f32.mrb[97].mxu1 }
 0x8f9   : > { %v3285_v48 = vadd.f32 %v6495_v59, %v3151_v12  ;;  %v3153_v53 = vpop.f32.mrb[98].mxu1 }
 0x8fa   : > { %3348 = vst [vmem:[%s6500_s5 + $0xc0] sm:$0xff] %v3284_v41  ;;  %v3286_v18 = vadd.f32 %v6493_v33, %v3153_v53  ;;  %v3155_v29 = vpop.f32.mrb[99].mxu1 }
 0x8fb   : > { %3349 = vst [vmem:[%s6500_s5 + $0xc8] sm:$0xff] %v3285_v48  ;;  %v3287_v56 = vadd.f32 %v6495_v59, %v3155_v29 }
 0x8fc   : > { %3350 = vst [vmem:[%s6500_s5 + $0xd0] sm:$0xff] %v3286_v18 }
 0x8fd   : > { %3351 = vst [vmem:[%s6500_s5 + $0xd8] sm:$0xff] %v3287_v56 }
 0x8ff   : > { %v3159_v40 = vpop.f32.mrb[100].mxu1 }
 0x900   : > { %v3288_v15 = vadd.f32 %v6493_v33, %v3159_v40  ;;  %v3161_v17 = vpop.f32.mrb[101].mxu1 }
 0x901   : > { %v3289_v55 = vadd.f32 %v6495_v59, %v3161_v17  ;;  %v3163_v63 = vpop.f32.mrb[102].mxu1 }
 0x902   : > { %3352 = vst [vmem:[%s6500_s5 + $0xe0] sm:$0xff] %v3288_v15  ;;  %v3290_v44 = vadd.f32 %v6493_v33, %v3163_v63  ;;  %v3165_v10 = vpop.f32.mrb[103].mxu1 }
 0x903   : > { %3353 = vst [vmem:[%s6500_s5 + $0xe8] sm:$0xff] %v3289_v55  ;;  %v3291_v42 = vadd.f32 %v6495_v59, %v3165_v10 }
 0x904   : > { %3354 = vst [vmem:[%s6500_s5 + $0xf0] sm:$0xff] %v3290_v44 }
 0x905   : > { %3355 = vst [vmem:[%s6500_s5 + $0xf8] sm:$0xff] %v3291_v42 }
 0x907   : > { %v3169_v13 = vpop.f32.mrb[104].mxu1 }
 0x908   : > { %v3292_v1 = vadd.f32 %v6493_v33, %v3169_v13  ;;  %v3171_v6 = vpop.f32.mrb[105].mxu1 }
 0x909   : > { %v3293_v62 = vadd.f32 %v6495_v59, %v3171_v6  ;;  %v3173_v20 = vpop.f32.mrb[106].mxu1 }
 0x90a   : > { %3356 = vst [vmem:[%s6500_s5 + $0x100] sm:$0xff] %v3292_v1  ;;  %v3294_v57 = vadd.f32 %v6493_v33, %v3173_v20  ;;  %v3175_v58 = vpop.f32.mrb[107].mxu1 }
 0x90b   : > { %3357 = vst [vmem:[%s6500_s5 + $0x108] sm:$0xff] %v3293_v62  ;;  %v3295_v49 = vadd.f32 %v6495_v59, %v3175_v58 }
 0x90c   : > { %3358 = vst [vmem:[%s6500_s5 + $0x110] sm:$0xff] %v3294_v57 }
 0x90d   : > { %3359 = vst [vmem:[%s6500_s5 + $0x118] sm:$0xff] %v3295_v49 }
 0x90f   : > { %v3179_v45 = vpop.f32.mrb[108].mxu1 }
 0x910   : > { %v3296_v24 = vadd.f32 %v6493_v33, %v3179_v45  ;;  %v3181_v54 = vpop.f32.mrb[109].mxu1 }
 0x911   : > { %v3297_v16 = vadd.f32 %v6495_v59, %v3181_v54  ;;  %v3183_v36 = vpop.f32.mrb[110].mxu1 }
 0x912   : > { %3360 = vst [vmem:[%s6500_s5 + $0x120] sm:$0xff] %v3296_v24  ;;  %v3298_v5 = vadd.f32 %v6493_v33, %v3183_v36  ;;  %v3185_v37 = vpop.f32.mrb[111].mxu1 }
 0x913   : > { %3361 = vst [vmem:[%s6500_s5 + $0x128] sm:$0xff] %v3297_v16  ;;  %v3299_v51 = vadd.f32 %v6495_v59, %v3185_v37 }
 0x914   : > { %3362 = vst [vmem:[%s6500_s5 + $0x130] sm:$0xff] %v3298_v5 }
 0x915   : > { %3363 = vst [vmem:[%s6500_s5 + $0x138] sm:$0xff] %v3299_v51 }
 0x917   : > { %v3189_v28 = vpop.f32.mrb[112].mxu1 }
 0x918   : > { %v3300_v61 = vadd.f32 %v6493_v33, %v3189_v28  ;;  %v3191_v22 = vpop.f32.mrb[113].mxu1 }
 0x919   : > { %v3301_v8 = vadd.f32 %v6495_v59, %v3191_v22  ;;  %v3193_v3 = vpop.f32.mrb[114].mxu1 }
 0x91a   : > { %3364 = vst [vmem:[%s6500_s5 + $0x140] sm:$0xff] %v3300_v61  ;;  %v3302_v50 = vadd.f32 %v6493_v33, %v3193_v3  ;;  %v3195_v31 = vpop.f32.mrb[115].mxu1 }
 0x91b   : > { %3365 = vst [vmem:[%s6500_s5 + $0x148] sm:$0xff] %v3301_v8  ;;  %v3303_v25 = vadd.f32 %v6495_v59, %v3195_v31 }
 0x91c   : > { %3366 = vst [vmem:[%s6500_s5 + $0x150] sm:$0xff] %v3302_v50 }
 0x91d   : > { %3367 = vst [vmem:[%s6500_s5 + $0x158] sm:$0xff] %v3303_v25 }
 0x91f   : > { %v3199_v39 = vpop.f32.mrb[116].mxu1 }
 0x920   : > { %v3304_v35 = vadd.f32 %v6493_v33, %v3199_v39  ;;  %v3201_v30 = vpop.f32.mrb[117].mxu1 }
 0x921   : > { %v3305_v21 = vadd.f32 %v6495_v59, %v3201_v30  ;;  %v3203_v60 = vpop.f32.mrb[118].mxu1 }
 0x922   : > { %3368 = vst [vmem:[%s6500_s5 + $0x160] sm:$0xff] %v3304_v35  ;;  %v3306_v9 = vadd.f32 %v6493_v33, %v3203_v60  ;;  %v3205_v47 = vpop.f32.mrb[119].mxu1 }
 0x923   : > { %3369 = vst [vmem:[%s6500_s5 + $0x168] sm:$0xff] %v3305_v21  ;;  %v3307_v7 = vadd.f32 %v6495_v59, %v3205_v47 }
 0x924   : > { %3370 = vst [vmem:[%s6500_s5 + $0x170] sm:$0xff] %v3306_v9 }
 0x925   : > { %3371 = vst [vmem:[%s6500_s5 + $0x178] sm:$0xff] %v3307_v7 }
 0x927   : > { %v3209_v0 = vpop.f32.mrb[120].mxu1 }
 0x928   : > { %v3308_v32 = vadd.f32 %v6493_v33, %v3209_v0  ;;  %v3211_v34 = vpop.f32.mrb[121].mxu1 }
 0x929   : > { %v3309_v27 = vadd.f32 %v6495_v59, %v3211_v34  ;;  %v3213_v26 = vpop.f32.mrb[122].mxu1 }
 0x92a   : > { %3372 = vst [vmem:[%s6500_s5 + $0x180] sm:$0xff] %v3308_v32  ;;  %v3310_v46 = vadd.f32 %v6493_v33, %v3213_v26  ;;  %v3215_v19 = vpop.f32.mrb[123].mxu1 }
 0x92b   : > { %3373 = vst [vmem:[%s6500_s5 + $0x188] sm:$0xff] %v3309_v27  ;;  %v3311_v4 = vadd.f32 %v6495_v59, %v3215_v19 }
 0x92c   : > { %3374 = vst [vmem:[%s6500_s5 + $0x190] sm:$0xff] %v3310_v46 }
 0x92d   : > { %3375 = vst [vmem:[%s6500_s5 + $0x198] sm:$0xff] %v3311_v4 }
 0x92f   : > { %v3219_v43 = vpop.f32.mrb[124].mxu1 }
 0x930   : > { %v3312_v2 = vadd.f32 %v6493_v33, %v3219_v43  ;;  %v3221_v14 = vpop.f32.mrb[125].mxu1 }
 0x931   : > { %v3313_v52 = vadd.f32 %v6495_v59, %v3221_v14  ;;  %v3223_v38 = vpop.f32.mrb[126].mxu1 }
 0x932   : > { %3376 = vst [vmem:[%s6500_s5 + $0x1a0] sm:$0xff] %v3312_v2  ;;  %v3314_v11 = vadd.f32 %v6493_v33, %v3223_v38  ;;  %v3225_v23 = vpop.f32.mrb[127].mxu1 }
 0x933   : > { %3377 = vst [vmem:[%s6500_s5 + $0x1a8] sm:$0xff] %v3313_v52  ;;  %v3315_v41 = vadd.f32 %v6495_v59, %v3225_v23 }
 0x934   : > { %3378 = vst [vmem:[%s6500_s5 + $0x1b0] sm:$0xff] %v3314_v11 }
 0x935   : > { %3379 = vst [vmem:[%s6500_s5 + $0x1b8] sm:$0xff] %v3315_v41 }
 0x937   : > { %v3229_v12 = vpop.f32.mrb[128].mxu1 }
 0x938   : > { %v3316_v48 = vadd.f32 %v6493_v33, %v3229_v12  ;;  %v3231_v53 = vpop.f32.mrb[129].mxu1 }
 0x939   : > { %v3317_v18 = vadd.f32 %v6495_v59, %v3231_v53  ;;  %v3233_v29 = vpop.f32.mrb[130].mxu1 }
 0x93a   : > { %3380 = vst [vmem:[%s6500_s5 + $0x1c0] sm:$0xff] %v3316_v48  ;;  %v3318_v56 = vadd.f32 %v6493_v33, %v3233_v29  ;;  %v3235_v40 = vpop.f32.mrb[131].mxu1 }
 0x93b   : > { %3381 = vst [vmem:[%s6500_s5 + $0x1c8] sm:$0xff] %v3317_v18  ;;  %v3319_v15 = vadd.f32 %v6495_v59, %v3235_v40 }
 0x93c   : > { %3382 = vst [vmem:[%s6500_s5 + $0x1d0] sm:$0xff] %v3318_v56 }
 0x93d   : > { %3383 = vst [vmem:[%s6500_s5 + $0x1d8] sm:$0xff] %v3319_v15 }
 0x93f   : > { %v3239_v17 = vpop.f32.mrb[132].mxu1 }
 0x940   : > { %v3320_v55 = vadd.f32 %v6493_v33, %v3239_v17  ;;  %v3241_v63 = vpop.f32.mrb[133].mxu1 }
 0x941   : > { %v3321_v44 = vadd.f32 %v6495_v59, %v3241_v63  ;;  %v3243_v10 = vpop.f32.mrb[134].mxu1 }
 0x942   : > { %3384 = vst [vmem:[%s6500_s5 + $0x1e0] sm:$0xff] %v3320_v55  ;;  %v3322_v42 = vadd.f32 %v6493_v33, %v3243_v10  ;;  %v3245_v13 = vpop.f32.mrb[135].mxu1 }
 0x943   : > { %3385 = vst [vmem:[%s6500_s5 + $0x1e8] sm:$0xff] %v3321_v44  ;;  %v3323_v1 = vadd.f32 %v6495_v59, %v3245_v13 }
 0x944   : > { %3386 = vst [vmem:[%s6500_s5 + $0x1f0] sm:$0xff] %v3322_v42 }
 0x945   : > { %3387 = vst [vmem:[%s6500_s5 + $0x1f8] sm:$0xff] %v3323_v1 }
 0x946 PF: > { %s13_s12 = sadd.s32 1, %s4358_s12  }
 0x947   : > { %p10_p4 = scmp.ge.s32.totalorder %s13_s12, 4  }
 0x949   :  { %12 = sbr.rel (!%p10_p4) target bundleno = 1 (0x1), region = 62 }

</bundles_post_ra>
